<compile_context>
chip_gen: v7x
topology: tpu7x:2x2x1
jax: 0.10.0
libtpu: 0.0.40
codegen_flags: <defaults>
</compile_context>

<pallas_src>
import functools

import jax
import jax.numpy as jnp
from jax.experimental import pallas as pl
from jax.experimental.pallas import tpu as pltpu

LANE = 128                 # channel padding target (TPU lane width)
F32 = jnp.float32
BF16 = jnp.bfloat16

_COMPILER_PARAMS = pltpu.CompilerParams(
    dimension_semantics=("parallel",),      # batch tiles shard across TCs
    vmem_limit_bytes=32 * 1024 * 1024,      # safe on v5e/v6e/v7x
)


# ----------------------------------------------------------------------------
# Fused whole-network kernel (one batch tile per grid step)
# ----------------------------------------------------------------------------
def _dqn_fused_kernel(xs_ref, w1_ref, b1_ref, w2_ref, b2_ref, w3_ref, b3_ref,
                      f1_ref, fb1_ref, f2_ref, fb2_ref, out_ref,
                      c1_scr, c2_scr, *, nb, c1p, p1, o2, o3, dh):
    """conv1->conv2->conv3->fc1->fc2 for one batch tile; all data in VMEM."""
    # ---- conv1 -------------------------------------------------------------
    # Host turned the 8x8/stride-4 conv into a 2x2/stride-1 conv on a
    # space-to-depth'd, even/odd-permuted input.  We emit conv1's output as 4
    # spatial-parity blocks so that conv2's stride-2 reads become contiguous.
    starts = (0, p1 + 1, 1)   # permuted-axis start for (parity + kernel offset)
    b1 = b1_ref[...]
    for rp in (0, 1):
        for cp in (0, 1):
            acc = jnp.zeros((nb * p1 * p1, LANE), F32)
            for i in (0, 1):
                for j in (0, 1):
                    rs = starts[rp + i]
                    cs = starts[cp + j]
                    xsl = xs_ref[0, :, rs:rs + p1, cs:cs + p1, :]
                    xsl = xsl.reshape(nb * p1 * p1, c1p)
                    acc = acc + jnp.dot(xsl, w1_ref[i * 2 + j],
                                        preferred_element_type=F32)
            y = jnp.maximum(acc + b1, 0.0).astype(BF16)
            c1_scr[rp * 2 + cp] = y.reshape(nb, p1, p1, LANE)

    # ---- conv2 (4x4, stride 2): 16 shifted K=128 matmuls ---------------------
    acc2 = jnp.zeros((nb * o2 * o2, LANE), F32)
    for rp in (0, 1):
        for cp in (0, 1):
            for ii in (0, 1):
                for jj in (0, 1):
                    xsl = c1_scr[rp * 2 + cp, :, ii:ii + o2, jj:jj + o2, :]
                    xsl = xsl.reshape(nb * o2 * o2, LANE)
                    w = w2_ref[(2 * ii + rp) * 4 + (2 * jj + cp)]
                    acc2 = acc2 + jnp.dot(xsl, w, preferred_element_type=F32)
    c2 = jnp.maximum(acc2 + b2_ref[...], 0.0).astype(BF16)
    c2_scr[...] = c2.reshape(nb, o2, o2, LANE)

    # ---- conv3 (3x3, stride 1): 9 shifted K=128 matmuls ----------------------
    acc3 = jnp.zeros((nb * o3 * o3, LANE), F32)
    for i in range(3):
        for j in range(3):
            xsl = c2_scr[:, i:i + o3, j:j + o3, :].reshape(nb * o3 * o3, LANE)
            acc3 = acc3 + jnp.dot(xsl, w3_ref[i * 3 + j],
                                  preferred_element_type=F32)
    c3 = jnp.maximum(acc3 + b3_ref[...], 0.0).astype(BF16)
    c3 = c3.reshape(nb, o3 * o3, LANE)

    # ---- fc head (fc1 blocked over conv3 spatial positions, then fc2) -------
    acc_h = jnp.zeros((nb, dh), F32)
    for p in range(o3 * o3):
        acc_h = acc_h + jnp.dot(c3[:, p, :], f1_ref[p],
                                preferred_element_type=F32)
    h = jnp.maximum(acc_h + fb1_ref[...], 0.0).astype(BF16)
    q = jnp.dot(h, f2_ref[...], preferred_element_type=F32) + fb2_ref[...]
    out_ref[0] = q


def _pick_grid(n, max_nb=16):
    """>=2 grid steps whenever n>=2 (v7x megacore); minimal batch padding."""
    if n <= 1:
        return 1, 1
    steps = max(2, pl.cdiv(n, max_nb))
    nb = pl.cdiv(n, steps)
    return steps, nb


# ----------------------------------------------------------------------------
# Full DQN forward: host input reorg + one fused pallas_call
# ----------------------------------------------------------------------------
def dqn_forward(prep, state_nchw):
    meta = prep['meta']
    G, p1, o2, o3 = meta['G'], meta['p1'], meta['o2'], meta['o3']
    c1p, dh, act = meta['c1p'], meta['dh'], meta['action_num']

    n, c = state_nchw.shape[0], state_nchw.shape[1]
    steps, nb = _pick_grid(n)
    n_pad = steps * nb

    # Input layout transform (cheap, input-sized): NCHW -> NHWC -> 4x4
    # space-to-depth -> even/odd row & col permutation -> pad channels to 128
    # and batch to the tile multiple -> bf16.
    x = jnp.transpose(state_nchw, (0, 2, 3, 1))
    x = x.reshape(n, G, 4, G, 4, c)
    x = jnp.transpose(x, (0, 1, 3, 2, 4, 5)).reshape(n, G, G, 16 * c)
    x = jnp.concatenate([x[:, 0::2], x[:, 1::2]], axis=1)
    x = jnp.concatenate([x[:, :, 0::2], x[:, :, 1::2]], axis=2)
    x = jnp.pad(x, ((0, n_pad - n), (0, 0), (0, 0), (0, c1p - 16 * c)))
    x = x.reshape(steps, nb, G, G, c1p).astype(BF16)

    kernel = functools.partial(_dqn_fused_kernel, nb=nb, c1p=c1p,
                               p1=p1, o2=o2, o3=o3, dh=dh)
    out = pl.pallas_call(
        kernel,
        out_shape=jax.ShapeDtypeStruct((steps, nb, LANE), F32),
        grid=(steps,),
        in_specs=[
            pl.BlockSpec((1, nb, G, G, c1p), lambda i: (i, 0, 0, 0, 0)),
            # Constant-index weight/bias blocks stay resident in VMEM.
            # (pl.Buffered(1) would shave ~1.5 MB of double-buffering, but VMEM
            #  has ample headroom here, so we keep the default pipelining.)
            pl.BlockSpec((4, c1p, LANE), lambda i: (0, 0, 0)),
            pl.BlockSpec((1, LANE), lambda i: (0, 0)),
            pl.BlockSpec((16, LANE, LANE), lambda i: (0, 0, 0)),
            pl.BlockSpec((1, LANE), lambda i: (0, 0)),
            pl.BlockSpec((9, LANE, LANE), lambda i: (0, 0, 0)),
            pl.BlockSpec((1, LANE), lambda i: (0, 0)),
            pl.BlockSpec((o3 * o3, LANE, dh), lambda i: (0, 0, 0)),
            pl.BlockSpec((1, dh), lambda i: (0, 0)),
            pl.BlockSpec((dh, LANE), lambda i: (0, 0)),
            pl.BlockSpec((1, LANE), lambda i: (0, 0)),
        ],
        out_specs=pl.BlockSpec((1, nb, LANE), lambda i: (i, 0, 0)),
        scratch_shapes=[
            pltpu.VMEM((4, nb, p1, p1, LANE), BF16),   # conv1 parity blocks
            pltpu.VMEM((nb, o2, o2, LANE), BF16),      # conv2 output
        ],
        compiler_params=_COMPILER_PARAMS,
    )(x, prep['w1'], prep['b1'], prep['w2'], prep['b2'],
      prep['w3'], prep['b3'], prep['fc1'], prep['fc1_b'],
      prep['fc2'], prep['fc2_b'])

    return out.reshape(n_pad, LANE)[:n, :act]


# ----------------------------------------------------------------------------
# One-time parameter preparation (BN fold, channel padding, layout remaps)
# ----------------------------------------------------------------------------
def prepare_inference_params(params, spatial, eps=1e-5):
    assert spatial % 8 == 4 and spatial >= 36, (
        "fused kernel supports spatial % 8 == 4 and spatial >= 36 (e.g. 44, 84)")
    G = spatial // 4          # space-to-depth(4) spatial extent
    o1 = G - 1                # conv1 output size  == (spatial-8)//4 + 1
    p1 = o1 // 2              # conv1 output per spatial-parity block
    o2 = p1 - 1               # conv2 output size  == (o1-4)//2 + 1
    o3 = o2 - 2               # conv3 output size
    cin = params['w1'].shape[2]
    c1p = ((16 * cin + LANE - 1) // LANE) * LANE
    dh = params['fc1_w'].shape[1]

    def fold(w, b, bn):
        gamma, beta, mean, var = bn
        s = gamma / jnp.sqrt(var + eps)
        return w * s[None, None, None, :], b * s + (beta - mean * s)

    prep = {}

    # conv1: fold BN, rearrange (8,8,cin,32) to the space-to-depth form:
    # w1[i*2+j][(rh*4+rw)*cin + c, :] = w1[4i+rh, 4j+rw, c, :]  (cout pad->128).
    w1, b1 = fold(params['w1'], params['b1'], params['bn1'])
    w1 = jnp.pad(w1, ((0, 0), (0, 0), (0, 0), (0, LANE - w1.shape[3])))
    w1 = w1.reshape(2, 4, 2, 4, cin, LANE)
    w1 = jnp.transpose(w1, (0, 2, 1, 3, 4, 5)).reshape(4, 16 * cin, LANE)
    prep['w1'] = jnp.pad(w1, ((0, 0), (0, c1p - 16 * cin), (0, 0))).astype(BF16)
    prep['b1'] = jnp.pad(b1, (0, LANE - b1.shape[0])).astype(F32).reshape(1, LANE)

    # conv2 / conv3: fold BN, zero-pad channels to 128, flatten kernel taps.
    w2, b2 = fold(params['w2'], params['b2'], params['bn2'])
    w2 = jnp.pad(w2, ((0, 0), (0, 0), (0, LANE - w2.shape[2]),
                      (0, LANE - w2.shape[3])))
    prep['w2'] = w2.reshape(16, LANE, LANE).astype(BF16)
    prep['b2'] = jnp.pad(b2, (0, LANE - b2.shape[0])).astype(F32).reshape(1, LANE)

    w3, b3 = fold(params['w3'], params['b3'], params['bn3'])
    w3 = jnp.pad(w3, ((0, 0), (0, 0), (0, LANE - w3.shape[2]),
                      (0, LANE - w3.shape[3])))
    prep['w3'] = w3.reshape(9, LANE, LANE).astype(BF16)
    prep['b3'] = jnp.pad(b3, (0, LANE - b3.shape[0])).astype(F32).reshape(1, LANE)

    # fc1: regroup rows from the PyTorch NCHW flatten (c*o3*o3 + p) into
    # per-spatial-position blocks of 128 (zero-padded) channel rows.
    cout3 = params['w3'].shape[3]
    f1 = params['fc1_w'].reshape(cout3, o3 * o3, dh)
    f1 = jnp.transpose(f1, (1, 0, 2))
    f1 = jnp.pad(f1, ((0, 0), (0, LANE - cout3), (0, 0)))
    prep['fc1'] = f1.astype(BF16)
    prep['fc1_b'] = params['fc1_b'].astype(F32).reshape(1, dh)

    # fc2: pad the action dim to 128 lanes (unmasked stores), slice later.
    act = params['fc2_w'].shape[1]
    prep['fc2'] = jnp.pad(params['fc2_w'], ((0, 0), (0, LANE - act))).astype(BF16)
    prep['fc2_b'] = jnp.pad(params['fc2_b'], (0, LANE - act)).astype(F32).reshape(1, LANE)

    prep['meta'] = dict(G=G, p1=p1, o2=o2, o3=o3, c1p=c1p, dh=dh, action_num=act)
    return prep


# ----------------------------------------------------------------------------
# Pure-JAX reference (for correctness check)
# ----------------------------------------------------------------------------
def dqn_forward_ref(params, state_nchw, eps=1e-5):
    def conv(x, w, b, stride):
        w_oihw = jnp.transpose(w, (3, 2, 0, 1))       # (KH,KW,Cin,Cout) -> OIHW
        y = jax.lax.conv_general_dilated(
            x, w_oihw, window_strides=(stride, stride), padding='VALID',
            dimension_numbers=('NCHW', 'OIHW', 'NCHW'))
        return y + b[None, :, None, None]

    def bn(x, p):
        gamma, beta, mean, var = p
        sc = gamma / jnp.sqrt(var + eps)
        return x * sc[None, :, None, None] + (beta - mean * sc)[None, :, None, None]

    x = state_nchw
    x = jax.nn.relu(bn(conv(x, params['w1'], params['b1'], 4), params['bn1']))
    x = jax.nn.relu(bn(conv(x, params['w2'], params['b2'], 2), params['bn2']))
    x = jax.nn.relu(bn(conv(x, params['w3'], params['b3'], 1), params['bn3']))
    flat = x.reshape(x.shape[0], -1)
    h = jax.nn.relu(flat @ params['fc1_w'] + params['fc1_b'])
    return h @ params['fc2_w'] + params['fc2_b']


# ----------------------------------------------------------------------------
# Deterministic parameter init (synthetic; shapes from the nn.Module __init__)
# ----------------------------------------------------------------------------
def init_params(key, in_channels, spatial, action_num=6):
    ks = jax.random.split(key, 16)

    def conv_w(k, kh, kw, cin, cout):
        fan_in = kh * kw * cin
        return jax.random.normal(k, (kh, kw, cin, cout), F32) / jnp.sqrt(fan_in)

    def bn_p(k, c):
        k1, k2, k3, k4 = jax.random.split(k, 4)
        gamma = 1.0 + 0.1 * jax.random.normal(k1, (c,), F32)
        beta = 0.1 * jax.random.normal(k2, (c,), F32)
        mean = 0.1 * jax.random.normal(k3, (c,), F32)
        var = 1.0 + 0.1 * jnp.abs(jax.random.normal(k4, (c,), F32))
        return (gamma, beta, mean, var)

    h1 = (spatial - 8) // 4 + 1
    h2 = (h1 - 4) // 2 + 1
    h3 = (h2 - 3) // 1 + 1
    conv_out_dim = 64 * h3 * h3

    return {
        'w1': conv_w(ks[0], 8, 8, in_channels, 32),
        'b1': 0.01 * jax.random.normal(ks[1], (32,), F32),
        'bn1': bn_p(ks[2], 32),
        'w2': conv_w(ks[3], 4, 4, 32, 64),
        'b2': 0.01 * jax.random.normal(ks[4], (64,), F32),
        'bn2': bn_p(ks[5], 64),
        'w3': conv_w(ks[6], 3, 3, 64, 64),
        'b3': 0.01 * jax.random.normal(ks[7], (64,), F32),
        'bn3': bn_p(ks[8], 64),
        'fc1_w': jax.random.normal(ks[9], (conv_out_dim, 512), F32)
                 / jnp.sqrt(conv_out_dim),
        'fc1_b': 0.01 * jax.random.normal(ks[10], (512,), F32),
        'fc2_w': jax.random.normal(ks[11], (512, action_num), F32)
                 / jnp.sqrt(512.0),
        'fc2_b': 0.01 * jax.random.normal(ks[12], (action_num,), F32),
    }


if __name__ == "__main__":
    key = jax.random.PRNGKey(0)
    k_params, k_x = jax.random.split(key)

    batch, in_channels, spatial = 2, 4, 44   # 44 -> 10 -> 4 -> 2 spatial
    action_num = 6

    params = init_params(k_params, in_channels, spatial, action_num)
    x = jax.random.normal(k_x, (batch, in_channels, spatial, spatial), F32)

    prep = prepare_inference_params(params, spatial)

    fwd = jax.jit(lambda s: dqn_forward(prep, s))
    out = jax.block_until_ready(fwd(x))
    assert out.shape == (batch, action_num), out.shape

    ref = jax.block_until_ready(dqn_forward_ref(params, x))
    err = float(jnp.max(jnp.abs(out - ref)) / (jnp.max(jnp.abs(ref)) + 1e-6))
    assert err < 5e-2, f"max relative error too large: {err}"

    print("KERNEL_OK")
</pallas_src>

<mosaic_0001>
module attributes {stable_mosaic.version = 11 : i64} {
  func.func @_dqn_fused_kernel(%arg0: i32, %arg1: memref<1x1x11x11x128xbf16, #tpu.memory_space<vmem>>, %arg2: memref<4x128x128xbf16, #tpu.memory_space<vmem>>, %arg3: memref<1x128xf32, #tpu.memory_space<vmem>>, %arg4: memref<16x128x128xbf16, #tpu.memory_space<vmem>>, %arg5: memref<1x128xf32, #tpu.memory_space<vmem>>, %arg6: memref<9x128x128xbf16, #tpu.memory_space<vmem>>, %arg7: memref<1x128xf32, #tpu.memory_space<vmem>>, %arg8: memref<4x128x512xbf16, #tpu.memory_space<vmem>>, %arg9: memref<1x512xf32, #tpu.memory_space<vmem>>, %arg10: memref<512x128xbf16, #tpu.memory_space<vmem>>, %arg11: memref<1x128xf32, #tpu.memory_space<vmem>>, %arg12: memref<1x1x128xf32, #tpu.memory_space<vmem>>, %arg13: memref<4x1x5x5x128xbf16, #tpu.memory_space<vmem>>, %arg14: memref<1x4x4x128xbf16, #tpu.memory_space<vmem>>) attributes {dimension_semantics = [#tpu.dimension_semantics<parallel>], iteration_bounds = array<i64: 2>, scalar_prefetch = 0 : i64, scratch_operands = 2 : i64, tpu.core_type = #tpu.core_type<tc>, window_params = [{transform_indices = @transform_0, window_bounds = array<i64: 1, 1, 11, 11, 128>}, {pipeline_mode = #tpu.pipeline_mode<synchronous>, transform_indices = @transform_1, window_bounds = array<i64: 4, 128, 128>}, {pipeline_mode = #tpu.pipeline_mode<synchronous>, transform_indices = @transform_2, window_bounds = array<i64: 1, 128>}, {pipeline_mode = #tpu.pipeline_mode<synchronous>, transform_indices = @transform_3, window_bounds = array<i64: 16, 128, 128>}, {pipeline_mode = #tpu.pipeline_mode<synchronous>, transform_indices = @transform_4, window_bounds = array<i64: 1, 128>}, {pipeline_mode = #tpu.pipeline_mode<synchronous>, transform_indices = @transform_5, window_bounds = array<i64: 9, 128, 128>}, {pipeline_mode = #tpu.pipeline_mode<synchronous>, transform_indices = @transform_6, window_bounds = array<i64: 1, 128>}, {pipeline_mode = #tpu.pipeline_mode<synchronous>, transform_indices = @transform_7, window_bounds = array<i64: 4, 128, 512>}, {pipeline_mode = #tpu.pipeline_mode<synchronous>, transform_indices = @transform_8, window_bounds = array<i64: 1, 512>}, {pipeline_mode = #tpu.pipeline_mode<synchronous>, transform_indices = @transform_9, window_bounds = array<i64: 512, 128>}, {pipeline_mode = #tpu.pipeline_mode<synchronous>, transform_indices = @transform_10, window_bounds = array<i64: 1, 128>}, {transform_indices = @transform_11, window_bounds = array<i64: 1, 1, 128>}]} {
    %c0 = arith.constant 0 : index
    %c0_0 = arith.constant 0 : index
    %0 = vector.load %arg3[%c0, %c0_0] : memref<1x128xf32, #tpu.memory_space<vmem>>, vector<1x128xf32>
    %cst = arith.constant 0.000000e+00 : f32
    %1 = vector.broadcast %cst : f32 to vector<25x128xf32>
    %c0_1 = arith.constant 0 : index
    %c0_2 = arith.constant 0 : index
    %c0_3 = arith.constant 0 : index
    %c0_4 = arith.constant 0 : index
    %c0_5 = arith.constant 0 : index
    %2 = vector.load %arg1[%c0_1, %c0_2, %c0_3, %c0_4, %c0_5] : memref<1x1x11x11x128xbf16, #tpu.memory_space<vmem>>, vector<1x1x5x5x128xbf16>
    %3 = vector.shape_cast %2 : vector<1x1x5x5x128xbf16> to vector<1x5x5x128xbf16>
    %4 = vector.shape_cast %3 : vector<1x5x5x128xbf16> to vector<25x128xbf16>
    %c0_6 = arith.constant 0 : index
    %c0_7 = arith.constant 0 : index
    %c0_8 = arith.constant 0 : index
    %5 = vector.load %arg2[%c0_6, %c0_7, %c0_8] : memref<4x128x128xbf16, #tpu.memory_space<vmem>>, vector<1x128x128xbf16>
    %6 = vector.shape_cast %5 : vector<1x128x128xbf16> to vector<128x128xbf16>
    %cst_9 = arith.constant dense<0.000000e+00> : vector<25x128xf32>
    %7 = tpu.matmul %4, %6, %cst_9 {dimension_numbers = #tpu.dot_dimension_numbers<[1], [0], [0], [1], [0, 0, 1, 1], [], []>} : vector<25x128xbf16>, vector<128x128xbf16>, vector<25x128xf32> -> vector<25x128xf32>
    %8 = arith.addf %1, %7 : vector<25x128xf32>
    %c0_10 = arith.constant 0 : index
    %c0_11 = arith.constant 0 : index
    %c0_12 = arith.constant 0 : index
    %c6 = arith.constant 6 : index
    %c0_13 = arith.constant 0 : index
    %9 = vector.load %arg1[%c0_10, %c0_11, %c0_12, %c6, %c0_13] : memref<1x1x11x11x128xbf16, #tpu.memory_space<vmem>>, vector<1x1x5x5x128xbf16>
    %10 = vector.shape_cast %9 : vector<1x1x5x5x128xbf16> to vector<1x5x5x128xbf16>
    %11 = vector.shape_cast %10 : vector<1x5x5x128xbf16> to vector<25x128xbf16>
    %c1 = arith.constant 1 : index
    %c0_14 = arith.constant 0 : index
    %c0_15 = arith.constant 0 : index
    %12 = vector.load %arg2[%c1, %c0_14, %c0_15] : memref<4x128x128xbf16, #tpu.memory_space<vmem>>, vector<1x128x128xbf16>
    %13 = vector.shape_cast %12 : vector<1x128x128xbf16> to vector<128x128xbf16>
    %cst_16 = arith.constant dense<0.000000e+00> : vector<25x128xf32>
    %14 = tpu.matmul %11, %13, %cst_16 {dimension_numbers = #tpu.dot_dimension_numbers<[1], [0], [0], [1], [0, 0, 1, 1], [], []>} : vector<25x128xbf16>, vector<128x128xbf16>, vector<25x128xf32> -> vector<25x128xf32>
    %15 = arith.addf %8, %14 : vector<25x128xf32>
    %c0_17 = arith.constant 0 : index
    %c0_18 = arith.constant 0 : index
    %c6_19 = arith.constant 6 : index
    %c0_20 = arith.constant 0 : index
    %c0_21 = arith.constant 0 : index
    %16 = vector.load %arg1[%c0_17, %c0_18, %c6_19, %c0_20, %c0_21] : memref<1x1x11x11x128xbf16, #tpu.memory_space<vmem>>, vector<1x1x5x5x128xbf16>
    %17 = vector.shape_cast %16 : vector<1x1x5x5x128xbf16> to vector<1x5x5x128xbf16>
    %18 = vector.shape_cast %17 : vector<1x5x5x128xbf16> to vector<25x128xbf16>
    %c2 = arith.constant 2 : index
    %c0_22 = arith.constant 0 : index
    %c0_23 = arith.constant 0 : index
    %19 = vector.load %arg2[%c2, %c0_22, %c0_23] : memref<4x128x128xbf16, #tpu.memory_space<vmem>>, vector<1x128x128xbf16>
    %20 = vector.shape_cast %19 : vector<1x128x128xbf16> to vector<128x128xbf16>
    %cst_24 = arith.constant dense<0.000000e+00> : vector<25x128xf32>
    %21 = tpu.matmul %18, %20, %cst_24 {dimension_numbers = #tpu.dot_dimension_numbers<[1], [0], [0], [1], [0, 0, 1, 1], [], []>} : vector<25x128xbf16>, vector<128x128xbf16>, vector<25x128xf32> -> vector<25x128xf32>
    %22 = arith.addf %15, %21 : vector<25x128xf32>
    %c0_25 = arith.constant 0 : index
    %c0_26 = arith.constant 0 : index
    %c6_27 = arith.constant 6 : index
    %c6_28 = arith.constant 6 : index
    %c0_29 = arith.constant 0 : index
    %23 = vector.load %arg1[%c0_25, %c0_26, %c6_27, %c6_28, %c0_29] : memref<1x1x11x11x128xbf16, #tpu.memory_space<vmem>>, vector<1x1x5x5x128xbf16>
    %24 = vector.shape_cast %23 : vector<1x1x5x5x128xbf16> to vector<1x5x5x128xbf16>
    %25 = vector.shape_cast %24 : vector<1x5x5x128xbf16> to vector<25x128xbf16>
    %c3 = arith.constant 3 : index
    %c0_30 = arith.constant 0 : index
    %c0_31 = arith.constant 0 : index
    %26 = vector.load %arg2[%c3, %c0_30, %c0_31] : memref<4x128x128xbf16, #tpu.memory_space<vmem>>, vector<1x128x128xbf16>
    %27 = vector.shape_cast %26 : vector<1x128x128xbf16> to vector<128x128xbf16>
    %cst_32 = arith.constant dense<0.000000e+00> : vector<25x128xf32>
    %28 = tpu.matmul %25, %27, %cst_32 {dimension_numbers = #tpu.dot_dimension_numbers<[1], [0], [0], [1], [0, 0, 1, 1], [], []>} : vector<25x128xbf16>, vector<128x128xbf16>, vector<25x128xf32> -> vector<25x128xf32>
    %29 = arith.addf %22, %28 : vector<25x128xf32>
    %30 = vector.broadcast %0 : vector<1x128xf32> to vector<25x128xf32>
    %31 = arith.addf %29, %30 : vector<25x128xf32>
    %cst_33 = arith.constant 0.000000e+00 : f32
    %32 = vector.broadcast %cst_33 : f32 to vector<25x128xf32>
    %33 = arith.maximumf %31, %32 : vector<25x128xf32>
    %34 = arith.truncf %33 : vector<25x128xf32> to vector<25x128xbf16>
    %35 = vector.shape_cast %34 : vector<25x128xbf16> to vector<1x5x5x128xbf16>
    %c0_34 = arith.constant 0 : index
    %c0_35 = arith.constant 0 : index
    %c0_36 = arith.constant 0 : index
    %c0_37 = arith.constant 0 : index
    %c0_38 = arith.constant 0 : index
    %36 = vector.load %arg13[%c0_34, %c0_35, %c0_36, %c0_37, %c0_38] : memref<4x1x5x5x128xbf16, #tpu.memory_space<vmem>>, vector<1x1x5x5x128xbf16>
    %37 = vector.shape_cast %36 : vector<1x1x5x5x128xbf16> to vector<1x5x5x128xbf16>
    %38 = vector.shape_cast %35 : vector<1x5x5x128xbf16> to vector<1x1x5x5x128xbf16>
    tpu.vector_store %arg13[%c0_34, %c0_35, %c0_36, %c0_37, %c0_38], %38 {strides = array<i32>} : memref<4x1x5x5x128xbf16, #tpu.memory_space<vmem>>, vector<1x1x5x5x128xbf16>,
    %cst_39 = arith.constant 0.000000e+00 : f32
    %39 = vector.broadcast %cst_39 : f32 to vector<25x128xf32>
    %c0_40 = arith.constant 0 : index
    %c0_41 = arith.constant 0 : index
    %c0_42 = arith.constant 0 : index
    %c6_43 = arith.constant 6 : index
    %c0_44 = arith.constant 0 : index
    %40 = vector.load %arg1[%c0_40, %c0_41, %c0_42, %c6_43, %c0_44] : memref<1x1x11x11x128xbf16, #tpu.memory_space<vmem>>, vector<1x1x5x5x128xbf16>
    %41 = vector.shape_cast %40 : vector<1x1x5x5x128xbf16> to vector<1x5x5x128xbf16>
    %42 = vector.shape_cast %41 : vector<1x5x5x128xbf16> to vector<25x128xbf16>
    %c0_45 = arith.constant 0 : index
    %c0_46 = arith.constant 0 : index
    %c0_47 = arith.constant 0 : index
    %43 = vector.load %arg2[%c0_45, %c0_46, %c0_47] : memref<4x128x128xbf16, #tpu.memory_space<vmem>>, vector<1x128x128xbf16>
    %44 = vector.shape_cast %43 : vector<1x128x128xbf16> to vector<128x128xbf16>
    %cst_48 = arith.constant dense<0.000000e+00> : vector<25x128xf32>
    %45 = tpu.matmul %42, %44, %cst_48 {dimension_numbers = #tpu.dot_dimension_numbers<[1], [0], [0], [1], [0, 0, 1, 1], [], []>} : vector<25x128xbf16>, vector<128x128xbf16>, vector<25x128xf32> -> vector<25x128xf32>
    %46 = arith.addf %39, %45 : vector<25x128xf32>
    %c0_49 = arith.constant 0 : index
    %c0_50 = arith.constant 0 : index
    %c0_51 = arith.constant 0 : index
    %c1_52 = arith.constant 1 : index
    %c0_53 = arith.constant 0 : index
    %47 = vector.load %arg1[%c0_49, %c0_50, %c0_51, %c1_52, %c0_53] : memref<1x1x11x11x128xbf16, #tpu.memory_space<vmem>>, vector<1x1x5x5x128xbf16>
    %48 = vector.shape_cast %47 : vector<1x1x5x5x128xbf16> to vector<1x5x5x128xbf16>
    %49 = vector.shape_cast %48 : vector<1x5x5x128xbf16> to vector<25x128xbf16>
    %c1_54 = arith.constant 1 : index
    %c0_55 = arith.constant 0 : index
    %c0_56 = arith.constant 0 : index
    %50 = vector.load %arg2[%c1_54, %c0_55, %c0_56] : memref<4x128x128xbf16, #tpu.memory_space<vmem>>, vector<1x128x128xbf16>
    %51 = vector.shape_cast %50 : vector<1x128x128xbf16> to vector<128x128xbf16>
    %cst_57 = arith.constant dense<0.000000e+00> : vector<25x128xf32>
    %52 = tpu.matmul %49, %51, %cst_57 {dimension_numbers = #tpu.dot_dimension_numbers<[1], [0], [0], [1], [0, 0, 1, 1], [], []>} : vector<25x128xbf16>, vector<128x128xbf16>, vector<25x128xf32> -> vector<25x128xf32>
    %53 = arith.addf %46, %52 : vector<25x128xf32>
    %c0_58 = arith.constant 0 : index
    %c0_59 = arith.constant 0 : index
    %c6_60 = arith.constant 6 : index
    %c6_61 = arith.constant 6 : index
    %c0_62 = arith.constant 0 : index
    %54 = vector.load %arg1[%c0_58, %c0_59, %c6_60, %c6_61, %c0_62] : memref<1x1x11x11x128xbf16, #tpu.memory_space<vmem>>, vector<1x1x5x5x128xbf16>
    %55 = vector.shape_cast %54 : vector<1x1x5x5x128xbf16> to vector<1x5x5x128xbf16>
    %56 = vector.shape_cast %55 : vector<1x5x5x128xbf16> to vector<25x128xbf16>
    %c2_63 = arith.constant 2 : index
    %c0_64 = arith.constant 0 : index
    %c0_65 = arith.constant 0 : index
    %57 = vector.load %arg2[%c2_63, %c0_64, %c0_65] : memref<4x128x128xbf16, #tpu.memory_space<vmem>>, vector<1x128x128xbf16>
    %58 = vector.shape_cast %57 : vector<1x128x128xbf16> to vector<128x128xbf16>
    %cst_66 = arith.constant dense<0.000000e+00> : vector<25x128xf32>
    %59 = tpu.matmul %56, %58, %cst_66 {dimension_numbers = #tpu.dot_dimension_numbers<[1], [0], [0], [1], [0, 0, 1, 1], [], []>} : vector<25x128xbf16>, vector<128x128xbf16>, vector<25x128xf32> -> vector<25x128xf32>
    %60 = arith.addf %53, %59 : vector<25x128xf32>
    %c0_67 = arith.constant 0 : index
    %c0_68 = arith.constant 0 : index
    %c6_69 = arith.constant 6 : index
    %c1_70 = arith.constant 1 : index
    %c0_71 = arith.constant 0 : index
    %61 = vector.load %arg1[%c0_67, %c0_68, %c6_69, %c1_70, %c0_71] : memref<1x1x11x11x128xbf16, #tpu.memory_space<vmem>>, vector<1x1x5x5x128xbf16>
    %62 = vector.shape_cast %61 : vector<1x1x5x5x128xbf16> to vector<1x5x5x128xbf16>
    %63 = vector.shape_cast %62 : vector<1x5x5x128xbf16> to vector<25x128xbf16>
    %c3_72 = arith.constant 3 : index
    %c0_73 = arith.constant 0 : index
    %c0_74 = arith.constant 0 : index
    %64 = vector.load %arg2[%c3_72, %c0_73, %c0_74] : memref<4x128x128xbf16, #tpu.memory_space<vmem>>, vector<1x128x128xbf16>
    %65 = vector.shape_cast %64 : vector<1x128x128xbf16> to vector<128x128xbf16>
    %cst_75 = arith.constant dense<0.000000e+00> : vector<25x128xf32>
    %66 = tpu.matmul %63, %65, %cst_75 {dimension_numbers = #tpu.dot_dimension_numbers<[1], [0], [0], [1], [0, 0, 1, 1], [], []>} : vector<25x128xbf16>, vector<128x128xbf16>, vector<25x128xf32> -> vector<25x128xf32>
    %67 = arith.addf %60, %66 : vector<25x128xf32>
    %68 = vector.broadcast %0 : vector<1x128xf32> to vector<25x128xf32>
    %69 = arith.addf %67, %68 : vector<25x128xf32>
    %cst_76 = arith.constant 0.000000e+00 : f32
    %70 = vector.broadcast %cst_76 : f32 to vector<25x128xf32>
    %71 = arith.maximumf %69, %70 : vector<25x128xf32>
    %72 = arith.truncf %71 : vector<25x128xf32> to vector<25x128xbf16>
    %73 = vector.shape_cast %72 : vector<25x128xbf16> to vector<1x5x5x128xbf16>
    %c1_77 = arith.constant 1 : index
    %c0_78 = arith.constant 0 : index
    %c0_79 = arith.constant 0 : index
    %c0_80 = arith.constant 0 : index
    %c0_81 = arith.constant 0 : index
    %74 = vector.load %arg13[%c1_77, %c0_78, %c0_79, %c0_80, %c0_81] : memref<4x1x5x5x128xbf16, #tpu.memory_space<vmem>>, vector<1x1x5x5x128xbf16>
    %75 = vector.shape_cast %74 : vector<1x1x5x5x128xbf16> to vector<1x5x5x128xbf16>
    %76 = vector.shape_cast %73 : vector<1x5x5x128xbf16> to vector<1x1x5x5x128xbf16>
    tpu.vector_store %arg13[%c1_77, %c0_78, %c0_79, %c0_80, %c0_81], %76 {strides = array<i32>} : memref<4x1x5x5x128xbf16, #tpu.memory_space<vmem>>, vector<1x1x5x5x128xbf16>,
    %cst_82 = arith.constant 0.000000e+00 : f32
    %77 = vector.broadcast %cst_82 : f32 to vector<25x128xf32>
    %c0_83 = arith.constant 0 : index
    %c0_84 = arith.constant 0 : index
    %c6_85 = arith.constant 6 : index
    %c0_86 = arith.constant 0 : index
    %c0_87 = arith.constant 0 : index
    %78 = vector.load %arg1[%c0_83, %c0_84, %c6_85, %c0_86, %c0_87] : memref<1x1x11x11x128xbf16, #tpu.memory_space<vmem>>, vector<1x1x5x5x128xbf16>
    %79 = vector.shape_cast %78 : vector<1x1x5x5x128xbf16> to vector<1x5x5x128xbf16>
    %80 = vector.shape_cast %79 : vector<1x5x5x128xbf16> to vector<25x128xbf16>
    %c0_88 = arith.constant 0 : index
    %c0_89 = arith.constant 0 : index
    %c0_90 = arith.constant 0 : index
    %81 = vector.load %arg2[%c0_88, %c0_89, %c0_90] : memref<4x128x128xbf16, #tpu.memory_space<vmem>>, vector<1x128x128xbf16>
    %82 = vector.shape_cast %81 : vector<1x128x128xbf16> to vector<128x128xbf16>
    %cst_91 = arith.constant dense<0.000000e+00> : vector<25x128xf32>
    %83 = tpu.matmul %80, %82, %cst_91 {dimension_numbers = #tpu.dot_dimension_numbers<[1], [0], [0], [1], [0, 0, 1, 1], [], []>} : vector<25x128xbf16>, vector<128x128xbf16>, vector<25x128xf32> -> vector<25x128xf32>
    %84 = arith.addf %77, %83 : vector<25x128xf32>
    %c0_92 = arith.constant 0 : index
    %c0_93 = arith.constant 0 : index
    %c6_94 = arith.constant 6 : index
    %c6_95 = arith.constant 6 : index
    %c0_96 = arith.constant 0 : index
    %85 = vector.load %arg1[%c0_92, %c0_93, %c6_94, %c6_95, %c0_96] : memref<1x1x11x11x128xbf16, #tpu.memory_space<vmem>>, vector<1x1x5x5x128xbf16>
    %86 = vector.shape_cast %85 : vector<1x1x5x5x128xbf16> to vector<1x5x5x128xbf16>
    %87 = vector.shape_cast %86 : vector<1x5x5x128xbf16> to vector<25x128xbf16>
    %c1_97 = arith.constant 1 : index
    %c0_98 = arith.constant 0 : index
    %c0_99 = arith.constant 0 : index
    %88 = vector.load %arg2[%c1_97, %c0_98, %c0_99] : memref<4x128x128xbf16, #tpu.memory_space<vmem>>, vector<1x128x128xbf16>
    %89 = vector.shape_cast %88 : vector<1x128x128xbf16> to vector<128x128xbf16>
    %cst_100 = arith.constant dense<0.000000e+00> : vector<25x128xf32>
    %90 = tpu.matmul %87, %89, %cst_100 {dimension_numbers = #tpu.dot_dimension_numbers<[1], [0], [0], [1], [0, 0, 1, 1], [], []>} : vector<25x128xbf16>, vector<128x128xbf16>, vector<25x128xf32> -> vector<25x128xf32>
    %91 = arith.addf %84, %90 : vector<25x128xf32>
    %c0_101 = arith.constant 0 : index
    %c0_102 = arith.constant 0 : index
    %c1_103 = arith.constant 1 : index
    %c0_104 = arith.constant 0 : index
    %c0_105 = arith.constant 0 : index
    %92 = vector.load %arg1[%c0_101, %c0_102, %c1_103, %c0_104, %c0_105] : memref<1x1x11x11x128xbf16, #tpu.memory_space<vmem>>, vector<1x1x5x5x128xbf16>
    %93 = vector.shape_cast %92 : vector<1x1x5x5x128xbf16> to vector<1x5x5x128xbf16>
    %94 = vector.shape_cast %93 : vector<1x5x5x128xbf16> to vector<25x128xbf16>
    %c2_106 = arith.constant 2 : index
    %c0_107 = arith.constant 0 : index
    %c0_108 = arith.constant 0 : index
    %95 = vector.load %arg2[%c2_106, %c0_107, %c0_108] : memref<4x128x128xbf16, #tpu.memory_space<vmem>>, vector<1x128x128xbf16>
    %96 = vector.shape_cast %95 : vector<1x128x128xbf16> to vector<128x128xbf16>
    %cst_109 = arith.constant dense<0.000000e+00> : vector<25x128xf32>
    %97 = tpu.matmul %94, %96, %cst_109 {dimension_numbers = #tpu.dot_dimension_numbers<[1], [0], [0], [1], [0, 0, 1, 1], [], []>} : vector<25x128xbf16>, vector<128x128xbf16>, vector<25x128xf32> -> vector<25x128xf32>
    %98 = arith.addf %91, %97 : vector<25x128xf32>
    %c0_110 = arith.constant 0 : index
    %c0_111 = arith.constant 0 : index
    %c1_112 = arith.constant 1 : index
    %c6_113 = arith.constant 6 : index
    %c0_114 = arith.constant 0 : index
    %99 = vector.load %arg1[%c0_110, %c0_111, %c1_112, %c6_113, %c0_114] : memref<1x1x11x11x128xbf16, #tpu.memory_space<vmem>>, vector<1x1x5x5x128xbf16>
    %100 = vector.shape_cast %99 : vector<1x1x5x5x128xbf16> to vector<1x5x5x128xbf16>
    %101 = vector.shape_cast %100 : vector<1x5x5x128xbf16> to vector<25x128xbf16>
    %c3_115 = arith.constant 3 : index
    %c0_116 = arith.constant 0 : index
    %c0_117 = arith.constant 0 : index
    %102 = vector.load %arg2[%c3_115, %c0_116, %c0_117] : memref<4x128x128xbf16, #tpu.memory_space<vmem>>, vector<1x128x128xbf16>
    %103 = vector.shape_cast %102 : vector<1x128x128xbf16> to vector<128x128xbf16>
    %cst_118 = arith.constant dense<0.000000e+00> : vector<25x128xf32>
    %104 = tpu.matmul %101, %103, %cst_118 {dimension_numbers = #tpu.dot_dimension_numbers<[1], [0], [0], [1], [0, 0, 1, 1], [], []>} : vector<25x128xbf16>, vector<128x128xbf16>, vector<25x128xf32> -> vector<25x128xf32>
    %105 = arith.addf %98, %104 : vector<25x128xf32>
    %106 = vector.broadcast %0 : vector<1x128xf32> to vector<25x128xf32>
    %107 = arith.addf %105, %106 : vector<25x128xf32>
    %cst_119 = arith.constant 0.000000e+00 : f32
    %108 = vector.broadcast %cst_119 : f32 to vector<25x128xf32>
    %109 = arith.maximumf %107, %108 : vector<25x128xf32>
    %110 = arith.truncf %109 : vector<25x128xf32> to vector<25x128xbf16>
    %111 = vector.shape_cast %110 : vector<25x128xbf16> to vector<1x5x5x128xbf16>
    %c2_120 = arith.constant 2 : index
    %c0_121 = arith.constant 0 : index
    %c0_122 = arith.constant 0 : index
    %c0_123 = arith.constant 0 : index
    %c0_124 = arith.constant 0 : index
    %112 = vector.load %arg13[%c2_120, %c0_121, %c0_122, %c0_123, %c0_124] : memref<4x1x5x5x128xbf16, #tpu.memory_space<vmem>>, vector<1x1x5x5x128xbf16>
    %113 = vector.shape_cast %112 : vector<1x1x5x5x128xbf16> to vector<1x5x5x128xbf16>
    %114 = vector.shape_cast %111 : vector<1x5x5x128xbf16> to vector<1x1x5x5x128xbf16>
    tpu.vector_store %arg13[%c2_120, %c0_121, %c0_122, %c0_123, %c0_124], %114 {strides = array<i32>} : memref<4x1x5x5x128xbf16, #tpu.memory_space<vmem>>, vector<1x1x5x5x128xbf16>,
    %cst_125 = arith.constant 0.000000e+00 : f32
    %115 = vector.broadcast %cst_125 : f32 to vector<25x128xf32>
    %c0_126 = arith.constant 0 : index
    %c0_127 = arith.constant 0 : index
    %c6_128 = arith.constant 6 : index
    %c6_129 = arith.constant 6 : index
    %c0_130 = arith.constant 0 : index
    %116 = vector.load %arg1[%c0_126, %c0_127, %c6_128, %c6_129, %c0_130] : memref<1x1x11x11x128xbf16, #tpu.memory_space<vmem>>, vector<1x1x5x5x128xbf16>
    %117 = vector.shape_cast %116 : vector<1x1x5x5x128xbf16> to vector<1x5x5x128xbf16>
    %118 = vector.shape_cast %117 : vector<1x5x5x128xbf16> to vector<25x128xbf16>
    %c0_131 = arith.constant 0 : index
    %c0_132 = arith.constant 0 : index
    %c0_133 = arith.constant 0 : index
    %119 = vector.load %arg2[%c0_131, %c0_132, %c0_133] : memref<4x128x128xbf16, #tpu.memory_space<vmem>>, vector<1x128x128xbf16>
    %120 = vector.shape_cast %119 : vector<1x128x128xbf16> to vector<128x128xbf16>
    %cst_134 = arith.constant dense<0.000000e+00> : vector<25x128xf32>
    %121 = tpu.matmul %118, %120, %cst_134 {dimension_numbers = #tpu.dot_dimension_numbers<[1], [0], [0], [1], [0, 0, 1, 1], [], []>} : vector<25x128xbf16>, vector<128x128xbf16>, vector<25x128xf32> -> vector<25x128xf32>
    %122 = arith.addf %115, %121 : vector<25x128xf32>
    %c0_135 = arith.constant 0 : index
    %c0_136 = arith.constant 0 : index
    %c6_137 = arith.constant 6 : index
    %c1_138 = arith.constant 1 : index
    %c0_139 = arith.constant 0 : index
    %123 = vector.load %arg1[%c0_135, %c0_136, %c6_137, %c1_138, %c0_139] : memref<1x1x11x11x128xbf16, #tpu.memory_space<vmem>>, vector<1x1x5x5x128xbf16>
    %124 = vector.shape_cast %123 : vector<1x1x5x5x128xbf16> to vector<1x5x5x128xbf16>
    %125 = vector.shape_cast %124 : vector<1x5x5x128xbf16> to vector<25x128xbf16>
    %c1_140 = arith.constant 1 : index
    %c0_141 = arith.constant 0 : index
    %c0_142 = arith.constant 0 : index
    %126 = vector.load %arg2[%c1_140, %c0_141, %c0_142] : memref<4x128x128xbf16, #tpu.memory_space<vmem>>, vector<1x128x128xbf16>
    %127 = vector.shape_cast %126 : vector<1x128x128xbf16> to vector<128x128xbf16>
    %cst_143 = arith.constant dense<0.000000e+00> : vector<25x128xf32>
    %128 = tpu.matmul %125, %127, %cst_143 {dimension_numbers = #tpu.dot_dimension_numbers<[1], [0], [0], [1], [0, 0, 1, 1], [], []>} : vector<25x128xbf16>, vector<128x128xbf16>, vector<25x128xf32> -> vector<25x128xf32>
    %129 = arith.addf %122, %128 : vector<25x128xf32>
    %c0_144 = arith.constant 0 : index
    %c0_145 = arith.constant 0 : index
    %c1_146 = arith.constant 1 : index
    %c6_147 = arith.constant 6 : index
    %c0_148 = arith.constant 0 : index
    %130 = vector.load %arg1[%c0_144, %c0_145, %c1_146, %c6_147, %c0_148] : memref<1x1x11x11x128xbf16, #tpu.memory_space<vmem>>, vector<1x1x5x5x128xbf16>
    %131 = vector.shape_cast %130 : vector<1x1x5x5x128xbf16> to vector<1x5x5x128xbf16>
    %132 = vector.shape_cast %131 : vector<1x5x5x128xbf16> to vector<25x128xbf16>
    %c2_149 = arith.constant 2 : index
    %c0_150 = arith.constant 0 : index
    %c0_151 = arith.constant 0 : index
    %133 = vector.load %arg2[%c2_149, %c0_150, %c0_151] : memref<4x128x128xbf16, #tpu.memory_space<vmem>>, vector<1x128x128xbf16>
    %134 = vector.shape_cast %133 : vector<1x128x128xbf16> to vector<128x128xbf16>
    %cst_152 = arith.constant dense<0.000000e+00> : vector<25x128xf32>
    %135 = tpu.matmul %132, %134, %cst_152 {dimension_numbers = #tpu.dot_dimension_numbers<[1], [0], [0], [1], [0, 0, 1, 1], [], []>} : vector<25x128xbf16>, vector<128x128xbf16>, vector<25x128xf32> -> vector<25x128xf32>
    %136 = arith.addf %129, %135 : vector<25x128xf32>
    %c0_153 = arith.constant 0 : index
    %c0_154 = arith.constant 0 : index
    %c1_155 = arith.constant 1 : index
    %c1_156 = arith.constant 1 : index
    %c0_157 = arith.constant 0 : index
    %137 = vector.load %arg1[%c0_153, %c0_154, %c1_155, %c1_156, %c0_157] : memref<1x1x11x11x128xbf16, #tpu.memory_space<vmem>>, vector<1x1x5x5x128xbf16>
    %138 = vector.shape_cast %137 : vector<1x1x5x5x128xbf16> to vector<1x5x5x128xbf16>
    %139 = vector.shape_cast %138 : vector<1x5x5x128xbf16> to vector<25x128xbf16>
    %c3_158 = arith.constant 3 : index
    %c0_159 = arith.constant 0 : index
    %c0_160 = arith.constant 0 : index
    %140 = vector.load %arg2[%c3_158, %c0_159, %c0_160] : memref<4x128x128xbf16, #tpu.memory_space<vmem>>, vector<1x128x128xbf16>
    %141 = vector.shape_cast %140 : vector<1x128x128xbf16> to vector<128x128xbf16>
    %cst_161 = arith.constant dense<0.000000e+00> : vector<25x128xf32>
    %142 = tpu.matmul %139, %141, %cst_161 {dimension_numbers = #tpu.dot_dimension_numbers<[1], [0], [0], [1], [0, 0, 1, 1], [], []>} : vector<25x128xbf16>, vector<128x128xbf16>, vector<25x128xf32> -> vector<25x128xf32>
    %143 = arith.addf %136, %142 : vector<25x128xf32>
    %144 = vector.broadcast %0 : vector<1x128xf32> to vector<25x128xf32>
    %145 = arith.addf %143, %144 : vector<25x128xf32>
    %cst_162 = arith.constant 0.000000e+00 : f32
    %146 = vector.broadcast %cst_162 : f32 to vector<25x128xf32>
    %147 = arith.maximumf %145, %146 : vector<25x128xf32>
    %148 = arith.truncf %147 : vector<25x128xf32> to vector<25x128xbf16>
    %149 = vector.shape_cast %148 : vector<25x128xbf16> to vector<1x5x5x128xbf16>
    %c3_163 = arith.constant 3 : index
    %c0_164 = arith.constant 0 : index
    %c0_165 = arith.constant 0 : index
    %c0_166 = arith.constant 0 : index
    %c0_167 = arith.constant 0 : index
    %150 = vector.load %arg13[%c3_163, %c0_164, %c0_165, %c0_166, %c0_167] : memref<4x1x5x5x128xbf16, #tpu.memory_space<vmem>>, vector<1x1x5x5x128xbf16>
    %151 = vector.shape_cast %150 : vector<1x1x5x5x128xbf16> to vector<1x5x5x128xbf16>
    %152 = vector.shape_cast %149 : vector<1x5x5x128xbf16> to vector<1x1x5x5x128xbf16>
    tpu.vector_store %arg13[%c3_163, %c0_164, %c0_165, %c0_166, %c0_167], %152 {strides = array<i32>} : memref<4x1x5x5x128xbf16, #tpu.memory_space<vmem>>, vector<1x1x5x5x128xbf16>,
    %cst_168 = arith.constant 0.000000e+00 : f32
    %153 = vector.broadcast %cst_168 : f32 to vector<16x128xf32>
    %c0_169 = arith.constant 0 : index
    %c0_170 = arith.constant 0 : index
    %c0_171 = arith.constant 0 : index
    %c0_172 = arith.constant 0 : index
    %c0_173 = arith.constant 0 : index
    %154 = vector.load %arg13[%c0_169, %c0_170, %c0_171, %c0_172, %c0_173] : memref<4x1x5x5x128xbf16, #tpu.memory_space<vmem>>, vector<1x1x4x4x128xbf16>
    %155 = vector.shape_cast %154 : vector<1x1x4x4x128xbf16> to vector<1x4x4x128xbf16>
    %156 = vector.shape_cast %155 : vector<1x4x4x128xbf16> to vector<16x128xbf16>
    %c0_174 = arith.constant 0 : index
    %c0_175 = arith.constant 0 : index
    %c0_176 = arith.constant 0 : index
    %157 = vector.load %arg4[%c0_174, %c0_175, %c0_176] : memref<16x128x128xbf16, #tpu.memory_space<vmem>>, vector<1x128x128xbf16>
    %158 = vector.shape_cast %157 : vector<1x128x128xbf16> to vector<128x128xbf16>
    %cst_177 = arith.constant dense<0.000000e+00> : vector<16x128xf32>
    %159 = tpu.matmul %156, %158, %cst_177 {dimension_numbers = #tpu.dot_dimension_numbers<[1], [0], [0], [1], [0, 0, 1, 1], [], []>} : vector<16x128xbf16>, vector<128x128xbf16>, vector<16x128xf32> -> vector<16x128xf32>
    %160 = arith.addf %153, %159 : vector<16x128xf32>
    %c0_178 = arith.constant 0 : index
    %c0_179 = arith.constant 0 : index
    %c0_180 = arith.constant 0 : index
    %c1_181 = arith.constant 1 : index
    %c0_182 = arith.constant 0 : index
    %161 = vector.load %arg13[%c0_178, %c0_179, %c0_180, %c1_181, %c0_182] : memref<4x1x5x5x128xbf16, #tpu.memory_space<vmem>>, vector<1x1x4x4x128xbf16>
    %162 = vector.shape_cast %161 : vector<1x1x4x4x128xbf16> to vector<1x4x4x128xbf16>
    %163 = vector.shape_cast %162 : vector<1x4x4x128xbf16> to vector<16x128xbf16>
    %c2_183 = arith.constant 2 : index
    %c0_184 = arith.constant 0 : index
    %c0_185 = arith.constant 0 : index
    %164 = vector.load %arg4[%c2_183, %c0_184, %c0_185] : memref<16x128x128xbf16, #tpu.memory_space<vmem>>, vector<1x128x128xbf16>
    %165 = vector.shape_cast %164 : vector<1x128x128xbf16> to vector<128x128xbf16>
    %cst_186 = arith.constant dense<0.000000e+00> : vector<16x128xf32>
    %166 = tpu.matmul %163, %165, %cst_186 {dimension_numbers = #tpu.dot_dimension_numbers<[1], [0], [0], [1], [0, 0, 1, 1], [], []>} : vector<16x128xbf16>, vector<128x128xbf16>, vector<16x128xf32> -> vector<16x128xf32>
    %167 = arith.addf %160, %166 : vector<16x128xf32>
    %c0_187 = arith.constant 0 : index
    %c0_188 = arith.constant 0 : index
    %c1_189 = arith.constant 1 : index
    %c0_190 = arith.constant 0 : index
    %c0_191 = arith.constant 0 : index
    %168 = vector.load %arg13[%c0_187, %c0_188, %c1_189, %c0_190, %c0_191] : memref<4x1x5x5x128xbf16, #tpu.memory_space<vmem>>, vector<1x1x4x4x128xbf16>
    %169 = vector.shape_cast %168 : vector<1x1x4x4x128xbf16> to vector<1x4x4x128xbf16>
    %170 = vector.shape_cast %169 : vector<1x4x4x128xbf16> to vector<16x128xbf16>
    %c8 = arith.constant 8 : index
    %c0_192 = arith.constant 0 : index
    %c0_193 = arith.constant 0 : index
    %171 = vector.load %arg4[%c8, %c0_192, %c0_193] : memref<16x128x128xbf16, #tpu.memory_space<vmem>>, vector<1x128x128xbf16>
    %172 = vector.shape_cast %171 : vector<1x128x128xbf16> to vector<128x128xbf16>
    %cst_194 = arith.constant dense<0.000000e+00> : vector<16x128xf32>
    %173 = tpu.matmul %170, %172, %cst_194 {dimension_numbers = #tpu.dot_dimension_numbers<[1], [0], [0], [1], [0, 0, 1, 1], [], []>} : vector<16x128xbf16>, vector<128x128xbf16>, vector<16x128xf32> -> vector<16x128xf32>
    %174 = arith.addf %167, %173 : vector<16x128xf32>
    %c0_195 = arith.constant 0 : index
    %c0_196 = arith.constant 0 : index
    %c1_197 = arith.constant 1 : index
    %c1_198 = arith.constant 1 : index
    %c0_199 = arith.constant 0 : index
    %175 = vector.load %arg13[%c0_195, %c0_196, %c1_197, %c1_198, %c0_199] : memref<4x1x5x5x128xbf16, #tpu.memory_space<vmem>>, vector<1x1x4x4x128xbf16>
    %176 = vector.shape_cast %175 : vector<1x1x4x4x128xbf16> to vector<1x4x4x128xbf16>
    %177 = vector.shape_cast %176 : vector<1x4x4x128xbf16> to vector<16x128xbf16>
    %c10 = arith.constant 10 : index
    %c0_200 = arith.constant 0 : index
    %c0_201 = arith.constant 0 : index
    %178 = vector.load %arg4[%c10, %c0_200, %c0_201] : memref<16x128x128xbf16, #tpu.memory_space<vmem>>, vector<1x128x128xbf16>
    %179 = vector.shape_cast %178 : vector<1x128x128xbf16> to vector<128x128xbf16>
    %cst_202 = arith.constant dense<0.000000e+00> : vector<16x128xf32>
    %180 = tpu.matmul %177, %179, %cst_202 {dimension_numbers = #tpu.dot_dimension_numbers<[1], [0], [0], [1], [0, 0, 1, 1], [], []>} : vector<16x128xbf16>, vector<128x128xbf16>, vector<16x128xf32> -> vector<16x128xf32>
    %181 = arith.addf %174, %180 : vector<16x128xf32>
    %c1_203 = arith.constant 1 : index
    %c0_204 = arith.constant 0 : index
    %c0_205 = arith.constant 0 : index
    %c0_206 = arith.constant 0 : index
    %c0_207 = arith.constant 0 : index
    %182 = vector.load %arg13[%c1_203, %c0_204, %c0_205, %c0_206, %c0_207] : memref<4x1x5x5x128xbf16, #tpu.memory_space<vmem>>, vector<1x1x4x4x128xbf16>
    %183 = vector.shape_cast %182 : vector<1x1x4x4x128xbf16> to vector<1x4x4x128xbf16>
    %184 = vector.shape_cast %183 : vector<1x4x4x128xbf16> to vector<16x128xbf16>
    %c1_208 = arith.constant 1 : index
    %c0_209 = arith.constant 0 : index
    %c0_210 = arith.constant 0 : index
    %185 = vector.load %arg4[%c1_208, %c0_209, %c0_210] : memref<16x128x128xbf16, #tpu.memory_space<vmem>>, vector<1x128x128xbf16>
    %186 = vector.shape_cast %185 : vector<1x128x128xbf16> to vector<128x128xbf16>
    %cst_211 = arith.constant dense<0.000000e+00> : vector<16x128xf32>
    %187 = tpu.matmul %184, %186, %cst_211 {dimension_numbers = #tpu.dot_dimension_numbers<[1], [0], [0], [1], [0, 0, 1, 1], [], []>} : vector<16x128xbf16>, vector<128x128xbf16>, vector<16x128xf32> -> vector<16x128xf32>
    %188 = arith.addf %181, %187 : vector<16x128xf32>
    %c1_212 = arith.constant 1 : index
    %c0_213 = arith.constant 0 : index
    %c0_214 = arith.constant 0 : index
    %c1_215 = arith.constant 1 : index
    %c0_216 = arith.constant 0 : index
    %189 = vector.load %arg13[%c1_212, %c0_213, %c0_214, %c1_215, %c0_216] : memref<4x1x5x5x128xbf16, #tpu.memory_space<vmem>>, vector<1x1x4x4x128xbf16>
    %190 = vector.shape_cast %189 : vector<1x1x4x4x128xbf16> to vector<1x4x4x128xbf16>
    %191 = vector.shape_cast %190 : vector<1x4x4x128xbf16> to vector<16x128xbf16>
    %c3_217 = arith.constant 3 : index
    %c0_218 = arith.constant 0 : index
    %c0_219 = arith.constant 0 : index
    %192 = vector.load %arg4[%c3_217, %c0_218, %c0_219] : memref<16x128x128xbf16, #tpu.memory_space<vmem>>, vector<1x128x128xbf16>
    %193 = vector.shape_cast %192 : vector<1x128x128xbf16> to vector<128x128xbf16>
    %cst_220 = arith.constant dense<0.000000e+00> : vector<16x128xf32>
    %194 = tpu.matmul %191, %193, %cst_220 {dimension_numbers = #tpu.dot_dimension_numbers<[1], [0], [0], [1], [0, 0, 1, 1], [], []>} : vector<16x128xbf16>, vector<128x128xbf16>, vector<16x128xf32> -> vector<16x128xf32>
    %195 = arith.addf %188, %194 : vector<16x128xf32>
    %c1_221 = arith.constant 1 : index
    %c0_222 = arith.constant 0 : index
    %c1_223 = arith.constant 1 : index
    %c0_224 = arith.constant 0 : index
    %c0_225 = arith.constant 0 : index
    %196 = vector.load %arg13[%c1_221, %c0_222, %c1_223, %c0_224, %c0_225] : memref<4x1x5x5x128xbf16, #tpu.memory_space<vmem>>, vector<1x1x4x4x128xbf16>
    %197 = vector.shape_cast %196 : vector<1x1x4x4x128xbf16> to vector<1x4x4x128xbf16>
    %198 = vector.shape_cast %197 : vector<1x4x4x128xbf16> to vector<16x128xbf16>
    %c9 = arith.constant 9 : index
    %c0_226 = arith.constant 0 : index
    %c0_227 = arith.constant 0 : index
    %199 = vector.load %arg4[%c9, %c0_226, %c0_227] : memref<16x128x128xbf16, #tpu.memory_space<vmem>>, vector<1x128x128xbf16>
    %200 = vector.shape_cast %199 : vector<1x128x128xbf16> to vector<128x128xbf16>
    %cst_228 = arith.constant dense<0.000000e+00> : vector<16x128xf32>
    %201 = tpu.matmul %198, %200, %cst_228 {dimension_numbers = #tpu.dot_dimension_numbers<[1], [0], [0], [1], [0, 0, 1, 1], [], []>} : vector<16x128xbf16>, vector<128x128xbf16>, vector<16x128xf32> -> vector<16x128xf32>
    %202 = arith.addf %195, %201 : vector<16x128xf32>
    %c1_229 = arith.constant 1 : index
    %c0_230 = arith.constant 0 : index
    %c1_231 = arith.constant 1 : index
    %c1_232 = arith.constant 1 : index
    %c0_233 = arith.constant 0 : index
    %203 = vector.load %arg13[%c1_229, %c0_230, %c1_231, %c1_232, %c0_233] : memref<4x1x5x5x128xbf16, #tpu.memory_space<vmem>>, vector<1x1x4x4x128xbf16>
    %204 = vector.shape_cast %203 : vector<1x1x4x4x128xbf16> to vector<1x4x4x128xbf16>
    %205 = vector.shape_cast %204 : vector<1x4x4x128xbf16> to vector<16x128xbf16>
    %c11 = arith.constant 11 : index
    %c0_234 = arith.constant 0 : index
    %c0_235 = arith.constant 0 : index
    %206 = vector.load %arg4[%c11, %c0_234, %c0_235] : memref<16x128x128xbf16, #tpu.memory_space<vmem>>, vector<1x128x128xbf16>
    %207 = vector.shape_cast %206 : vector<1x128x128xbf16> to vector<128x128xbf16>
    %cst_236 = arith.constant dense<0.000000e+00> : vector<16x128xf32>
    %208 = tpu.matmul %205, %207, %cst_236 {dimension_numbers = #tpu.dot_dimension_numbers<[1], [0], [0], [1], [0, 0, 1, 1], [], []>} : vector<16x128xbf16>, vector<128x128xbf16>, vector<16x128xf32> -> vector<16x128xf32>
    %209 = arith.addf %202, %208 : vector<16x128xf32>
    %c2_237 = arith.constant 2 : index
    %c0_238 = arith.constant 0 : index
    %c0_239 = arith.constant 0 : index
    %c0_240 = arith.constant 0 : index
    %c0_241 = arith.constant 0 : index
    %210 = vector.load %arg13[%c2_237, %c0_238, %c0_239, %c0_240, %c0_241] : memref<4x1x5x5x128xbf16, #tpu.memory_space<vmem>>, vector<1x1x4x4x128xbf16>
    %211 = vector.shape_cast %210 : vector<1x1x4x4x128xbf16> to vector<1x4x4x128xbf16>
    %212 = vector.shape_cast %211 : vector<1x4x4x128xbf16> to vector<16x128xbf16>
    %c4 = arith.constant 4 : index
    %c0_242 = arith.constant 0 : index
    %c0_243 = arith.constant 0 : index
    %213 = vector.load %arg4[%c4, %c0_242, %c0_243] : memref<16x128x128xbf16, #tpu.memory_space<vmem>>, vector<1x128x128xbf16>
    %214 = vector.shape_cast %213 : vector<1x128x128xbf16> to vector<128x128xbf16>
    %cst_244 = arith.constant dense<0.000000e+00> : vector<16x128xf32>
    %215 = tpu.matmul %212, %214, %cst_244 {dimension_numbers = #tpu.dot_dimension_numbers<[1], [0], [0], [1], [0, 0, 1, 1], [], []>} : vector<16x128xbf16>, vector<128x128xbf16>, vector<16x128xf32> -> vector<16x128xf32>
    %216 = arith.addf %209, %215 : vector<16x128xf32>
    %c2_245 = arith.constant 2 : index
    %c0_246 = arith.constant 0 : index
    %c0_247 = arith.constant 0 : index
    %c1_248 = arith.constant 1 : index
    %c0_249 = arith.constant 0 : index
    %217 = vector.load %arg13[%c2_245, %c0_246, %c0_247, %c1_248, %c0_249] : memref<4x1x5x5x128xbf16, #tpu.memory_space<vmem>>, vector<1x1x4x4x128xbf16>
    %218 = vector.shape_cast %217 : vector<1x1x4x4x128xbf16> to vector<1x4x4x128xbf16>
    %219 = vector.shape_cast %218 : vector<1x4x4x128xbf16> to vector<16x128xbf16>
    %c6_250 = arith.constant 6 : index
    %c0_251 = arith.constant 0 : index
    %c0_252 = arith.constant 0 : index
    %220 = vector.load %arg4[%c6_250, %c0_251, %c0_252] : memref<16x128x128xbf16, #tpu.memory_space<vmem>>, vector<1x128x128xbf16>
    %221 = vector.shape_cast %220 : vector<1x128x128xbf16> to vector<128x128xbf16>
    %cst_253 = arith.constant dense<0.000000e+00> : vector<16x128xf32>
    %222 = tpu.matmul %219, %221, %cst_253 {dimension_numbers = #tpu.dot_dimension_numbers<[1], [0], [0], [1], [0, 0, 1, 1], [], []>} : vector<16x128xbf16>, vector<128x128xbf16>, vector<16x128xf32> -> vector<16x128xf32>
    %223 = arith.addf %216, %222 : vector<16x128xf32>
    %c2_254 = arith.constant 2 : index
    %c0_255 = arith.constant 0 : index
    %c1_256 = arith.constant 1 : index
    %c0_257 = arith.constant 0 : index
    %c0_258 = arith.constant 0 : index
    %224 = vector.load %arg13[%c2_254, %c0_255, %c1_256, %c0_257, %c0_258] : memref<4x1x5x5x128xbf16, #tpu.memory_space<vmem>>, vector<1x1x4x4x128xbf16>
    %225 = vector.shape_cast %224 : vector<1x1x4x4x128xbf16> to vector<1x4x4x128xbf16>
    %226 = vector.shape_cast %225 : vector<1x4x4x128xbf16> to vector<16x128xbf16>
    %c12 = arith.constant 12 : index
    %c0_259 = arith.constant 0 : index
    %c0_260 = arith.constant 0 : index
    %227 = vector.load %arg4[%c12, %c0_259, %c0_260] : memref<16x128x128xbf16, #tpu.memory_space<vmem>>, vector<1x128x128xbf16>
    %228 = vector.shape_cast %227 : vector<1x128x128xbf16> to vector<128x128xbf16>
    %cst_261 = arith.constant dense<0.000000e+00> : vector<16x128xf32>
    %229 = tpu.matmul %226, %228, %cst_261 {dimension_numbers = #tpu.dot_dimension_numbers<[1], [0], [0], [1], [0, 0, 1, 1], [], []>} : vector<16x128xbf16>, vector<128x128xbf16>, vector<16x128xf32> -> vector<16x128xf32>
    %230 = arith.addf %223, %229 : vector<16x128xf32>
    %c2_262 = arith.constant 2 : index
    %c0_263 = arith.constant 0 : index
    %c1_264 = arith.constant 1 : index
    %c1_265 = arith.constant 1 : index
    %c0_266 = arith.constant 0 : index
    %231 = vector.load %arg13[%c2_262, %c0_263, %c1_264, %c1_265, %c0_266] : memref<4x1x5x5x128xbf16, #tpu.memory_space<vmem>>, vector<1x1x4x4x128xbf16>
    %232 = vector.shape_cast %231 : vector<1x1x4x4x128xbf16> to vector<1x4x4x128xbf16>
    %233 = vector.shape_cast %232 : vector<1x4x4x128xbf16> to vector<16x128xbf16>
    %c14 = arith.constant 14 : index
    %c0_267 = arith.constant 0 : index
    %c0_268 = arith.constant 0 : index
    %234 = vector.load %arg4[%c14, %c0_267, %c0_268] : memref<16x128x128xbf16, #tpu.memory_space<vmem>>, vector<1x128x128xbf16>
    %235 = vector.shape_cast %234 : vector<1x128x128xbf16> to vector<128x128xbf16>
    %cst_269 = arith.constant dense<0.000000e+00> : vector<16x128xf32>
    %236 = tpu.matmul %233, %235, %cst_269 {dimension_numbers = #tpu.dot_dimension_numbers<[1], [0], [0], [1], [0, 0, 1, 1], [], []>} : vector<16x128xbf16>, vector<128x128xbf16>, vector<16x128xf32> -> vector<16x128xf32>
    %237 = arith.addf %230, %236 : vector<16x128xf32>
    %c3_270 = arith.constant 3 : index
    %c0_271 = arith.constant 0 : index
    %c0_272 = arith.constant 0 : index
    %c0_273 = arith.constant 0 : index
    %c0_274 = arith.constant 0 : index
    %238 = vector.load %arg13[%c3_270, %c0_271, %c0_272, %c0_273, %c0_274] : memref<4x1x5x5x128xbf16, #tpu.memory_space<vmem>>, vector<1x1x4x4x128xbf16>
    %239 = vector.shape_cast %238 : vector<1x1x4x4x128xbf16> to vector<1x4x4x128xbf16>
    %240 = vector.shape_cast %239 : vector<1x4x4x128xbf16> to vector<16x128xbf16>
    %c5 = arith.constant 5 : index
    %c0_275 = arith.constant 0 : index
    %c0_276 = arith.constant 0 : index
    %241 = vector.load %arg4[%c5, %c0_275, %c0_276] : memref<16x128x128xbf16, #tpu.memory_space<vmem>>, vector<1x128x128xbf16>
    %242 = vector.shape_cast %241 : vector<1x128x128xbf16> to vector<128x128xbf16>
    %cst_277 = arith.constant dense<0.000000e+00> : vector<16x128xf32>
    %243 = tpu.matmul %240, %242, %cst_277 {dimension_numbers = #tpu.dot_dimension_numbers<[1], [0], [0], [1], [0, 0, 1, 1], [], []>} : vector<16x128xbf16>, vector<128x128xbf16>, vector<16x128xf32> -> vector<16x128xf32>
    %244 = arith.addf %237, %243 : vector<16x128xf32>
    %c3_278 = arith.constant 3 : index
    %c0_279 = arith.constant 0 : index
    %c0_280 = arith.constant 0 : index
    %c1_281 = arith.constant 1 : index
    %c0_282 = arith.constant 0 : index
    %245 = vector.load %arg13[%c3_278, %c0_279, %c0_280, %c1_281, %c0_282] : memref<4x1x5x5x128xbf16, #tpu.memory_space<vmem>>, vector<1x1x4x4x128xbf16>
    %246 = vector.shape_cast %245 : vector<1x1x4x4x128xbf16> to vector<1x4x4x128xbf16>
    %247 = vector.shape_cast %246 : vector<1x4x4x128xbf16> to vector<16x128xbf16>
    %c7 = arith.constant 7 : index
    %c0_283 = arith.constant 0 : index
    %c0_284 = arith.constant 0 : index
    %248 = vector.load %arg4[%c7, %c0_283, %c0_284] : memref<16x128x128xbf16, #tpu.memory_space<vmem>>, vector<1x128x128xbf16>
    %249 = vector.shape_cast %248 : vector<1x128x128xbf16> to vector<128x128xbf16>
    %cst_285 = arith.constant dense<0.000000e+00> : vector<16x128xf32>
    %250 = tpu.matmul %247, %249, %cst_285 {dimension_numbers = #tpu.dot_dimension_numbers<[1], [0], [0], [1], [0, 0, 1, 1], [], []>} : vector<16x128xbf16>, vector<128x128xbf16>, vector<16x128xf32> -> vector<16x128xf32>
    %251 = arith.addf %244, %250 : vector<16x128xf32>
    %c3_286 = arith.constant 3 : index
    %c0_287 = arith.constant 0 : index
    %c1_288 = arith.constant 1 : index
    %c0_289 = arith.constant 0 : index
    %c0_290 = arith.constant 0 : index
    %252 = vector.load %arg13[%c3_286, %c0_287, %c1_288, %c0_289, %c0_290] : memref<4x1x5x5x128xbf16, #tpu.memory_space<vmem>>, vector<1x1x4x4x128xbf16>
    %253 = vector.shape_cast %252 : vector<1x1x4x4x128xbf16> to vector<1x4x4x128xbf16>
    %254 = vector.shape_cast %253 : vector<1x4x4x128xbf16> to vector<16x128xbf16>
    %c13 = arith.constant 13 : index
    %c0_291 = arith.constant 0 : index
    %c0_292 = arith.constant 0 : index
    %255 = vector.load %arg4[%c13, %c0_291, %c0_292] : memref<16x128x128xbf16, #tpu.memory_space<vmem>>, vector<1x128x128xbf16>
    %256 = vector.shape_cast %255 : vector<1x128x128xbf16> to vector<128x128xbf16>
    %cst_293 = arith.constant dense<0.000000e+00> : vector<16x128xf32>
    %257 = tpu.matmul %254, %256, %cst_293 {dimension_numbers = #tpu.dot_dimension_numbers<[1], [0], [0], [1], [0, 0, 1, 1], [], []>} : vector<16x128xbf16>, vector<128x128xbf16>, vector<16x128xf32> -> vector<16x128xf32>
    %258 = arith.addf %251, %257 : vector<16x128xf32>
    %c3_294 = arith.constant 3 : index
    %c0_295 = arith.constant 0 : index
    %c1_296 = arith.constant 1 : index
    %c1_297 = arith.constant 1 : index
    %c0_298 = arith.constant 0 : index
    %259 = vector.load %arg13[%c3_294, %c0_295, %c1_296, %c1_297, %c0_298] : memref<4x1x5x5x128xbf16, #tpu.memory_space<vmem>>, vector<1x1x4x4x128xbf16>
    %260 = vector.shape_cast %259 : vector<1x1x4x4x128xbf16> to vector<1x4x4x128xbf16>
    %261 = vector.shape_cast %260 : vector<1x4x4x128xbf16> to vector<16x128xbf16>
    %c15 = arith.constant 15 : index
    %c0_299 = arith.constant 0 : index
    %c0_300 = arith.constant 0 : index
    %262 = vector.load %arg4[%c15, %c0_299, %c0_300] : memref<16x128x128xbf16, #tpu.memory_space<vmem>>, vector<1x128x128xbf16>
    %263 = vector.shape_cast %262 : vector<1x128x128xbf16> to vector<128x128xbf16>
    %cst_301 = arith.constant dense<0.000000e+00> : vector<16x128xf32>
    %264 = tpu.matmul %261, %263, %cst_301 {dimension_numbers = #tpu.dot_dimension_numbers<[1], [0], [0], [1], [0, 0, 1, 1], [], []>} : vector<16x128xbf16>, vector<128x128xbf16>, vector<16x128xf32> -> vector<16x128xf32>
    %265 = arith.addf %258, %264 : vector<16x128xf32>
    %c0_302 = arith.constant 0 : index
    %c0_303 = arith.constant 0 : index
    %266 = vector.load %arg5[%c0_302, %c0_303] : memref<1x128xf32, #tpu.memory_space<vmem>>, vector<1x128xf32>
    %267 = vector.broadcast %266 : vector<1x128xf32> to vector<16x128xf32>
    %268 = arith.addf %265, %267 : vector<16x128xf32>
    %cst_304 = arith.constant 0.000000e+00 : f32
    %269 = vector.broadcast %cst_304 : f32 to vector<16x128xf32>
    %270 = arith.maximumf %268, %269 : vector<16x128xf32>
    %271 = arith.truncf %270 : vector<16x128xf32> to vector<16x128xbf16>
    %272 = vector.shape_cast %271 : vector<16x128xbf16> to vector<1x4x4x128xbf16>
    %c0_305 = arith.constant 0 : index
    %c0_306 = arith.constant 0 : index
    %c0_307 = arith.constant 0 : index
    %c0_308 = arith.constant 0 : index
    %273 = vector.load %arg14[%c0_305, %c0_306, %c0_307, %c0_308] : memref<1x4x4x128xbf16, #tpu.memory_space<vmem>>, vector<1x4x4x128xbf16>
    tpu.vector_store %arg14[%c0_305, %c0_306, %c0_307, %c0_308], %272 {strides = array<i32>} : memref<1x4x4x128xbf16, #tpu.memory_space<vmem>>, vector<1x4x4x128xbf16>,
    %cst_309 = arith.constant 0.000000e+00 : f32
    %274 = vector.broadcast %cst_309 : f32 to vector<4x128xf32>
    %c0_310 = arith.constant 0 : index
    %c0_311 = arith.constant 0 : index
    %c0_312 = arith.constant 0 : index
    %c0_313 = arith.constant 0 : index
    %275 = vector.load %arg14[%c0_310, %c0_311, %c0_312, %c0_313] : memref<1x4x4x128xbf16, #tpu.memory_space<vmem>>, vector<1x2x2x128xbf16>
    %276 = vector.shape_cast %275 : vector<1x2x2x128xbf16> to vector<4x128xbf16>
    %c0_314 = arith.constant 0 : index
    %c0_315 = arith.constant 0 : index
    %c0_316 = arith.constant 0 : index
    %277 = vector.load %arg6[%c0_314, %c0_315, %c0_316] : memref<9x128x128xbf16, #tpu.memory_space<vmem>>, vector<1x128x128xbf16>
    %278 = vector.shape_cast %277 : vector<1x128x128xbf16> to vector<128x128xbf16>
    %cst_317 = arith.constant dense<0.000000e+00> : vector<4x128xf32>
    %279 = tpu.matmul %276, %278, %cst_317 {dimension_numbers = #tpu.dot_dimension_numbers<[1], [0], [0], [1], [0, 0, 1, 1], [], []>} : vector<4x128xbf16>, vector<128x128xbf16>, vector<4x128xf32> -> vector<4x128xf32>
    %280 = arith.addf %274, %279 : vector<4x128xf32>
    %c0_318 = arith.constant 0 : index
    %c0_319 = arith.constant 0 : index
    %c1_320 = arith.constant 1 : index
    %c0_321 = arith.constant 0 : index
    %281 = vector.load %arg14[%c0_318, %c0_319, %c1_320, %c0_321] : memref<1x4x4x128xbf16, #tpu.memory_space<vmem>>, vector<1x2x2x128xbf16>
    %282 = vector.shape_cast %281 : vector<1x2x2x128xbf16> to vector<4x128xbf16>
    %c1_322 = arith.constant 1 : index
    %c0_323 = arith.constant 0 : index
    %c0_324 = arith.constant 0 : index
    %283 = vector.load %arg6[%c1_322, %c0_323, %c0_324] : memref<9x128x128xbf16, #tpu.memory_space<vmem>>, vector<1x128x128xbf16>
    %284 = vector.shape_cast %283 : vector<1x128x128xbf16> to vector<128x128xbf16>
    %cst_325 = arith.constant dense<0.000000e+00> : vector<4x128xf32>
    %285 = tpu.matmul %282, %284, %cst_325 {dimension_numbers = #tpu.dot_dimension_numbers<[1], [0], [0], [1], [0, 0, 1, 1], [], []>} : vector<4x128xbf16>, vector<128x128xbf16>, vector<4x128xf32> -> vector<4x128xf32>
    %286 = arith.addf %280, %285 : vector<4x128xf32>
    %c0_326 = arith.constant 0 : index
    %c0_327 = arith.constant 0 : index
    %c2_328 = arith.constant 2 : index
    %c0_329 = arith.constant 0 : index
    %287 = vector.load %arg14[%c0_326, %c0_327, %c2_328, %c0_329] : memref<1x4x4x128xbf16, #tpu.memory_space<vmem>>, vector<1x2x2x128xbf16>
    %288 = vector.shape_cast %287 : vector<1x2x2x128xbf16> to vector<4x128xbf16>
    %c2_330 = arith.constant 2 : index
    %c0_331 = arith.constant 0 : index
    %c0_332 = arith.constant 0 : index
    %289 = vector.load %arg6[%c2_330, %c0_331, %c0_332] : memref<9x128x128xbf16, #tpu.memory_space<vmem>>, vector<1x128x128xbf16>
    %290 = vector.shape_cast %289 : vector<1x128x128xbf16> to vector<128x128xbf16>
    %cst_333 = arith.constant dense<0.000000e+00> : vector<4x128xf32>
    %291 = tpu.matmul %288, %290, %cst_333 {dimension_numbers = #tpu.dot_dimension_numbers<[1], [0], [0], [1], [0, 0, 1, 1], [], []>} : vector<4x128xbf16>, vector<128x128xbf16>, vector<4x128xf32> -> vector<4x128xf32>
    %292 = arith.addf %286, %291 : vector<4x128xf32>
    %c0_334 = arith.constant 0 : index
    %c1_335 = arith.constant 1 : index
    %c0_336 = arith.constant 0 : index
    %c0_337 = arith.constant 0 : index
    %293 = vector.load %arg14[%c0_334, %c1_335, %c0_336, %c0_337] : memref<1x4x4x128xbf16, #tpu.memory_space<vmem>>, vector<1x2x2x128xbf16>
    %294 = vector.shape_cast %293 : vector<1x2x2x128xbf16> to vector<4x128xbf16>
    %c3_338 = arith.constant 3 : index
    %c0_339 = arith.constant 0 : index
    %c0_340 = arith.constant 0 : index
    %295 = vector.load %arg6[%c3_338, %c0_339, %c0_340] : memref<9x128x128xbf16, #tpu.memory_space<vmem>>, vector<1x128x128xbf16>
    %296 = vector.shape_cast %295 : vector<1x128x128xbf16> to vector<128x128xbf16>
    %cst_341 = arith.constant dense<0.000000e+00> : vector<4x128xf32>
    %297 = tpu.matmul %294, %296, %cst_341 {dimension_numbers = #tpu.dot_dimension_numbers<[1], [0], [0], [1], [0, 0, 1, 1], [], []>} : vector<4x128xbf16>, vector<128x128xbf16>, vector<4x128xf32> -> vector<4x128xf32>
    %298 = arith.addf %292, %297 : vector<4x128xf32>
    %c0_342 = arith.constant 0 : index
    %c1_343 = arith.constant 1 : index
    %c1_344 = arith.constant 1 : index
    %c0_345 = arith.constant 0 : index
    %299 = vector.load %arg14[%c0_342, %c1_343, %c1_344, %c0_345] : memref<1x4x4x128xbf16, #tpu.memory_space<vmem>>, vector<1x2x2x128xbf16>
    %300 = vector.shape_cast %299 : vector<1x2x2x128xbf16> to vector<4x128xbf16>
    %c4_346 = arith.constant 4 : index
    %c0_347 = arith.constant 0 : index
    %c0_348 = arith.constant 0 : index
    %301 = vector.load %arg6[%c4_346, %c0_347, %c0_348] : memref<9x128x128xbf16, #tpu.memory_space<vmem>>, vector<1x128x128xbf16>
    %302 = vector.shape_cast %301 : vector<1x128x128xbf16> to vector<128x128xbf16>
    %cst_349 = arith.constant dense<0.000000e+00> : vector<4x128xf32>
    %303 = tpu.matmul %300, %302, %cst_349 {dimension_numbers = #tpu.dot_dimension_numbers<[1], [0], [0], [1], [0, 0, 1, 1], [], []>} : vector<4x128xbf16>, vector<128x128xbf16>, vector<4x128xf32> -> vector<4x128xf32>
    %304 = arith.addf %298, %303 : vector<4x128xf32>
    %c0_350 = arith.constant 0 : index
    %c1_351 = arith.constant 1 : index
    %c2_352 = arith.constant 2 : index
    %c0_353 = arith.constant 0 : index
    %305 = vector.load %arg14[%c0_350, %c1_351, %c2_352, %c0_353] : memref<1x4x4x128xbf16, #tpu.memory_space<vmem>>, vector<1x2x2x128xbf16>
    %306 = vector.shape_cast %305 : vector<1x2x2x128xbf16> to vector<4x128xbf16>
    %c5_354 = arith.constant 5 : index
    %c0_355 = arith.constant 0 : index
    %c0_356 = arith.constant 0 : index
    %307 = vector.load %arg6[%c5_354, %c0_355, %c0_356] : memref<9x128x128xbf16, #tpu.memory_space<vmem>>, vector<1x128x128xbf16>
    %308 = vector.shape_cast %307 : vector<1x128x128xbf16> to vector<128x128xbf16>
    %cst_357 = arith.constant dense<0.000000e+00> : vector<4x128xf32>
    %309 = tpu.matmul %306, %308, %cst_357 {dimension_numbers = #tpu.dot_dimension_numbers<[1], [0], [0], [1], [0, 0, 1, 1], [], []>} : vector<4x128xbf16>, vector<128x128xbf16>, vector<4x128xf32> -> vector<4x128xf32>
    %310 = arith.addf %304, %309 : vector<4x128xf32>
    %c0_358 = arith.constant 0 : index
    %c2_359 = arith.constant 2 : index
    %c0_360 = arith.constant 0 : index
    %c0_361 = arith.constant 0 : index
    %311 = vector.load %arg14[%c0_358, %c2_359, %c0_360, %c0_361] : memref<1x4x4x128xbf16, #tpu.memory_space<vmem>>, vector<1x2x2x128xbf16>
    %312 = vector.shape_cast %311 : vector<1x2x2x128xbf16> to vector<4x128xbf16>
    %c6_362 = arith.constant 6 : index
    %c0_363 = arith.constant 0 : index
    %c0_364 = arith.constant 0 : index
    %313 = vector.load %arg6[%c6_362, %c0_363, %c0_364] : memref<9x128x128xbf16, #tpu.memory_space<vmem>>, vector<1x128x128xbf16>
    %314 = vector.shape_cast %313 : vector<1x128x128xbf16> to vector<128x128xbf16>
    %cst_365 = arith.constant dense<0.000000e+00> : vector<4x128xf32>
    %315 = tpu.matmul %312, %314, %cst_365 {dimension_numbers = #tpu.dot_dimension_numbers<[1], [0], [0], [1], [0, 0, 1, 1], [], []>} : vector<4x128xbf16>, vector<128x128xbf16>, vector<4x128xf32> -> vector<4x128xf32>
    %316 = arith.addf %310, %315 : vector<4x128xf32>
    %c0_366 = arith.constant 0 : index
    %c2_367 = arith.constant 2 : index
    %c1_368 = arith.constant 1 : index
    %c0_369 = arith.constant 0 : index
    %317 = vector.load %arg14[%c0_366, %c2_367, %c1_368, %c0_369] : memref<1x4x4x128xbf16, #tpu.memory_space<vmem>>, vector<1x2x2x128xbf16>
    %318 = vector.shape_cast %317 : vector<1x2x2x128xbf16> to vector<4x128xbf16>
    %c7_370 = arith.constant 7 : index
    %c0_371 = arith.constant 0 : index
    %c0_372 = arith.constant 0 : index
    %319 = vector.load %arg6[%c7_370, %c0_371, %c0_372] : memref<9x128x128xbf16, #tpu.memory_space<vmem>>, vector<1x128x128xbf16>
    %320 = vector.shape_cast %319 : vector<1x128x128xbf16> to vector<128x128xbf16>
    %cst_373 = arith.constant dense<0.000000e+00> : vector<4x128xf32>
    %321 = tpu.matmul %318, %320, %cst_373 {dimension_numbers = #tpu.dot_dimension_numbers<[1], [0], [0], [1], [0, 0, 1, 1], [], []>} : vector<4x128xbf16>, vector<128x128xbf16>, vector<4x128xf32> -> vector<4x128xf32>
    %322 = arith.addf %316, %321 : vector<4x128xf32>
    %c0_374 = arith.constant 0 : index
    %c2_375 = arith.constant 2 : index
    %c2_376 = arith.constant 2 : index
    %c0_377 = arith.constant 0 : index
    %323 = vector.load %arg14[%c0_374, %c2_375, %c2_376, %c0_377] : memref<1x4x4x128xbf16, #tpu.memory_space<vmem>>, vector<1x2x2x128xbf16>
    %324 = vector.shape_cast %323 : vector<1x2x2x128xbf16> to vector<4x128xbf16>
    %c8_378 = arith.constant 8 : index
    %c0_379 = arith.constant 0 : index
    %c0_380 = arith.constant 0 : index
    %325 = vector.load %arg6[%c8_378, %c0_379, %c0_380] : memref<9x128x128xbf16, #tpu.memory_space<vmem>>, vector<1x128x128xbf16>
    %326 = vector.shape_cast %325 : vector<1x128x128xbf16> to vector<128x128xbf16>
    %cst_381 = arith.constant dense<0.000000e+00> : vector<4x128xf32>
    %327 = tpu.matmul %324, %326, %cst_381 {dimension_numbers = #tpu.dot_dimension_numbers<[1], [0], [0], [1], [0, 0, 1, 1], [], []>} : vector<4x128xbf16>, vector<128x128xbf16>, vector<4x128xf32> -> vector<4x128xf32>
    %328 = arith.addf %322, %327 : vector<4x128xf32>
    %c0_382 = arith.constant 0 : index
    %c0_383 = arith.constant 0 : index
    %329 = vector.load %arg7[%c0_382, %c0_383] : memref<1x128xf32, #tpu.memory_space<vmem>>, vector<1x128xf32>
    %330 = vector.broadcast %329 : vector<1x128xf32> to vector<4x128xf32>
    %331 = arith.addf %328, %330 : vector<4x128xf32>
    %cst_384 = arith.constant 0.000000e+00 : f32
    %332 = vector.broadcast %cst_384 : f32 to vector<4x128xf32>
    %333 = arith.maximumf %331, %332 : vector<4x128xf32>
    %334 = arith.truncf %333 : vector<4x128xf32> to vector<4x128xbf16>
    %335 = vector.shape_cast %334 : vector<4x128xbf16> to vector<1x4x128xbf16>
    %cst_385 = arith.constant 0.000000e+00 : f32
    %336 = vector.broadcast %cst_385 : f32 to vector<1x512xf32>
    %337 = vector.extract_strided_slice %335 {offsets = [0, 0, 0], sizes = [1, 1, 128], strides = [1, 1, 1]} : vector<1x4x128xbf16> to vector<1x1x128xbf16>
    %338 = vector.shape_cast %337 : vector<1x1x128xbf16> to vector<1x128xbf16>
    %c0_386 = arith.constant 0 : index
    %c0_387 = arith.constant 0 : index
    %c0_388 = arith.constant 0 : index
    %339 = vector.load %arg8[%c0_386, %c0_387, %c0_388] : memref<4x128x512xbf16, #tpu.memory_space<vmem>>, vector<1x128x512xbf16>
    %340 = vector.shape_cast %339 : vector<1x128x512xbf16> to vector<128x512xbf16>
    %cst_389 = arith.constant dense<0.000000e+00> : vector<1x512xf32>
    %341 = tpu.matmul %338, %340, %cst_389 {dimension_numbers = #tpu.dot_dimension_numbers<[1], [0], [0], [1], [0, 0, 1, 1], [], []>} : vector<1x128xbf16>, vector<128x512xbf16>, vector<1x512xf32> -> vector<1x512xf32>
    %342 = arith.addf %336, %341 : vector<1x512xf32>
    %343 = vector.extract_strided_slice %335 {offsets = [0, 1, 0], sizes = [1, 1, 128], strides = [1, 1, 1]} : vector<1x4x128xbf16> to vector<1x1x128xbf16>
    %344 = vector.shape_cast %343 : vector<1x1x128xbf16> to vector<1x128xbf16>
    %c1_390 = arith.constant 1 : index
    %c0_391 = arith.constant 0 : index
    %c0_392 = arith.constant 0 : index
    %345 = vector.load %arg8[%c1_390, %c0_391, %c0_392] : memref<4x128x512xbf16, #tpu.memory_space<vmem>>, vector<1x128x512xbf16>
    %346 = vector.shape_cast %345 : vector<1x128x512xbf16> to vector<128x512xbf16>
    %cst_393 = arith.constant dense<0.000000e+00> : vector<1x512xf32>
    %347 = tpu.matmul %344, %346, %cst_393 {dimension_numbers = #tpu.dot_dimension_numbers<[1], [0], [0], [1], [0, 0, 1, 1], [], []>} : vector<1x128xbf16>, vector<128x512xbf16>, vector<1x512xf32> -> vector<1x512xf32>
    %348 = arith.addf %342, %347 : vector<1x512xf32>
    %349 = vector.extract_strided_slice %335 {offsets = [0, 2, 0], sizes = [1, 1, 128], strides = [1, 1, 1]} : vector<1x4x128xbf16> to vector<1x1x128xbf16>
    %350 = vector.shape_cast %349 : vector<1x1x128xbf16> to vector<1x128xbf16>
    %c2_394 = arith.constant 2 : index
    %c0_395 = arith.constant 0 : index
    %c0_396 = arith.constant 0 : index
    %351 = vector.load %arg8[%c2_394, %c0_395, %c0_396] : memref<4x128x512xbf16, #tpu.memory_space<vmem>>, vector<1x128x512xbf16>
    %352 = vector.shape_cast %351 : vector<1x128x512xbf16> to vector<128x512xbf16>
    %cst_397 = arith.constant dense<0.000000e+00> : vector<1x512xf32>
    %353 = tpu.matmul %350, %352, %cst_397 {dimension_numbers = #tpu.dot_dimension_numbers<[1], [0], [0], [1], [0, 0, 1, 1], [], []>} : vector<1x128xbf16>, vector<128x512xbf16>, vector<1x512xf32> -> vector<1x512xf32>
    %354 = arith.addf %348, %353 : vector<1x512xf32>
    %355 = vector.extract_strided_slice %335 {offsets = [0, 3, 0], sizes = [1, 1, 128], strides = [1, 1, 1]} : vector<1x4x128xbf16> to vector<1x1x128xbf16>
    %356 = vector.shape_cast %355 : vector<1x1x128xbf16> to vector<1x128xbf16>
    %c3_398 = arith.constant 3 : index
    %c0_399 = arith.constant 0 : index
    %c0_400 = arith.constant 0 : index
    %357 = vector.load %arg8[%c3_398, %c0_399, %c0_400] : memref<4x128x512xbf16, #tpu.memory_space<vmem>>, vector<1x128x512xbf16>
    %358 = vector.shape_cast %357 : vector<1x128x512xbf16> to vector<128x512xbf16>
    %cst_401 = arith.constant dense<0.000000e+00> : vector<1x512xf32>
    %359 = tpu.matmul %356, %358, %cst_401 {dimension_numbers = #tpu.dot_dimension_numbers<[1], [0], [0], [1], [0, 0, 1, 1], [], []>} : vector<1x128xbf16>, vector<128x512xbf16>, vector<1x512xf32> -> vector<1x512xf32>
    %360 = arith.addf %354, %359 : vector<1x512xf32>
    %c0_402 = arith.constant 0 : index
    %c0_403 = arith.constant 0 : index
    %361 = vector.load %arg9[%c0_402, %c0_403] : memref<1x512xf32, #tpu.memory_space<vmem>>, vector<1x512xf32>
    %362 = arith.addf %360, %361 : vector<1x512xf32>
    %cst_404 = arith.constant 0.000000e+00 : f32
    %363 = vector.broadcast %cst_404 : f32 to vector<1x512xf32>
    %364 = arith.maximumf %362, %363 : vector<1x512xf32>
    %365 = arith.truncf %364 : vector<1x512xf32> to vector<1x512xbf16>
    %c0_405 = arith.constant 0 : index
    %c0_406 = arith.constant 0 : index
    %366 = vector.load %arg10[%c0_405, %c0_406] : memref<512x128xbf16, #tpu.memory_space<vmem>>, vector<512x128xbf16>
    %cst_407 = arith.constant dense<0.000000e+00> : vector<1x128xf32>
    %367 = tpu.matmul %365, %366, %cst_407 {dimension_numbers = #tpu.dot_dimension_numbers<[1], [0], [0], [1], [0, 0, 1, 1], [], []>} : vector<1x512xbf16>, vector<512x128xbf16>, vector<1x128xf32> -> vector<1x128xf32>
    %c0_408 = arith.constant 0 : index
    %c0_409 = arith.constant 0 : index
    %368 = vector.load %arg11[%c0_408, %c0_409] : memref<1x128xf32, #tpu.memory_space<vmem>>, vector<1x128xf32>
    %369 = arith.addf %367, %368 : vector<1x128xf32>
    %c0_410 = arith.constant 0 : index
    %c0_411 = arith.constant 0 : index
    %c0_412 = arith.constant 0 : index
    %370 = vector.load %arg12[%c0_410, %c0_411, %c0_412] : memref<1x1x128xf32, #tpu.memory_space<vmem>>, vector<1x1x128xf32>
    %371 = vector.shape_cast %370 : vector<1x1x128xf32> to vector<1x128xf32>
    %372 = vector.shape_cast %369 : vector<1x128xf32> to vector<1x1x128xf32>
    tpu.vector_store %arg12[%c0_410, %c0_411, %c0_412], %372 {strides = array<i32>} : memref<1x1x128xf32, #tpu.memory_space<vmem>>, vector<1x1x128xf32>,
    return
  }
  func.func @transform_0(%arg0: i32) -> (i32, i32, i32, i32, i32) {
    %c0_i32 = arith.constant 0 : i32
    %c0_i32_0 = arith.constant 0 : i32
    %c0_i32_1 = arith.constant 0 : i32
    %c0_i32_2 = arith.constant 0 : i32
    %c0_i32_3 = arith.constant 0 : i32
    return %arg0, %c0_i32, %c0_i32_0, %c0_i32_1, %c0_i32_2 : i32, i32, i32, i32, i32
  }
  func.func @transform_1(%arg0: i32) -> (i32, i32, i32) {
    %c0_i32 = arith.constant 0 : i32
    %c0_i32_0 = arith.constant 0 : i32
    %c0_i32_1 = arith.constant 0 : i32
    %c0_i32_2 = arith.constant 0 : i32
    return %c0_i32, %c0_i32_0, %c0_i32_1 : i32, i32, i32
  }
  func.func @transform_2(%arg0: i32) -> (i32, i32) {
    %c0_i32 = arith.constant 0 : i32
    %c0_i32_0 = arith.constant 0 : i32
    %c0_i32_1 = arith.constant 0 : i32
    return %c0_i32, %c0_i32_0 : i32, i32
  }
  func.func @transform_3(%arg0: i32) -> (i32, i32, i32) {
    %c0_i32 = arith.constant 0 : i32
    %c0_i32_0 = arith.constant 0 : i32
    %c0_i32_1 = arith.constant 0 : i32
    %c0_i32_2 = arith.constant 0 : i32
    return %c0_i32, %c0_i32_0, %c0_i32_1 : i32, i32, i32
  }
  func.func @transform_4(%arg0: i32) -> (i32, i32) {
    %c0_i32 = arith.constant 0 : i32
    %c0_i32_0 = arith.constant 0 : i32
    %c0_i32_1 = arith.constant 0 : i32
    return %c0_i32, %c0_i32_0 : i32, i32
  }
  func.func @transform_5(%arg0: i32) -> (i32, i32, i32) {
    %c0_i32 = arith.constant 0 : i32
    %c0_i32_0 = arith.constant 0 : i32
    %c0_i32_1 = arith.constant 0 : i32
    %c0_i32_2 = arith.constant 0 : i32
    return %c0_i32, %c0_i32_0, %c0_i32_1 : i32, i32, i32
  }
  func.func @transform_6(%arg0: i32) -> (i32, i32) {
    %c0_i32 = arith.constant 0 : i32
    %c0_i32_0 = arith.constant 0 : i32
    %c0_i32_1 = arith.constant 0 : i32
    return %c0_i32, %c0_i32_0 : i32, i32
  }
  func.func @transform_7(%arg0: i32) -> (i32, i32, i32) {
    %c0_i32 = arith.constant 0 : i32
    %c0_i32_0 = arith.constant 0 : i32
    %c0_i32_1 = arith.constant 0 : i32
    %c0_i32_2 = arith.constant 0 : i32
    return %c0_i32, %c0_i32_0, %c0_i32_1 : i32, i32, i32
  }
  func.func @transform_8(%arg0: i32) -> (i32, i32) {
    %c0_i32 = arith.constant 0 : i32
    %c0_i32_0 = arith.constant 0 : i32
    %c0_i32_1 = arith.constant 0 : i32
    return %c0_i32, %c0_i32_0 : i32, i32
  }
  func.func @transform_9(%arg0: i32) -> (i32, i32) {
    %c0_i32 = arith.constant 0 : i32
    %c0_i32_0 = arith.constant 0 : i32
    %c0_i32_1 = arith.constant 0 : i32
    return %c0_i32, %c0_i32_0 : i32, i32
  }
  func.func @transform_10(%arg0: i32) -> (i32, i32) {
    %c0_i32 = arith.constant 0 : i32
    %c0_i32_0 = arith.constant 0 : i32
    %c0_i32_1 = arith.constant 0 : i32
    return %c0_i32, %c0_i32_0 : i32, i32
  }
  func.func @transform_11(%arg0: i32) -> (i32, i32, i32) {
    %c0_i32 = arith.constant 0 : i32
    %c0_i32_0 = arith.constant 0 : i32
    %c0_i32_1 = arith.constant 0 : i32
    return %arg0, %c0_i32, %c0_i32_0 : i32, i32, i32
  }
}

</mosaic_0001>

<bundles_post_ra>
// kernel: _lambda_.1
= control target key start
LH: loop header
LB: loop body
LE: loop exit
PB: predicated region body
PF: predicated region fallthrough
CT: control target
= control target key end

     0   :  { %16 = vsyncpa [#allocation5], 0  ;;  %s20420_s0 = inlined_call_operand.vmem [shape: bf16[2,1,11,11,128], index: 0, kind: input, shape index: {}]   ;;  %s20421_s1 = inlined_call_operand.vmem [shape: bf16[4,128,128], index: 1, kind: input, shape index: {}]   ;;  %s20422_s2 = inlined_call_operand.vmem [shape: f32[1,128], index: 2, kind: input, shape index: {}]   ;;  %s20423_s3 = inlined_call_operand.vmem [shape: bf16[16,128,128], index: 3, kind: input, shape index: {}]   ;;  %s20424_s4 = inlined_call_operand.vmem [shape: f32[1,128], index: 4, kind: input, shape index: {}]   ;;  %s20425_s5 = inlined_call_operand.vmem [shape: bf16[9,128,128], index: 5, kind: input, shape index: {}]   ;;  %s20426_s6 = inlined_call_operand.vmem [shape: f32[1,128], index: 6, kind: input, shape index: {}]   ;;  %s20427_s7 = inlined_call_operand.vmem [shape: bf16[4,128,512], index: 7, kind: input, shape index: {}]   ;;  %s20428_s8 = inlined_call_operand.vmem [shape: f32[1,512], index: 8, kind: input, shape index: {}]   ;;  %s20429_s9 = inlined_call_operand.vmem [shape: bf16[512,128], index: 9, kind: input, shape index: {}]   ;;  %s20430_s10 = inlined_call_operand.vmem [shape: f32[1,128], index: 10, kind: input, shape index: {}]   ;;  %s20431_s11 = inlined_call_operand.hbm [shape: f32[2,1,128], index: 11, kind: output, shape index: {}]  }
   0x1   :  { %18 = vsyncpa [#allocation5 + $0x1], 0  ;;  %s17427_s17 = smov 0   ;;  %s17429_s18 = smov 0  }
   0x2   :  { %s17431_s19 = smov 0   ;;  %s17433_s20 = smov 0  }
   0x3 LB: > { %20433 = sst [smem:[#allocation7_spill]] %s17354_s19  ;;  %s17448_s21 = sadd.s32 4294967295, %s17358_s20   ;;  %s17358_s20 = sphi %s17433_s20, %s20449_s20   ;;  %s17354_s19 = sphi %s17431_s19, %s20446_s19   ;;  %s17350_s18 = sphi %s17429_s18, %s20448_s18   ;;  %s17346_s17 = sphi %s17427_s17, %s20447_s17  }
   0x4   : > { %s13827_s22 = sadd.s32 4294967294, %s17358_s20   ;;  %s17452_s23 = sadd.s32 1, %s17358_s20  }
   0x5   : > { %s267_s24 = sadd.s32 1, %s17354_s19  ;;  %s264_s25 = ssub.s32 %s17358_s20, %s17452_s23 }
   0x6   : > { %p277_p0 = scmp.ne.s32.totalorder %s17354_s19, %s17350_s18  ;;  %p265_p1 = scmp.eq.s32.totalorder %s264_s25, 0 }
   0x7   : > { %p278_p2 = scmp.eq.s32.totalorder %s17448_s21, 1  ;;  %p283_p3 = scmp.ne.s32.totalorder %s17350_s18, %s17346_s17 }
   0x8   : > { %p284_p4 = scmp.eq.s32.totalorder %s13827_s22, 1  ;;  %p13830_p7 = scmp.ge.s32.totalorder %s17358_s20, 1 }
   0x9   : > { %s17463_s26 = scalar_select %p265_p1, %s17354_s19, %s267_s24  }
   0xa   : > { %p17465_p5 = por %p278_p2, %p277_p0  ;;  %p17469_p6 = por %p284_p4, %p283_p3 }
   0xb   : > { %20434 = sst [smem:[#allocation8_spill]] %s17463_s26  ;;  %p340_p8 = scmp.lt.s32.totalorder %s17358_s20, 3 }
   0xd   : > { %p341_p9 = pnand %p13830_p7, %p340_p8 }
   0xe   : > { %v16711_v0 = vld [vmem:[%s20421_s1 + $0x40] sm:$0xff] (!%p341_p9)   ;;  %v16713_v2 = vld [vmem:[%s20421_s1 + $0x48] sm:$0xff] (!%p341_p9)   ;;  %p379_p10 = scmp.lt.s32.totalorder (!%p341_p9), %s17448_s21, 1  ;;  %v16715_v4 = vld [vmem:[%s20421_s1 + $0x50] sm:$0xff] (!%p341_p9)   ;;  %v407_v8 = vlaneseq (!%p341_p9)  ;;  %v17360_v15 = vmov (!%p341_p9), 1966171168  }
   0xf   : > { %344 = sbr.rel (%p341_p9) target bundleno = 1813 (0x715), region = 64  ;;  %v16712_v1 = vld [vmem:[%s20421_s1 + $0x40] sm:$0xff] (!%p341_p9)   ;;  %15797 = vmatprep.subr.bf16.mxu0 (!%p341_p9), %v16711_v0  ;;  %v16714_v3 = vld [vmem:[%s20421_s1 + $0x48] sm:$0xff] (!%p341_p9)   ;;  %v16716_v5 = vld [vmem:[%s20421_s1 + $0x50] sm:$0xff] (!%p341_p9)   ;;  %v405_v16 = vunpack.c.l.s4 (!%p341_p9), %v17360_v15  ;;  %vm17362_vm0 = vmmov (!%p341_p9), 0   ;;  %vm2298_vm2 = vcmask (!%p341_p9), 1042432  }
  0x10   : > { %15877 = vmatprep.subr.bf16.mxu1 (!%p341_p9), %v16712_v1  ;;  %15798 = vmatpush3.bf16.msra.mxu0 (!%p341_p9), %v16711_v0  ;;  %v16717_v6 = vld [vmem:[%s20421_s1 + $0x58] sm:$0xff] (!%p341_p9)   ;;  %v16719_v9 = vld [vmem:[%s20421_s1 + $0x60] sm:$0xff] (!%p341_p9)   ;;  %v16721_v11 = vld [vmem:[%s20421_s1 + $0x68] sm:$0xff] (!%p341_p9)   ;;  %v17518_v13 = vshrl.u32 (!%p341_p9), %v407_v8, 7  ;;  %vm2299_vm1 = vsmask.f32 (!%p341_p9), 2304 }
  0x11   : > { %15878 = vmatpush3.bf16.msra.mxu1 (!%p341_p9), %v16712_v1  ;;  %15799 = vmatprep.subr.bf16.mxu0 (!%p341_p9), %v16713_v2  ;;  %v16718_v7 = vld [vmem:[%s20421_s1 + $0x58] sm:$0xff] (!%p341_p9)   ;;  %v16720_v10 = vld [vmem:[%s20421_s1 + $0x60] sm:$0xff] (!%p341_p9)   ;;  %v16722_v12 = vld [vmem:[%s20421_s1 + $0x68] sm:$0xff] (!%p341_p9)   ;;  %v406_v21 = vunpack.c.0.s8 (!%p341_p9), %v405_v16  ;;  %vm8131_vm4 = vsmask.f32 (!%p341_p9), 1280  ;;  %s377_s13 = sand.u32 (!%p341_p9), 1, %s17350_s18  }
  0x12   : > { %15879 = vmatprep.subr.bf16.mxu1 (!%p341_p9), %v16714_v3  ;;  %v16723_v19 = vld [vmem:[%s20421_s1 + $0x70] sm:$0xff] (!%p341_p9)   ;;  %v16725_v38 = vld [vmem:[%s20421_s1 + $0x78] sm:$0xff] (!%p341_p9)   ;;  %v17560_v50 = vld [vmem:[%s20421_s1] sm:$0xff] (!%p341_p9)   ;;  %vm8132_vm5 = vsmask.f32 (!%p341_p9), 3336  ;;  %s15365_s16 = sshll.u32 (!%p341_p9), %s17448_s21, 4 }
  0x13   : > { %v16724_v20 = vld [vmem:[%s20421_s1 + $0x70] sm:$0xff] (!%p341_p9)   ;;  %v17532_v28 = vsub.s32 (!%p341_p9), %v406_v21, %v17518_v13  ;;  %v16726_v42 = vld [vmem:[%s20421_s1 + $0x78] sm:$0xff] (!%p341_p9)   ;;  %vm18699_vm3 = vmand (!%p341_p9), %vm2298_vm2, %vm2299_vm1  ;;  %vm8134_vm6 = vsmask.f32 (!%p341_p9), 5392  ;;  %vm8136_vm7 = vsmask.f32 (!%p341_p9), 7448  ;;  %s20378_s24 = scalar_lea.hbm (!%p341_p9), %s20431_s11, %s15365_s16 }
  0x14   : > { %15800 = vmatpush3.bf16.msra.mxu0 (!%p341_p9), %v16713_v2  ;;  %v17582_v2 = vld [vmem:[%s20421_s1] sm:$0xff] (!%p341_p9)   ;;  %vm18799_vm8 = vmor (!%p341_p9), %vm8131_vm4, %vm8132_vm5  ;;  %vm11001_vm11 = vsmask.f32 (!%p341_p9), 256  ;;  %vm11002_vm12 = vsmask.f32 (!%p341_p9), 1284  ;;  %s13760_s25 = scalar_lea.sflag (!%p341_p9), [#allocation5], %s377_s13 }
  0x15   : > { %15880 = vmatpush3.bf16.msra.mxu1 (!%p341_p9), %v16714_v3  ;;  %15801 = vmatprep.subr.bf16.mxu0 (!%p341_p9), %v16715_v4  ;;  %vm8135_vm9 = vmor (!%p341_p9), %vm18799_vm8, %vm8134_vm6  ;;  %vm11004_vm14 = vsmask.f32 (!%p341_p9), 2312  ;;  %vm11006_vm1 = vsmask.f32 (!%p341_p9), 3340  ;;  %vm11010_vm5 = vsmask.f32 (!%p341_p9), 5396 }
  0x16   : > { %s380_s12 = scalar_select %p379_p10, %s17448_s21, 1  ;;  %15881 = vmatprep.subr.bf16.mxu1 %v16716_v5  ;;  %vm18813_vm10 = vmor %vm8135_vm9, %vm8136_vm7  ;;  %vm11012_vm7 = vsmask.f32 6424  ;;  %vm11014_vm9 = vsmask.f32 7452 }
  0x17   : > { %vm11003_vm13 = vmor %vm11001_vm11, %vm11002_vm12  ;;  %s17366_s21 = smov [#allocation4]  }
  0x18   : > { %15802 = vmatpush3.bf16.msra.mxu0 %v16715_v4  ;;  %s16665_s22 = smul.u32 88, %s380_s12  ;;  %vm11005_vm15 = vmor %vm11003_vm13, %vm11004_vm14  ;;  %s17300_s30 = sshll.u32 %s17366_s21, 4  ;;  %s17301_s30 = int_to_ptr.vmem [resolvable:$false] %s17300_s30 }
  0x19   : > { %15882 = vmatpush3.bf16.msra.mxu1 %v16716_v5  ;;  %15803 = vmatprep.subr.bf16.mxu0 %v16717_v6  ;;  %vm11007_vm2 = vmor %vm11005_vm15, %vm11006_vm1  ;;  %s17302_s14 = scalar_lea.vmem %s17301_s30, 32 }
  0x1a   : > { %15883 = vmatprep.subr.bf16.mxu1 %v16718_v7  ;;  %s17516_s19 = scalar_lea.vmem %s20420_s0, %s16665_s22 }
  0x1b   : > { %v13837_v14 = vld.sshfl [vmem:[%s17516_s19] sm:$0x20 pattern:$0x75316420] }
  0x1c   : > { %15804 = vmatpush3.bf16.msra.mxu0 %v16717_v6  ;;  %v13838_v17 = vld.sshfl [vmem:[%s17516_s19 + $0x4] sm:$0x11 pattern:$0x75316420]  ;;  %v579_v23 = vcombine.high %v13837_v14, %v13837_v14 }
  0x1d   : > { %15884 = vmatpush3.bf16.msra.mxu1 %v16718_v7  ;;  %15805 = vmatprep.subr.bf16.mxu0 %v16719_v9  ;;  %v13839_v18 = vld.sshfl [vmem:[%s17516_s19 + $0x8] sm:$0x20 pattern:$0x75316420]  ;;  %v595_v24 = vcombine.high %v13838_v17, %v13838_v17  ;;  %v602_v34 = vrot.slane %v13838_v17, %v17532_v28 }
  0x1e   : > { %15885 = vmatprep.subr.bf16.mxu1 %v16720_v10  ;;  %v13840_v22 = vld.sshfl [vmem:[%s17516_s19 + $0xc] sm:$0x11 pattern:$0x75316420]  ;;  %v617_v25 = vcombine.high %v13839_v18, %v13839_v18  ;;  %v586_v33 = vrot.slane %v579_v23, %v17532_v28 }
  0x1f   : > { %v13841_v26 = vld.sshfl [vmem:[%s17516_s19 + $0x10] sm:$0x20 pattern:$0x75316420]  ;;  %v633_v27 = vcombine.high %v13840_v22, %v13840_v22  ;;  %v609_v35 = vrot.slane %v595_v24, %v17532_v28  ;;  %v640_v39 = vrot.slane %v13840_v22, %v17532_v28 }
  0x20   : > { %15806 = vmatpush3.bf16.msra.mxu0 %v16719_v9  ;;  %v17535_v29 = vld.sshfl [vmem:[%s17516_s19 + $0x14] sm:$0x11 pattern:$0x75316420]  ;;  %v655_v30 = vcombine.high %v13841_v26, %v13841_v26  ;;  %v624_v36 = vrot.slane %v617_v25, %v17532_v28  ;;  %v587_v43 = vcombine.high %v586_v33, %v586_v33 }
  0x21   : > { %15886 = vmatpush3.bf16.msra.mxu1 %v16720_v10  ;;  %15807 = vmatprep.subr.bf16.mxu0 %v16721_v11  ;;  %v13843_v31 = vld.sshfl [vmem:[%s17516_s19 + $0x18] sm:$0x20 pattern:$0x75316420]  ;;  %v671_v32 = vcombine.high %v17535_v29, %v17535_v29  ;;  %v647_v40 = vrot.slane %v633_v27, %v17532_v28  ;;  %v678_v45 = vrot.slane %v17535_v29, %v17532_v28  ;;  %v770_v49 = vunpack.i.h.s16 %v640_v39 }
  0x22   : > { %15887 = vmatprep.subr.bf16.mxu1 %v16722_v12  ;;  %v13998_v37 = vld.sshfl [vmem:[%s17516_s19] sm:$0x13 pattern:$0x75316420]  ;;  %v662_v41 = vrot.slane %v655_v30, %v17532_v28  ;;  %v625_v44 = vcombine.high %v624_v36, %v624_v36  ;;  %v693_v48 = vcombine.high %v13843_v31, %v13843_v31  ;;  %v817_v55 = vcombine.low %v587_v43, %v602_v34 }
  0x23   : > { %v685_v46 = vrot.slane %v671_v32, %v17532_v28  ;;  %v13999_v51 = vld.sshfl [vmem:[%s17516_s19 + $0x8] sm:$0x13 pattern:$0x75316420]  ;;  %v2584_v52 = vcombine.high %v13998_v37, %v13998_v37  ;;  %v17565_v57 = vrot.slane %v13998_v37, %v17532_v28  ;;  %v13865_v59 = vpack.i.b16 %v647_v40, %v770_v49 }
  0x24   : > { %15808 = vmatpush3.bf16.msra.mxu0 %v16721_v11  ;;  %v663_v47 = vcombine.high %v662_v41, %v662_v41  ;;  %v768_v53 = vunpack.i.h.s16 %v625_v44  ;;  %v13863_v54 = vpack.i.b16 %v625_v44, %v609_v35  ;;  %v14000_v56 = vld.sshfl [vmem:[%s17516_s19 + $0x10] sm:$0x13 pattern:$0x75316420]  ;;  %v700_v58 = vrot.slane %v693_v48, %v17532_v28 }
  0x25   : > { %15888 = vmatpush3.bf16.msra.mxu1 %v16722_v12  ;;  %15809 = vmatprep.subr.bf16.mxu0 %v16723_v19  ;;  %v17569_v60 = vld.sshfl [vmem:[%s17516_s19 + $0x18] sm:$0x13 pattern:$0x75316420]  ;;  %v17572_v61 = vrot.slane %v2584_v52, %v17532_v28  ;;  %v827_v63 = vrot.slane %v817_v55, %v17532_v28  ;;  %v17577_v0 = vcombine.high %v17565_v57, %v17565_v57 }
  0x26   : > { %15889 = vmatprep.subr.bf16.mxu1 %v16724_v20  ;;  %v13864_v62 = vpack.i.b16 %v640_v39, %v768_v53  ;;  %v2607_v1 = vcombine.high %v13999_v51, %v13999_v51  ;;  %v17584_v3 = vcombine.high %v700_v58, %v700_v58  ;;  %v819_v4 = vcombine.low %v13865_v59, %v663_v47  ;;  %v13845_v25 = vld.sshfl [vmem:[%s17516_s19 + $0x20] sm:$0x20 pattern:$0x75316420] }
  0x27   : > { %v17587_v5 = vrot.slane %v13999_v51, %v17532_v28  ;;  %v2630_v6 = vcombine.high %v14000_v56, %v14000_v56  ;;  %v17593_v9 = vrot.slane %v14000_v56, %v17532_v28  ;;  %v17597_v10 = vrot.slane %v17569_v60, %v17532_v28  ;;  %v13846_v35 = vld.sshfl [vmem:[%s17516_s19 + $0x24] sm:$0x11 pattern:$0x75316420] }
  0x28   : > { %15810 = vmatpush3.bf16.msra.mxu0 %v16723_v19  ;;  %v818_v7 = vcombine.low %v13863_v54, %v13864_v62  ;;  %v17590_v8 = vrot.slane %v2607_v1, %v17532_v28  ;;  %v778_v11 = vunpack.i.h.s16 %v17584_v3  ;;  %v13866_v12 = vpack.i.b16 %v17584_v3, %v685_v46  ;;  %v14002_v53 = vld.sshfl [vmem:[%s17516_s19 + $0x20] sm:$0x13 pattern:$0x75316420] }
  0x29   : > { %15890 = vmatpush3.bf16.msra.mxu1 %v16724_v20  ;;  %15811 = vmatprep.subr.bf16.mxu0 %v16725_v38  ;;  %v841_v14 = vrot.slane %v819_v4, %v17532_v28  ;;  %v17605_v15 = vcombine.high %v17587_v5, %v17587_v5  ;;  %v17609_v17 = vrot.slane %v2630_v6, %v17532_v28  ;;  %v2692_v19 = vunpack.i.h.s16 %v17565_v57  ;;  %v13844_v20 = vld.sshfl [vmem:[%s17516_s19 + $0x1c] sm:$0x11 pattern:$0x75316420] }
  0x2a   : > { %15891 = vmatprep.subr.bf16.mxu1 %v16726_v42  ;;  %v834_v16 = vrot.slane %v818_v7, %v17532_v28  ;;  %v17613_v18 = vcombine.high %v17593_v9, %v17593_v9  ;;  %v820_v21 = vcombine.low %v678_v45, %v13866_v12  ;;  %v2694_v22 = vunpack.i.h.s16 %v17572_v61 }
  0x2b   : > { %v2696_v23 = vunpack.i.h.s16 %v17577_v0  ;;  %v2697_v24 = vunpack.i.h.s16 %v17587_v5  ;;  %v2702_v27 = vunpack.i.h.s16 %v17593_v9  ;;  %v2704_v29 = vunpack.i.h.s16 %v17609_v17 }
  0x2c   : > { %15812 = vmatpush3.bf16.msra.mxu0 %v16725_v38  ;;  %v849_v26 = vcombine.low %v827_v63, %v834_v16  ;;  %v2706_v30 = vunpack.i.h.s16 %v17613_v18  ;;  %v848_v31 = vrot.slane %v820_v21, %v17532_v28  ;;  %v2707_v32 = vunpack.i.h.s16 %v17597_v10 }
  0x2d   : > { %15892 = vmatpush3.bf16.msra.mxu1 %v16726_v42  ;;  %15817 = vmatprep.subr.bf16.mxu0 %v17560_v50  ;;  %v14019_v33 = vpack.i.b16 %v17572_v61, %v2692_v19  ;;  %v14020_v34 = vpack.i.b16 %v17577_v0, %v2694_v22  ;;  %v2735_v37 = vpack.i.b16 %v2697_v24, %v2696_v23 }
  0x2e   : > { %15897 = vmatprep.subr.bf16.mxu1 %v17582_v2  ;;  %v857_v36 = vrot.slane %v849_v26, %v17532_v28  ;;  %v14021_v38 = vpack.i.b16 %v17609_v17, %v2702_v27  ;;  %v14022_v39 = vpack.i.b16 %v17613_v18, %v2704_v29  ;;  %v850_v40 = vcombine.low %v841_v14, %v848_v31 }
  0x2f   : > { %v2740_v41 = vpack.i.b16 %v2707_v32, %v2706_v30  ;;  %v2746_v42 = vcombine.low %v14019_v33, %v14020_v34  ;;  %v709_v43 = vcombine.high %v13844_v20, %v13844_v20  ;;  %v2747_v44 = vcombine.low %v2735_v37, %v17590_v8 }
  0x30   : > { %v2748_v45 = vcombine.low %v17605_v15, %v14021_v38  ;;  %v716_v46 = vrot.slane %v13844_v20, %v17532_v28  ;;  %v731_v47 = vcombine.high %v13845_v25, %v13845_v25  ;;  %v864_v48 = vrot.slane %v850_v40, %v17532_v28 }
  0x31   : > { %v2749_v49 = vcombine.low %v14022_v39, %v2740_v41  ;;  %v2756_v51 = vrot.slane %v2746_v42, %v17532_v28  ;;  %v723_v52 = vrot.slane %v709_v43, %v17532_v28  ;;  %v2763_v54 = vrot.slane %v2747_v44, %v17532_v28 }
  0x32   : > { %v2770_v55 = vrot.slane %v2748_v45, %v17532_v28  ;;  %v738_v56 = vrot.slane %v731_v47, %v17532_v28  ;;  %v747_v58 = vcombine.high %v13846_v35, %v13846_v35  ;;  %v17647_v59 = vcombine.low %v857_v36, %v864_v48 }
  0x33   : > { %v2777_v62 = vrot.slane %v2749_v49, %v17532_v28  ;;  %v754_v63 = vrot.slane %v13846_v35, %v17532_v28  ;;  %v780_v1 = vunpack.i.h.s16 %v716_v46  ;;  %v2778_v3 = vcombine.low %v2756_v51, %v2763_v54 }
  0x34   : > { %v739_v4 = vcombine.high %v738_v56, %v738_v56  ;;  %v761_v6 = vrot.slane %v747_v58, %v17532_v28  ;;  %v13867_v7 = vpack.i.b16 %v716_v46, %v778_v11  ;;  %15813 = vmatprep.mubr.bf16.mxu0 %v17647_v59  ;;  %v2653_v16 = vcombine.high %v17569_v60, %v17569_v60 }
  0x35   : > { %v2779_v12 = vcombine.low %v2770_v55, %v2777_v62  ;;  %v13868_v14 = vpack.i.b16 %v723_v52, %v780_v1  ;;  %v2668_v19 = vcombine.high %v17597_v10, %v17597_v10  ;;  %v2786_v20 = vrot.slane %v2778_v3, %v17532_v28  ;;  %v16731_v1 = vld [vmem:[%s20421_s1 + $0x10] sm:$0xff]  }
  0x36   : > { %v786_v21 = vunpack.i.l.s16 %v761_v6  ;;  %v867_v22 = vcombine.low %v739_v4, %v754_v63  ;;  %v2676_v23 = vcombine.high %v14002_v53, %v14002_v53  ;;  %v2667_v11 = vrot.slane %v2653_v16, %v17532_v28  ;;  %v13896_v4 = vld.sshfl [vmem:[%s17516_s19 + $0x30] sm:$0x13 pattern:$0x75316420] }
  0x37   : > { %v2793_v25 = vrot.slane %v2779_v12, %v17532_v28  ;;  %v866_v26 = vcombine.low %v13867_v7, %v13868_v14  ;;  %v17661_v27 = vrot.slane %v14002_v53, %v17532_v28  ;;  %v519_v31 = vunpack.i.h.s16 %v17590_v8  ;;  %v13898_v16 = vld.sshfl [vmem:[%s17516_s19 + $0x40] sm:$0x13 pattern:$0x75316420] }
  0x38   : > { %v881_v29 = vrot.slane %v867_v22, %v17532_v28  ;;  %v888_v60 = vrot.slane %v786_v21, %v17532_v28  ;;  %v17666_v30 = vrot.slane %v2676_v23, %v17532_v28  ;;  %v2795_v39 = vcombine.low %v2667_v11, %v2668_v19 }
  0x39   : > { %v2794_v33 = vcombine.low %v2786_v20, %v2793_v25  ;;  %v874_v34 = vrot.slane %v866_v26, %v17532_v28  ;;  %v17672_v35 = vcombine.high %v17661_v27, %v17661_v27  ;;  %v2712_v36 = vunpack.i.h.s16 %v17661_v27  ;;  %v16730_v20 = vld [vmem:[%s20421_s1 + $0x8] sm:$0xff]  }
  0x3a   : > { %v903_v37 = vrot.slane %v888_v60, %v17532_v28  ;;  %v2714_v38 = vunpack.i.h.s16 %v17666_v30  ;;  %v13877_v40 = vpack.i.b16 %v17587_v5, %v17577_v0  ;;  %v13878_v44 = vpack.i.b16 %v17590_v8, %v2697_v24  ;;  %v16733_v60 = vld [vmem:[%s20421_s1 + $0x18] sm:$0xff]  }
  0x3b   : > { %15893 = vmatprep.mubr.bf16.mxu1 %v2794_v33  ;;  %v889_v41 = vcombine.low %v874_v34, %v881_v29  ;;  %v2716_v42 = vunpack.i.h.s16 %v17672_v35  ;;  %v14023_v43 = vpack.i.b16 %v17666_v30, %v2712_v36  ;;  %v2803_v46 = vrot.slane %v2795_v39, %v17532_v28 }
  0x3c   : > { %v14024_v45 = vpack.i.b16 %v17672_v35, %v2714_v38  ;;  %v13879_v47 = vpack.i.b16 %v17605_v15, %v519_v31  ;;  %v13880_v48 = vpack.i.b16 %v17597_v10, %v17613_v18  ;;  %v1017_v51 = vcombine.low %v17565_v57, %v17572_v61  ;;  %v16729_v15 = vld [vmem:[%s20421_s1 + $0x8] sm:$0xff]  }
  0x3d   : > { %v896_v0 = vrot.slane %v889_v41, %v17532_v28  ;;  %v2817_v49 = vrot.slane %v2716_v42, %v17532_v28  ;;  %v1018_v52 = vcombine.low %v13877_v40, %v13878_v44  ;;  %v529_v53 = vunpack.i.h.s16 %v2667_v11  ;;  %v17767_v40 = vld.sshfl [vmem:[%s17516_s19 + $0x34] sm:$0x11 pattern:$0x75316420]  ;;  %v16735_v42 = vld [vmem:[%s20421_s1 + $0x20] sm:$0xff]  }
  0x3e   : > { %v2796_v5 = vcombine.low %v14023_v43, %v14024_v45  ;;  %v1019_v8 = vcombine.low %v13879_v47, %v17593_v9  ;;  %v1020_v24 = vcombine.low %v17609_v17, %v13880_v48  ;;  %v1027_v18 = vrot.slane %v1017_v51, %v17532_v28  ;;  %v16732_v41 = vld [vmem:[%s20421_s1 + $0x10] sm:$0xff]   ;;  %v14060_v51 = vld.sshfl [vmem:[%s17516_s19 + $0x3c] sm:$0x11 pattern:$0x75316420] }
  0x3f   : > { %v17695_v54 = vcombine.low %v896_v0, %v903_v37  ;;  %v1034_v55 = vrot.slane %v1018_v52, %v17532_v28  ;;  %v13881_v56 = vpack.i.b16 %v2667_v11, %v2707_v32  ;;  %v13882_v58 = vpack.i.b16 %v2668_v19, %v529_v53  ;;  %v13897_v32 = vld.sshfl [vmem:[%s17516_s19 + $0x38] sm:$0x13 pattern:$0x75316420] }
  0x40   : > { %v2810_v57 = vrot.slane %v2796_v5, %v17532_v28  ;;  %v1041_v61 = vrot.slane %v1019_v8, %v17532_v28  ;;  %v1048_v9 = vrot.slane %v1020_v24, %v17532_v28  ;;  %v2832_v63 = vrot.slane %v2817_v49, %v17532_v28  ;;  %v17732_v11 = vld.sshfl [vmem:[%s17516_s19 + $0x48] sm:$0x13 pattern:$0x75316420]  ;;  %v16734_v5 = vld [vmem:[%s20421_s1 + $0x18] sm:$0xff]  }
  0x41   : > { %15814 = vmatmul.mubr.bf16.vlgmr.msra.gmra.mrb[0].mxu0 %v17695_v54  ;;  %v1049_v17 = vcombine.low %v1027_v18, %v1034_v55  ;;  %v1067_v10 = vcombine.low %v17661_v27, %v17666_v30  ;;  %v1222_v7 = vcombine.high %v13896_v4, %v13896_v4  ;;  %v1066_v14 = vcombine.low %v13881_v56, %v13882_v58  ;;  %v14061_v53 = vld.sshfl [vmem:[%s17516_s19 + $0x40] sm:$0x20 pattern:$0x75316420] }
  0x42   : > { %15818 = vmatpush3.bf16.msra.mxu0 %v17560_v50  ;;  %v2818_v62 = vcombine.low %v2803_v46, %v2810_v57  ;;  %v1050_v3 = vcombine.low %v1041_v61, %v1048_v9  ;;  %v17722_v19 = vrot.slane %v13896_v4, %v17532_v28  ;;  %v535_v21 = vunpack.i.l.s16 %v17672_v35  ;;  %v14057_v35 = vld.sshfl [vmem:[%s17516_s19 + $0x30] sm:$0x20 pattern:$0x75316420] }
  0x43   : > { %15819 = vmatprep.subr.bf16.mxu0 %v16729_v15  ;;  %v1057_v6 = vrot.slane %v1049_v17, %v17532_v28  ;;  %v1245_v22 = vcombine.high %v13897_v32, %v13897_v32  ;;  %v17729_v23 = vrot.slane %v13897_v32, %v17532_v28  ;;  %v1268_v29 = vcombine.high %v13898_v16, %v13898_v16  ;;  %v17811_v55 = vld.sshfl [vmem:[%s17516_s19 + $0x44] sm:$0x11 pattern:$0x75316420] }
  0x44   : > { %v2825_v50 = vrot.slane %v2818_v62, %v17532_v28  ;;  %v1064_v12 = vrot.slane %v1050_v3, %v17532_v28  ;;  %v17736_v27 = vcombine.high %v17722_v19, %v17722_v19  ;;  %v17742_v30 = vrot.slane %v1222_v7, %v17532_v28  ;;  %v14063_v56 = vld.sshfl [vmem:[%s17516_s19 + $0x48] sm:$0x20 pattern:$0x75316420] }
  0x45   : > { %v17745_v31 = vrot.slane %v1245_v22, %v17532_v28  ;;  %v17749_v33 = vcombine.high %v17729_v23, %v17729_v23  ;;  %v17752_v34 = vrot.slane %v13898_v16, %v17532_v28  ;;  %v17756_v36 = vrot.slane %v1066_v14, %v17532_v28  ;;  %v16737_v62 = vld [vmem:[%s20421_s1 + $0x28] sm:$0xff]  }
  0x46   : > { %v2833_v25 = vcombine.low %v2825_v50, %v2832_v63  ;;  %15820 = vmatpush3.bf16.msra.mxu0 %v16729_v15  ;;  %v1065_v26 = vcombine.low %v1057_v6, %v1064_v12  ;;  %v17759_v37 = vrot.slane %v1067_v10, %v17532_v28  ;;  %v17763_v38 = vrot.slane %v17732_v11, %v17532_v28 }
  0x47   : > { %15821 = vmatprep.subr.bf16.mxu0 %v16731_v1  ;;  %v1336_v39 = vunpack.i.h.s16 %v17729_v23  ;;  %v17779_v43 = vcombine.high %v17752_v34, %v17752_v34  ;;  %v1338_v44 = vunpack.i.h.s16 %v17745_v31  ;;  %v17785_v45 = vrot.slane %v1268_v29, %v17532_v28 }
  0x48   : > { %15894 = vmatmul.mubr.bf16.vlgmr.msra.gmra.mrb[0].mxu1 %v2833_v25  ;;  %15833 = vmatprep.mubr.bf16.mxu0 %v1065_v26  ;;  %v3160_v47 = vcombine.high %v14057_v35, %v14057_v35  ;;  %v1385_v49 = vcombine.low %v17722_v19, %v17742_v30  ;;  %v3176_v52 = vcombine.high %v17767_v40, %v17767_v40 }
  0x49   : > { %15898 = vmatpush3.bf16.msra.mxu1 %v17582_v2  ;;  %15913 = vmatprep.mubr.bf16.mxu1 %v17647_v59  ;;  %v13917_v2 = vpack.i.b16 %v17729_v23, %v17736_v27  ;;  %v13918_v46 = vpack.i.b16 %v17745_v31, %v1336_v39  ;;  %v14059_v59 = vld.sshfl [vmem:[%s17516_s19 + $0x38] sm:$0x20 pattern:$0x75316420]  ;;  %v13919_v48 = vpack.i.b16 %v17749_v33, %v1338_v44 }
  0x4a   : > { %15899 = vmatprep.subr.bf16.mxu1 %v16730_v20  ;;  %15822 = vmatpush3.bf16.msra.mxu0 %v16731_v1  ;;  %v13920_v0 = vpack.i.b16 %v17763_v38, %v17779_v43  ;;  %v17803_v8 = vrot.slane %v535_v21, %v17532_v28  ;;  %v1089_v24 = vcombine.low %v17756_v36, %v17759_v37  ;;  %v13900_v37 = vld.sshfl [vmem:[%s17516_s19 + $0x50] sm:$0x13 pattern:$0x75316420] }
  0x4b   : > { %15823 = vmatprep.subr.bf16.mxu0 %v16733_v60  ;;  %v1291_v15 = vcombine.high %v17732_v11, %v17732_v11  ;;  %v1386_v18 = vcombine.low %v13917_v2, %v13918_v46  ;;  %v3167_v57 = vrot.slane %v3160_v47, %v17532_v28  ;;  %v3198_v61 = vcombine.high %v14059_v59, %v14059_v59  ;;  %v16739_v11 = vld [vmem:[%s20421_s1 + $0x30] sm:$0xff]   ;;  %v16738_v47 = vld [vmem:[%s20421_s1 + $0x28] sm:$0xff]  }
  0x4c   : > { %v1387_v9 = vcombine.low %v13919_v48, %v17752_v34  ;;  %v1388_v17 = vcombine.low %v17785_v45, %v13920_v0  ;;  %v3214_v58 = vcombine.high %v14060_v51, %v14060_v51  ;;  %v1395_v63 = vrot.slane %v1385_v49, %v17532_v28 }
  0x4d   : > { %15900 = vmatpush3.bf16.msra.mxu1 %v16730_v20  ;;  %v3190_v1 = vrot.slane %v3176_v52, %v17532_v28  ;;  %v3205_v3 = vrot.slane %v3198_v61, %v17532_v28  ;;  %v3221_v4 = vrot.slane %v14060_v51, %v17532_v28  ;;  %v3183_v6 = vrot.slane %v17767_v40, %v17532_v28  ;;  %v16736_v20 = vld [vmem:[%s20421_s1 + $0x20] sm:$0xff]   ;;  %v16741_v51 = vld [vmem:[%s20421_s1 + $0x38] sm:$0xff]  }
  0x4e   : > { %15901 = vmatprep.subr.bf16.mxu1 %v16732_v41  ;;  %15824 = vmatpush3.bf16.msra.mxu0 %v16733_v60  ;;  %v3228_v10 = vrot.slane %v3214_v58, %v17532_v28  ;;  %v3236_v32 = vcombine.high %v14061_v53, %v14061_v53  ;;  %v3252_v7 = vcombine.high %v17811_v55, %v17811_v55 }
  0x4f   : > { %15825 = vmatprep.subr.bf16.mxu0 %v16735_v42  ;;  %v1402_v50 = vrot.slane %v1386_v18, %v17532_v28  ;;  %v3168_v12 = vcombine.high %v3167_v57, %v3167_v57  ;;  %v3206_v14 = vcombine.high %v3205_v3, %v3205_v3  ;;  %v3274_v16 = vcombine.high %v14063_v56, %v14063_v56  ;;  %v16740_v56 = vld [vmem:[%s20421_s1 + $0x30] sm:$0xff]  }
  0x50   : > { %v1409_v21 = vrot.slane %v1387_v9, %v17532_v28  ;;  %v1416_v22 = vrot.slane %v1388_v17, %v17532_v28  ;;  %v3243_v25 = vrot.slane %v3236_v32, %v17532_v28  ;;  %v3351_v26 = vunpack.i.h.s16 %v3221_v4 }
  0x51   : > { %15902 = vmatpush3.bf16.msra.mxu1 %v16732_v41  ;;  %v3266_v29 = vrot.slane %v3252_v7, %v17532_v28  ;;  %v3281_v60 = vrot.slane %v3274_v16, %v17532_v28  ;;  %v3349_v35 = vunpack.i.h.s16 %v3206_v14  ;;  %v14083_v36 = vpack.i.b16 %v3206_v14, %v3190_v1  ;;  %v16743_v1 = vld [vmem:[%s20421_s1 + $0x80] sm:$0xff]   ;;  %v16742_v16 = vld [vmem:[%s20421_s1 + $0x38] sm:$0xff]  }
  0x52   : > { %15903 = vmatprep.subr.bf16.mxu1 %v16734_v5  ;;  %15826 = vmatpush3.bf16.msra.mxu0 %v16735_v42  ;;  %v3244_v40 = vcombine.high %v3243_v25, %v3243_v25  ;;  %v14085_v41 = vpack.i.b16 %v3228_v10, %v3351_v26  ;;  %v17843_v42 = vrot.slane %v1291_v15, %v17532_v28 }
  0x53   : > { %15827 = vmatprep.subr.bf16.mxu0 %v16737_v62  ;;  %v3259_v44 = vrot.slane %v17811_v55, %v17532_v28  ;;  %v17847_v2 = vcombine.high %v3281_v60, %v3281_v60  ;;  %v14084_v46 = vpack.i.b16 %v3221_v4, %v3349_v35  ;;  %v3397_v59 = vcombine.low %v3168_v12, %v3183_v6  ;;  %v14066_v35 = vld.sshfl [vmem:[%s17516_s19 + $0x54] sm:$0x11 pattern:$0x75316420] }
  0x54   : > { %v1096_v48 = vrot.slane %v1089_v24, %v17532_v28  ;;  %v1103_v0 = vrot.slane %v17803_v8, %v17532_v28  ;;  %v3399_v49 = vcombine.low %v14085_v41, %v3244_v40  ;;  %v1417_v52 = vcombine.low %v1395_v63, %v1402_v50  ;;  %v14065_v63 = vld.sshfl [vmem:[%s17516_s19 + $0x50] sm:$0x20 pattern:$0x75316420]  ;;  %v16744_v40 = vld [vmem:[%s20421_s1 + $0x80] sm:$0xff]  }
  0x55   : > { %15904 = vmatpush3.bf16.msra.mxu1 %v16734_v5  ;;  %v1418_v5 = vcombine.low %v1409_v21, %v1416_v22  ;;  %v14086_v53 = vpack.i.b16 %v17847_v2, %v3266_v29  ;;  %v3398_v15 = vcombine.low %v14083_v36, %v14084_v46  ;;  %v17861_v18 = vcombine.high %v17763_v38, %v17763_v38  ;;  %v16745_v21 = vld [vmem:[%s20421_s1 + $0x88] sm:$0xff]  }
  0x56   : > { %15905 = vmatprep.subr.bf16.mxu1 %v16736_v20  ;;  %15828 = vmatpush3.bf16.msra.mxu0 %v16737_v62  ;;  %v1314_v24 = vcombine.high %v13900_v37, %v13900_v37  ;;  %v1346_v8 = vunpack.i.h.s16 %v17763_v38  ;;  %v1348_v55 = vunpack.i.h.s16 %v17843_v42  ;;  %v3407_v61 = vrot.slane %v3397_v59, %v17532_v28  ;;  %v14064_v62 = vld.sshfl [vmem:[%s17516_s19 + $0x4c] sm:$0x11 pattern:$0x75316420]  ;;  %v16752_v38 = vld [vmem:[%s20421_s1 + $0xa0] sm:$0xff]  }
  0x57   : > { %15829 = vmatprep.subr.bf16.mxu0 %v16739_v11  ;;  %v3400_v57 = vcombine.low %v3259_v44, %v14086_v53  ;;  %v3414_v9 = vrot.slane %v3398_v15, %v17532_v28  ;;  %v3421_v17 = vrot.slane %v3399_v49, %v17532_v28  ;;  %v17872_v58 = vrot.slane %v13900_v37, %v17532_v28  ;;  %v16747_v44 = vld [vmem:[%s20421_s1 + $0x90] sm:$0xff]   ;;  %v16749_v15 = vld [vmem:[%s20421_s1 + $0x98] sm:$0xff]  }
  0x58   : > { %v1425_v3 = vrot.slane %v1417_v52, %v17532_v28  ;;  %v1432_v4 = vrot.slane %v1418_v5, %v17532_v28  ;;  %v17883_v10 = vrot.slane %v1314_v24, %v17532_v28  ;;  %v13921_v32 = vpack.i.b16 %v17843_v42, %v1346_v8 }
  0x59   : > { %15906 = vmatpush3.bf16.msra.mxu1 %v16736_v20  ;;  %v3428_v6 = vrot.slane %v3400_v57, %v17532_v28  ;;  %v13922_v7 = vpack.i.b16 %v17861_v18, %v1348_v55  ;;  %v1104_v50 = vcombine.low %v1096_v48, %v1103_v0  ;;  %v3429_v12 = vcombine.low %v3407_v61, %v3414_v9 }
  0x5a   : > { %15907 = vmatprep.subr.bf16.mxu1 %v16738_v47  ;;  %15830 = vmatpush3.bf16.msra.mxu0 %v16739_v11  ;;  %v17894_v20 = vcombine.high %v17872_v58, %v17872_v58  ;;  %v1433_v22 = vcombine.low %v1425_v3, %v1432_v4  ;;  %v3290_v25 = vcombine.high %v14064_v62, %v14064_v62  ;;  %v3359_v46 = vunpack.i.h.s16 %v17847_v2  ;;  %v16746_v2 = vld [vmem:[%s20421_s1 + $0x88] sm:$0xff]   ;;  %v16751_v4 = vld [vmem:[%s20421_s1 + $0xa0] sm:$0xff]  }
  0x5b   : > { %15831 = vmatprep.subr.bf16.mxu0 %v16741_v51  ;;  %v3430_v14 = vcombine.low %v3421_v17, %v3428_v6  ;;  %v3297_v26 = vrot.slane %v14064_v62, %v17532_v28  ;;  %v3312_v11 = vcombine.high %v14065_v63, %v14065_v63  ;;  %v1434_v29 = vcombine.low %v13921_v32, %v13922_v7 }
  0x5c   : > { %v1435_v60 = vcombine.low %v17872_v58, %v17883_v10  ;;  %v3437_v36 = vrot.slane %v3429_v12, %v17532_v28  ;;  %v1354_v41 = vunpack.i.l.s16 %v17894_v20  ;;  %v3304_v59 = vrot.slane %v3290_v25, %v17532_v28 }
  0x5d   : > { %15908 = vmatpush3.bf16.msra.mxu1 %v16738_v47  ;;  %v3444_v37 = vrot.slane %v3430_v14, %v17532_v28  ;;  %v3319_v47 = vrot.slane %v3312_v11, %v17532_v28  ;;  %v3361_v48 = vunpack.i.h.s16 %v3297_v26  ;;  %v17916_v0 = vrot.slane %v1434_v29, %v17532_v28  ;;  %v16750_v14 = vld [vmem:[%s20421_s1 + $0x98] sm:$0xff]  }
  0x5e   : > { %15909 = vmatprep.subr.bf16.mxu1 %v16740_v56  ;;  %15832 = vmatpush3.bf16.msra.mxu0 %v16741_v51  ;;  %v17919_v49 = vrot.slane %v1435_v60, %v17532_v28  ;;  %v3328_v52 = vcombine.high %v14066_v35, %v14066_v35  ;;  %v17927_v5 = vrot.slane %v1354_v41, %v17532_v28  ;;  %v3713_v53 = vunpack.i.h.s16 %v17722_v19  ;;  %v16754_v41 = vld [vmem:[%s20421_s1 + $0xa8] sm:$0xff]  }
  0x5f   : > { %15837 = vmatprep.subr.bf16.mxu0 %v16743_v1  ;;  %v17921_v51 = vcombine.low %v3437_v36, %v3444_v37  ;;  %v3320_v24 = vcombine.high %v3319_v47, %v3319_v47  ;;  %v3335_v55 = vrot.slane %v14066_v35, %v17532_v28  ;;  %v17934_v57 = vpack.i.b16 %v3297_v26, %v3359_v46 }
  0x60   : > { %v17936_v61 = vpack.i.b16 %v3304_v59, %v3361_v48  ;;  %v1457_v9 = vcombine.low %v17916_v0, %v17919_v49  ;;  %v3715_v17 = vunpack.i.h.s16 %v17742_v30  ;;  %v17944_v19 = vrot.slane %v3328_v52, %v17532_v28 }
  0x61   : > { %15910 = vmatpush3.bf16.msra.mxu1 %v16740_v56  ;;  %15834 = vmatmul.mubr.bf16.vlgmr.msra.gmra.mrb[0].mxu0 %v1104_v50  ;;  %v3717_v56 = vunpack.i.h.s16 %v17736_v27  ;;  %v3723_v62 = vunpack.i.h.s16 %v17752_v34  ;;  %v1471_v63 = vrot.slane %v17927_v5, %v17532_v28  ;;  %v3727_v3 = vunpack.i.h.s16 %v17779_v43  ;;  %v16760_v5 = vld [vmem:[%s20421_s1 + $0xc0] sm:$0xff]  }
  0x62   : > { %15911 = vmatprep.subr.bf16.mxu1 %v16742_v16  ;;  %15838 = vmatpush3.bf16.msra.mxu0 %v16743_v1  ;;  %v3725_v1 = vunpack.i.h.s16 %v17785_v45  ;;  %v3446_v34 = vcombine.low %v17934_v57, %v17936_v61  ;;  %v17960_v6 = vcombine.low %v3320_v24, %v3335_v55  ;;  %v14123_v32 = vpack.i.b16 %v17742_v30, %v3713_v53  ;;  %v16753_v30 = vld [vmem:[%s20421_s1 + $0xa8] sm:$0xff]   ;;  %v16759_v53 = vld [vmem:[%s20421_s1 + $0xc0] sm:$0xff]  }
  0x63   : > { %15839 = vmatprep.subr.bf16.mxu0 %v16745_v21  ;;  %15853 = vmatprep.mubr.bf16.mxu0 %v1433_v22  ;;  %v14124_v7 = vpack.i.b16 %v17736_v27, %v3715_v17  ;;  %v3756_v50 = vpack.i.b16 %v1336_v39, %v3717_v56  ;;  %v14125_v12 = vpack.i.b16 %v17785_v45, %v3723_v62  ;;  %v6549_v39 = vunpack.i.h.s16 %v17872_v58  ;;  %v16761_v17 = vld [vmem:[%s20421_s1 + $0xc8] sm:$0xff]   ;;  %v16763_v62 = vld [vmem:[%s20421_s1 + $0xd0] sm:$0xff]  }
  0x64   : > { %v6577_v27 = vpack.i.b16 %v1346_v8, %v3727_v3  ;;  %v6551_v22 = vunpack.i.h.s16 %v17883_v10  ;;  %v6553_v26 = vunpack.i.h.s16 %v17894_v20  ;;  %v6632_v35 = vcombine.low %v17843_v42, %v17861_v18  ;;  %v16757_v42 = vld [vmem:[%s20421_s1 + $0xb8] sm:$0xff]   ;;  %v16764_v3 = vld [vmem:[%s20421_s1 + $0xd0] sm:$0xff]  }
  0x65   : > { %15912 = vmatpush3.bf16.msra.mxu1 %v16742_v16  ;;  %v14362_v16 = vpack.i.b16 %v17779_v43, %v3725_v1  ;;  %v6583_v23 = vcombine.low %v14123_v32, %v14124_v7  ;;  %v6584_v45 = vcombine.low %v3756_v50, %v17745_v31  ;;  %v14363_v11 = vpack.i.b16 %v17883_v10, %v6549_v39  ;;  %v16765_v1 = vld [vmem:[%s20421_s1 + $0xd8] sm:$0xff]   ;;  %v16768_v32 = vld [vmem:[%s20421_s1 + $0xe0] sm:$0xff]   ;;  %v16771_v7 = vld [vmem:[%s20421_s1 + $0xf0] sm:$0xff]  }
  0x66   : > { %15917 = vmatprep.subr.bf16.mxu1 %v16744_v40  ;;  %15840 = vmatpush3.bf16.msra.mxu0 %v16745_v21  ;;  %v6585_v21 = vcombine.low %v17749_v33, %v14125_v12  ;;  %v16755_v33 = vld [vmem:[%s20421_s1 + $0xb0] sm:$0xff]   ;;  %v14364_v29 = vpack.i.b16 %v17894_v20, %v6551_v22  ;;  %v6640_v20 = vrot.slane %v6632_v35, %v17532_v28  ;;  %v3367_v18 = vunpack.i.l.s16 %v17944_v19  ;;  %v16770_v50 = vld [vmem:[%s20421_s1 + $0xe8] sm:$0xff]   ;;  %v16773_v12 = vld [vmem:[%s20421_s1 + $0xf8] sm:$0xff]  }
  0x67   : > { %15841 = vmatprep.subr.bf16.mxu0 %v16747_v44  ;;  %v6586_v25 = vcombine.low %v14362_v16, %v6577_v27  ;;  %v6593_v43 = vrot.slane %v6583_v23, %v17532_v28  ;;  %v6600_v8 = vrot.slane %v6584_v45, %v17532_v28  ;;  %v3454_v46 = vrot.slane %v3446_v34, %v17532_v28  ;;  %v16766_v34 = vld [vmem:[%s20421_s1 + $0xd8] sm:$0xff]   ;;  %v16775_v16 = vld [vmem:[%s20421_s1 + $0x40] sm:$0xff]   ;;  %v14148_v39 = vld.sshfl [vmem:[%s17516_s19 + $0x30] sm:$0x13 pattern:$0x75316420] }
  0x68   : > { %15914 = vmatmul.mubr.bf16.vlgmr.msra.gmra.mrb[0].mxu1 %v17695_v54  ;;  %v16748_v54 = vld [vmem:[%s20421_s1 + $0x90] sm:$0xff]   ;;  %v6607_v31 = vrot.slane %v6585_v21, %v17532_v28  ;;  %v6633_v37 = vcombine.low %v14363_v11, %v14364_v29  ;;  %v3461_v48 = vrot.slane %v17960_v6, %v17532_v28  ;;  %v3468_v24 = vrot.slane %v3367_v18, %v17532_v28  ;;  %v16769_v6 = vld [vmem:[%s20421_s1 + $0xe8] sm:$0xff]   ;;  %v14325_v27 = vld.sshfl [vmem:[%s17516_s19 + $0x38] sm:$0x20 pattern:$0x75316420] }
  0x69   : > { %15918 = vmatpush3.bf16.msra.mxu1 %v16744_v40  ;;  %15933 = vmatprep.mubr.bf16.mxu1 %v17921_v51  ;;  %v6614_v58 = vrot.slane %v6586_v25, %v17532_v28  ;;  %v6615_v60 = vcombine.low %v6593_v43, %v6600_v8  ;;  %v6654_v40 = vrot.slane %v6553_v26, %v17532_v28  ;;  %v16774_v23 = vld [vmem:[%s20421_s1 + $0xf8] sm:$0xff]   ;;  %v16777_v45 = vld [vmem:[%s20421_s1 + $0x48] sm:$0xff]   ;;  %v14150_v22 = vld.sshfl [vmem:[%s17516_s19 + $0x40] sm:$0x13 pattern:$0x75316420] }
  0x6a   : > { %15919 = vmatprep.subr.bf16.mxu1 %v16746_v2  ;;  %15842 = vmatpush3.bf16.msra.mxu0 %v16747_v44  ;;  %v1464_v44 = vrot.slane %v1457_v9, %v17532_v28  ;;  %v6647_v47 = vrot.slane %v6633_v37, %v17532_v28  ;;  %v3469_v55 = vcombine.low %v3454_v46, %v3461_v48  ;;  %v16758_v9 = vld [vmem:[%s20421_s1 + $0xb8] sm:$0xff]   ;;  %v16776_v43 = vld [vmem:[%s20421_s1 + $0x40] sm:$0xff]   ;;  %v14323_v8 = vld.sshfl [vmem:[%s17516_s19 + $0x30] sm:$0x20 pattern:$0x75316420] }
  0x6b   : > { %15843 = vmatprep.subr.bf16.mxu0 %v16749_v15  ;;  %v6616_v36 = vcombine.low %v6607_v31, %v6614_v58  ;;  %v6623_v10 = vrot.slane %v6615_v60, %v17532_v28  ;;  %v6669_v52 = vrot.slane %v6654_v40, %v17532_v28  ;;  %v3483_v56 = vrot.slane %v3468_v24, %v17532_v28  ;;  %v14329_v31 = vld.sshfl [vmem:[%s17516_s19 + $0x48] sm:$0x20 pattern:$0x75316420]  ;;  %v16781_v46 = vld [vmem:[%s20421_s1 + $0x58] sm:$0xff]  }
  0x6c   : > { %v6655_v49 = vcombine.low %v6640_v20, %v6647_v47  ;;  %v1472_v57 = vcombine.low %v1464_v44, %v1471_v63  ;;  %v3476_v19 = vrot.slane %v3469_v55, %v17532_v28  ;;  %v16762_v63 = vld [vmem:[%s20421_s1 + $0xc8] sm:$0xff]   ;;  %v6218_v25 = vcombine.high %v14325_v27, %v14325_v27  ;;  %v18114_v60 = vld.sshfl [vmem:[%s17516_s19 + $0x34] sm:$0x11 pattern:$0x75316420] }
  0x6d   : > { %15920 = vmatpush3.bf16.msra.mxu1 %v16746_v2  ;;  %v6630_v59 = vrot.slane %v6616_v36, %v17532_v28  ;;  %v16756_v2 = vld [vmem:[%s20421_s1 + $0xb0] sm:$0xff]   ;;  %v18097_v26 = vrot.slane %v14148_v39, %v17532_v28  ;;  %v18107_v58 = vld.sshfl [vmem:[%s17516_s19 + $0x48] sm:$0x13 pattern:$0x75316420]  ;;  %v18111_v29 = vrot.slane %v14150_v22, %v17532_v28  ;;  %v6294_v44 = vcombine.high %v14329_v31, %v14329_v31 }
  0x6e   : > { %15921 = vmatprep.subr.bf16.mxu1 %v16748_v54  ;;  %15844 = vmatpush3.bf16.msra.mxu0 %v16749_v15  ;;  %v6662_v15 = vrot.slane %v6655_v49, %v17532_v28  ;;  %v14326_v35 = vld.sshfl [vmem:[%s17516_s19 + $0x3c] sm:$0x11 pattern:$0x75316420]  ;;  %v6225_v40 = vrot.slane %v6218_v25, %v17532_v28  ;;  %v18129_v18 = vrot.slane %v18107_v58, %v17532_v28 }
  0x6f   : > { %15845 = vmatprep.subr.bf16.mxu0 %v16751_v4  ;;  %v18011_v0 = vcombine.low %v6623_v10, %v6630_v59  ;;  %v14327_v36 = vld.sshfl [vmem:[%s17516_s19 + $0x40] sm:$0x20 pattern:$0x75316420]  ;;  %v16778_v10 = vld [vmem:[%s20421_s1 + $0x48] sm:$0xff]   ;;  %v4312_v59 = vcombine.high %v18111_v29, %v18111_v29  ;;  %v6180_v49 = vcombine.high %v14323_v8, %v14323_v8 }
  0x70   : > { %v18025_v61 = vcombine.low %v6662_v15, %v6669_v52  ;;  %v18119_v37 = vld.sshfl [vmem:[%s17516_s19 + $0x44] sm:$0x11 pattern:$0x75316420]  ;;  %v6196_v52 = vcombine.high %v18114_v60, %v18114_v60  ;;  %v6241_v15 = vrot.slane %v14326_v35, %v17532_v28  ;;  %v6256_v24 = vcombine.high %v14327_v36, %v14327_v36  ;;  %v16786_v36 = vld [vmem:[%s20421_s1 + $0x68] sm:$0xff]  }
  0x71   : > { %15922 = vmatpush3.bf16.msra.mxu1 %v16748_v54  ;;  %v18042_v54 = vcombine.low %v3476_v19, %v3483_v56  ;;  %v6272_v55 = vcombine.high %v18119_v37, %v18119_v37  ;;  %v6279_v8 = vrot.slane %v18119_v37, %v17532_v28 }
  0x72   : > { %15923 = vmatprep.subr.bf16.mxu1 %v16750_v14  ;;  %15846 = vmatpush3.bf16.msra.mxu0 %v16751_v4  ;;  %v16767_v4 = vld [vmem:[%s20421_s1 + $0xe0] sm:$0xff]  }
  0x73   : > { %15847 = vmatprep.subr.bf16.mxu0 %v16753_v30 }
  0x75   : > { %15924 = vmatpush3.bf16.msra.mxu1 %v16750_v14  ;;  %v16772_v14 = vld [vmem:[%s20421_s1 + $0xf0] sm:$0xff]  }
  0x76   : > { %15925 = vmatprep.subr.bf16.mxu1 %v16752_v38  ;;  %15848 = vmatpush3.bf16.msra.mxu0 %v16753_v30  ;;  %v14149_v30 = vld.sshfl [vmem:[%s17516_s19 + $0x38] sm:$0x13 pattern:$0x75316420] }
  0x77   : > { %15849 = vmatprep.subr.bf16.mxu0 %v16755_v33  ;;  %v4274_v21 = vcombine.high %v14149_v30, %v14149_v30 }
  0x79   : > { %15926 = vmatpush3.bf16.msra.mxu1 %v16752_v38  ;;  %v4281_v38 = vrot.slane %v14149_v30, %v17532_v28  ;;  %v4288_v11 = vrot.slane %v4274_v21, %v17532_v28 }
  0x7a   : > { %15927 = vmatprep.subr.bf16.mxu1 %v16754_v41  ;;  %15850 = vmatpush3.bf16.msra.mxu0 %v16755_v33  ;;  %v16779_v33 = vld [vmem:[%s20421_s1 + $0x50] sm:$0xff]  }
  0x7b   : > { %15851 = vmatprep.subr.bf16.mxu0 %v16757_v42  ;;  %v4289_v20 = vcombine.high %v4281_v38, %v4281_v38  ;;  %v4365_v47 = vunpack.i.h.s16 %v4281_v38  ;;  %v4367_v48 = vunpack.i.h.s16 %v4288_v11 }
  0x7d   : > { %15928 = vmatpush3.bf16.msra.mxu1 %v16754_v41  ;;  %v4251_v41 = vcombine.high %v14148_v39, %v14148_v39 }
  0x7e   : > { %15929 = vmatprep.subr.bf16.mxu1 %v16756_v2  ;;  %15852 = vmatpush3.bf16.msra.mxu0 %v16757_v42  ;;  %v4297_v42 = vcombine.high %v14150_v22, %v14150_v22  ;;  %v6203_v22 = vrot.slane %v18114_v60, %v17532_v28 }
  0x7f   : > { %15857 = vmatprep.subr.bf16.mxu0 %v16759_v53 }
  0x80   : > { %v4311_v19 = vrot.slane %v4297_v42, %v17532_v28 }
  0x81   : > { %15930 = vmatpush3.bf16.msra.mxu1 %v16756_v2  ;;  %15854 = vmatmul.mubr.bf16.vlgmr.msra.gmra.mrb[0].mxu0 %v1472_v57  ;;  %v6226_v2 = vcombine.high %v6225_v40, %v6225_v40  ;;  %v6301_v57 = vrot.slane %v6294_v44, %v17532_v28 }
  0x82   : > { %15931 = vmatprep.subr.bf16.mxu1 %v16758_v9  ;;  %15858 = vmatpush3.bf16.msra.mxu0 %v16759_v53  ;;  %v6234_v53 = vcombine.high %v14326_v35, %v14326_v35 }
  0x83   : > { %15859 = vmatprep.subr.bf16.mxu0 %v16761_v17  ;;  %15873 = vmatprep.mubr.bf16.mxu0 %v17921_v51 }
  0x85   : > { %15932 = vmatpush3.bf16.msra.mxu1 %v16758_v9  ;;  %v16780_v9 = vld [vmem:[%s20421_s1 + $0x50] sm:$0xff]  }
  0x86   : > { %15937 = vmatprep.subr.bf16.mxu1 %v16760_v5  ;;  %15860 = vmatpush3.bf16.msra.mxu0 %v16761_v17  ;;  %v4265_v17 = vrot.slane %v4251_v41, %v17532_v28 }
  0x87   : > { %15861 = vmatprep.subr.bf16.mxu0 %v16763_v62 }
  0x88   : > { %15934 = vmatmul.mubr.bf16.vlgmr.msra.gmra.mrb[0].mxu1 %v18042_v54  ;;  %v4864_v30 = vcombine.low %v18097_v26, %v4265_v17 }
  0x89   : > { %15938 = vmatpush3.bf16.msra.mxu1 %v16760_v5  ;;  %15953 = vmatprep.mubr.bf16.mxu1 %v18011_v0  ;;  %v14204_v5 = vpack.i.b16 %v4288_v11, %v4365_v47  ;;  %v16788_v47 = vld [vmem:[%s20421_s1 + $0x70] sm:$0xff]  }
  0x8a   : > { %15939 = vmatprep.subr.bf16.mxu1 %v16762_v63  ;;  %15862 = vmatpush3.bf16.msra.mxu0 %v16763_v62  ;;  %v14205_v62 = vpack.i.b16 %v4289_v20, %v4367_v48  ;;  %v4874_v11 = vrot.slane %v4864_v30, %v17532_v28  ;;  %v16792_v30 = vld [vmem:[%s20421_s1] sm:$0xff]  }
  0x8b   : > { %15863 = vmatprep.subr.bf16.mxu0 %v16765_v1 }
  0x8d   : > { %15940 = vmatpush3.bf16.msra.mxu1 %v16762_v63  ;;  %v14206_v63 = vpack.i.b16 %v18129_v18, %v4312_v59  ;;  %v4375_v59 = vunpack.i.h.s16 %v18129_v18 }
  0x8e   : > { %15941 = vmatprep.subr.bf16.mxu1 %v16764_v3  ;;  %15864 = vmatpush3.bf16.msra.mxu0 %v16765_v1  ;;  %v6187_v1 = vrot.slane %v6180_v49, %v17532_v28 }
  0x8f   : > { %15865 = vmatprep.subr.bf16.mxu0 %v16767_v4  ;;  %v4867_v39 = vcombine.low %v4311_v19, %v14206_v63 }
  0x90   : > { %v6188_v21 = vcombine.high %v6187_v1, %v6187_v1  ;;  %v18219_v1 = vld.sshfl [vmem:[%s17516_s19 + $0x8] sm:$0x13 pattern:$0x75316420] }
  0x91   : > { %15942 = vmatpush3.bf16.msra.mxu1 %v16764_v3  ;;  %v6210_v3 = vrot.slane %v6196_v52, %v17532_v28  ;;  %v4895_v35 = vrot.slane %v4867_v39, %v17532_v28  ;;  %v4335_v52 = vcombine.high %v18129_v18, %v18129_v18  ;;  %v14330_v18 = vld.sshfl [vmem:[%s17516_s19 + $0x4c] sm:$0x11 pattern:$0x75316420] }
  0x92   : > { %15943 = vmatprep.subr.bf16.mxu1 %v16766_v34  ;;  %15866 = vmatpush3.bf16.msra.mxu0 %v16767_v4  ;;  %v6248_v4 = vrot.slane %v6234_v53, %v17532_v28  ;;  %v6783_v37 = vcombine.low %v6188_v21, %v6203_v22  ;;  %v16791_v53 = vld [vmem:[%s20421_s1] sm:$0xff]   ;;  %v16795_v22 = vld [vmem:[%s20421_s1 + $0x10] sm:$0xff]  }
  0x93   : > { %15867 = vmatprep.subr.bf16.mxu0 %v16769_v6  ;;  %v14373_v25 = vpack.i.b16 %v6226_v2, %v6210_v3  ;;  %v14399_v3 = vld.sshfl [vmem:[%s17516_s19 + $0x10] sm:$0x20 pattern:$0x75316420] }
  0x94   : > { %v6793_v48 = vrot.slane %v6783_v37, %v17532_v28  ;;  %v14403_v21 = vld.sshfl [vmem:[%s17516_s19 + $0x20] sm:$0x20 pattern:$0x75316420]  ;;  %v16794_v37 = vld [vmem:[%s20421_s1 + $0x8] sm:$0xff]  }
  0x95   : > { %15944 = vmatpush3.bf16.msra.mxu1 %v16766_v34  ;;  %v6369_v34 = vunpack.i.h.s16 %v6226_v2 }
  0x96   : > { %15945 = vmatprep.subr.bf16.mxu1 %v16768_v32  ;;  %15868 = vmatpush3.bf16.msra.mxu0 %v16769_v6  ;;  %v16782_v6 = vld [vmem:[%s20421_s1 + $0x58] sm:$0xff]  }
  0x97   : > { %15869 = vmatprep.subr.bf16.mxu0 %v16771_v7 }
  0x99   : > { %15946 = vmatpush3.bf16.msra.mxu1 %v16768_v32  ;;  %v16785_v32 = vld [vmem:[%s20421_s1 + $0x68] sm:$0xff]  }
  0x9a   : > { %15947 = vmatprep.subr.bf16.mxu1 %v16770_v50  ;;  %15870 = vmatpush3.bf16.msra.mxu0 %v16771_v7  ;;  %v6263_v7 = vrot.slane %v6256_v24, %v17532_v28 }
  0x9b   : > { %15871 = vmatprep.subr.bf16.mxu0 %v16773_v12 }
  0x9d   : > { %15948 = vmatpush3.bf16.msra.mxu1 %v16770_v50  ;;  %v6286_v50 = vrot.slane %v6272_v55, %v17532_v28 }
  0x9e   : > { %15949 = vmatprep.subr.bf16.mxu1 %v16772_v14  ;;  %15872 = vmatpush3.bf16.msra.mxu0 %v16773_v12  ;;  %v18164_v12 = vcombine.high %v6301_v57, %v6301_v57 }
  0x9f   : > { %15957 = vmatprep.subr.bf16.mxu0 %v16775_v16 }
  0xa1   : > { %15950 = vmatpush3.bf16.msra.mxu1 %v16772_v14  ;;  %15874 = vmatmul.mubr.bf16.vlgmr.msra.gmra.mrb[0].mxu0 %v18042_v54  ;;  %v6371_v14 = vunpack.i.h.s16 %v6241_v15 }
  0xa2   : > { %15951 = vmatprep.subr.bf16.mxu1 %v16774_v23  ;;  %15958 = vmatpush3.bf16.msra.mxu0 %v16775_v16  ;;  %v4320_v16 = vcombine.high %v18107_v58, %v18107_v58  ;;  %v14152_v58 = vld.sshfl [vmem:[%s17516_s19 + $0x50] sm:$0x13 pattern:$0x75316420] }
  0xa3   : > { %15959 = vmatprep.subr.bf16.mxu0 %v16777_v45  ;;  %15973 = vmatprep.mubr.bf16.mxu0 %v17921_v51  ;;  %v4266_v51 = vcombine.high %v18097_v26, %v18097_v26  ;;  %v6264_v26 = vcombine.high %v6263_v7, %v6263_v7  ;;  %v14375_v31 = vpack.i.b16 %v6248_v4, %v6371_v14  ;;  %v16793_v4 = vld [vmem:[%s20421_s1 + $0x8] sm:$0xff]  }
  0xa4   : > { %v4334_v41 = vrot.slane %v4320_v16, %v17532_v28  ;;  %v4343_v20 = vcombine.high %v14152_v58, %v14152_v58  ;;  %v18207_v55 = vrot.slane %v14152_v58, %v17532_v28  ;;  %v6310_v14 = vcombine.high %v14330_v18, %v14330_v18  ;;  %v18262_v58 = vld.sshfl [vmem:[%s17516_s19 + $0x20] sm:$0x13 pattern:$0x75316420] }
  0xa5   : > { %15952 = vmatpush3.bf16.msra.mxu1 %v16774_v23  ;;  %v14203_v56 = vpack.i.b16 %v4281_v38, %v4266_v51  ;;  %v4866_v23 = vcombine.low %v14205_v62, %v18111_v29  ;;  %v16787_v38 = vld [vmem:[%s20421_s1 + $0x70] sm:$0xff]   ;;  %v16789_v51 = vld [vmem:[%s20421_s1 + $0x78] sm:$0xff]   ;;  %v6785_v44 = vcombine.low %v14375_v31, %v6264_v26  ;;  %v14397_v31 = vld.sshfl [vmem:[%s17516_s19 + $0x8] sm:$0x20 pattern:$0x75316420] }
  0xa6   : > { %16037 = vmatprep.subr.bf16.mxu1 %v16776_v43  ;;  %15960 = vmatpush3.bf16.msra.mxu0 %v16777_v45  ;;  %v16784_v45 = vld [vmem:[%s20421_s1 + $0x60] sm:$0xff]   ;;  %v4377_v2 = vunpack.i.h.s16 %v4334_v41  ;;  %v4357_v57 = vrot.slane %v4343_v20, %v17532_v28  ;;  %v14207_v62 = vpack.i.b16 %v4334_v41, %v4375_v59  ;;  %v16797_v20 = vld [vmem:[%s20421_s1 + $0x18] sm:$0xff]  }
  0xa7   : > { %15961 = vmatprep.subr.bf16.mxu0 %v16779_v33  ;;  %v4865_v27 = vcombine.low %v14203_v56, %v14204_v5  ;;  %v4888_v60 = vrot.slane %v4866_v23, %v17532_v28  ;;  %v16790_v56 = vld [vmem:[%s20421_s1 + $0x78] sm:$0xff]   ;;  %v4358_v23 = vcombine.high %v18207_v55, %v18207_v55 }
  0xa8   : > { %15954 = vmatmul.mubr.bf16.vlgmr.msra.gmra.mrb[0].mxu1 %v18025_v61  ;;  %v14208_v63 = vpack.i.b16 %v4335_v52, %v4377_v2  ;;  %v18308_v52 = vrot.slane %v18262_v58, %v17532_v28 }
  0xa9   : > { %16038 = vmatpush3.bf16.msra.mxu1 %v16776_v43  ;;  %16053 = vmatprep.mubr.bf16.mxu1 %v18011_v0  ;;  %v16783_v0 = vld [vmem:[%s20421_s1 + $0x60] sm:$0xff]   ;;  %v14374_v43 = vpack.i.b16 %v6241_v15, %v6369_v34  ;;  %v4881_v29 = vrot.slane %v4865_v27, %v17532_v28  ;;  %v6807_v15 = vrot.slane %v6785_v44, %v17532_v28 }
  0xaa   : > { %16039 = vmatprep.subr.bf16.mxu1 %v16778_v10  ;;  %15962 = vmatpush3.bf16.msra.mxu0 %v16779_v33  ;;  %v14376_v33 = vpack.i.b16 %v18164_v12, %v6286_v50  ;;  %v18230_v50 = vld.sshfl [vmem:[%s17516_s19 + $0x54] sm:$0x11 pattern:$0x75316420]  ;;  %v4913_v39 = vcombine.low %v14207_v62, %v14208_v63  ;;  %v5069_v44 = vcombine.high %v18219_v1, %v18219_v1 }
  0xab   : > { %15963 = vmatprep.subr.bf16.mxu0 %v16781_v46  ;;  %v6784_v40 = vcombine.low %v14373_v25, %v14374_v43  ;;  %v4896_v42 = vcombine.low %v4874_v11, %v4881_v29  ;;  %v18246_v43 = vrot.slane %v18219_v1, %v17532_v28  ;;  %v6355_v63 = vrot.slane %v18230_v50, %v17532_v28 }
  0xad   : > { %16040 = vmatpush3.bf16.msra.mxu1 %v16778_v10  ;;  %v6786_v10 = vcombine.low %v6279_v8, %v14376_v33  ;;  %v6800_v49 = vrot.slane %v6784_v40, %v17532_v28  ;;  %v4904_v17 = vrot.slane %v4896_v42, %v17532_v28  ;;  %v18259_v33 = vrot.slane %v6310_v14, %v17532_v28 }
  0xae   : > { %16041 = vmatprep.subr.bf16.mxu1 %v16780_v9  ;;  %15964 = vmatpush3.bf16.msra.mxu0 %v16781_v46  ;;  %v4897_v46 = vcombine.low %v4888_v60, %v4895_v35  ;;  %v18272_v60 = vld.sshfl [vmem:[%s17516_s19 + $0xc] sm:$0x11 pattern:$0x75316420]  ;;  %v18280_v40 = vrot.slane %v4913_v39, %v17532_v28 }
  0xaf   : > { %15965 = vmatprep.subr.bf16.mxu0 %v16783_v0  ;;  %v6814_v24 = vrot.slane %v6786_v10, %v17532_v28  ;;  %v6815_v5 = vcombine.low %v6793_v48, %v6800_v49  ;;  %v14400_v35 = vld.sshfl [vmem:[%s17516_s19 + $0x14] sm:$0x11 pattern:$0x75316420]  ;;  %v16801_v39 = vld [vmem:[%s20421_s1 + $0x28] sm:$0xff]  }
  0xb0   : > { %v4911_v19 = vrot.slane %v4897_v46, %v17532_v28  ;;  %v18290_v10 = vld.sshfl [vmem:[%s17516_s19 + $0x1c] sm:$0x11 pattern:$0x75316420]  ;;  %v18297_v46 = vcombine.high %v18246_v43, %v18246_v43 }
  0xb1   : > { %16042 = vmatpush3.bf16.msra.mxu1 %v16780_v9  ;;  %v14223_v9 = vld.sshfl [vmem:[%s17516_s19 + $0x10] sm:$0x13 pattern:$0x75316420]  ;;  %v6816_v34 = vcombine.low %v6807_v15, %v6814_v24  ;;  %v6823_v27 = vrot.slane %v6815_v5, %v17532_v28  ;;  %v6997_v24 = vcombine.high %v14397_v31, %v14397_v31  ;;  %v7089_v5 = vcombine.high %v18290_v10, %v18290_v10 }
  0xb2   : > { %16043 = vmatprep.subr.bf16.mxu1 %v16782_v6  ;;  %15966 = vmatpush3.bf16.msra.mxu0 %v16783_v0  ;;  %v14331_v0 = vld.sshfl [vmem:[%s17516_s19 + $0x50] sm:$0x20 pattern:$0x75316420]  ;;  %v4912_v7 = vcombine.low %v4904_v17, %v4911_v19  ;;  %v5092_v16 = vcombine.high %v14223_v9, %v14223_v9  ;;  %v18255_v8 = vrot.slane %v14223_v9, %v17532_v28 }
  0xb3   : > { %15967 = vmatprep.subr.bf16.mxu0 %v16785_v32  ;;  %v6830_v25 = vrot.slane %v6816_v34, %v17532_v28  ;;  %v7051_v9 = vcombine.high %v14400_v35, %v14400_v35  ;;  %v7058_v17 = vrot.slane %v14400_v35, %v17532_v28  ;;  %v7004_v14 = vrot.slane %v6997_v24, %v17532_v28 }
  0xb4   : > { %v18265_v11 = vrot.slane %v5092_v16, %v17532_v28  ;;  %v18302_v48 = vcombine.high %v18255_v8, %v18255_v8 }
  0xb5   : > { %16044 = vmatpush3.bf16.msra.mxu1 %v16782_v6  ;;  %v4914_v6 = vcombine.low %v18207_v55, %v4357_v57  ;;  %v6831_v42 = vcombine.low %v6823_v27, %v6830_v25  ;;  %v16796_v57 = vld [vmem:[%s20421_s1 + $0x10] sm:$0xff]   ;;  %v7188_v25 = vunpack.i.h.s16 %v7058_v17  ;;  %v16800_v55 = vld [vmem:[%s20421_s1 + $0x20] sm:$0xff]  }
  0xb6   : > { %16045 = vmatprep.subr.bf16.mxu1 %v16784_v45  ;;  %15968 = vmatpush3.bf16.msra.mxu0 %v16785_v32  ;;  %v18227_v32 = vld.sshfl [vmem:[%s17516_s19 + $0x18] sm:$0x13 pattern:$0x75316420]  ;;  %v5185_v15 = vunpack.i.h.s16 %v18265_v11 }
  0xb7   : > { %15969 = vmatprep.subr.bf16.mxu0 %v16787_v38  ;;  %v18249_v26 = vrot.slane %v4914_v6, %v17532_v28  ;;  %v18269_v29 = vrot.slane %v18227_v32, %v17532_v28  ;;  %v5115_v49 = vcombine.high %v18227_v32, %v18227_v32 }
  0xb8   : > { %v14245_v6 = vpack.i.b16 %v18302_v48, %v5185_v15 }
  0xb9   : > { %16046 = vmatpush3.bf16.msra.mxu1 %v16784_v45  ;;  %v6332_v45 = vcombine.high %v14331_v0, %v14331_v0  ;;  %v18312_v2 = vcombine.high %v18269_v29, %v18269_v29  ;;  %v16799_v0 = vld [vmem:[%s20421_s1 + $0x20] sm:$0xff]  }
  0xba   : > { %16047 = vmatprep.subr.bf16.mxu1 %v16786_v36  ;;  %15970 = vmatpush3.bf16.msra.mxu0 %v16787_v38  ;;  %v7035_v38 = vcombine.high %v14399_v3, %v14399_v3  ;;  %v18336_v3 = vrot.slane %v5069_v44, %v17532_v28 }
  0xbb   : > { %15971 = vmatprep.subr.bf16.mxu0 %v16789_v51  ;;  %v18283_v41 = vrot.slane %v6332_v45, %v17532_v28  ;;  %v14246_v32 = vpack.i.b16 %v18308_v52, %v18312_v2  ;;  %v7103_v45 = vrot.slane %v7089_v5, %v17532_v28  ;;  %v16805_v5 = vld [vmem:[%s20421_s1 + $0x38] sm:$0xff]  }
  0xbc   : > { %v7042_v59 = vrot.slane %v7035_v38, %v17532_v28  ;;  %v4383_v38 = vunpack.i.l.s16 %v4358_v23  ;;  %v7005_v23 = vcombine.high %v7004_v14, %v7004_v14  ;;  %v16807_v14 = vld [vmem:[%s20421_s1 + $0x80] sm:$0xff]  }
  0xbd   : > { %16048 = vmatpush3.bf16.msra.mxu1 %v16786_v36  ;;  %v14401_v36 = vld.sshfl [vmem:[%s17516_s19 + $0x18] sm:$0x20 pattern:$0x75316420]  ;;  %v6340_v31 = vcombine.high %v18283_v41, %v18283_v41  ;;  %v7020_v41 = vrot.slane %v18272_v60, %v17532_v28 }
  0xbe   : > { %16049 = vmatprep.subr.bf16.mxu1 %v16788_v47  ;;  %15972 = vmatpush3.bf16.msra.mxu0 %v16789_v51  ;;  %v6348_v51 = vcombine.high %v18230_v50, %v18230_v50  ;;  %v7073_v19 = vcombine.high %v14401_v36, %v14401_v36  ;;  %v16804_v50 = vld [vmem:[%s20421_s1 + $0x30] sm:$0xff]  }
  0xbf   : > { %15977 = vmatprep.subr.bf16.mxu0 %v16791_v53 }
  0xc0   : > { %v7080_v27 = vrot.slane %v7073_v19, %v17532_v28  ;;  %v4936_v19 = vcombine.low %v18280_v40, %v18249_v26 }
  0xc1   : > { %16050 = vmatpush3.bf16.msra.mxu1 %v16788_v47  ;;  %15974 = vmatmul.mubr.bf16.vlgmr.msra.gmra.mrb[4].mxu0 %v18042_v54  ;;  %v18252_v54 = vrot.slane %v14330_v18, %v17532_v28  ;;  %v7111_v47 = vcombine.high %v14403_v21, %v14403_v21  ;;  %v7013_v18 = vcombine.high %v18272_v60, %v18272_v60 }
  0xc2   : > { %16051 = vmatprep.subr.bf16.mxu1 %v16790_v56  ;;  %15978 = vmatpush3.bf16.msra.mxu0 %v16791_v53  ;;  %v5183_v53 = vunpack.i.h.s16 %v18255_v8 }
  0xc3   : > { %15979 = vmatprep.subr.bf16.mxu0 %v16793_v4  ;;  %15993 = vmatprep.mubr.bf16.mxu0 %v4912_v7  ;;  %v7118_v62 = vrot.slane %v7111_v47, %v17532_v28  ;;  %v6381_v1 = vunpack.i.h.s16 %v18252_v54  ;;  %v16798_v7 = vld [vmem:[%s20421_s1 + $0x18] sm:$0xff]   ;;  %v7027_v16 = vrot.slane %v7013_v18, %v17532_v28  ;;  %v4935_v18 = vrot.slane %v4383_v38, %v17532_v28 }
  0xc4   : > { %v14244_v34 = vpack.i.b16 %v18265_v11, %v5183_v53  ;;  %v16806_v38 = vld [vmem:[%s20421_s1 + $0x38] sm:$0xff]  }
  0xc5   : > { %16052 = vmatpush3.bf16.msra.mxu1 %v16790_v56  ;;  %v6379_v56 = vunpack.i.h.s16 %v18164_v12  ;;  %v18339_v12 = vrot.slane %v5115_v49, %v17532_v28  ;;  %v18360_v21 = vcombine.high %v7118_v62, %v7118_v62  ;;  %v14378_v36 = vpack.i.b16 %v18259_v33, %v6381_v1 }
  0xc6   : > { %16057 = vmatprep.subr.bf16.mxu1 %v16792_v30  ;;  %15980 = vmatpush3.bf16.msra.mxu0 %v16793_v4  ;;  %v14243_v4 = vpack.i.b16 %v18255_v8, %v18297_v46  ;;  %v7096_v33 = vrot.slane %v18290_v10, %v17532_v28  ;;  %v7234_v62 = vcombine.low %v7005_v23, %v7020_v41  ;;  %v16808_v23 = vld [vmem:[%s20421_s1 + $0x80] sm:$0xff]  }
  0xc7   : > { %15981 = vmatprep.subr.bf16.mxu0 %v16795_v22  ;;  %v14377_v35 = vpack.i.b16 %v18252_v54, %v6379_v56  ;;  %v7081_v54 = vcombine.high %v7080_v27, %v7080_v27  ;;  %v14426_v24 = vpack.i.b16 %v18360_v21, %v7103_v45  ;;  %v4950_v26 = vrot.slane %v4935_v18, %v17532_v28 }
  0xc8   : > { %16054 = vmatmul.mubr.bf16.vlgmr.msra.gmra.mrb[4].mxu1 %v18025_v61  ;;  %v18327_v61 = vcombine.high %v7042_v59, %v7042_v59  ;;  %v5232_v44 = vcombine.low %v14243_v4, %v14244_v34  ;;  %v16803_v59 = vld [vmem:[%s20421_s1 + $0x30] sm:$0xff]   ;;  %v5138_v45 = vcombine.high %v18262_v58, %v18262_v58  ;;  %v14226_v58 = vld.sshfl [vmem:[%s17516_s19 + $0x28] sm:$0x13 pattern:$0x75316420]  ;;  %v5193_v18 = vunpack.i.h.s16 %v18308_v52 }
  0xc9   : > { %16058 = vmatpush3.bf16.msra.mxu1 %v16792_v30  ;;  %16073 = vmatprep.mubr.bf16.mxu1 %v6831_v42  ;;  %v7065_v30 = vrot.slane %v7051_v9, %v17532_v28  ;;  %v5233_v42 = vcombine.low %v14245_v6, %v18269_v29  ;;  %v6832_v56 = vcombine.low %v14377_v35, %v14378_v36 }
  0xca   : > { %16059 = vmatprep.subr.bf16.mxu1 %v16794_v37  ;;  %15982 = vmatpush3.bf16.msra.mxu0 %v16795_v22  ;;  %v7186_v22 = vunpack.i.h.s16 %v18327_v61  ;;  %v14423_v47 = vpack.i.b16 %v18327_v61, %v7027_v16  ;;  %v5248_v10 = vrot.slane %v5232_v44, %v17532_v28  ;;  %v6833_v61 = vcombine.low %v6340_v31, %v6355_v63 }
  0xcb   : > { %15983 = vmatprep.subr.bf16.mxu0 %v16797_v20  ;;  %v14425_v15 = vpack.i.b16 %v7065_v30, %v7188_v25  ;;  %v7237_v34 = vcombine.low %v7096_v33, %v14426_v24  ;;  %v7244_v16 = vrot.slane %v7234_v62, %v17532_v28  ;;  %v16811_v33 = vld [vmem:[%s20421_s1 + $0x90] sm:$0xff]   ;;  %v5161_v24 = vcombine.high %v14226_v58, %v14226_v58 }
  0xcc   : > { %v14424_v49 = vpack.i.b16 %v7058_v17, %v7186_v22  ;;  %v16802_v17 = vld [vmem:[%s20421_s1 + $0x28] sm:$0xff]   ;;  %v16812_v62 = vld [vmem:[%s20421_s1 + $0x90] sm:$0xff]  }
  0xcd   : > { %16060 = vmatpush3.bf16.msra.mxu1 %v16794_v37  ;;  %v5231_v37 = vcombine.low %v18246_v43, %v18336_v3  ;;  %v7236_v4 = vcombine.low %v14425_v15, %v7081_v54  ;;  %v18445_v15 = vcombine.high %v18308_v52, %v18308_v52  ;;  %v18459_v52 = vrot.slane %v14226_v58, %v17532_v28 }
  0xce   : > { %16061 = vmatprep.subr.bf16.mxu1 %v16796_v57  ;;  %15984 = vmatpush3.bf16.msra.mxu0 %v16797_v20  ;;  %v5234_v20 = vcombine.low %v18339_v12, %v14246_v32  ;;  %v7235_v1 = vcombine.low %v14423_v47, %v14424_v49  ;;  %v6840_v32 = vrot.slane %v6832_v56, %v17532_v28  ;;  %v14405_v49 = vld.sshfl [vmem:[%s17516_s19 + $0x28] sm:$0x20 pattern:$0x75316420] }
  0xcf   : > { %15985 = vmatprep.subr.bf16.mxu0 %v16799_v0  ;;  %v5241_v60 = vrot.slane %v5231_v37, %v17532_v28  ;;  %v7258_v27 = vrot.slane %v7236_v4, %v17532_v28  ;;  %v16809_v37 = vld [vmem:[%s20421_s1 + $0x88] sm:$0xff]  }
  0xd0   : > { %v5262_v9 = vrot.slane %v5234_v20, %v17532_v28  ;;  %v7251_v30 = vrot.slane %v7235_v1, %v17532_v28 }
  0xd1   : > { %16062 = vmatpush3.bf16.msra.mxu1 %v16796_v57  ;;  %v5255_v57 = vrot.slane %v5233_v42, %v17532_v28  ;;  %v5263_v40 = vcombine.low %v5241_v60, %v5248_v10  ;;  %v14404_v10 = vld.sshfl [vmem:[%s17516_s19 + $0x24] sm:$0x11 pattern:$0x75316420] }
  0xd2   : > { %16063 = vmatprep.subr.bf16.mxu1 %v16798_v7  ;;  %15986 = vmatpush3.bf16.msra.mxu0 %v16799_v0  ;;  %v6362_v0 = vrot.slane %v6348_v51, %v17532_v28  ;;  %v4943_v51 = vrot.slane %v4936_v19, %v17532_v28  ;;  %v7266_v44 = vcombine.low %v7244_v16, %v7251_v30  ;;  %v7552_v30 = vunpack.i.h.s16 %v18336_v3 }
  0xd3   : > { %15987 = vmatprep.subr.bf16.mxu0 %v16801_v39  ;;  %v5264_v6 = vcombine.low %v5255_v57, %v5262_v9  ;;  %v5271_v22 = vrot.slane %v5263_v40, %v17532_v28  ;;  %v16810_v9 = vld [vmem:[%s20421_s1 + $0x88] sm:$0xff]   ;;  %v7127_v1 = vcombine.high %v14404_v10, %v14404_v10  ;;  %v7134_v4 = vrot.slane %v14404_v10, %v17532_v28  ;;  %v16820_v10 = vld [vmem:[%s20421_s1 + $0xb0] sm:$0xff]  }
  0xd4   : > { %v6387_v63 = vunpack.i.l.s16 %v6362_v0  ;;  %v4951_v36 = vcombine.low %v4943_v51, %v4950_v26  ;;  %v18462_v0 = vrot.slane %v5161_v24, %v17532_v28  ;;  %v14406_v26 = vld.sshfl [vmem:[%s17516_s19 + $0x2c] sm:$0x11 pattern:$0x75316420]  ;;  %v18477_v40 = vcombine.high %v18459_v52, %v18459_v52  ;;  %s378_s19 = scalar_lea.vmem [#allocation4], %s377_s13 }
  0xd5   : > { %16064 = vmatpush3.bf16.msra.mxu1 %v16798_v7  ;;  %v6847_v7 = vrot.slane %v6833_v61, %v17532_v28  ;;  %v5278_v25 = vrot.slane %v5264_v6, %v17532_v28  ;;  %v7198_v16 = vunpack.i.h.s16 %v7134_v4  ;;  %v14464_v58 = vpack.i.b16 %v18297_v46, %v7552_v30  ;;  %v16827_v30 = vld [vmem:[%s20421_s1 + $0xd0] sm:$0xff]   ;;  %s13772_s12 = sshll.u32 %s378_s19, 4  ;;  %s20380_s12 = int_to_ptr.vmem [resolvable:$true] %s13772_s12 }
  0xd6   : > { %16065 = vmatprep.subr.bf16.mxu1 %v16800_v55  ;;  %15988 = vmatpush3.bf16.msra.mxu0 %v16801_v39  ;;  %v7265_v39 = vrot.slane %v7237_v34, %v17532_v28  ;;  %v6854_v31 = vrot.slane %v6387_v63, %v17532_v28  ;;  %v16815_v34 = vld [vmem:[%s20421_s1 + $0xa0] sm:$0xff]   ;;  %v7550_v63 = vunpack.i.h.s16 %v18246_v43  ;;  %v7560_v43 = vunpack.i.h.s16 %v18269_v29  ;;  %s17296_s29 = scalar_lea.vmem %s20380_s12, 16  ;;  %p17303_p0 = scmp.lt.s32.totalorder %s20380_s12, %s17301_s30 }
  0xd7   : > { %15989 = vmatprep.subr.bf16.mxu0 %v16803_v59  ;;  %v6855_v35 = vcombine.low %v6840_v32, %v6847_v7  ;;  %v5279_v20 = vcombine.low %v5271_v22, %v5278_v25  ;;  %v16814_v32 = vld [vmem:[%s20421_s1 + $0x98] sm:$0xff]   ;;  %v7196_v7 = vunpack.i.h.s16 %v18360_v21  ;;  %v7564_v22 = vunpack.i.h.s16 %v18312_v2  ;;  %v16816_v29 = vld [vmem:[%s20421_s1 + $0xa0] sm:$0xff]   ;;  %p17297_p11 = scmp.ne.s32.totalorder %s20380_s12, %s17296_s29  ;;  %p17304_p1 = scmp.lt.s32.totalorder %s17302_s14, %s17296_s29 }
  0xd8   : > { %v7267_v42 = vcombine.low %v7258_v27, %v7265_v39  ;;  %v6869_v54 = vrot.slane %v6854_v31, %v17532_v28  ;;  %v16817_v27 = vld [vmem:[%s20421_s1 + $0xa8] sm:$0xff]   ;;  %v7554_v39 = vunpack.i.h.s16 %v18297_v46  ;;  %v5201_v21 = vunpack.i.l.s16 %v18477_v40 }
  0xd9   : > { %16066 = vmatpush3.bf16.msra.mxu1 %v16800_v55  ;;  %v18430_v55 = vrot.slane %v5138_v45, %v17532_v28  ;;  %v6862_v41 = vrot.slane %v6855_v35, %v17532_v28  ;;  %v7562_v45 = vunpack.i.h.s16 %v18339_v12  ;;  %v7165_v25 = vcombine.high %v14406_v26, %v14406_v26  ;;  %v16818_v46 = vld [vmem:[%s20421_s1 + $0xa8] sm:$0xff]   ;;  %p17298_p12 = pnand %p17297_p11, %p17465_p5  ;;  %p17305_p2 = por %p17304_p1, %p17303_p0 }
  0xda   : > { %16067 = vmatprep.subr.bf16.mxu1 %v16802_v17  ;;  %15990 = vmatpush3.bf16.msra.mxu0 %v16803_v59  ;;  %v7274_v59 = vrot.slane %v7266_v44, %v17532_v28  ;;  %v7281_v47 = vrot.slane %v7267_v42, %v17532_v28  ;;  %v14463_v42 = vpack.i.b16 %v18336_v3, %v7550_v63  ;;  %v16824_v63 = vld [vmem:[%s20421_s1 + $0xc0] sm:$0xff]  }
  0xdb   : > { %15991 = vmatprep.subr.bf16.mxu0 %v16805_v5  ;;  %v5195_v60 = vunpack.i.h.s16 %v18430_v55  ;;  %v6870_v57 = vcombine.low %v6862_v41, %v6869_v54  ;;  %v14247_v56 = vpack.i.b16 %v18430_v55, %v5193_v18  ;;  %v14465_v41 = vpack.i.b16 %v18339_v12, %v7560_v43  ;;  %v16829_v43 = vld [vmem:[%s20421_s1 + $0xd8] sm:$0xff]   ;;  %p17299_p13 = pneg %p17298_p12 }
  0xdc   : > { %v18456_v19 = vcombine.low %v7274_v59, %v7281_v47  ;;  %v14466_v54 = vpack.i.b16 %v18312_v2, %v7562_v45  ;;  %v5302_v3 = vrot.slane %v5201_v21, %v17532_v28  ;;  %v7179_v47 = vrot.slane %v7165_v25, %v17532_v28  ;;  %v16821_v2 = vld [vmem:[%s20421_s1 + $0xb8] sm:$0xff]  }
  0xdd   : > { %16068 = vmatpush3.bf16.msra.mxu1 %v16802_v17  ;;  %v16813_v17 = vld [vmem:[%s20421_s1 + $0x98] sm:$0xff]   ;;  %v14248_v61 = vpack.i.b16 %v18445_v15, %v5195_v60  ;;  %v7606_v24 = vcombine.low %v18302_v48, %v14465_v41  ;;  %v7570_v25 = vunpack.i.h.s16 %v18459_v52  ;;  %p17306_p3 = pnand %p17305_p2, %p17299_p13 }
  0xde   : > { %16069 = vmatprep.subr.bf16.mxu1 %v16804_v50  ;;  %15992 = vmatpush3.bf16.msra.mxu0 %v16805_v5  ;;  %v7149_v5 = vcombine.high %v14405_v49, %v14405_v49  ;;  %v5317_v60 = vrot.slane %v5302_v3, %v17532_v28  ;;  %v16830_v21 = vld [vmem:[%s20421_s1 + $0xd8] sm:$0xff]  }
  0xdf   : > { %15997 = vmatprep.subr.bf16.mxu0 %v16807_v14  ;;  %v5280_v6 = vcombine.low %v14247_v56, %v14248_v61 }
  0xe0   : > { %v7156_v51 = vrot.slane %v7149_v5, %v17532_v28  ;;  %v7628_v5 = vrot.slane %v7606_v24, %v17532_v28  ;;  %v16850_v24 = vld [vmem:[%s20423_s3 + $0xa0] sm:$0xff]  }
  0xe1   : > { %16070 = vmatpush3.bf16.msra.mxu1 %v16804_v50  ;;  %15994 = vmatmul.mubr.bf16.vlgmr.msra.gmra.mrb[4].mxu0 %v4951_v36  ;;  %v5281_v50 = vcombine.low %v18459_v52, %v18462_v0  ;;  %v7172_v36 = vrot.slane %v14406_v26, %v17532_v28  ;;  %v16835_v52 = vld [vmem:[%s20421_s1 + $0xf0] sm:$0xff]  }
  0xe2   : > { %16071 = vmatprep.subr.bf16.mxu1 %v16806_v38  ;;  %15998 = vmatpush3.bf16.msra.mxu0 %v16807_v14  ;;  %v7141_v14 = vrot.slane %v7127_v1, %v17532_v28  ;;  %v7157_v35 = vcombine.high %v7156_v51, %v7156_v51  ;;  %v16822_v1 = vld [vmem:[%s20421_s1 + $0xb8] sm:$0xff]  }
  0xe3   : > { %15999 = vmatprep.subr.bf16.mxu0 %v16809_v37  ;;  %16013 = vmatprep.mubr.bf16.mxu0 %v5279_v20  ;;  %v5295_v31 = vrot.slane %v5281_v50, %v17532_v28  ;;  %v16819_v20 = vld [vmem:[%s20421_s1 + $0xb0] sm:$0xff]  }
  0xe4   : > { %v14428_v44 = vpack.i.b16 %v7141_v14, %v7198_v16  ;;  %v7284_v8 = vcombine.low %v7157_v35, %v7172_v36  ;;  %v16832_v35 = vld [vmem:[%s20421_s1 + $0xe0] sm:$0xff]   ;;  %v14467_v36 = vpack.i.b16 %v18462_v0, %v7570_v25 }
  0xe5   : > { %16072 = vmatpush3.bf16.msra.mxu1 %v16806_v38  ;;  %v5288_v38 = vrot.slane %v5280_v6, %v17532_v28  ;;  %v16825_v6 = vld [vmem:[%s20421_s1 + $0xc8] sm:$0xff]  }
  0xe6   : > { %16077 = vmatprep.subr.bf16.mxu1 %v16808_v23  ;;  %16000 = vmatpush3.bf16.msra.mxu0 %v16809_v37  ;;  %v14427_v37 = vpack.i.b16 %v7134_v4, %v7196_v7  ;;  %v7298_v56 = vrot.slane %v7284_v8, %v17532_v28  ;;  %v16840_v8 = vld [vmem:[%s20423_s3 + $0x8] sm:$0xff]  }
  0xe7   : > { %16001 = vmatprep.subr.bf16.mxu0 %v16811_v33  ;;  %v5303_v59 = vcombine.low %v5288_v38, %v5295_v31  ;;  %v7572_v38 = vunpack.i.h.s16 %v18462_v0  ;;  %v16833_v31 = vld [vmem:[%s20421_s1 + $0xe8] sm:$0xff]  }
  0xe8   : > { %16074 = vmatmul.mubr.bf16.vlgmr.msra.gmra.mrb[4].mxu1 %v6870_v57  ;;  %v7283_v49 = vcombine.low %v14427_v37, %v14428_v44  ;;  %v7653_v37 = vcombine.low %v18430_v55, %v18445_v15  ;;  %v16834_v0 = vld [vmem:[%s20421_s1 + $0xe8] sm:$0xff]   ;;  %v16836_v55 = vld [vmem:[%s20421_s1 + $0xf0] sm:$0xff]  }
  0xe9   : > { %16078 = vmatpush3.bf16.msra.mxu1 %v16808_v23  ;;  %16093 = vmatprep.mubr.bf16.mxu1 %v18456_v19  ;;  %v7593_v23 = vpack.i.b16 %v5183_v53, %v7554_v39  ;;  %v7604_v53 = vcombine.low %v14463_v42, %v14464_v58  ;;  %v5310_v57 = vrot.slane %v5303_v59, %v17532_v28  ;;  %v16826_v39 = vld [vmem:[%s20421_s1 + $0xc8] sm:$0xff]   ;;  %v16837_v42 = vld [vmem:[%s20421_s1 + $0xf8] sm:$0xff]   ;;  %v7574_v58 = vunpack.i.h.s16 %v18477_v40 }
  0xea   : > { %16079 = vmatprep.subr.bf16.mxu1 %v16810_v9  ;;  %16002 = vmatpush3.bf16.msra.mxu0 %v16811_v33  ;;  %v7598_v33 = vpack.i.b16 %v5193_v18, %v7564_v22  ;;  %v16831_v22 = vld [vmem:[%s20421_s1 + $0xe0] sm:$0xff]  }
  0xeb   : > { %16003 = vmatprep.subr.bf16.mxu0 %v16813_v17  ;;  %v7605_v12 = vcombine.low %v7593_v23, %v18265_v11  ;;  %v16823_v11 = vld [vmem:[%s20421_s1 + $0xc0] sm:$0xff]   ;;  %v7614_v48 = vrot.slane %v7604_v53, %v17532_v28  ;;  %v5318_v26 = vcombine.low %v5310_v57, %v5317_v60  ;;  %v7675_v15 = vrot.slane %v7574_v58, %v17532_v28  ;;  %v16848_v53 = vld [vmem:[%s20423_s3 + $0x98] sm:$0xff]   ;;  %v16852_v60 = vld [vmem:[%s20423_s3 + $0xa8] sm:$0xff]  }
  0xec   : > { %v7607_v18 = vcombine.low %v14466_v54, %v7598_v33  ;;  %v17361_v54 = vmov 0.0   ;;  %v16856_v57 = vld [vmem:[%s20423_s3 + $0xb0] sm:$0xff]  }
  0xed   : > { %16080 = vmatpush3.bf16.msra.mxu1 %v16810_v9  ;;  %v7204_v9 = vunpack.i.l.s16 %v7179_v47  ;;  %v7621_v61 = vrot.slane %v7605_v12, %v17532_v28  ;;  %v7690_v3 = vrot.slane %v7675_v15, %v17532_v28  ;;  %v16844_v47 = vld [vmem:[%s20423_s3 + $0x88] sm:$0xff]   ;;  %v16841_v12 = vld [vmem:[%s20423_s3 + $0x10] sm:$0xff]  }
  0xee   : > { %16081 = vmatprep.subr.bf16.mxu1 %v16812_v62  ;;  %16004 = vmatpush3.bf16.msra.mxu0 %v16813_v17  ;;  %v7291_v17 = vrot.slane %v7283_v49, %v17532_v28  ;;  %v16839_v49 = vld [vmem:[%s20423_s3] sm:$0xff]  }
  0xef   : > { %16005 = vmatprep.subr.bf16.mxu0 %v16815_v34  ;;  %v7305_v4 = vrot.slane %v7204_v9, %v17532_v28  ;;  %v7636_v50 = vcombine.low %v7614_v48, %v7621_v61  ;;  %v16847_v9 = vld [vmem:[%s20423_s3 + $0x28] sm:$0xff]   ;;  %v18675_v48 = vld [vmem:[%s20422_s2] ss:$0 sm:$0xff] }
  0xf1   : > { %16082 = vmatpush3.bf16.msra.mxu1 %v16812_v62  ;;  %v7635_v62 = vrot.slane %v7607_v18, %v17532_v28  ;;  %v7320_v7 = vrot.slane %v7305_v4, %v17532_v28  ;;  %v7644_v14 = vrot.slane %v7636_v50, %v17532_v28  ;;  %v16843_v18 = vld [vmem:[%s20423_s3 + $0x18] sm:$0xff]  }
  0xf2   : > { %16083 = vmatprep.subr.bf16.mxu1 %v16814_v32  ;;  %16006 = vmatpush3.bf16.msra.mxu0 %v16815_v34  ;;  %v7306_v34 = vcombine.low %v7291_v17, %v7298_v56  ;;  %v16858_v17 = vld [vmem:[%s20423_s3 + $0xb8] sm:$0xff]   ;;  %v16849_v56 = vld [vmem:[%s20423_s3 + $0x30] sm:$0xff]  }
  0xf3   : > { %16007 = vmatprep.subr.bf16.mxu0 %v16817_v27  ;;  %v7637_v51 = vcombine.low %v7628_v5, %v7635_v62 }
  0xf5   : > { %16084 = vmatpush3.bf16.msra.mxu1 %v16814_v32  ;;  %v7313_v32 = vrot.slane %v7306_v34, %v17532_v28  ;;  %v7651_v16 = vrot.slane %v7637_v51, %v17532_v28 }
  0xf6   : > { %16085 = vmatprep.subr.bf16.mxu1 %v16816_v29  ;;  %16008 = vmatpush3.bf16.msra.mxu0 %v16817_v27 }
  0xf7   : > { %16009 = vmatprep.subr.bf16.mxu0 %v16819_v20  ;;  %v7321_v27 = vcombine.low %v7313_v32, %v7320_v7  ;;  %v7652_v45 = vcombine.low %v7644_v14, %v7651_v16 }
  0xf9   : > { %16086 = vmatpush3.bf16.msra.mxu1 %v16816_v29  ;;  %v14468_v29 = vpack.i.b16 %v18477_v40, %v7572_v38  ;;  %v16838_v40 = vld [vmem:[%s20421_s1 + $0xf8] sm:$0xff]  }
  0xfa   : > { %16087 = vmatprep.subr.bf16.mxu1 %v16818_v46  ;;  %16010 = vmatpush3.bf16.msra.mxu0 %v16819_v20  ;;  %v7661_v20 = vrot.slane %v7653_v37, %v17532_v28 }
  0xfb   : > { %16011 = vmatprep.subr.bf16.mxu0 %v16821_v2  ;;  %v7654_v44 = vcombine.low %v14467_v36, %v14468_v29 }
  0xfd   : > { %16088 = vmatpush3.bf16.msra.mxu1 %v16818_v46  ;;  %v7668_v23 = vrot.slane %v7654_v44, %v17532_v28  ;;  %v16842_v46 = vld [vmem:[%s20423_s3 + $0x80] sm:$0xff]  }
  0xfe   : > { %16089 = vmatprep.subr.bf16.mxu1 %v16820_v10  ;;  %16012 = vmatpush3.bf16.msra.mxu0 %v16821_v2  ;;  %v16846_v2 = vld [vmem:[%s20423_s3 + $0x90] sm:$0xff]  }
  0xff   : > { %16017 = vmatprep.subr.bf16.mxu0 %v16823_v11  ;;  %v7676_v41 = vcombine.low %v7661_v20, %v7668_v23 }
 0x101   : > { %16090 = vmatpush3.bf16.msra.mxu1 %v16820_v10  ;;  %16014 = vmatmul.mubr.bf16.vlgmr.msra.gmra.mrb[4].mxu0 %v5318_v26  ;;  %v7683_v33 = vrot.slane %v7676_v41, %v17532_v28  ;;  %v16845_v10 = vld [vmem:[%s20423_s3 + $0x20] sm:$0xff]  }
 0x102   : > { %16091 = vmatprep.subr.bf16.mxu1 %v16822_v1  ;;  %16018 = vmatpush3.bf16.msra.mxu0 %v16823_v11  ;;  %v16851_v11 = vld [vmem:[%s20423_s3 + $0x38] sm:$0xff]  }
 0x103   : > { %16019 = vmatprep.subr.bf16.mxu0 %v16825_v6  ;;  %16033 = vmatprep.mubr.bf16.mxu0 %v18456_v19  ;;  %v16828_v19 = vld [vmem:[%s20421_s1 + $0xd0] sm:$0xff]   ;;  %v7691_v59 = vcombine.low %v7683_v33, %v7690_v3 }
 0x105   : > { %16092 = vmatpush3.bf16.msra.mxu1 %v16822_v1 }
 0x106   : > { %16097 = vmatprep.subr.bf16.mxu1 %v16824_v63  ;;  %16020 = vmatpush3.bf16.msra.mxu0 %v16825_v6 }
 0x107   : > { %16021 = vmatprep.subr.bf16.mxu0 %v16827_v30 }
 0x108   : > { %16094 = vmatmul.mubr.bf16.vlgmr.msra.gmra.mrb[4].mxu1 %v7321_v27 }
 0x109   : > { %16098 = vmatpush3.bf16.msra.mxu1 %v16824_v63  ;;  %16113 = vmatprep.mubr.bf16.mxu1 %v7652_v45  ;;  %v17363_v63 = vmov 1935823168  }
 0x10a   : > { %16099 = vmatprep.subr.bf16.mxu1 %v16826_v39  ;;  %16022 = vmatpush3.bf16.msra.mxu0 %v16827_v30  ;;  %v2180_v32 = vunpack.c.l.s4 %v17363_v63 }
 0x10b   : > { %16023 = vmatprep.subr.bf16.mxu0 %v16829_v43 }
 0x10c   : > { %v2181_v25 = vunpack.c.0.s8 %v2180_v32 }
 0x10d   : > { %16100 = vmatpush3.bf16.msra.mxu1 %v16826_v39 }
 0x10e   : > { %16101 = vmatprep.subr.bf16.mxu1 %v16828_v19  ;;  %16024 = vmatpush3.bf16.msra.mxu0 %v16829_v43 }
 0x10f   : > { %16025 = vmatprep.subr.bf16.mxu0 %v16831_v22 }
 0x111   : > { %16102 = vmatpush3.bf16.msra.mxu1 %v16828_v19 }
 0x112   : > { %16103 = vmatprep.subr.bf16.mxu1 %v16830_v21  ;;  %16026 = vmatpush3.bf16.msra.mxu0 %v16831_v22 }
 0x113   : > { %16027 = vmatprep.subr.bf16.mxu0 %v16833_v31 }
 0x115   : > { %16104 = vmatpush3.bf16.msra.mxu1 %v16830_v21 }
 0x116   : > { %16105 = vmatprep.subr.bf16.mxu1 %v16832_v35  ;;  %16028 = vmatpush3.bf16.msra.mxu0 %v16833_v31 }
 0x117   : > { %16029 = vmatprep.subr.bf16.mxu0 %v16835_v52 }
 0x119   : > { %16106 = vmatpush3.bf16.msra.mxu1 %v16832_v35 }
 0x11a   : > { %16107 = vmatprep.subr.bf16.mxu1 %v16834_v0  ;;  %16030 = vmatpush3.bf16.msra.mxu0 %v16835_v52 }
 0x11b   : > { %16031 = vmatprep.subr.bf16.mxu0 %v16837_v42 }
 0x11d   : > { %16108 = vmatpush3.bf16.msra.mxu1 %v16834_v0 }
 0x11e   : > { %16109 = vmatprep.subr.bf16.mxu1 %v16836_v55  ;;  %16032 = vmatpush3.bf16.msra.mxu0 %v16837_v42 }
 0x11f   : > { %16117 = vmatprep.subr.bf16.mxu0 %v17361_v54 }
 0x121   : > { %16110 = vmatpush3.bf16.msra.mxu1 %v16836_v55  ;;  %16034 = vmatmul.mubr.bf16.vlgmr.msra.gmra.mrb[4].mxu0 %v7321_v27 }
 0x122   : > { %16111 = vmatprep.subr.bf16.mxu1 %v16838_v40  ;;  %16118 = vmatpush3.bf16.msra.mxu0 %v16842_v46 }
 0x123   : > { %16119 = vmatprep.subr.bf16.mxu0 %v17361_v54  ;;  %16133 = vmatprep.mubr.msk.bf16.mxu0 %vm17362_vm0, %v17361_v54 }
 0x125   : > { %16112 = vmatpush3.bf16.msra.mxu1 %v16838_v40  ;;  %v18694_v40 = vsub.s32 %v2181_v25, %v17518_v13 }
 0x126   : > { %16137 = vmatprep.subr.bf16.mxu1 %v17361_v54  ;;  %16120 = vmatpush3.bf16.msra.mxu0 %v16844_v47 }
 0x127   : > { %16121 = vmatprep.subr.bf16.mxu0 %v17361_v54 }
 0x128   : > { %16114 = vmatmul.mubr.bf16.vlgmr.msra.gmra.mrb[4].mxu1 %v7691_v59 }
 0x129   : > { %16138 = vmatpush3.bf16.msra.mxu1 %v16839_v49  ;;  %16153 = vmatprep.mubr.msk.bf16.mxu1 %vm17362_vm0, %v17361_v54 }
 0x12a   : > { %16139 = vmatprep.subr.bf16.mxu1 %v17361_v54  ;;  %16122 = vmatpush3.bf16.msra.mxu0 %v16846_v2 }
 0x12b   : > { %16123 = vmatprep.subr.bf16.mxu0 %v17361_v54 }
 0x12d   : > { %16140 = vmatpush3.bf16.msra.mxu1 %v16840_v8 }
 0x12e   : > { %16141 = vmatprep.subr.bf16.mxu1 %v17361_v54  ;;  %16124 = vmatpush3.bf16.msra.mxu0 %v16848_v53 }
 0x12f   : > { %16125 = vmatprep.subr.bf16.mxu0 %v17361_v54 }
 0x131   : > { %16142 = vmatpush3.bf16.msra.mxu1 %v16841_v12 }
 0x132   : > { %16143 = vmatprep.subr.bf16.mxu1 %v17361_v54  ;;  %16126 = vmatpush3.bf16.msra.mxu0 %v16850_v24 }
 0x133   : > { %16127 = vmatprep.subr.bf16.mxu0 %v17361_v54 }
 0x135   : > { %16144 = vmatpush3.bf16.msra.mxu1 %v16843_v18 }
 0x136   : > { %16145 = vmatprep.subr.bf16.mxu1 %v17361_v54  ;;  %16128 = vmatpush3.bf16.msra.mxu0 %v16852_v60 }
 0x137   : > { %16129 = vmatprep.subr.bf16.mxu0 %v17361_v54 }
 0x139   : > { %16146 = vmatpush3.bf16.msra.mxu1 %v16845_v10  ;;  %v2313_v10 = vld [vmem:[#allocation2 + $0x10] sm:$0x7] }
 0x13a   : > { %16147 = vmatprep.subr.bf16.mxu1 %v17361_v54  ;;  %16130 = vmatpush3.bf16.msra.mxu0 %v16856_v57 }
 0x13b   : > { %16131 = vmatprep.subr.bf16.mxu0 %v17361_v54 }
 0x13d   : > { %16148 = vmatpush3.bf16.msra.mxu1 %v16847_v9 }
 0x13e   : > { %16149 = vmatprep.subr.bf16.mxu1 %v17361_v54  ;;  %16132 = vmatpush3.bf16.msra.mxu0 %v16858_v17 }
 0x13f   : > { %16157 = vmatprep.subr.bf16.mxu0 %v17361_v54 }
 0x141   : > { %16150 = vmatpush3.bf16.msra.mxu1 %v16849_v56 }
 0x142   : > { %16151 = vmatprep.subr.bf16.mxu1 %v17361_v54 }
 0x145   : > { %16152 = vmatpush3.bf16.msra.mxu1 %v16851_v11 }
 0x146   : > { %16177 = vmatprep.subr.bf16.mxu1 %v17361_v54 }
 0x174   : > { %v15875_v61 = vpop.f32.mrb[0].mxu0 }
 0x175   : > { %v2040_v5 = vadd.f32 %v15875_v61, %v18675_v48  ;;  %v2013_v62 = vpop.f32.mrb[1].mxu0 }
 0x176   : > { %v2038_v1 = vadd.f32 %v18675_v48, %v2013_v62  ;;  %v15876_v4 = vpop.f32.mrb[2].mxu0 }
 0x177   : > { %v2041_v34 = vadd.f32 %v15876_v4, %v18675_v48  ;;  %v2016_v26 = vpop.f32.mrb[3].mxu0  ;;  %v2044_v50 = vmax.f32 %v2040_v5, 0.0 }
 0x178   : > { %v2039_v6 = vadd.f32 %v18675_v48, %v2016_v26  ;;  %v2042_v7 = vmax.f32 %v2038_v1, 0.0 }
 0x179   : > { %v2045_v51 = vmax.f32 %v2041_v34, 0.0 }
 0x17a   : > { %v2043_v14 = vmax.f32 %v2039_v6, 0.0 }
 0x17b   : > { %v15955_v16 = vpop.f32.mrb[0].mxu1  ;;  %v2047_v30 = vpack.c.bf16 %v2045_v51, %v2044_v50  ;;  %v13983_v27 = vpack.c.bf16 %v2045_v51, %v2045_v51 }
 0x17c   : > { %v3960_v39 = vadd.f32 %v15955_v16, %v18675_v48  ;;  %v3939_v43 = vpop.f32.mrb[1].mxu1  ;;  %v2046_v45 = vpack.c.bf16 %v2043_v14, %v2042_v7  ;;  %v13982_v19 = vpack.c.bf16 %v2043_v14, %v2043_v14 }
 0x17d   : > { %v2106_v22 = vrot.slane %v2047_v30, %v17532_v28  ;;  %v2113_v21 = vrot.slane %v13983_v27, %v17532_v28  ;;  %v15956_v38 = vpop.f32.mrb[2].mxu1  ;;  %v3958_v11 = vadd.f32 %v18675_v48, %v3939_v43 }
 0x17e   : > { %v3961_v31 = vadd.f32 %v15956_v38, %v18675_v48  ;;  %v2057_v35 = vrot.slane %v2046_v45, %v17532_v28  ;;  %v2064_v36 = vrot.slane %v13982_v19, %v17532_v28  ;;  %v18687_v29 = vpop.f32.mrb[3].mxu1  ;;  %v3964_v52 = vmax.f32 %v3960_v39, 0.0  ;;  %v4231_v38 = vld [vmem:[#allocation2 + $0x24] sm:$0x7] }
 0x17f   : > { %v2114_v37 = vcombine.high %v2106_v22, %v2106_v22  ;;  %v2121_v44 = vrot.slane %v2106_v22, %v17532_v28  ;;  %v2128_v0 = vrot.slane %v2113_v21, %v17532_v28 }
 0x180   : > { %v3965_v42 = vmax.f32 %v3961_v31, 0.0  ;;  %v2065_v58 = vcombine.high %v2057_v35, %v2057_v35  ;;  %v2066_v20 = vcombine.high %v2064_v36, %v2064_v36  ;;  %v2073_v23 = vrot.slane %v2057_v35, %v17532_v28 }
 0x181   : > { %v2135_v55 = vrot.slane %v2114_v37, %v17532_v28  ;;  %v2136_v15 = vcombine.high %v2121_v44, %v2121_v44  ;;  %v2162_v41 = vunpack.i.l.s16 %v2128_v0  ;;  %v2080_v60 = vrot.slane %v2064_v36, %v17532_v28 }
 0x182   : > { %v3967_v33 = vpack.c.bf16 %v3965_v42, %v3964_v52  ;;  %v14138_v3 = vpack.c.bf16 %v3965_v42, %v3965_v42  ;;  %v2087_v46 = vrot.slane %v2065_v58, %v17532_v28  ;;  %v2094_v53 = vrot.slane %v2066_v20, %v17532_v28 }
 0x183   : > { %v2137_v59 = vcombine.high %v2135_v55, %v2135_v55  ;;  %v2270_v47 = vcombine.low %v2136_v15, %v2162_v41  ;;  %v2095_v12 = vcombine.high %v2073_v23, %v2073_v23  ;;  %v2155_v6 = vunpack.i.h.s16 %v2121_v44 }
 0x184   : > { %v4026_v8 = vrot.slane %v3967_v33, %v17532_v28  ;;  %v4033_v2 = vrot.slane %v14138_v3, %v17532_v28  ;;  %v2097_v56 = vcombine.high %v2087_v46, %v2087_v46  ;;  %v2098_v5 = vcombine.high %v2094_v53, %v2094_v53 }
 0x185   : > { %v2277_v24 = vrot.slane %v2270_v47, %v18694_v40  ;;  %v2284_v18 = vrot.slane %v2137_v59, %v18694_v40  ;;  %v2143_v62 = vunpack.i.h.s16 %v2095_v12  ;;  %v2142_v26 = vunpack.i.l.s16 %v2095_v12  ;;  %v2301_v47 = vld [vmem:[#allocation2] sm:$0x7] }
 0x186   : > { %v4034_v57 = vcombine.high %v4026_v8, %v4026_v8  ;;  %v18710_v9 = vrot.slane %v4026_v8, %v17532_v28  ;;  %v4048_v17 = vrot.slane %v4033_v2, %v17532_v28  ;;  %v2157_v50 = vunpack.i.h.s16 %v2135_v55 }
 0x187   : > { %v2285_v61 = vcombine.low %v2277_v24, %v2284_v18  ;;  %v2145_v63 = vunpack.i.h.s16 %v2097_v56  ;;  %v2147_v14 = vunpack.i.h.s16 %v2080_v60  ;;  %v2152_v16 = vunpack.i.l.s16 %v2098_v5  ;;  %v2307_v18 = vld [vmem:[#allocation2 + $0x8] sm:$0x7] }
 0x188   : > { %v18715_v1 = vrot.slane %v4034_v57, %v17532_v28  ;;  %v4056_v4 = vcombine.high %v18710_v9, %v18710_v9  ;;  %v4082_v34 = vunpack.i.l.s16 %v4048_v17  ;;  %v2153_v27 = vunpack.i.h.s16 %v2098_v5 }
 0x189   : > { %v2292_v51 = vrot.slane %v2285_v61, %v18694_v40  ;;  %v13984_v39 = vpack.i.b16 %v2097_v56, %v2143_v62  ;;  %v13985_v43 = vpack.i.b16 %v2080_v60, %v2145_v63  ;;  %v2096_v22 = vcombine.high %v2080_v60, %v2080_v60  ;;  %v2310_v56 = vld [vmem:[#allocation2 + $0xc] sm:$0x7] }
 0x18a   : > { %v4057_v32 = vcombine.high %v18715_v1, %v18715_v1  ;;  %v4190_v7 = vcombine.low %v4056_v4, %v4082_v34  ;;  %v2178_v21 = vcombine.low %v2073_v23, %v2142_v26  ;;  %v13987_v25 = vpack.i.b16 %v2135_v55, %v2155_v6 }
 0x18b   : > { %v2314_v30 = vsel %vm18699_vm3, %v2292_v51, %v2313_v10  ;;  %v13986_v31 = vpack.i.b16 %v2121_v44, %v2153_v27  ;;  %v2201_v35 = vcombine.low %v13984_v39, %v2147_v14  ;;  %v2215_v36 = vrot.slane %v13985_v43, %v18694_v40 }
 0x18c   : > { %2315 = vst [vmem:[#allocation2 + $0x10] sm:$0x7] %v2314_v30  ;;  %v4197_v45 = vrot.slane %v4190_v7, %v18694_v40  ;;  %v4204_v19 = vrot.slane %v4057_v32, %v18694_v40  ;;  %v2185_v37 = vrot.slane %v2178_v21, %v18694_v40  ;;  %v2192_v0 = vrot.slane %v2087_v46, %v18694_v40 }
 0x18d   : > { %v2224_v42 = vcombine.low %v2094_v53, %v2152_v16  ;;  %v3962_v58 = vmax.f32 %v3958_v11, 0.0  ;;  %v2208_v20 = vrot.slane %v2201_v35, %v18694_v40  ;;  %v2247_v15 = vcombine.low %v13986_v31, %v2157_v50 }
 0x18e   : > { %v4205_v52 = vcombine.low %v4197_v45, %v4204_v19  ;;  %v3959_v41 = vadd.f32 %v18675_v48, %v18687_v29  ;;  %v2193_v55 = vcombine.low %v2185_v37, %v2192_v0  ;;  %v2238_v33 = vrot.slane %v2096_v22, %v18694_v40  ;;  %v2304_v29 = vld [vmem:[#allocation2 + $0x4] sm:$0x7] }
 0x18f   : > { %v2231_v44 = vrot.slane %v2224_v42, %v18694_v40  ;;  %v2261_v3 = vrot.slane %v13987_v25, %v18694_v40  ;;  %v2216_v59 = vcombine.low %v2208_v20, %v2215_v36  ;;  %v2254_v46 = vrot.slane %v2247_v15, %v18694_v40 }
 0x190   : > { %v4212_v23 = vrot.slane %v4205_v52, %v18694_v40  ;;  %v3963_v8 = vmax.f32 %v3959_v41, 0.0  ;;  %v2200_v53 = vrot.slane %v2193_v55, %v18694_v40  ;;  %v17364_v11 = vmov 1983009808  }
 0x191   : > { %v2239_v48 = vcombine.low %v2231_v44, %v2238_v33  ;;  %v2223_v12 = vrot.slane %v2216_v59, %v18694_v40  ;;  %v2262_v24 = vcombine.low %v2254_v46, %v2261_v3  ;;  %v8214_v61 = vunpack.c.l.s4 %v17364_v11  ;;  %v4225_v11 = vld [vmem:[#allocation2 + $0x1c] sm:$0x7] }
 0x192   : > { %v4232_v2 = vsel %vm18699_vm3, %v4212_v23, %v4231_v38  ;;  %v3966_v60 = vpack.c.bf16 %v3963_v8, %v3962_v58  ;;  %v14137_v10 = vpack.c.bf16 %v3963_v8, %v3963_v8  ;;  %v2302_v17 = vsel %vm18699_vm3, %v2200_v53, %v2301_v47 }
 0x193   : > { %4233 = vst [vmem:[#allocation2 + $0x24] sm:$0x7] %v4232_v2  ;;  %v2246_v57 = vrot.slane %v2239_v48, %v18694_v40  ;;  %v2269_v5 = vrot.slane %v2262_v24, %v18694_v40  ;;  %2303 = vst [vmem:[#allocation2] sm:$0x7] %v2302_v17  ;;  %v2305_v62 = vsel %vm18699_vm3, %v2223_v12, %v2304_v29  ;;  %v4075_v26 = vunpack.i.h.s16 %v18710_v9  ;;  %v4219_v48 = vld [vmem:[#allocation2 + $0x14] sm:$0x7] }
 0x194   : > { %v3977_v4 = vrot.slane %v3966_v60, %v17532_v28  ;;  %v3984_v34 = vrot.slane %v14137_v10, %v17532_v28  ;;  %2306 = vst [vmem:[#allocation2 + $0x4] sm:$0x7] %v2305_v62  ;;  %v8215_v14 = vunpack.c.0.s8 %v8214_v61  ;;  %v4077_v0 = vunpack.i.h.s16 %v18715_v1  ;;  %v16855_v60 = vld [vmem:[%s20423_s3 + $0x280] sm:$0xff]  }
 0x195   : > { %v2308_v6 = vsel %vm18699_vm3, %v2246_v57, %v2307_v18  ;;  %v2311_v50 = vsel %vm18699_vm3, %v2269_v5, %v2310_v56  ;;  %v14142_v39 = vpack.i.b16 %v18715_v1, %v4075_v26  ;;  %v4222_v56 = vld [vmem:[#allocation2 + $0x18] sm:$0x7] }
 0x196   : > { %2309 = vst [vmem:[#allocation2 + $0x8] sm:$0x7] %v2308_v6  ;;  %v3985_v51 = vcombine.high %v3977_v4, %v3977_v4  ;;  %v3986_v63 = vcombine.high %v3984_v34, %v3984_v34  ;;  %v3993_v32 = vrot.slane %v3977_v4, %v17532_v28  ;;  %2312 = vst [vmem:[#allocation2 + $0xc] sm:$0x7] %v2311_v50 }
 0x197   : > { %v4000_v7 = vrot.slane %v3984_v34, %v17532_v28  ;;  %v18760_v38 = vsub.s32 %v8215_v14, %v17518_v13  ;;  %v4181_v42 = vrot.slane %v14142_v39, %v18694_v40  ;;  %v16857_v39 = vld [vmem:[%s20423_s3 + $0x288] sm:$0xff]  }
 0x198   : > { %v4007_v16 = vrot.slane %v3985_v51, %v17532_v28  ;;  %v4014_v30 = vrot.slane %v3986_v63, %v17532_v28  ;;  %v4015_v27 = vcombine.high %v3993_v32, %v3993_v32  ;;  %v4228_v63 = vld [vmem:[#allocation2 + $0x20] sm:$0x7] }
 0x199   : > { %v4016_v21 = vcombine.high %v4000_v7, %v4000_v7  ;;  %v4067_v25 = vunpack.i.h.s16 %v4000_v7 }
 0x19a   : > { %v4017_v43 = vcombine.high %v4007_v16, %v4007_v16  ;;  %v4018_v45 = vcombine.high %v4014_v30, %v4014_v30  ;;  %v4062_v19 = vunpack.i.l.s16 %v4015_v27  ;;  %v4063_v22 = vunpack.i.h.s16 %v4015_v27  ;;  %v18762_v31 = vld.sshfl [vmem:[#allocation2] sm:$0x13 pattern:$0x76325410] }
 0x19b   : > { %v17280_v20 = vld.sshfl [vmem:[#allocation2] sm:$0xf pattern:$0x76325410]  ;;  %v4112_v3 = vrot.slane %v4007_v16, %v18694_v40  ;;  %v4158_v59 = vrot.slane %v4016_v21, %v18694_v40  ;;  %v8139_v1 = vshrl.u32 %v18762_v31, 16  ;;  %v8106_v29 = vcombine.high %v18762_v31, %v18762_v31 }
 0x19c   : > { %v4065_v35 = vunpack.i.h.s16 %v4017_v43  ;;  %v4072_v36 = vunpack.i.l.s16 %v4018_v45  ;;  %v4073_v52 = vunpack.i.h.s16 %v4018_v45  ;;  %v14139_v37 = vpack.i.b16 %v4017_v43, %v4063_v22  ;;  %v14484_v46 = vld.sshfl [vmem:[#allocation2 + $0x4] sm:$0x13 pattern:$0x76325410] }
 0x19d   : > { %v4098_v58 = vcombine.low %v3993_v32, %v4062_v19  ;;  %v17281_v44 = vld.sshfl [vmem:[#allocation2 + $0x8] sm:$0xf pattern:$0x76325410]  ;;  %v8114_v57 = vcombine.high %v14484_v46, %v14484_v46  ;;  %v8141_v5 = vrot.slane %v8139_v1, 6  ;;  %v8142_v62 = vshll.u32 %v18762_v31, 16 }
 0x19e   : > { %v14140_v15 = vpack.i.b16 %v4000_v7, %v4065_v35  ;;  %v14141_v41 = vpack.i.b16 %v18710_v9, %v4073_v52  ;;  %v4121_v23 = vcombine.low %v14139_v37, %v4067_v25  ;;  %v4144_v55 = vcombine.low %v4014_v30, %v4072_v36  ;;  %v14485_v10 = vld.sshfl [vmem:[#allocation2 + $0x8] sm:$0x13 pattern:$0x76325410] }
 0x19f   : > { %v4105_v33 = vrot.slane %v4098_v58, %v18694_v40  ;;  %v8338_v61 = vcombine.low %v17280_v20, %v17281_v44  ;;  %v14486_v6 = vld.sshfl [vmem:[#allocation2 + $0xc] sm:$0x13 pattern:$0x76325410]  ;;  %v8153_v50 = vshrl.u32 %v14484_v46, 16  ;;  %v8122_v32 = vcombine.high %v14485_v10, %v14485_v10 }
 0x1a0   : > { %v4128_v47 = vrot.slane %v4121_v23, %v18694_v40  ;;  %v4135_v8 = vrot.slane %v14140_v15, %v18694_v40  ;;  %v4151_v2 = vrot.slane %v4144_v55, %v18694_v40  ;;  %v4167_v9 = vcombine.low %v14141_v41, %v4077_v0  ;;  %v14546_v45 = vld.sshfl [vmem:[#allocation2 + $0x10] sm:$0x13 pattern:$0x76325410] }
 0x1a1   : > { %v4113_v53 = vcombine.low %v4105_v33, %v4112_v3  ;;  %16154 = vmatmul.mubr.bf16.vlgmr.msra.gmra.mrb[8].mxu1 %v8338_v61  ;;  %v8144_v7 = vrot.slane %v8142_v62, 7  ;;  %v8156_v14 = vshll.u32 %v14484_v46, 16  ;;  %v8155_v43 = vrot.slane %v8153_v50, 6  ;;  %v16859_v15 = vld [vmem:[%s20423_s3 + $0x290] sm:$0xff]   ;;  %v16863_v62 = vld [vmem:[%s20423_s3 + $0x2a0] sm:$0xff]  }
 0x1a2   : > { %v4136_v12 = vcombine.low %v4128_v47, %v4135_v8  ;;  %v4159_v24 = vcombine.low %v4151_v2, %v4158_v59  ;;  %v4174_v18 = vrot.slane %v4167_v9, %v18694_v40  ;;  %16178 = vmatpush3.bf16.msra.mxu1 %v16855_v60  ;;  %16193 = vmatprep.mubr.msk.bf16.mxu1 %vm17362_vm0, %v17361_v54  ;;  %v8167_v31 = vshrl.u32 %v14485_v10, 16  ;;  %v16979_v2 = vld [vmem:[%s20423_s3 + $0x378] sm:$0xff]  }
 0x1a3   : > { %v4120_v17 = vrot.slane %v4113_v53, %v18694_v40  ;;  %16179 = vmatprep.subr.bf16.mxu1 %v17361_v54  ;;  %v8130_v19 = vcombine.high %v14486_v6, %v14486_v6  ;;  %v8145_v21 = vor.u32 %v8144_v7, %v8141_v5  ;;  %v8158_v25 = vrot.slane %v8156_v14, 7 }
 0x1a4   : > { %v4143_v4 = vrot.slane %v4136_v12, %v18694_v40  ;;  %v4166_v34 = vrot.slane %v4159_v24, %v18694_v40  ;;  %v4182_v26 = vcombine.low %v4174_v18, %v4181_v42  ;;  %v8162_v36 = vshll.u32 %v8114_v57, 16  ;;  %v16861_v18 = vld [vmem:[%s20423_s3 + $0x298] sm:$0xff]  }
 0x1a5   : > { %v4220_v51 = vsel %vm18699_vm3, %v4120_v17, %v4219_v48  ;;  %v8170_v52 = vshll.u32 %v14485_v10, 16  ;;  %v8181_v37 = vshrl.u32 %v14486_v6, 16  ;;  %v8159_v0 = vor.u32 %v8158_v25, %v8155_v43  ;;  %v16866_v25 = vld [vmem:[%s20423_s3 + $0x218] sm:$0xff]  }
 0x1a6   : > { %v4189_v16 = vrot.slane %v4182_v26, %v18694_v40  ;;  %4221 = vst [vmem:[#allocation2 + $0x14] sm:$0x7] %v4220_v51  ;;  %v4223_v30 = vsel %vm18699_vm3, %v4143_v4, %v4222_v56  ;;  %v4226_v27 = vsel %vm18699_vm3, %v4166_v34, %v4225_v11  ;;  %v8169_v42 = vrot.slane %v8167_v31, 6  ;;  %16180 = vmatpush3.bf16.msra.mxu1 %v16857_v39  ;;  %v16860_v51 = vld [vmem:[%s20423_s3 + $0x200] sm:$0xff]  }
 0x1a7   : > { %4224 = vst [vmem:[#allocation2 + $0x18] sm:$0x7] %v4223_v30  ;;  %4227 = vst [vmem:[#allocation2 + $0x1c] sm:$0x7] %v4226_v27  ;;  %v8647_v58 = vshrl.u32 %v14546_v45, 16  ;;  %v8650_v20 = vshll.u32 %v14546_v45, 16  ;;  %16181 = vmatprep.subr.bf16.mxu1 %v17361_v54  ;;  %v8603_v60 = vcombine.high %v14546_v45, %v14546_v45 }
 0x1a8   : > { %v4229_v35 = vsel %vm18699_vm3, %v4189_v16, %v4228_v63  ;;  %v8148_v41 = vshll.u32 %v8106_v29, 16  ;;  %v8172_v23 = vrot.slane %v8170_v52, 7  ;;  %v8183_v55 = vrot.slane %v8181_v37, 6  ;;  %v16865_v63 = vld [vmem:[%s20423_s3 + $0x2a8] sm:$0xff]   ;;  %v16867_v30 = vld [vmem:[%s20423_s3 + $0x2b0] sm:$0xff]   ;;  %v16871_v31 = vld [vmem:[%s20423_s3 + $0xc0] sm:$0xff]  }
 0x1a9   : > { %4230 = vst [vmem:[#allocation2 + $0x20] sm:$0x7] %v4229_v35  ;;  %v8184_v44 = vshll.u32 %v14486_v6, 16  ;;  %v8146_v33 = vrot.slane %v8145_v21, 2  ;;  %v8160_v3 = vrot.slane %v8159_v0, 2  ;;  %v8176_v59 = vshll.u32 %v8122_v32, 16 }
 0x1aa   : > { %v8164_v46 = vrot.slane %v8162_v36, 7  ;;  %v8173_v1 = vor.u32 %v8172_v23, %v8169_v42  ;;  %v8190_v8 = vshll.u32 %v8130_v19, 16  ;;  %v8649_v9 = vrot.slane %v8647_v58, 6  ;;  %16182 = vmatpush3.bf16.msra.mxu1 %v16859_v15  ;;  %v16862_v16 = vld [vmem:[%s20423_s3 + $0x208] sm:$0xff]   ;;  %v16864_v45 = vld [vmem:[%s20423_s3 + $0x210] sm:$0xff]   ;;  %v16869_v19 = vld [vmem:[%s20423_s3 + $0x2b8] sm:$0xff]  }
 0x1ab   : > { %v8186_v47 = vrot.slane %v8184_v44, 7  ;;  %v8652_v53 = vrot.slane %v8650_v20, 7  ;;  %v8150_v48 = vrot.slane %v8148_v41, 7  ;;  %16183 = vmatprep.subr.bf16.mxu1 %v17361_v54  ;;  %v8178_v57 = vrot.slane %v8176_v59, 7  ;;  %v16868_v52 = vld [vmem:[%s20423_s3 + $0x220] sm:$0xff]   ;;  %v16873_v37 = vld [vmem:[%s20423_s3 + $0xc8] sm:$0xff]  }
 0x1ac   : > { %v8165_v29 = vsel %vm18813_vm10, %v8160_v3, %v8164_v46  ;;  %v8174_v12 = vrot.slane %v8173_v1, 2  ;;  %v8192_v56 = vrot.slane %v8190_v8, 7  ;;  %v8656_v26 = vshll.u32 %v8603_v60, 16  ;;  %v16870_v41 = vld [vmem:[%s20423_s3 + $0x228] sm:$0xff]   ;;  %v16877_v23 = vld [vmem:[%s20423_s3 + $0xd0] sm:$0xff]  }
 0x1ad   : > { %v8187_v24 = vor.u32 %v8186_v47, %v8183_v55  ;;  %v8151_v10 = vsel %vm18813_vm10, %v8146_v33, %v8150_v48  ;;  %v8653_v4 = vor.u32 %v8652_v53, %v8649_v9  ;;  %v14595_v15 = vld.sshfl [vmem:[#allocation2 + $0x14] sm:$0x13 pattern:$0x76325410]  ;;  %v16879_v53 = vld [vmem:[%s20423_s3 + $0xd8] sm:$0xff]  }
 0x1ae   : > { %v8211_v11 = vcombine.low %v8151_v10, %v8165_v29  ;;  %v8179_v61 = vsel %vm18813_vm10, %v8174_v12, %v8178_v57  ;;  %16184 = vmatpush3.bf16.msra.mxu1 %v16861_v18  ;;  %v8658_v14 = vrot.slane %v8656_v26, 7  ;;  %v14596_v0 = vld.sshfl [vmem:[#allocation2 + $0x18] sm:$0x13 pattern:$0x76325410]  ;;  %v8961_v59 = vshrl.u32 %v14595_v15, 16 }
 0x1af   : > { %v8188_v17 = vrot.slane %v8187_v24, 2  ;;  %16185 = vmatprep.subr.bf16.mxu1 %v17361_v54  ;;  %v8654_v32 = vrot.slane %v8653_v4, 2  ;;  %v8677_v43 = vcombine.low %v8165_v29, %v8179_v61  ;;  %v14597_v42 = vld.sshfl [vmem:[#allocation2 + $0x1c] sm:$0x13 pattern:$0x76325410]  ;;  %v8943_v60 = vcombine.high %v14596_v0, %v14596_v0 }
 0x1b0   : > { %v8219_v6 = vrot.slane %v8211_v11, %v18760_v38  ;;  %v14598_v36 = vld.sshfl [vmem:[#allocation2 + $0x20] sm:$0x13 pattern:$0x76325410]  ;;  %v8975_v55 = vshrl.u32 %v14596_v0, 16  ;;  %v8978_v44 = vshll.u32 %v14596_v0, 16  ;;  %v8951_v10 = vcombine.high %v14597_v42, %v14597_v42 }
 0x1b1   : > { %v8193_v5 = vsel %vm18813_vm10, %v8188_v17, %v8192_v56  ;;  %v8659_v27 = vsel %vm18813_vm10, %v8654_v32, %v8658_v14  ;;  %v8685_v21 = vrot.slane %v8677_v43, %v18760_v38  ;;  %v9003_v58 = vshrl.u32 %v14598_v36, 16  ;;  %v16872_v9 = vld [vmem:[%s20423_s3 + $0x230] sm:$0xff]   ;;  %v17283_v11 = vld.sshfl [vmem:[#allocation2 + $0x4] sm:$0xf pattern:$0x76325410] }
 0x1b2   : > { %v8212_v34 = vcombine.low %v8179_v61, %v8193_v5  ;;  %16186 = vmatpush3.bf16.msra.mxu1 %v16863_v62  ;;  %v8678_v39 = vcombine.low %v8193_v5, %v8659_v27  ;;  %v9006_v20 = vshll.u32 %v14598_v36, 16  ;;  %v8989_v33 = vshrl.u32 %v14597_v42, 16  ;;  %v17282_v18 = vld.sshfl [vmem:[#allocation2 + $0xc] sm:$0xf pattern:$0x76325410] }
 0x1b3   : > { %16187 = vmatprep.subr.bf16.mxu1 %v17361_v54  ;;  %v8992_v3 = vshll.u32 %v14597_v42, 16  ;;  %v8964_v46 = vshll.u32 %v14595_v15, 16  ;;  %v9005_v1 = vrot.slane %v9003_v58, 6  ;;  %v8959_v8 = vcombine.high %v14598_v36, %v14598_v36  ;;  %v16874_v61 = vld [vmem:[%s20423_s3 + $0x238] sm:$0xff]   ;;  %v16881_v5 = vld [vmem:[%s20423_s3 + $0xe0] sm:$0xff]   ;;  %v16882_v42 = vld [vmem:[%s20423_s3 + $0x50] sm:$0xff]  }
 0x1b4   : > { %v8226_v50 = vrot.slane %v8212_v34, %v18760_v38  ;;  %v8692_v22 = vrot.slane %v8678_v39, %v18760_v38  ;;  %v9008_v47 = vrot.slane %v9006_v20, 7  ;;  %v8977_v48 = vrot.slane %v8975_v55, 6  ;;  %v16878_v32 = vld [vmem:[%s20423_s3 + $0x40] sm:$0xff]   ;;  %v16887_v58 = vld [vmem:[%s20423_s3 + $0xf8] sm:$0xff]  }
 0x1b5   : > { %v8980_v29 = vrot.slane %v8978_v44, 7  ;;  %v8991_v12 = vrot.slane %v8989_v33, 6  ;;  %v8994_v24 = vrot.slane %v8992_v3, 7  ;;  %v8963_v57 = vrot.slane %v8961_v59, 6  ;;  %v16886_v33 = vld [vmem:[%s20423_s3 + $0x60] sm:$0xff]   ;;  %v16891_v3 = vld [vmem:[%s20423_s3 + $0x2c8] sm:$0xff]  }
 0x1b6   : > { %v8227_v7 = vcombine.low %v8219_v6, %v8226_v50  ;;  %16188 = vmatpush3.bf16.msra.mxu1 %v16865_v63  ;;  %v8693_v35 = vcombine.low %v8685_v21, %v8692_v22  ;;  %v8966_v17 = vrot.slane %v8964_v46, 7  ;;  %v9009_v56 = vor.u32 %v9008_v47, %v9005_v1  ;;  %v16880_v21 = vld [vmem:[%s20423_s3 + $0x48] sm:$0xff]   ;;  %v14650_v44 = vld.sshfl [vmem:[#allocation2 + $0x24] sm:$0x13 pattern:$0x76325410] }
 0x1b7   : > { %16189 = vmatprep.subr.bf16.mxu1 %v17361_v54  ;;  %v8935_v62 = vcombine.high %v14595_v15, %v14595_v15  ;;  %v8981_v4 = vor.u32 %v8980_v29, %v8977_v48  ;;  %v8995_v34 = vor.u32 %v8994_v24, %v8991_v12  ;;  %v9012_v26 = vshll.u32 %v8959_v8, 16  ;;  %v16888_v1 = vld [vmem:[%s20423_s3 + $0x68] sm:$0xff]   ;;  %v16895_v47 = vld [vmem:[%s20423_s3 + $0x2d0] sm:$0xff]   ;;  %v16897_v48 = vld [vmem:[%s20423_s3 + $0x2d8] sm:$0xff]  }
 0x1b8   : > { %16134 = vmatmul.mubr.bf16.vlgmr.msra.gmra.mrb[8].mxu0 %v8227_v7  ;;  %v8967_v6 = vor.u32 %v8966_v17, %v8963_v57  ;;  %v8984_v50 = vshll.u32 %v8943_v60, 16  ;;  %v9010_v63 = vrot.slane %v9009_v56, 2  ;;  %v16883_v7 = vld [vmem:[%s20423_s3 + $0xe8] sm:$0xff]   ;;  %v8471_v39 = vcombine.low %v17283_v11, %v17282_v18  ;;  %v16892_v60 = vld [vmem:[%s20423_s3 + $0x78] sm:$0xff]   ;;  %v18996_v56 = vld [vmem:[%s20422_s2] ss:$0 sm:$0xff] }
 0x1b9   : > { %16158 = vmatpush3.bf16.msra.mxu0 %v16860_v51  ;;  %16173 = vmatprep.mubr.msk.bf16.mxu0 %vm17362_vm0, %v17361_v54  ;;  %v8998_v51 = vshll.u32 %v8951_v10, 16  ;;  %v8970_v14 = vshll.u32 %v8935_v62, 16  ;;  %v9014_v27 = vrot.slane %v9012_v26, 7  ;;  %v9360_v59 = vshrl.u32 %v14650_v44, 16  ;;  %v16899_v10 = vld [vmem:[%s20423_s3 + $0x2e0] sm:$0xff]   ;;  %v16901_v26 = vld [vmem:[%s20423_s3 + $0x2e8] sm:$0xff]  }
 0x1ba   : > { %16159 = vmatprep.subr.bf16.mxu0 %v17361_v54  ;;  %16190 = vmatpush3.bf16.msra.mxu1 %v16867_v30  ;;  %v8996_v30 = vrot.slane %v8995_v34, 2  ;;  %v8968_v43 = vrot.slane %v8967_v6, 2  ;;  %v9363_v46 = vshll.u32 %v14650_v44, 16  ;;  %v9316_v29 = vcombine.high %v14650_v44, %v14650_v44  ;;  %v16896_v34 = vld [vmem:[%s20423_s3 + $0x240] sm:$0xff]  }
 0x1bb   : > { %16191 = vmatprep.subr.bf16.mxu1 %v17361_v54  ;;  %v18916_v22 = vsel %vm18813_vm10, %v9010_v63, %v9014_v27  ;;  %v9362_v8 = vrot.slane %v9360_v59, 6  ;;  %v17284_v12 = vld.sshfl [vmem:[#allocation2 + $0x1c] sm:$0xf pattern:$0x76325410] }
 0x1bc   : > { %v17285_v18 = vld.sshfl [vmem:[#allocation2 + $0x14] sm:$0xf pattern:$0x76325410]  ;;  %v9369_v57 = vshll.u32 %v9316_v29, 16 }
 0x1bd   : > { %16160 = vmatpush3.bf16.msra.mxu0 %v16862_v16  ;;  %v8982_v16 = vrot.slane %v8981_v4, 2  ;;  %v8827_v63 = vcombine.low %v17285_v18, %v17284_v12 }
 0x1be   : > { %16161 = vmatprep.subr.bf16.mxu0 %v17361_v54  ;;  %16192 = vmatpush3.bf16.msra.mxu1 %v16869_v19  ;;  %v9000_v19 = vrot.slane %v8998_v51, 7  ;;  %v9371_v51 = vrot.slane %v9369_v57, 7 }
 0x1bf   : > { %16217 = vmatprep.subr.bf16.mxu1 %v17361_v54 }
 0x1c0   : > { %v18930_v36 = vsel %vm18813_vm10, %v8996_v30, %v9000_v19 }
 0x1c1   : > { %16162 = vmatpush3.bf16.msra.mxu0 %v16864_v45  ;;  %16194 = vmatmul.mubr.bf16.vlgmr.msra.gmra.mrb[12].mxu1 %v8693_v35  ;;  %v8986_v45 = vrot.slane %v8984_v50, 7 }
 0x1c2   : > { %16163 = vmatprep.subr.bf16.mxu0 %v17361_v54  ;;  %16218 = vmatpush3.bf16.msra.mxu1 %v16871_v31  ;;  %v8972_v31 = vrot.slane %v8970_v14, 7 }
 0x1c3   : > { %16219 = vmatprep.subr.bf16.mxu1 %v17361_v54  ;;  %16233 = vmatprep.mubr.msk.bf16.mxu1 %vm17362_vm0, %v17361_v54  ;;  %v18926_v35 = vsel %vm18813_vm10, %v8982_v16, %v8986_v45 }
 0x1c5   : > { %16164 = vmatpush3.bf16.msra.mxu0 %v16866_v25  ;;  %v16885_v25 = vld [vmem:[%s20423_s3 + $0xf0] sm:$0xff]  }
 0x1c6   : > { %16165 = vmatprep.subr.bf16.mxu0 %v17361_v54  ;;  %16220 = vmatpush3.bf16.msra.mxu1 %v16873_v37  ;;  %v8973_v37 = vsel %vm18813_vm10, %v8968_v43, %v8972_v31  ;;  %v16898_v43 = vld [vmem:[%s20423_s3 + $0x248] sm:$0xff]  }
 0x1c7   : > { %16221 = vmatprep.subr.bf16.mxu1 %v17361_v54  ;;  %v9033_v0 = vcombine.low %v8973_v37, %v18926_v35 }
 0x1c9   : > { %16166 = vmatpush3.bf16.msra.mxu0 %v16868_v52  ;;  %v9034_v52 = vcombine.low %v18930_v36, %v18916_v22  ;;  %v9041_v15 = vrot.slane %v9033_v0, %v18760_v38 }
 0x1ca   : > { %16167 = vmatprep.subr.bf16.mxu0 %v17361_v54  ;;  %16222 = vmatpush3.bf16.msra.mxu1 %v16877_v23  ;;  %v16889_v23 = vld [vmem:[%s20423_s3 + $0x2c0] sm:$0xff]  }
 0x1cb   : > { %16223 = vmatprep.subr.bf16.mxu1 %v17361_v54  ;;  %v9048_v20 = vrot.slane %v9034_v52, %v18760_v38 }
 0x1cd   : > { %16168 = vmatpush3.bf16.msra.mxu0 %v16870_v41  ;;  %v16884_v41 = vld [vmem:[%s20423_s3 + $0x58] sm:$0xff]   ;;  %v9049_v55 = vcombine.low %v9041_v15, %v9048_v20  ;;  %v9390_v20 = vcombine.low %v18926_v35, %v18930_v36 }
 0x1ce   : > { %16169 = vmatprep.subr.bf16.mxu0 %v17361_v54  ;;  %16224 = vmatpush3.bf16.msra.mxu1 %v16879_v53  ;;  %v16890_v53 = vld [vmem:[%s20423_s3 + $0x70] sm:$0xff]  }
 0x1cf   : > { %16225 = vmatprep.subr.bf16.mxu1 %v17361_v54  ;;  %v9398_v12 = vrot.slane %v9390_v20, %v18760_v38 }
 0x1d1   : > { %16170 = vmatpush3.bf16.msra.mxu0 %v16872_v9  ;;  %v9365_v9 = vrot.slane %v9363_v46, 7  ;;  %v16905_v46 = vld [vmem:[%s20423_s3 + $0x2f8] sm:$0xff]  }
 0x1d2   : > { %16171 = vmatprep.subr.bf16.mxu0 %v17361_v54  ;;  %16226 = vmatpush3.bf16.msra.mxu1 %v16881_v5 }
 0x1d3   : > { %16227 = vmatprep.subr.bf16.mxu1 %v17361_v54  ;;  %v9366_v24 = vor.u32 %v9365_v9, %v9362_v8 }
 0x1d5   : > { %16172 = vmatpush3.bf16.msra.mxu0 %v16874_v61  ;;  %v9367_v5 = vrot.slane %v9366_v24, 2 }
 0x1d6   : > { %16197 = vmatprep.subr.bf16.mxu0 %v17361_v54  ;;  %16228 = vmatpush3.bf16.msra.mxu1 %v16883_v7 }
 0x1d7   : > { %16229 = vmatprep.subr.bf16.mxu1 %v17361_v54  ;;  %v9372_v16 = vsel %vm18813_vm10, %v9367_v5, %v9371_v51 }
 0x1d8   : > { %16174 = vmatmul.mubr.bf16.vlgmr.msra.gmra.mrb[12].mxu0 %v8471_v39  ;;  %v9391_v39 = vcombine.low %v18916_v22, %v9372_v16 }
 0x1d9   : > { %16198 = vmatpush3.bf16.msra.mxu0 %v16878_v32  ;;  %16213 = vmatprep.mubr.msk.bf16.mxu0 %vm17362_vm0, %v17361_v54 }
 0x1da   : > { %16199 = vmatprep.subr.bf16.mxu0 %v17361_v54  ;;  %16230 = vmatpush3.bf16.msra.mxu1 %v16885_v25  ;;  %v16903_v25 = vld [vmem:[%s20423_s3 + $0x2f0] sm:$0xff]   ;;  %v9405_v44 = vrot.slane %v9391_v39, %v18760_v38 }
 0x1db   : > { %16231 = vmatprep.subr.bf16.mxu1 %v17361_v54 }
 0x1dd   : > { %16200 = vmatpush3.bf16.msra.mxu0 %v16880_v21 }
 0x1de   : > { %16201 = vmatprep.subr.bf16.mxu0 %v17361_v54  ;;  %16232 = vmatpush3.bf16.msra.mxu1 %v16887_v58 }
 0x1df   : > { %16257 = vmatprep.subr.bf16.mxu1 %v17361_v54 }
 0x1e1   : > { %16202 = vmatpush3.bf16.msra.mxu0 %v16882_v42  ;;  %16234 = vmatmul.mubr.bf16.vlgmr.msra.gmra.mrb[16].mxu1 %v9049_v55 }
 0x1e2   : > { %16203 = vmatprep.subr.bf16.mxu0 %v17361_v54  ;;  %16258 = vmatpush3.bf16.msra.mxu1 %v16889_v23 }
 0x1e3   : > { %16259 = vmatprep.subr.bf16.mxu1 %v17361_v54  ;;  %16273 = vmatprep.mubr.msk.bf16.mxu1 %vm17362_vm0, %v17361_v54 }
 0x1e5   : > { %16204 = vmatpush3.bf16.msra.mxu0 %v16884_v41 }
 0x1e6   : > { %16205 = vmatprep.subr.bf16.mxu0 %v17361_v54  ;;  %16260 = vmatpush3.bf16.msra.mxu1 %v16891_v3 }
 0x1e7   : > { %16261 = vmatprep.subr.bf16.mxu1 %v17361_v54 }
 0x1e9   : > { %16206 = vmatpush3.bf16.msra.mxu0 %v16886_v33  ;;  %v16900_v33 = vld [vmem:[%s20423_s3 + $0x250] sm:$0xff]  }
 0x1ea   : > { %16207 = vmatprep.subr.bf16.mxu0 %v17361_v54  ;;  %16262 = vmatpush3.bf16.msra.mxu1 %v16895_v47 }
 0x1eb   : > { %16263 = vmatprep.subr.bf16.mxu1 %v17361_v54 }
 0x1ed   : > { %16208 = vmatpush3.bf16.msra.mxu0 %v16888_v1 }
 0x1ee   : > { %16209 = vmatprep.subr.bf16.mxu0 %v17361_v54  ;;  %16264 = vmatpush3.bf16.msra.mxu1 %v16897_v48 }
 0x1ef   : > { %16265 = vmatprep.subr.bf16.mxu1 %v17361_v54 }
 0x1f1   : > { %16210 = vmatpush3.bf16.msra.mxu0 %v16890_v53 }
 0x1f2   : > { %16211 = vmatprep.subr.bf16.mxu0 %v17361_v54  ;;  %16266 = vmatpush3.bf16.msra.mxu1 %v16899_v10 }
 0x1f3   : > { %16267 = vmatprep.subr.bf16.mxu1 %v17361_v54 }
 0x1f4   : > { %v16035_v17 = vpop.f32.mrb[4].mxu0 }
 0x1f5   : > { %v5879_v11 = vadd.f32 %v18996_v56, %v16035_v17  ;;  %v5858_v61 = vpop.f32.mrb[5].mxu0  ;;  %16212 = vmatpush3.bf16.msra.mxu0 %v16892_v60  ;;  %v16902_v17 = vld [vmem:[%s20423_s3 + $0x258] sm:$0xff]  }
 0x1f6   : > { %v5877_v62 = vadd.f32 %v18996_v56, %v5858_v61  ;;  %v16036_v4 = vpop.f32.mrb[6].mxu0  ;;  %16237 = vmatprep.subr.bf16.mxu0 %v17361_v54  ;;  %16268 = vmatpush3.bf16.msra.mxu1 %v16901_v26  ;;  %v16912_v61 = vld [vmem:[%s20423_s3 + $0x180] sm:$0xff]  }
 0x1f7   : > { %v5880_v6 = vadd.f32 %v18996_v56, %v16036_v4  ;;  %v5861_v50 = vpop.f32.mrb[7].mxu0  ;;  %v5883_v7 = vmax.f32 %v5879_v11, 0.0  ;;  %16269 = vmatprep.subr.bf16.mxu1 %v17361_v54  ;;  %v9406_v11 = vcombine.low %v9398_v12, %v9405_v44 }
 0x1f8   : > { %v5878_v32 = vadd.f32 %v18996_v56, %v5861_v50  ;;  %16214 = vmatmul.mubr.bf16.vlgmr.msra.gmra.mrb[16].mxu0 %v8827_v63  ;;  %v5881_v30 = vmax.f32 %v5877_v62, 0.0 }
 0x1f9   : > { %v5884_v14 = vmax.f32 %v5880_v6, 0.0  ;;  %16238 = vmatpush3.bf16.msra.mxu0 %v16896_v34  ;;  %16253 = vmatprep.mubr.msk.bf16.mxu0 %vm17362_vm0, %v17361_v54 }
 0x1fa   : > { %v5882_v27 = vmax.f32 %v5878_v32, 0.0  ;;  %16239 = vmatprep.subr.bf16.mxu0 %v17361_v54  ;;  %16270 = vmatpush3.bf16.msra.mxu1 %v16903_v25 }
 0x1fb   : > { %v16115_v45 = vpop.f32.mrb[4].mxu1  ;;  %v5886_v19 = vpack.c.bf16 %v5884_v14, %v5883_v7  ;;  %v14308_v21 = vpack.c.bf16 %v5884_v14, %v5884_v14  ;;  %16271 = vmatprep.subr.bf16.mxu1 %v17361_v54 }
 0x1fc   : > { %v7797_v31 = vadd.f32 %v18996_v56, %v16115_v45  ;;  %v7776_v52 = vpop.f32.mrb[5].mxu1  ;;  %v5885_v37 = vpack.c.bf16 %v5882_v27, %v5881_v30  ;;  %v14307_v22 = vpack.c.bf16 %v5882_v27, %v5882_v27  ;;  %v16914_v45 = vld [vmem:[%s20423_s3 + $0x188] sm:$0xff]  }
 0x1fd   : > { %v5945_v0 = vrot.slane %v5886_v19, %v17532_v28  ;;  %v5952_v42 = vrot.slane %v14308_v21, %v17532_v28  ;;  %v16116_v58 = vpop.f32.mrb[6].mxu1  ;;  %16240 = vmatpush3.bf16.msra.mxu0 %v16898_v43  ;;  %v19073_v26 = vadd.f32 %v18996_v56, %v7776_v52  ;;  %v16904_v43 = vld [vmem:[%s20423_s3 + $0x260] sm:$0xff]   ;;  %v6150_v19 = vld [vmem:[#allocation2 + $0x38] sm:$0x7] }
 0x1fe   : > { %v7798_v15 = vadd.f32 %v18996_v56, %v16116_v58  ;;  %v5896_v41 = vrot.slane %v5885_v37, %v17532_v28  ;;  %v5903_v23 = vrot.slane %v14307_v22, %v17532_v28  ;;  %v19031_v55 = vpop.f32.mrb[7].mxu1  ;;  %v7801_v3 = vmax.f32 %v7797_v31, 0.0  ;;  %16241 = vmatprep.subr.bf16.mxu0 %v17361_v54  ;;  %16272 = vmatpush3.bf16.msra.mxu1 %v16905_v46 }
 0x1ff   : > { %v5953_v35 = vcombine.high %v5945_v0, %v5945_v0  ;;  %v19038_v36 = vrot.slane %v5945_v0, %v17532_v28  ;;  %v5967_v59 = vrot.slane %v5952_v42, %v17532_v28  ;;  %16297 = vmatprep.subr.bf16.mxu1 %v17361_v54 }
 0x200   : > { %v7802_v1 = vmax.f32 %v7798_v15, 0.0  ;;  %v5904_v47 = vcombine.high %v5896_v41, %v5896_v41  ;;  %v5905_v8 = vcombine.high %v5903_v23, %v5903_v23  ;;  %v19046_v9 = vrot.slane %v5896_v41, %v17532_v28 }
 0x201   : > { %v19050_v53 = vrot.slane %v5953_v35, %v17532_v28  ;;  %v5975_v48 = vcombine.high %v19038_v36, %v19038_v36  ;;  %v6001_v29 = vunpack.i.l.s16 %v5967_v59  ;;  %16242 = vmatpush3.bf16.msra.mxu0 %v16900_v33  ;;  %v5919_v51 = vrot.slane %v5903_v23, %v17532_v28  ;;  %16274 = vmatmul.mubr.bf16.vlgmr.msra.gmra.mrb[20].mxu1 %v9406_v11  ;;  %v16906_v35 = vld [vmem:[%s20423_s3 + $0x268] sm:$0xff]   ;;  %v16916_v59 = vld [vmem:[%s20423_s3 + $0x190] sm:$0xff]  }
 0x202   : > { %v7804_v24 = vpack.c.bf16 %v7802_v1, %v7801_v3  ;;  %v14478_v18 = vpack.c.bf16 %v7802_v1, %v7802_v1  ;;  %v19056_v60 = vrot.slane %v5904_v47, %v17532_v28  ;;  %16243 = vmatprep.subr.bf16.mxu0 %v17361_v54  ;;  %v5933_v4 = vrot.slane %v5905_v8, %v17532_v28 }
 0x203   : > { %v5976_v10 = vcombine.high %v19050_v53, %v19050_v53  ;;  %v6109_v57 = vcombine.low %v5975_v48, %v6001_v29  ;;  %v5934_v34 = vcombine.high %v19046_v9, %v19046_v9  ;;  %v5994_v16 = vunpack.i.h.s16 %v19038_v36  ;;  %16298 = vmatpush3.bf16.msra.mxu1 %v16912_v61  ;;  %16313 = vmatprep.mubr.msk.bf16.mxu1 %vm17362_vm0, %v17361_v54 }
 0x204   : > { %v7863_v5 = vrot.slane %v7804_v24, %v17532_v28  ;;  %v7870_v62 = vrot.slane %v14478_v18, %v17532_v28  ;;  %v5936_v14 = vcombine.high %v19056_v60, %v19056_v60  ;;  %v5937_v27 = vcombine.high %v5933_v4, %v5933_v4  ;;  %16299 = vmatprep.subr.bf16.mxu1 %v17361_v54 }
 0x205   : > { %v6116_v6 = vrot.slane %v6109_v57, %v18694_v40  ;;  %v6123_v50 = vrot.slane %v5976_v10, %v18694_v40  ;;  %16244 = vmatpush3.bf16.msra.mxu0 %v16902_v17  ;;  %v5982_v39 = vunpack.i.h.s16 %v5934_v34  ;;  %v5981_v52 = vunpack.i.l.s16 %v5934_v34  ;;  %v8068_v17 = vld [vmem:[#allocation2 + $0x4c] sm:$0x7]  ;;  %v17286_v34 = vld.sshfl [vmem:[#allocation2 + $0x20] sm:$0xf pattern:$0x76325410] }
 0x206   : > { %v7871_v63 = vcombine.high %v7863_v5, %v7863_v5  ;;  %v19080_v32 = vrot.slane %v7863_v5, %v17532_v28  ;;  %v7885_v7 = vrot.slane %v7870_v62, %v17532_v28  ;;  %16245 = vmatprep.subr.bf16.mxu0 %v17361_v54  ;;  %v5996_v37 = vunpack.i.h.s16 %v19050_v53 }
 0x207   : > { %v6124_v30 = vcombine.low %v6116_v6, %v6123_v50  ;;  %v5935_v0 = vcombine.high %v5919_v51, %v5919_v51  ;;  %v5984_v42 = vunpack.i.h.s16 %v5936_v14  ;;  %v5986_v15 = vunpack.i.h.s16 %v5919_v51  ;;  %16300 = vmatpush3.bf16.msra.mxu1 %v16914_v45 }
 0x208   : > { %v19093_v21 = vrot.slane %v7871_v63, %v17532_v28  ;;  %v7893_v25 = vcombine.high %v19080_v32, %v19080_v32  ;;  %v7919_v31 = vunpack.i.l.s16 %v7885_v7  ;;  %v5991_v41 = vunpack.i.l.s16 %v5937_v27  ;;  %16301 = vmatprep.subr.bf16.mxu1 %v17361_v54 }
 0x209   : > { %v6131_v22 = vrot.slane %v6124_v30, %v18694_v40  ;;  %v5992_v44 = vunpack.i.h.s16 %v5937_v27  ;;  %v14309_v33 = vpack.i.b16 %v5936_v14, %v5982_v39  ;;  %v14310_v3 = vpack.i.b16 %v5919_v51, %v5984_v42  ;;  %16246 = vmatpush3.bf16.msra.mxu0 %v16904_v43  ;;  %v17287_v30 = vld.sshfl [vmem:[#allocation2 + $0x18] sm:$0xf pattern:$0x76325410]  ;;  %v6144_v43 = vld [vmem:[#allocation2 + $0x30] sm:$0x7] }
 0x20a   : > { %v7894_v58 = vcombine.high %v19093_v21, %v19093_v21  ;;  %v8027_v20 = vcombine.low %v7893_v25, %v7919_v31  ;;  %v14312_v46 = vpack.i.b16 %v19050_v53, %v5994_v16  ;;  %v6017_v8 = vcombine.low %v19046_v9, %v5981_v52  ;;  %16247 = vmatprep.subr.bf16.mxu0 %v17361_v54  ;;  %v6141_v16 = vld [vmem:[#allocation2 + $0x2c] sm:$0x7]  ;;  %v16908_v25 = vld [vmem:[%s20423_s3 + $0x278] sm:$0xff]  }
 0x20b   : > { %v6151_v23 = vsel %vm18699_vm3, %v6131_v22, %v6150_v19  ;;  %v14311_v48 = vpack.i.b16 %v19038_v36, %v5992_v44  ;;  %v6031_v29 = vrot.slane %v19056_v60, %v18694_v40  ;;  %v6040_v12 = vcombine.low %v14309_v33, %v5986_v15  ;;  %v16907_v60 = vld [vmem:[%s20423_s3 + $0x270] sm:$0xff]   ;;  %16302 = vmatpush3.bf16.msra.mxu1 %v16916_v59  ;;  %v16920_v22 = vld [vmem:[%s20423_s3 + $0x1a0] sm:$0xff]  }
 0x20c   : > { %6152 = vst [vmem:[#allocation2 + $0x38] sm:$0x7] %v6151_v23  ;;  %v8034_v1 = vrot.slane %v8027_v20, %v18694_v40  ;;  %v8041_v47 = vrot.slane %v7894_v58, %v18694_v40  ;;  %v6054_v24 = vrot.slane %v14310_v3, %v18694_v40  ;;  %v6024_v18 = vrot.slane %v6017_v8, %v18694_v40  ;;  %v16911_v3 = vld [vmem:[%s20423_s3 + $0x100] sm:$0xff]  }
 0x20d   : > { %v6063_v10 = vcombine.low %v5933_v4, %v5991_v41  ;;  %v6077_v57 = vrot.slane %v5935_v0, %v18694_v40  ;;  %v6047_v9 = vrot.slane %v6040_v12, %v18694_v40  ;;  %v6086_v11 = vcombine.low %v14311_v48, %v5996_v37  ;;  %16248 = vmatpush3.bf16.msra.mxu0 %v16906_v35  ;;  %v6147_v37 = vld [vmem:[#allocation2 + $0x34] sm:$0x7] }
 0x20e   : > { %v8042_v53 = vcombine.low %v8034_v1, %v8041_v47  ;;  %v7796_v36 = vadd.f32 %v18996_v56, %v19031_v55  ;;  %v7799_v61 = vmax.f32 %v19073_v26, 0.0  ;;  %v6032_v62 = vcombine.low %v6024_v18, %v6031_v29  ;;  %16249 = vmatprep.subr.bf16.mxu0 %v17361_v54  ;;  %16303 = vmatprep.subr.bf16.mxu1 %v17361_v54  ;;  %v16918_v56 = vld [vmem:[%s20423_s3 + $0x198] sm:$0xff]   ;;  %v6138_v26 = vld [vmem:[#allocation2 + $0x28] sm:$0x7] }
 0x20f   : > { %v6070_v4 = vrot.slane %v6063_v10, %v18694_v40  ;;  %v6100_v55 = vrot.slane %v14312_v46, %v18694_v40  ;;  %v6055_v6 = vcombine.low %v6047_v9, %v6054_v24  ;;  %v6093_v50 = vrot.slane %v6086_v11, %v18694_v40  ;;  %16304 = vmatpush3.bf16.msra.mxu1 %v16918_v56  ;;  %v16922_v46 = vld [vmem:[%s20423_s3 + $0x1a8] sm:$0xff]   ;;  %v16924_v10 = vld [vmem:[%s20423_s3 + $0x1b0] sm:$0xff]  }
 0x210   : > { %v8049_v5 = vrot.slane %v8042_v53, %v18694_v40  ;;  %v7800_v51 = vmax.f32 %v7796_v36, 0.0  ;;  %v6039_v7 = vrot.slane %v6032_v62, %v18694_v40  ;;  %16305 = vmatprep.subr.bf16.mxu1 %v17361_v54  ;;  %v9184_v59 = vcombine.low %v17287_v30, %v17286_v34  ;;  %v16913_v18 = vld [vmem:[%s20423_s3 + $0x108] sm:$0xff]  }
 0x211   : > { %v6078_v14 = vcombine.low %v6070_v4, %v6077_v57  ;;  %v6062_v27 = vrot.slane %v6055_v6, %v18694_v40  ;;  %v6101_v39 = vcombine.low %v6093_v50, %v6100_v55  ;;  %16250 = vmatpush3.bf16.msra.mxu0 %v16907_v60  ;;  %v7912_v48 = vunpack.i.h.s16 %v19080_v32  ;;  %v16915_v50 = vld [vmem:[%s20423_s3 + $0x110] sm:$0xff]  }
 0x212   : > { %v8069_v63 = vsel %vm18699_vm3, %v8049_v5, %v8068_v17  ;;  %v7803_v45 = vpack.c.bf16 %v7800_v51, %v7799_v61  ;;  %v14477_v19 = vpack.c.bf16 %v7800_v51, %v7800_v51  ;;  %v6139_v52 = vsel %vm18699_vm3, %v6039_v7, %v6138_v26  ;;  %16251 = vmatprep.subr.bf16.mxu0 %v17361_v54 }
 0x213   : > { %8070 = vst [vmem:[#allocation2 + $0x4c] sm:$0x7] %v8069_v63  ;;  %v6085_v31 = vrot.slane %v6078_v14, %v18694_v40  ;;  %v6108_v0 = vrot.slane %v6101_v39, %v18694_v40  ;;  %6140 = vst [vmem:[#allocation2 + $0x28] sm:$0x7] %v6139_v52  ;;  %v6142_v42 = vsel %vm18699_vm3, %v6062_v27, %v6141_v16  ;;  %16306 = vmatpush3.bf16.msra.mxu1 %v16920_v22  ;;  %v16917_v52 = vld [vmem:[%s20423_s3 + $0x118] sm:$0xff]  }
 0x214   : > { %v7814_v58 = vrot.slane %v7803_v45, %v17532_v28  ;;  %v7821_v20 = vrot.slane %v14477_v19, %v17532_v28  ;;  %6143 = vst [vmem:[#allocation2 + $0x2c] sm:$0x7] %v6142_v42  ;;  %16307 = vmatprep.subr.bf16.mxu1 %v17361_v54  ;;  %v7914_v5 = vunpack.i.h.s16 %v19093_v21  ;;  %v14482_v62 = vpack.i.b16 %v19093_v21, %v7912_v48  ;;  %v8056_v45 = vld [vmem:[#allocation2 + $0x3c] sm:$0x7]  ;;  %v8059_v42 = vld [vmem:[#allocation2 + $0x40] sm:$0x7] }
 0x215   : > { %v6145_v15 = vsel %vm18699_vm3, %v6085_v31, %v6144_v43  ;;  %v6148_v41 = vsel %vm18699_vm3, %v6108_v0, %v6147_v37  ;;  %16252 = vmatpush3.bf16.msra.mxu0 %v16908_v25 }
 0x216   : > { %6146 = vst [vmem:[#allocation2 + $0x30] sm:$0x7] %v6145_v15  ;;  %v7822_v23 = vcombine.high %v7814_v58, %v7814_v58  ;;  %v7823_v44 = vcombine.high %v7821_v20, %v7821_v20  ;;  %v7830_v33 = vrot.slane %v7814_v58, %v17532_v28  ;;  %6149 = vst [vmem:[#allocation2 + $0x34] sm:$0x7] %v6148_v41  ;;  %16277 = vmatprep.subr.bf16.mxu0 %v17361_v54  ;;  %v8062_v58 = vld [vmem:[#allocation2 + $0x44] sm:$0x7] }
 0x217   : > { %v7837_v35 = vrot.slane %v7821_v20, %v17532_v28  ;;  %16308 = vmatpush3.bf16.msra.mxu1 %v16922_v46  ;;  %v8018_v39 = vrot.slane %v14482_v62, %v18694_v40  ;;  %v8065_v46 = vld [vmem:[#allocation2 + $0x48] sm:$0x7] }
 0x218   : > { %v7844_v1 = vrot.slane %v7822_v23, %v17532_v28  ;;  %v7851_v47 = vrot.slane %v7823_v44, %v17532_v28  ;;  %v7852_v8 = vcombine.high %v7830_v33, %v7830_v33  ;;  %16254 = vmatmul.mubr.bf16.vlgmr.msra.gmra.mrb[20].mxu0 %v9184_v59  ;;  %16309 = vmatprep.subr.bf16.mxu1 %v17361_v54 }
 0x219   : > { %16278 = vmatpush3.bf16.msra.mxu0 %v16911_v3  ;;  %16293 = vmatprep.mubr.msk.bf16.mxu0 %vm17362_vm0, %v17361_v54  ;;  %v7853_v57 = vcombine.high %v7837_v35, %v7837_v35  ;;  %v7904_v17 = vunpack.i.h.s16 %v7837_v35 }
 0x21a   : > { %v7854_v29 = vcombine.high %v7844_v1, %v7844_v1  ;;  %v7855_v12 = vcombine.high %v7851_v47, %v7851_v47  ;;  %v7899_v24 = vunpack.i.l.s16 %v7852_v8  ;;  %v7900_v53 = vunpack.i.h.s16 %v7852_v8  ;;  %16279 = vmatprep.subr.bf16.mxu0 %v17361_v54  ;;  %v19187_v9 = vld.sshfl [vmem:[#allocation2 + $0x28] sm:$0x13 pattern:$0x76325410] }
 0x21b   : > { %v7949_v51 = vrot.slane %v7844_v1, %v18694_v40  ;;  %v7995_v63 = vrot.slane %v7853_v57, %v18694_v40  ;;  %16310 = vmatpush3.bf16.msra.mxu1 %v16924_v10  ;;  %v9674_v21 = vshrl.u32 %v19187_v9, 16  ;;  %v14700_v27 = vld.sshfl [vmem:[#allocation2 + $0x2c] sm:$0x13 pattern:$0x76325410]  ;;  %v9648_v22 = vcombine.high %v19187_v9, %v19187_v9 }
 0x21c   : > { %v7902_v11 = vunpack.i.h.s16 %v7854_v29  ;;  %v7909_v36 = vunpack.i.l.s16 %v7855_v12  ;;  %v7910_v60 = vunpack.i.h.s16 %v7855_v12  ;;  %v14479_v61 = vpack.i.b16 %v7854_v29, %v7900_v53  ;;  %16311 = vmatprep.subr.bf16.mxu1 %v17361_v54 }
 0x21d   : > { %v7935_v4 = vcombine.low %v7830_v33, %v7899_v24  ;;  %16280 = vmatpush3.bf16.msra.mxu0 %v16913_v18  ;;  %v14701_v37 = vld.sshfl [vmem:[#allocation2 + $0x30] sm:$0x13 pattern:$0x76325410]  ;;  %v9656_v20 = vcombine.high %v14700_v27, %v14700_v27  ;;  %v9676_v15 = vrot.slane %v9674_v21, 6  ;;  %v9677_v41 = vshll.u32 %v19187_v9, 16 }
 0x21e   : > { %v14480_v34 = vpack.i.b16 %v7837_v35, %v7902_v11  ;;  %v14481_v56 = vpack.i.b16 %v19080_v32, %v7910_v60  ;;  %v7958_v55 = vcombine.low %v14479_v61, %v7904_v17  ;;  %v7981_v6 = vcombine.low %v7851_v47, %v7909_v36  ;;  %16281 = vmatprep.subr.bf16.mxu0 %v17361_v54  ;;  %v16926_v32 = vld [vmem:[%s20423_s3 + $0x1b8] sm:$0xff]   ;;  %v14702_v3 = vld.sshfl [vmem:[#allocation2 + $0x34] sm:$0x13 pattern:$0x76325410]  ;;  %v16919_v24 = vld [vmem:[%s20423_s3 + $0x120] sm:$0xff]  }
 0x21f   : > { %v7942_v26 = vrot.slane %v7935_v4, %v18694_v40  ;;  %16312 = vmatpush3.bf16.msra.mxu1 %v16926_v32  ;;  %v9688_v35 = vshrl.u32 %v14700_v27, 16  ;;  %v9664_v1 = vcombine.high %v14701_v37, %v14701_v37  ;;  %v9679_v47 = vrot.slane %v9677_v41, 7  ;;  %v16923_v32 = vld [vmem:[%s20423_s3 + $0x130] sm:$0xff]  }
 0x220   : > { %v7965_v7 = vrot.slane %v7958_v55, %v18694_v40  ;;  %v7972_v14 = vrot.slane %v14480_v34, %v18694_v40  ;;  %v7988_v16 = vrot.slane %v7981_v6, %v18694_v40  ;;  %v8004_v30 = vcombine.low %v14481_v56, %v7914_v5  ;;  %16337 = vmatprep.subr.bf16.mxu1 %v17361_v54  ;;  %v16921_v5 = vld [vmem:[%s20423_s3 + $0x128] sm:$0xff]  }
 0x221   : > { %v7950_v43 = vcombine.low %v7942_v26, %v7949_v51  ;;  %16282 = vmatpush3.bf16.msra.mxu0 %v16915_v50  ;;  %v9691_v8 = vshll.u32 %v14700_v27, 16  ;;  %v9690_v53 = vrot.slane %v9688_v35, 6  ;;  %v9672_v18 = vcombine.high %v14702_v3, %v14702_v3  ;;  %v16934_v35 = vld [vmem:[%s20423_s3 + $0x390] sm:$0xff]  }
 0x222   : > { %v7973_v19 = vcombine.low %v7965_v7, %v7972_v14  ;;  %v7996_v25 = vcombine.low %v7988_v16, %v7995_v63  ;;  %v8011_v31 = vrot.slane %v8004_v30, %v18694_v40  ;;  %16283 = vmatprep.subr.bf16.mxu0 %v17361_v54  ;;  %v9680_v10 = vor.u32 %v9679_v47, %v9676_v15  ;;  %v17288_v30 = vld.sshfl [vmem:[#allocation2 + $0x30] sm:$0xf pattern:$0x76325410]  ;;  %v16936_v47 = vld [vmem:[%s20423_s3 + $0x398] sm:$0xff]  }
 0x223   : > { %v7957_v0 = vrot.slane %v7950_v43, %v18694_v40  ;;  %v9702_v57 = vshrl.u32 %v14701_v37, 16  ;;  %v9697_v9 = vshll.u32 %v9656_v20, 16  ;;  %v9705_v11 = vshll.u32 %v14701_v37, 16  ;;  %v16930_v20 = vld [vmem:[%s20423_s3 + $0x380] sm:$0xff]  }
 0x224   : > { %v7980_v23 = vrot.slane %v7973_v19, %v18694_v40  ;;  %v8003_v44 = vrot.slane %v7996_v25, %v18694_v40  ;;  %v8019_v33 = vcombine.low %v8011_v31, %v8018_v39  ;;  %v9716_v36 = vshrl.u32 %v14702_v3, 16  ;;  %v17289_v19 = vld.sshfl [vmem:[#allocation2 + $0x28] sm:$0xf pattern:$0x76325410]  ;;  %v16925_v31 = vld [vmem:[%s20423_s3 + $0x138] sm:$0xff]  }
 0x225   : > { %v8057_v59 = vsel %vm18699_vm3, %v7957_v0, %v8056_v45  ;;  %16284 = vmatpush3.bf16.msra.mxu0 %v16917_v52  ;;  %v9704_v61 = vrot.slane %v9702_v57, 6  ;;  %v9683_v62 = vshll.u32 %v9648_v22, 16  ;;  %v9707_v4 = vrot.slane %v9705_v11, 7  ;;  %v16942_v11 = vld [vmem:[%s20423_s3 + $0x3b0] sm:$0xff]  }
 0x226   : > { %v8026_v48 = vrot.slane %v8019_v33, %v18694_v40  ;;  %8058 = vst [vmem:[#allocation2 + $0x3c] sm:$0x7] %v8057_v59  ;;  %v8060_v29 = vsel %vm18699_vm3, %v7980_v23, %v8059_v42  ;;  %v8063_v12 = vsel %vm18699_vm3, %v8003_v44, %v8062_v58  ;;  %16285 = vmatprep.subr.bf16.mxu0 %v17361_v54  ;;  %v9693_v40 = vrot.slane %v9691_v8, 7  ;;  %v16929_v58 = vld [vmem:[%s20423_s3 + $0x300] sm:$0xff]   ;;  %v16931_v23 = vld [vmem:[%s20423_s3 + $0x308] sm:$0xff]  }
 0x227   : > { %8061 = vst [vmem:[#allocation2 + $0x40] sm:$0x7] %v8060_v29  ;;  %8064 = vst [vmem:[#allocation2 + $0x44] sm:$0x7] %v8063_v12  ;;  %v9718_v34 = vrot.slane %v9716_v36, 6  ;;  %v9719_v56 = vshll.u32 %v14702_v3, 16  ;;  %v9708_v26 = vor.u32 %v9707_v4, %v9704_v61  ;;  %v9540_v15 = vcombine.low %v17289_v19, %v17288_v30 }
 0x228   : > { %v8066_v17 = vsel %vm18699_vm3, %v8026_v48, %v8065_v46  ;;  %v9694_v60 = vor.u32 %v9693_v40, %v9690_v53  ;;  %v9681_v55 = vrot.slane %v9680_v10, 2  ;;  %v9711_v6 = vshll.u32 %v9664_v1, 16  ;;  %v16932_v44 = vld [vmem:[%s20423_s3 + $0x388] sm:$0xff]   ;;  %v16933_v3 = vld [vmem:[%s20423_s3 + $0x310] sm:$0xff]   ;;  %v16935_v1 = vld [vmem:[%s20423_s3 + $0x318] sm:$0xff]  }
 0x229   : > { %8067 = vst [vmem:[#allocation2 + $0x48] sm:$0x7] %v8066_v17  ;;  %16286 = vmatpush3.bf16.msra.mxu0 %v16919_v24  ;;  %v9699_v50 = vrot.slane %v9697_v9, 7  ;;  %v9721_v51 = vrot.slane %v9719_v56, 7  ;;  %v9725_v63 = vshll.u32 %v9672_v18, 16  ;;  %v9685_v21 = vrot.slane %v9683_v62, 7 }
 0x22a   : > { %16287 = vmatprep.subr.bf16.mxu0 %v17361_v54  ;;  %v9695_v49 = vrot.slane %v9694_v60, 2  ;;  %v9709_v14 = vrot.slane %v9708_v26, 2  ;;  %v9713_v39 = vrot.slane %v9711_v6, 7  ;;  %v16937_v12 = vld [vmem:[%s20423_s3 + $0x320] sm:$0xff]   ;;  %v16939_v10 = vld [vmem:[%s20423_s3 + $0x328] sm:$0xff]   ;;  %v16941_v9 = vld [vmem:[%s20423_s3 + $0x330] sm:$0xff]  }
 0x22b   : > { %v9722_v16 = vor.u32 %v9721_v51, %v9718_v34  ;;  %v9686_v27 = vsel %vm18813_vm10, %v9681_v55, %v9685_v21  ;;  %v9727_v45 = vrot.slane %v9725_v63, 7  ;;  %v14754_v33 = vld.sshfl [vmem:[#allocation2 + $0x38] sm:$0x13 pattern:$0x76325410]  ;;  %v16938_v24 = vld [vmem:[%s20423_s3 + $0x3a0] sm:$0xff]  }
 0x22c   : > { %v19243_v7 = vsel %vm18813_vm10, %v9695_v49, %v9699_v50  ;;  %v19254_v52 = vsel %vm18813_vm10, %v9709_v14, %v9713_v39  ;;  %v10073_v59 = vshrl.u32 %v14754_v33, 16  ;;  %v10076_v46 = vshll.u32 %v14754_v33, 16  ;;  %v16940_v40 = vld [vmem:[%s20423_s3 + $0x3a8] sm:$0xff]   ;;  %v16943_v4 = vld [vmem:[%s20423_s3 + $0x338] sm:$0xff]   ;;  %v16947_v49 = vld [vmem:[%s20423_s3 + $0x140] sm:$0xff]  }
 0x22d   : > { %16288 = vmatpush3.bf16.msra.mxu0 %v16921_v5  ;;  %v9723_v43 = vrot.slane %v9722_v16, 2  ;;  %v9746_v25 = vcombine.low %v9686_v27, %v19243_v7  ;;  %v10029_v29 = vcombine.high %v14754_v33, %v14754_v33  ;;  %v17290_v60 = vld.sshfl [vmem:[#allocation2 + $0x34] sm:$0xf pattern:$0x76325410]  ;;  %v10103_v62 = vcombine.low %v19243_v7, %v19254_v52  ;;  %v16948_v6 = vld [vmem:[%s20423_s3 + $0x1c0] sm:$0xff]  }
 0x22e   : > { %16289 = vmatprep.subr.bf16.mxu0 %v17361_v54  ;;  %v10075_v8 = vrot.slane %v10073_v59, 6  ;;  %v10078_v48 = vrot.slane %v10076_v46, 7  ;;  %v17291_v5 = vld.sshfl [vmem:[#allocation2 + $0x2c] sm:$0xf pattern:$0x76325410] }
 0x22f   : > { %v19258_v37 = vsel %vm18813_vm10, %v9723_v43, %v9727_v45  ;;  %v9754_v0 = vrot.slane %v9746_v25, %v18760_v38  ;;  %v10082_v18 = vshll.u32 %v10029_v29, 16  ;;  %v16944_v34 = vld [vmem:[%s20423_s3 + $0x3b8] sm:$0xff]   ;;  %v10111_v55 = vrot.slane %v10103_v62, %v18760_v38  ;;  %v16949_v63 = vld [vmem:[%s20423_s3 + $0x148] sm:$0xff]   ;;  %v16951_v27 = vld [vmem:[%s20423_s3 + $0x150] sm:$0xff]  }
 0x230   : > { %v9747_v22 = vcombine.low %v19254_v52, %v19258_v37  ;;  %v10079_v53 = vor.u32 %v10078_v48, %v10075_v8  ;;  %v9897_v50 = vcombine.low %v17291_v5, %v17290_v60  ;;  %v14806_v51 = vld.sshfl [vmem:[#allocation2 + $0x48] sm:$0x13 pattern:$0x76325410]  ;;  %v16952_v39 = vld [vmem:[%s20423_s3 + $0x1d0] sm:$0xff]   ;;  %v16955_v46 = vld [vmem:[%s20423_s3 + $0x160] sm:$0xff]  }
 0x231   : > { %16290 = vmatpush3.bf16.msra.mxu0 %v16923_v32  ;;  %v10084_v17 = vrot.slane %v10082_v18, 7  ;;  %v16950_v32 = vld [vmem:[%s20423_s3 + $0x1c8] sm:$0xff]   ;;  %v14804_v21 = vld.sshfl [vmem:[#allocation2 + $0x40] sm:$0x13 pattern:$0x76325410] }
 0x232   : > { %16291 = vmatprep.subr.bf16.mxu0 %v17361_v54  ;;  %v9761_v42 = vrot.slane %v9747_v22, %v18760_v38  ;;  %v10080_v57 = vrot.slane %v10079_v53, 2  ;;  %v14805_v7 = vld.sshfl [vmem:[#allocation2 + $0x44] sm:$0x13 pattern:$0x76325410]  ;;  %v10429_v14 = vshrl.u32 %v14806_v51, 16 }
 0x233   : > { %v10432_v16 = vshll.u32 %v14806_v51, 16  ;;  %v14803_v30 = vld.sshfl [vmem:[#allocation2 + $0x3c] sm:$0x13 pattern:$0x76325410]  ;;  %v10401_v43 = vshrl.u32 %v14804_v21, 16  ;;  %v10377_v33 = vcombine.high %v14805_v7, %v14805_v7 }
 0x234   : > { %v9762_v41 = vcombine.low %v9754_v0, %v9761_v42  ;;  %v10085_v36 = vsel %vm18813_vm10, %v10080_v57, %v10084_v17  ;;  %v10404_v45 = vshll.u32 %v14804_v21, 16  ;;  %v10415_v19 = vshrl.u32 %v14805_v7, 16  ;;  %v16953_v42 = vld [vmem:[%s20423_s3 + $0x158] sm:$0xff]   ;;  %v16959_v62 = vld [vmem:[%s20423_s3 + $0x170] sm:$0xff]  }
 0x235   : > { %16292 = vmatpush3.bf16.msra.mxu0 %v16925_v31  ;;  %v10104_v61 = vcombine.low %v19258_v37, %v10085_v36  ;;  %v10418_v25 = vshll.u32 %v14805_v7, 16  ;;  %v10387_v31 = vshrl.u32 %v14803_v30, 16  ;;  %v10390_v52 = vshll.u32 %v14803_v30, 16 }
 0x236   : > { %16317 = vmatprep.subr.bf16.mxu0 %v17361_v54  ;;  %16314 = vmatmul.mubr.bf16.vlgmr.msra.gmra.mrb[24].mxu1 %v9762_v41  ;;  %v10431_v37 = vrot.slane %v10429_v14, 6  ;;  %v10434_v22 = vrot.slane %v10432_v16, 7  ;;  %v10385_v0 = vcombine.high %v14806_v51, %v14806_v51  ;;  %v10417_v41 = vrot.slane %v10415_v19, 6  ;;  %v16965_v14 = vld [vmem:[%s20423_s3 + $0x340] sm:$0xff]   ;;  %v16968_v19 = vld [vmem:[%s20423_s3 + $0x3c8] sm:$0xff]  }
 0x237   : > { %16338 = vmatpush3.bf16.msra.mxu1 %v16930_v20  ;;  %16353 = vmatprep.mubr.msk.bf16.mxu1 %vm17362_vm0, %v17361_v54  ;;  %v10118_v56 = vrot.slane %v10104_v61, %v18760_v38  ;;  %v10403_v20 = vrot.slane %v10401_v43, 6  ;;  %v10424_v53 = vshll.u32 %v10377_v33, 16  ;;  %v16966_v16 = vld [vmem:[%s20423_s3 + $0x3c0] sm:$0xff]   ;;  %vm11008_vm3 = vsmask.f32 4368 }
 0x238   : > { %16294 = vmatmul.mubr.bf16.vlgmr.msra.gmra.mrb[24].mxu0 %v9540_v15  ;;  %16339 = vmatprep.subr.bf16.mxu1 %v17361_v54  ;;  %v10406_v15 = vrot.slane %v10404_v45, 7  ;;  %v10435_v59 = vor.u32 %v10434_v22, %v10431_v37  ;;  %v10438_v29 = vshll.u32 %v10385_v0, 16  ;;  %v16967_v45 = vld [vmem:[%s20423_s3 + $0x348] sm:$0xff]   ;;  %v16969_v37 = vld [vmem:[%s20423_s3 + $0x350] sm:$0xff]   ;;  %v16974_v33 = vld [vmem:[%s20423_s3 + $0x3e0] sm:$0xff]  }
 0x239   : > { %16318 = vmatpush3.bf16.msra.mxu0 %v16929_v58  ;;  %16333 = vmatprep.mubr.msk.bf16.mxu0 %vm17362_vm0, %v17361_v54  ;;  %v10119_v26 = vcombine.low %v10111_v55, %v10118_v56  ;;  %v16954_v58 = vld [vmem:[%s20423_s3 + $0x1d8] sm:$0xff]   ;;  %v10426_v61 = vrot.slane %v10424_v53, 7  ;;  %v16970_v22 = vld [vmem:[%s20423_s3 + $0x3d0] sm:$0xff]   ;;  %vm11009_vm4 = vmor %vm11007_vm2, %vm11008_vm3 }
 0x23a   : > { %16319 = vmatprep.subr.bf16.mxu0 %v17361_v54  ;;  %v10407_v8 = vor.u32 %v10406_v15, %v10403_v20  ;;  %v10436_v18 = vrot.slane %v10435_v59, 2  ;;  %v16972_v20 = vld [vmem:[%s20423_s3 + $0x3d8] sm:$0xff]   ;;  %v16975_v59 = vld [vmem:[%s20423_s3 + $0x368] sm:$0xff]   ;;  %v16978_v53 = vld [vmem:[%s20423_s3 + $0x3f0] sm:$0xff]  }
 0x23b   : > { %16340 = vmatpush3.bf16.msra.mxu1 %v16932_v44  ;;  %v10369_v44 = vcombine.high %v14804_v21, %v14804_v21  ;;  %vm11011_vm6 = vmor %vm11009_vm4, %vm11010_vm5 }
 0x23c   : > { %16341 = vmatprep.subr.bf16.mxu1 %v17361_v54  ;;  %v10408_v17 = vrot.slane %v10407_v8, 2  ;;  %vm11013_vm8 = vmor %vm11011_vm6, %vm11012_vm7 }
 0x23d   : > { %16320 = vmatpush3.bf16.msra.mxu0 %v16931_v23  ;;  %v10420_v23 = vrot.slane %v10418_v25, 7 }
 0x23e   : > { %16321 = vmatprep.subr.bf16.mxu0 %v17361_v54 }
 0x23f   : > { %16342 = vmatpush3.bf16.msra.mxu1 %v16934_v35  ;;  %v10392_v35 = vrot.slane %v10390_v52, 7  ;;  %v10421_v48 = vor.u32 %v10420_v23, %v10417_v41  ;;  %v14858_v52 = vld.sshfl [vmem:[#allocation2 + $0x4c] sm:$0x13 pattern:$0x76325410] }
 0x240   : > { %16343 = vmatprep.subr.bf16.mxu1 %v17361_v54  ;;  %v10786_v0 = vshrl.u32 %v14858_v52, 16  ;;  %v10742_v23 = vcombine.high %v14858_v52, %v14858_v52 }
 0x241   : > { %16322 = vmatpush3.bf16.msra.mxu0 %v16933_v3  ;;  %v10389_v3 = vrot.slane %v10387_v31, 6 }
 0x242   : > { %16323 = vmatprep.subr.bf16.mxu0 %v17361_v54  ;;  %v10788_v15 = vrot.slane %v10786_v0, 6 }
 0x243   : > { %16344 = vmatpush3.bf16.msra.mxu1 %v16936_v47  ;;  %v10361_v47 = vcombine.high %v14803_v30, %v14803_v30 }
 0x244   : > { %16345 = vmatprep.subr.bf16.mxu1 %v17361_v54 }
 0x245   : > { %16324 = vmatpush3.bf16.msra.mxu0 %v16935_v1  ;;  %v16956_v1 = vld [vmem:[%s20423_s3 + $0x1e0] sm:$0xff]   ;;  %v10396_v57 = vshll.u32 %v10361_v47, 16 }
 0x246   : > { %16325 = vmatprep.subr.bf16.mxu0 %v17361_v54 }
 0x247   : > { %16346 = vmatpush3.bf16.msra.mxu1 %v16938_v24  ;;  %v10410_v24 = vshll.u32 %v10369_v44, 16  ;;  %v16973_v44 = vld [vmem:[%s20423_s3 + $0x360] sm:$0xff]  }
 0x248   : > { %16347 = vmatprep.subr.bf16.mxu1 %v17361_v54 }
 0x249   : > { %16326 = vmatpush3.bf16.msra.mxu0 %v16937_v12  ;;  %v10393_v12 = vor.u32 %v10392_v35, %v10389_v3  ;;  %v10412_v60 = vrot.slane %v10410_v24, 7  ;;  %v10795_v35 = vshll.u32 %v10742_v23, 16  ;;  %v16977_v24 = vld [vmem:[%s20423_s3 + $0x370] sm:$0xff]  }
 0x24a   : > { %16327 = vmatprep.subr.bf16.mxu0 %v17361_v54 }
 0x24b   : > { %16348 = vmatpush3.bf16.msra.mxu1 %v16940_v40  ;;  %v16958_v40 = vld [vmem:[%s20423_s3 + $0x1e8] sm:$0xff]   ;;  %v10394_v36 = vrot.slane %v10393_v12, 2  ;;  %v19403_v56 = vsel %vm18813_vm10, %v10408_v17, %v10412_v60  ;;  %v10797_v8 = vrot.slane %v10795_v35, 7 }
 0x24c   : > { %16349 = vmatprep.subr.bf16.mxu1 %v17361_v54 }
 0x24d   : > { %16328 = vmatpush3.bf16.msra.mxu0 %v16939_v10  ;;  %v16957_v10 = vld [vmem:[%s20423_s3 + $0x168] sm:$0xff]  }
 0x24e   : > { %16329 = vmatprep.subr.bf16.mxu0 %v17361_v54 }
 0x24f   : > { %16350 = vmatpush3.bf16.msra.mxu1 %v16942_v11  ;;  %v10440_v11 = vrot.slane %v10438_v29, 7 }
 0x250   : > { %16351 = vmatprep.subr.bf16.mxu1 %v17361_v54 }
 0x251   : > { %16330 = vmatpush3.bf16.msra.mxu0 %v16941_v9  ;;  %v10422_v9 = vrot.slane %v10421_v48, 2  ;;  %v19393_v5 = vsel %vm18813_vm10, %v10436_v18, %v10440_v11 }
 0x252   : > { %16331 = vmatprep.subr.bf16.mxu0 %v17361_v54 }
 0x253   : > { %16352 = vmatpush3.bf16.msra.mxu1 %v16944_v34  ;;  %v10398_v34 = vrot.slane %v10396_v57, 7  ;;  %v19407_v55 = vsel %vm18813_vm10, %v10422_v9, %v10426_v61  ;;  %v17294_v57 = vld.sshfl [vmem:[#allocation2 + $0x48] sm:$0xf pattern:$0x76325410] }
 0x254   : > { %16377 = vmatprep.subr.bf16.mxu1 %v17361_v54  ;;  %v17295_v9 = vld.sshfl [vmem:[#allocation2 + $0x40] sm:$0xf pattern:$0x76325410]  ;;  %v10816_v11 = vcombine.low %v19403_v56, %v19407_v55 }
 0x255   : > { %16332 = vmatpush3.bf16.msra.mxu0 %v16943_v4  ;;  %v16960_v4 = vld [vmem:[%s20423_s3 + $0x1f0] sm:$0xff]  }
 0x256   : > { %16357 = vmatprep.subr.bf16.mxu0 %v17361_v54  ;;  %16354 = vmatmul.mubr.bf16.vlgmr.msra.gmra.mrb[28].mxu1 %v10119_v26  ;;  %v17293_v26 = vld.sshfl [vmem:[#allocation2 + $0x3c] sm:$0xf pattern:$0x76325410]  ;;  %v10824_v61 = vrot.slane %v10816_v11, %v18760_v38 }
 0x257   : > { %16378 = vmatpush3.bf16.msra.mxu1 %v16948_v6  ;;  %16393 = vmatprep.mubr.msk.bf16.mxu1 %vm17362_vm0, %v17361_v54  ;;  %v10460_v6 = vcombine.low %v19407_v55, %v19393_v5 }
 0x258   : > { %16334 = vmatmul.mubr.bf16.vlgmr.msra.gmra.mrb[28].mxu0 %v9897_v50  ;;  %16379 = vmatprep.subr.bf16.mxu1 %v17361_v54  ;;  %v10399_v50 = vsel %vm18813_vm10, %v10394_v36, %v10398_v34  ;;  %v16980_v36 = vld [vmem:[%s20423_s3 + $0x3f8] sm:$0xff]  }
 0x259   : > { %16358 = vmatpush3.bf16.msra.mxu0 %v16947_v49  ;;  %16373 = vmatprep.mubr.msk.bf16.mxu0 %vm17362_vm0, %v17361_v54  ;;  %v17292_v49 = vld.sshfl [vmem:[#allocation2 + $0x44] sm:$0xf pattern:$0x76325410]  ;;  %v10459_v51 = vcombine.low %v10399_v50, %v19403_v56  ;;  %v10474_v21 = vrot.slane %v10460_v6, %v18760_v38 }
 0x25a   : > { %16359 = vmatprep.subr.bf16.mxu0 %v17361_v54  ;;  %v10253_v30 = vcombine.low %v17293_v26, %v17292_v49 }
 0x25b   : > { %16380 = vmatpush3.bf16.msra.mxu1 %v16950_v32  ;;  %v16962_v32 = vld [vmem:[%s20423_s3 + $0x1f8] sm:$0xff]   ;;  %v10467_v7 = vrot.slane %v10459_v51, %v18760_v38 }
 0x25c   : > { %16381 = vmatprep.subr.bf16.mxu1 %v17361_v54 }
 0x25d   : > { %16360 = vmatpush3.bf16.msra.mxu0 %v16949_v63  ;;  %v16961_v63 = vld [vmem:[%s20423_s3 + $0x178] sm:$0xff]  }
 0x25e   : > { %16361 = vmatprep.subr.bf16.mxu0 %v17361_v54 }
 0x25f   : > { %16382 = vmatpush3.bf16.msra.mxu1 %v16952_v39 }
 0x260   : > { %16383 = vmatprep.subr.bf16.mxu1 %v17361_v54 }
 0x261   : > { %16362 = vmatpush3.bf16.msra.mxu0 %v16951_v27  ;;  %v10475_v27 = vcombine.low %v10467_v7, %v10474_v21 }
 0x262   : > { %16363 = vmatprep.subr.bf16.mxu0 %v17361_v54 }
 0x263   : > { %16384 = vmatpush3.bf16.msra.mxu1 %v16954_v58  ;;  %v16971_v58 = vld [vmem:[%s20423_s3 + $0x358] sm:$0xff]  }
 0x264   : > { %16385 = vmatprep.subr.bf16.mxu1 %v17361_v54 }
 0x265   : > { %16364 = vmatpush3.bf16.msra.mxu0 %v16953_v42  ;;  %v10789_v42 = vshll.u32 %v14858_v52, 16 }
 0x266   : > { %16365 = vmatprep.subr.bf16.mxu0 %v17361_v54 }
 0x267   : > { %16386 = vmatpush3.bf16.msra.mxu1 %v16956_v1  ;;  %v10791_v41 = vrot.slane %v10789_v42, 7 }
 0x268   : > { %16387 = vmatprep.subr.bf16.mxu1 %v17361_v54 }
 0x269   : > { %16366 = vmatpush3.bf16.msra.mxu0 %v16955_v46  ;;  %v10792_v3 = vor.u32 %v10791_v41, %v10788_v15  ;;  %v16976_v46 = vld [vmem:[%s20423_s3 + $0x3e8] sm:$0xff]  }
 0x26a   : > { %16367 = vmatprep.subr.bf16.mxu0 %v17361_v54 }
 0x26b   : > { %16388 = vmatpush3.bf16.msra.mxu1 %v16958_v40  ;;  %v10793_v1 = vrot.slane %v10792_v3, 2 }
 0x26c   : > { %16389 = vmatprep.subr.bf16.mxu1 %v17361_v54 }
 0x26d   : > { %16368 = vmatpush3.bf16.msra.mxu0 %v16957_v10  ;;  %v10798_v18 = vsel %vm18813_vm10, %v10793_v1, %v10797_v8  ;;  %v16986_v1 = vld [vmem:[%s20425_s5 + $0x10] sm:$0xff]   ;;  %v16988_v8 = vld [vmem:[%s20425_s5 + $0x18] sm:$0xff]   ;;  %vm19576_vm10 = vmor %vm11013_vm8, %vm11014_vm9 }
 0x26e   : > { %16369 = vmatprep.subr.bf16.mxu0 %v17361_v54  ;;  %v10817_v17 = vcombine.low %v19393_v5, %v10798_v18  ;;  %v10610_v5 = vcombine.low %v17295_v9, %v17294_v57 }
 0x26f   : > { %16390 = vmatpush3.bf16.msra.mxu1 %v16960_v4 }
 0x270   : > { %16391 = vmatprep.subr.bf16.mxu1 %v17361_v54  ;;  %v10831_v60 = vrot.slane %v10817_v17, %v18760_v38 }
 0x271   : > { %16370 = vmatpush3.bf16.msra.mxu0 %v16959_v62 }
 0x272   : > { %16371 = vmatprep.subr.bf16.mxu0 %v17361_v54  ;;  %v10832_v62 = vcombine.low %v10824_v61, %v10831_v60 }
 0x273   : > { %16392 = vmatpush3.bf16.msra.mxu1 %v16962_v32 }
 0x274   : > { %16417 = vmatprep.subr.bf16.mxu1 %v17361_v54  ;;  %v8422_v39 = vpop.f32.mrb[8].mxu1 }
 0x275   : > { %16372 = vmatpush3.bf16.msra.mxu0 %v16961_v63  ;;  %v16155_v43 = vpop.f32.mrb[9].mxu1 }
 0x276   : > { %16397 = vmatprep.subr.bf16.mxu0 %v17361_v54  ;;  %16394 = vmatmul.mubr.bf16.vlgmr.msra.gmra.mrb[32].mxu1 %v10475_v27  ;;  %v8425_v25 = vpop.f32.mrb[10].mxu1 }
 0x277   : > { %16418 = vmatpush3.bf16.msra.mxu1 %v16966_v16  ;;  %v16156_v31 = vpop.f32.mrb[11].mxu1  ;;  %16433 = vmatprep.mubr.msk.bf16.mxu1 %vm17362_vm0, %v17361_v54 }
 0x278   : > { %16374 = vmatmul.mubr.bf16.vlgmr.msra.gmra.mrb[32].mxu0 %v10253_v30  ;;  %16419 = vmatprep.subr.bf16.mxu1 %v17361_v54 }
 0x279   : > { %16398 = vmatpush3.bf16.msra.mxu0 %v16965_v14  ;;  %16413 = vmatprep.mubr.msk.bf16.mxu0 %vm17362_vm0, %v17361_v54 }
 0x27a   : > { %16399 = vmatprep.subr.bf16.mxu0 %v17361_v54 }
 0x27b   : > { %16420 = vmatpush3.bf16.msra.mxu1 %v16968_v19 }
 0x27c   : > { %16421 = vmatprep.subr.bf16.mxu1 %v17361_v54 }
 0x27d   : > { %16400 = vmatpush3.bf16.msra.mxu0 %v16967_v45 }
 0x27e   : > { %16401 = vmatprep.subr.bf16.mxu0 %v17361_v54 }
 0x27f   : > { %16422 = vmatpush3.bf16.msra.mxu1 %v16970_v22 }
 0x280   : > { %16423 = vmatprep.subr.bf16.mxu1 %v17361_v54 }
 0x281   : > { %16402 = vmatpush3.bf16.msra.mxu0 %v16969_v37  ;;  %v16983_v37 = vld [vmem:[%s20425_s5] sm:$0xff]  }
 0x282   : > { %16403 = vmatprep.subr.bf16.mxu0 %v17361_v54 }
 0x283   : > { %16424 = vmatpush3.bf16.msra.mxu1 %v16972_v20 }
 0x284   : > { %16425 = vmatprep.subr.bf16.mxu1 %v17361_v54 }
 0x285   : > { %16404 = vmatpush3.bf16.msra.mxu0 %v16971_v58 }
 0x286   : > { %16405 = vmatprep.subr.bf16.mxu0 %v17361_v54 }
 0x287   : > { %16426 = vmatpush3.bf16.msra.mxu1 %v16974_v33 }
 0x288   : > { %16427 = vmatprep.subr.bf16.mxu1 %v17361_v54 }
 0x289   : > { %16406 = vmatpush3.bf16.msra.mxu0 %v16973_v44 }
 0x28a   : > { %16407 = vmatprep.subr.bf16.mxu0 %v17361_v54 }
 0x28b   : > { %v8311_v47 = vpop.f32.mrb[8].mxu0  ;;  %16428 = vmatpush3.bf16.msra.mxu1 %v16976_v46  ;;  %v16985_v46 = vld [vmem:[%s20425_s5 + $0x40] sm:$0xff]  }
 0x28c   : > { %v8423_v48 = vadd.f32 %v8422_v39, %v8311_v47  ;;  %v16135_v29 = vpop.f32.mrb[9].mxu0  ;;  %16429 = vmatprep.subr.bf16.mxu1 %v17361_v54  ;;  %v16987_v47 = vld [vmem:[%s20425_s5 + $0x48] sm:$0xff]  }
 0x28d   : > { %16408 = vmatpush3.bf16.msra.mxu0 %v16975_v59  ;;  %v8314_v12 = vpop.f32.mrb[10].mxu0  ;;  %v16984_v59 = vld [vmem:[%s20425_s5 + $0x8] sm:$0xff]   ;;  %v16990_v29 = vld [vmem:[%s20425_s5 + $0x20] sm:$0xff]  }
 0x28e   : > { %v8426_v10 = vadd.f32 %v8425_v25, %v8314_v12  ;;  %v16136_v40 = vpop.f32.mrb[11].mxu0  ;;  %16409 = vmatprep.subr.bf16.mxu0 %v17361_v54  ;;  %v16991_v12 = vld [vmem:[%s20425_s5 + $0x58] sm:$0xff]  }
 0x28f   : > { %16430 = vmatpush3.bf16.msra.mxu1 %v16978_v53  ;;  %v16993_v53 = vld [vmem:[%s20425_s5 + $0x60] sm:$0xff]  }
 0x290   : > { %16431 = vmatprep.subr.bf16.mxu1 %v17361_v54 }
 0x291   : > { %16410 = vmatpush3.bf16.msra.mxu0 %v16977_v24  ;;  %v16992_v24 = vld [vmem:[%s20425_s5 + $0x28] sm:$0xff]  }
 0x292   : > { %16411 = vmatprep.subr.bf16.mxu0 %v17361_v54 }
 0x293   : > { %16432 = vmatpush3.bf16.msra.mxu1 %v16980_v36 }
 0x294   : > { %16457 = vmatprep.subr.bf16.mxu1 %v17361_v54  ;;  %v8777_v4 = vpop.f32.mrb[12].mxu1 }
 0x295   : > { %16412 = vmatpush3.bf16.msra.mxu0 %v16979_v2  ;;  %v16195_v34 = vpop.f32.mrb[13].mxu1 }
 0x296   : > { %16437 = vmatprep.subr.bf16.mxu0 %v17361_v54  ;;  %16434 = vmatmul.mubr.bf16.vlgmr.msra.gmra.mrb[36].mxu1 %v10832_v62  ;;  %v8780_v56 = vpop.f32.mrb[14].mxu1  ;;  %v16995_v62 = vld [vmem:[%s20425_s5 + $0x68] sm:$0xff]   ;;  %v16996_v34 = vld [vmem:[%s20425_s5 + $0x38] sm:$0xff]  }
 0x297   : > { %16473 = vmatprep.mubr.msk.bf16.mxu1 %vm17362_vm0, %v17361_v54  ;;  %v16196_v55 = vpop.f32.mrb[15].mxu1  ;;  %16458 = vmatpush3.bf16.msra.mxu1 %v16983_v37 }
 0x298   : > { %16414 = vmatmul.mubr.bf16.vlgmr.msra.gmra.mrb[36].mxu0 %v10610_v5  ;;  %16459 = vmatprep.subr.bf16.mxu1 %v17361_v54  ;;  %v16994_v5 = vld [vmem:[%s20425_s5 + $0x30] sm:$0xff]   ;;  %v16999_v55 = vld [vmem:[%s20425_s5 + $0x78] sm:$0xff]  }
 0x299   : > { %16453 = vmatprep.mubr.msk.bf16.mxu0 %vm17362_vm0, %v17361_v54  ;;  %16438 = vmatpush3.bf16.msra.mxu0 %v16985_v46 }
 0x29a   : > { %16439 = vmatprep.subr.bf16.mxu0 %v17361_v54 }
 0x29b   : > { %16460 = vmatpush3.bf16.msra.mxu1 %v16984_v59 }
 0x29c   : > { %16461 = vmatprep.subr.bf16.mxu1 %v17361_v54 }
 0x29d   : > { %16440 = vmatpush3.bf16.msra.mxu0 %v16987_v47 }
 0x29e   : > { %16441 = vmatprep.subr.bf16.mxu0 %v17361_v54 }
 0x29f   : > { %16462 = vmatpush3.bf16.msra.mxu1 %v16986_v1 }
 0x2a0   : > { %16463 = vmatprep.subr.bf16.mxu1 %v17361_v54 }
 0x2a3   : > { %16464 = vmatpush3.bf16.msra.mxu1 %v16988_v8 }
 0x2a4   : > { %16465 = vmatprep.subr.bf16.mxu1 %v17361_v54 }
 0x2a7   : > { %16466 = vmatpush3.bf16.msra.mxu1 %v16990_v29 }
 0x2a8   : > { %16467 = vmatprep.subr.bf16.mxu1 %v17361_v54 }
 0x2ab   : > { %v8555_v49 = vpop.f32.mrb[12].mxu0  ;;  %16468 = vmatpush3.bf16.msra.mxu1 %v16992_v24 }
 0x2ac   : > { %v8562_v6 = vadd.f32 %v8555_v49, %v8423_v48  ;;  %v16175_v50 = vpop.f32.mrb[13].mxu0  ;;  %v16989_v48 = vld [vmem:[%s20425_s5 + $0x50] sm:$0xff]   ;;  %16469 = vmatprep.subr.bf16.mxu1 %v17361_v54 }
 0x2ad   : > { %v8558_v26 = vpop.f32.mrb[14].mxu0  ;;  %16442 = vmatpush3.bf16.msra.mxu0 %v16989_v48 }
 0x2ae   : > { %v8563_v51 = vadd.f32 %v8558_v26, %v8426_v10  ;;  %v16176_v63 = vpop.f32.mrb[15].mxu0  ;;  %v8784_v32 = vadd.f32 %v8777_v4, %v8562_v6  ;;  %16443 = vmatprep.subr.bf16.mxu0 %v17361_v54 }
 0x2af   : > { %16470 = vmatpush3.bf16.msra.mxu1 %v16994_v5  ;;  %v17044_v5 = vld [vmem:[%s20425_s5 + $0x1f8] sm:$0xff]  }
 0x2b0   : > { %v8785_v21 = vadd.f32 %v8780_v56, %v8563_v51  ;;  %v16997_v56 = vld [vmem:[%s20425_s5 + $0x70] sm:$0xff]   ;;  %16471 = vmatprep.subr.bf16.mxu1 %v17361_v54 }
 0x2b1   : > { %16444 = vmatpush3.bf16.msra.mxu0 %v16991_v12 }
 0x2b2   : > { %16445 = vmatprep.subr.bf16.mxu0 %v17361_v54 }
 0x2b3   : > { %16472 = vmatpush3.bf16.msra.mxu1 %v16996_v34 }
 0x2b4   : > { %v9133_v7 = vpop.f32.mrb[16].mxu1  ;;  %16497 = vmatprep.subr.bf16.mxu1 %v17361_v54 }
 0x2b5   : > { %v16235_v14 = vpop.f32.mrb[17].mxu1  ;;  %16446 = vmatpush3.bf16.msra.mxu0 %v16993_v53 }
 0x2b6   : > { %v9136_v16 = vpop.f32.mrb[18].mxu1  ;;  %16447 = vmatprep.subr.bf16.mxu0 %v17361_v54 }
 0x2b7   : > { %v16236_v30 = vpop.f32.mrb[19].mxu1 }
 0x2b9   : > { %16448 = vmatpush3.bf16.msra.mxu0 %v16995_v62 }
 0x2ba   : > { %16449 = vmatprep.subr.bf16.mxu0 %v17361_v54 }
 0x2bd   : > { %16450 = vmatpush3.bf16.msra.mxu0 %v16997_v56 }
 0x2be   : > { %16451 = vmatprep.subr.bf16.mxu0 %v17361_v54 }
 0x2c1   : > { %16452 = vmatpush3.bf16.msra.mxu0 %v16999_v55 }
 0x2c2   : > { %16477 = vmatprep.subr.bf16.mxu0 %v17361_v54 }
 0x2cb   : > { %v8911_v27 = vpop.f32.mrb[16].mxu0 }
 0x2cc   : > { %v8918_v39 = vadd.f32 %v8911_v27, %v8784_v32  ;;  %v16215_v43 = vpop.f32.mrb[17].mxu0 }
 0x2cd   : > { %v8914_v45 = vpop.f32.mrb[18].mxu0 }
 0x2ce   : > { %v8919_v19 = vadd.f32 %v8914_v45, %v8785_v21  ;;  %v16216_v25 = vpop.f32.mrb[19].mxu0  ;;  %v9140_v31 = vadd.f32 %v9133_v7, %v8918_v39 }
 0x2d0   : > { %v9141_v52 = vadd.f32 %v9136_v16, %v8919_v19 }
 0x2d4   : > { %v9490_v22 = vpop.f32.mrb[20].mxu1 }
 0x2d5   : > { %v16275_v0 = vpop.f32.mrb[21].mxu1 }
 0x2d6   : > { %v9493_v42 = vpop.f32.mrb[22].mxu1 }
 0x2d7   : > { %v16276_v58 = vpop.f32.mrb[23].mxu1 }
 0x2eb   : > { %v9268_v20 = vpop.f32.mrb[20].mxu0 }
 0x2ec   : > { %v9275_v15 = vadd.f32 %v9268_v20, %v9140_v31  ;;  %v16255_v41 = vpop.f32.mrb[21].mxu0 }
 0x2ed   : > { %v9271_v23 = vpop.f32.mrb[22].mxu0 }
 0x2ee   : > { %v9276_v44 = vadd.f32 %v9271_v23, %v9141_v52  ;;  %v16256_v33 = vpop.f32.mrb[23].mxu0  ;;  %v9497_v3 = vadd.f32 %v9490_v22, %v9275_v15 }
 0x2f0   : > { %v9498_v35 = vadd.f32 %v9493_v42, %v9276_v44  ;;  %v14883_v44 = vld [vmem:[%s20424_s4] ss:$0 sm:$0xff] }
 0x309   : > { %v9846_v10 = vpop.f32.mrb[24].mxu1 }
 0x30a   : > { %v16315_v17 = vpop.f32.mrb[25].mxu1 }
 0x30b   : > { %v9624_v18 = vpop.f32.mrb[24].mxu0  ;;  %v9849_v11 = vpop.f32.mrb[26].mxu1 }
 0x30c   : > { %v9631_v40 = vadd.f32 %v9624_v18, %v9497_v3  ;;  %v16295_v57 = vpop.f32.mrb[25].mxu0  ;;  %v16316_v61 = vpop.f32.mrb[27].mxu1 }
 0x30d   : > { %v9627_v9 = vpop.f32.mrb[26].mxu0 }
 0x30e   : > { %v9853_v2 = vadd.f32 %v9846_v10, %v9631_v40  ;;  %v9632_v36 = vadd.f32 %v9627_v9, %v9498_v35  ;;  %v16296_v60 = vpop.f32.mrb[27].mxu0 }
 0x310   : > { %v9854_v4 = vadd.f32 %v9849_v11, %v9632_v36 }
 0x329   : > { %v10203_v6 = vpop.f32.mrb[28].mxu1 }
 0x32a   : > { %v16355_v51 = vpop.f32.mrb[29].mxu1 }
 0x32b   : > { %v9981_v49 = vpop.f32.mrb[28].mxu0  ;;  %v10206_v32 = vpop.f32.mrb[30].mxu1 }
 0x32c   : > { %v9988_v50 = vadd.f32 %v9981_v49, %v9853_v2  ;;  %v16335_v26 = vpop.f32.mrb[29].mxu0  ;;  %v16356_v16 = vpop.f32.mrb[31].mxu1  ;;  %v16998_v49 = vld [vmem:[%s20425_s5 + $0xc0] sm:$0xff]  }
 0x32d   : > { %v9984_v63 = vpop.f32.mrb[30].mxu0 }
 0x32e   : > { %v10210_v21 = vadd.f32 %v10203_v6, %v9988_v50  ;;  %v9989_v7 = vadd.f32 %v9984_v63, %v9854_v4  ;;  %v16336_v14 = vpop.f32.mrb[31].mxu0 }
 0x330   : > { %v10211_v30 = vadd.f32 %v10206_v32, %v9989_v7  ;;  %v17000_v7 = vld [vmem:[%s20425_s5 + $0xc8] sm:$0xff]  }
 0x349   : > { %v10559_v39 = vpop.f32.mrb[32].mxu1 }
 0x34a   : > { %v16395_v19 = vpop.f32.mrb[33].mxu1 }
 0x34b   : > { %v10337_v27 = vpop.f32.mrb[32].mxu0  ;;  %v10562_v31 = vpop.f32.mrb[34].mxu1  ;;  %v17004_v19 = vld [vmem:[%s20425_s5 + $0xd8] sm:$0xff]  }
 0x34c   : > { %v10344_v43 = vadd.f32 %v10337_v27, %v10210_v21  ;;  %v16375_v45 = vpop.f32.mrb[33].mxu0  ;;  %v16396_v0 = vpop.f32.mrb[35].mxu1 }
 0x34d   : > { %v10340_v25 = vpop.f32.mrb[34].mxu0  ;;  %v17003_v45 = vld [vmem:[%s20425_s5 + $0x88] sm:$0xff]  }
 0x34e   : > { %v10566_v52 = vadd.f32 %v10559_v39, %v10344_v43  ;;  %v10345_v37 = vadd.f32 %v10340_v25, %v10211_v30  ;;  %v16376_v22 = vpop.f32.mrb[35].mxu0  ;;  %v17001_v30 = vld [vmem:[%s20425_s5 + $0x80] sm:$0xff]   ;;  %v17002_v43 = vld [vmem:[%s20425_s5 + $0xd0] sm:$0xff]  }
 0x34f   : > { %v17005_v25 = vld [vmem:[%s20425_s5 + $0x90] sm:$0xff]   ;;  %v17009_v22 = vld [vmem:[%s20425_s5 + $0xa0] sm:$0xff]  }
 0x350   : > { %v10567_v42 = vadd.f32 %v10562_v31, %v10345_v37  ;;  %v17006_v31 = vld [vmem:[%s20425_s5 + $0xe0] sm:$0xff]   ;;  %v17008_v37 = vld [vmem:[%s20425_s5 + $0xe8] sm:$0xff]  }
 0x369   : > { %v10916_v20 = vpop.f32.mrb[36].mxu1 }
 0x36a   : > { %v16435_v23 = vpop.f32.mrb[37].mxu1 }
 0x36b   : > { %v10694_v58 = vpop.f32.mrb[36].mxu0  ;;  %v10919_v3 = vpop.f32.mrb[38].mxu1  ;;  %v17012_v23 = vld [vmem:[%s20425_s5 + $0xf8] sm:$0xff]  }
 0x36c   : > { %v10701_v15 = vadd.f32 %v10694_v58, %v10566_v52  ;;  %v16415_v41 = vpop.f32.mrb[37].mxu0  ;;  %v16436_v1 = vpop.f32.mrb[39].mxu1  ;;  %v17007_v52 = vld [vmem:[%s20425_s5 + $0x98] sm:$0xff]  }
 0x36d   : > { %v10697_v33 = vpop.f32.mrb[38].mxu0  ;;  %v17015_v1 = vld [vmem:[%s20425_s5 + $0xb8] sm:$0xff]  }
 0x36e   : > { %v10923_v35 = vadd.f32 %v10916_v20, %v10701_v15  ;;  %v10702_v59 = vadd.f32 %v10697_v33, %v10567_v42  ;;  %v16416_v46 = vpop.f32.mrb[39].mxu0  ;;  %v17010_v42 = vld [vmem:[%s20425_s5 + $0xf0] sm:$0xff]   ;;  %v17011_v20 = vld [vmem:[%s20425_s5 + $0xa8] sm:$0xff]  }
 0x370   : > { %v10932_v47 = vadd.f32 %v14883_v44, %v10923_v35  ;;  %v10924_v8 = vadd.f32 %v10919_v3, %v10702_v59  ;;  %v17014_v59 = vld [vmem:[%s20425_s5 + $0x140] sm:$0xff]  }
 0x372   : > { %v10933_v48 = vadd.f32 %v14883_v44, %v10924_v8  ;;  %v10934_v29 = vmax.f32 %v10932_v47, 0.0  ;;  %v17013_v44 = vld [vmem:[%s20425_s5 + $0xb0] sm:$0xff]   ;;  %v17016_v8 = vld [vmem:[%s20425_s5 + $0x148] sm:$0xff]  }
 0x374   : > { %v10935_v12 = vmax.f32 %v10933_v48, 0.0  ;;  %v17017_v48 = vld [vmem:[%s20425_s5 + $0x100] sm:$0xff]  }
 0x376   : > { %v10936_v24 = vpack.c.bf16 %v10935_v12, %v10934_v29  ;;  %v14884_v53 = vpack.c.bf16 %v10935_v12, %v10935_v12  ;;  %v17018_v12 = vld [vmem:[%s20425_s5 + $0x150] sm:$0xff]  }
 0x378   : > { %v10945_v18 = vrot.slane %v10936_v24, %v18760_v38  ;;  %v10952_v10 = vrot.slane %v14884_v53, %v18760_v38  ;;  %14885 = vst.sshfl [vmem:[#allocation3] sm:$0x3 pattern:$0x76325410] %v10936_v24  ;;  %v17019_v24 = vld [vmem:[%s20425_s5 + $0x108] sm:$0xff]  }
 0x379   : > { %14886 = vst.sshfl [vmem:[#allocation3 + $0x4] sm:$0x3 pattern:$0x76325410] %v14884_v53  ;;  %v17020_v53 = vld [vmem:[%s20425_s5 + $0x158] sm:$0xff]  }
 0x37a   : > { %v10953_v40 = vcombine.high %v10945_v18, %v10945_v18  ;;  %v10954_v57 = vcombine.high %v10952_v10, %v10952_v10  ;;  %v17021_v18 = vld [vmem:[%s20425_s5 + $0x110] sm:$0xff]   ;;  %v17022_v10 = vld [vmem:[%s20425_s5 + $0x160] sm:$0xff]  }
 0x37c   : > { %10960 = vst [vmem:[#allocation3 + $0x2] sm:$0x3] %v10953_v40  ;;  %10962 = vst [vmem:[#allocation3 + $0x6] sm:$0x3] %v10954_v57  ;;  %v17023_v40 = vld [vmem:[%s20425_s5 + $0x118] sm:$0xff]   ;;  %v17024_v57 = vld [vmem:[%s20425_s5 + $0x168] sm:$0xff]  }
 0x37f   : > { %v14887_v17 = vld.sshfl [vmem:[#allocation3] sm:$0x11 pattern:$0x75316420] }
 0x380   : > { %v10992_v9 = vcombine.high %v14887_v17, %v14887_v17  ;;  %v10963_v11 = vld [vmem:[#allocation3] sm:$0x1]  ;;  %v11017_v62 = vshrl.u32 %v14887_v17, 16  ;;  %v11405_v58 = vld [vmem:[#allocation3 + $0x4] sm:$0x1]  ;;  %v17025_v17 = vld [vmem:[%s20425_s5 + $0x120] sm:$0xff]  }
 0x381   : > { %v14975_v55 = vld.sshfl [vmem:[#allocation3 + $0x4] sm:$0x11 pattern:$0x75316420] }
 0x382   : > { %v11022_v61 = vshll.u32 %v10992_v9, 16  ;;  %v11549_v6 = vcombine.high %v14975_v55, %v14975_v55  ;;  %v11560_v32 = vshrl.u32 %v14975_v55, 16  ;;  %v14923_v3 = vld.sshfl [vmem:[#allocation3] sm:$0x10 pattern:$0x75316420] }
 0x383   : > { %v10964_v2 = vld [vmem:[#allocation3 + $0x2] sm:$0x1]  ;;  %v19651_v41 = vld.sshfl [vmem:[#allocation3 + $0x2] sm:$0x10 pattern:$0x75316420] }
 0x384   : > { %v14888_v36 = vld.sshfl [vmem:[#allocation3 + $0x2] sm:$0x11 pattern:$0x75316420]  ;;  %v11157_v38 = vcombine.low %v10963_v11, %v10964_v2  ;;  %v11024_v26 = vsel %vm19576_vm10, %v11017_v62, %v11022_v61  ;;  %v11565_v21 = vshll.u32 %v11549_v6, 16  ;;  %v14941_v35 = vcombine.high %v14923_v3, %v19651_v41  ;;  %v17027_v2 = vld [vmem:[%s20425_s5 + $0x128] sm:$0xff]  }
 0x385   : > { %v11000_v60 = vcombine.high %v14888_v36, %v14888_v36  ;;  %v11026_v34 = vshrl.u32 %v14888_v36, 16  ;;  %v11404_v0 = vld [vmem:[#allocation3 + $0x2] sm:$0x1]  ;;  %v17030_v62 = vld [vmem:[%s20425_s5 + $0x1c0] sm:$0xff]   ;;  %v17032_v55 = vld [vmem:[%s20425_s5 + $0x1c8] sm:$0xff]  }
 0x386   : > { %v11164_v4 = vrot.slane %v11157_v38, %v17532_v28  ;;  %v19600_v16 = vsel %vm19576_vm10, %v11560_v32, %v11565_v21  ;;  %v11425_v15 = vcombine.low %v11404_v0, %v11405_v58  ;;  %v11305_v47 = vrot.slane %v14941_v35, %v17532_v28  ;;  %v17026_v9 = vld [vmem:[%s20425_s5 + $0x170] sm:$0xff]   ;;  %v17028_v38 = vld [vmem:[%s20425_s5 + $0x178] sm:$0xff]   ;;  %v17051_v3 = vld [vmem:[%s20425_s5 + $0x220] sm:$0xff]  }
 0x387   : > { %v11031_v56 = vshll.u32 %v11000_v60, 16  ;;  %v19721_v11 = vld.sshfl [vmem:[#allocation3 + $0x4] sm:$0x10 pattern:$0x75316420]  ;;  %v17046_v58 = vld [vmem:[%s20425_s5 + $0x1b8] sm:$0xff]  }
 0x388   : > { %v11171_v50 = vrot.slane %v11164_v4, %v17532_v28  ;;  %v11432_v33 = vrot.slane %v11425_v15, %v17532_v28  ;;  %v11312_v29 = vrot.slane %v11305_v47, %v17532_v28  ;;  %v15020_v36 = vcombine.high %v19651_v41, %v19721_v11  ;;  %v17029_v60 = vld [vmem:[%s20425_s5 + $0x130] sm:$0xff]   ;;  %v17047_v15 = vld [vmem:[%s20425_s5 + $0x200] sm:$0xff]   ;;  %v17052_v35 = vld [vmem:[%s20425_s5 + $0x228] sm:$0xff]  }
 0x389   : > { %v19589_v51 = vsel %vm19576_vm10, %v11026_v34, %v11031_v56  ;;  %v17031_v34 = vld [vmem:[%s20425_s5 + $0x138] sm:$0xff]   ;;  %v17037_v32 = vld [vmem:[%s20425_s5 + $0x190] sm:$0xff]  }
 0x38a   : > { %v11051_v63 = vcombine.low %v11024_v26, %v19589_v51  ;;  %16474 = vmatmul.mubr.bf16.vlgmr.msra.gmra.mrb[40].mxu1 %v11171_v50  ;;  %v11585_v27 = vcombine.low %v19589_v51, %v19600_v16  ;;  %v11439_v46 = vrot.slane %v11432_v33, %v17532_v28  ;;  %v11734_v61 = vrot.slane %v15020_v36, %v17532_v28  ;;  %v17034_v50 = vld [vmem:[%s20425_s5 + $0x1d0] sm:$0xff]   ;;  %v17035_v26 = vld [vmem:[%s20425_s5 + $0x188] sm:$0xff]   ;;  %v17050_v33 = vld [vmem:[%s20425_s5 + $0x218] sm:$0xff]  }
 0x38b   : > { %16498 = vmatpush3.bf16.msra.mxu1 %v16998_v49  ;;  %16513 = vmatprep.mubr.msk.bf16.mxu1 %vm17362_vm0, %v17361_v54  ;;  %v17033_v49 = vld [vmem:[%s20425_s5 + $0x180] sm:$0xff]   ;;  %v15054_v51 = vld.sshfl [vmem:[#allocation3 + $0x6] sm:$0x11 pattern:$0x75316420]  ;;  %v17054_v47 = vld [vmem:[%s20425_s5 + $0x238] sm:$0xff]  }
 0x38c   : > { %v11058_v14 = vrot.slane %v11051_v63, %v17532_v28  ;;  %16499 = vmatprep.subr.bf16.mxu1 %v17361_v54  ;;  %v11741_v4 = vrot.slane %v11734_v61, %v17532_v28  ;;  %v11592_v56 = vrot.slane %v11585_v27, %v17532_v28  ;;  %v17036_v63 = vld [vmem:[%s20425_s5 + $0x1d8] sm:$0xff]   ;;  %v11978_v21 = vcombine.high %v15054_v51, %v15054_v51  ;;  %v17040_v27 = vld [vmem:[%s20425_s5 + $0x1e8] sm:$0xff]   ;;  %v11833_v0 = vld [vmem:[#allocation3 + $0x4] sm:$0x1] }
 0x38d   : > { %v17073_v36 = vld [vmem:[%s20427_s7 + $0x160] ss:$16 sps:$4 sm:$0xff]   ;;  %v17084_v61 = vld [vmem:[%s20427_s7 + $0x18c] ss:$16 sps:$4 sm:$0xff]  }
 0x38e   : > { %v11065_v39 = vrot.slane %v11058_v14, %v17532_v28  ;;  %v11599_v6 = vrot.slane %v11592_v56, %v17532_v28  ;;  %v17039_v14 = vld [vmem:[%s20425_s5 + $0x198] sm:$0xff]  }
 0x38f   : > { %16500 = vmatpush3.bf16.msra.mxu1 %v17000_v7  ;;  %v17038_v7 = vld [vmem:[%s20425_s5 + $0x1e0] sm:$0xff]   ;;  %v17090_v56 = vld [vmem:[%s20427_s7 + $0x1ac] ss:$16 sps:$4 sm:$0xff]  }
 0x390   : > { %16454 = vmatmul.mubr.bf16.vlgmr.msra.gmra.mrb[40].mxu0 %v11065_v39  ;;  %16501 = vmatprep.subr.bf16.mxu1 %v17361_v54  ;;  %v11989_v39 = vshrl.u32 %v15054_v51, 16 }
 0x391   : > { %16478 = vmatpush3.bf16.msra.mxu0 %v17001_v30  ;;  %16493 = vmatprep.mubr.msk.bf16.mxu0 %vm17362_vm0, %v17361_v54  ;;  %v11994_v30 = vshll.u32 %v11978_v21, 16 }
 0x392   : > { %16479 = vmatprep.subr.bf16.mxu0 %v17361_v54 }
 0x393   : > { %16502 = vmatpush3.bf16.msra.mxu1 %v17002_v43  ;;  %v17041_v43 = vld [vmem:[%s20425_s5 + $0x1a0] sm:$0xff]  }
 0x394   : > { %16503 = vmatprep.subr.bf16.mxu1 %v17361_v54 }
 0x395   : > { %16480 = vmatpush3.bf16.msra.mxu0 %v17003_v45  ;;  %v11996_v45 = vsel %vm19576_vm10, %v11989_v39, %v11994_v30  ;;  %v17091_v30 = vld [vmem:[%s20427_s7 + $0x1c0] ss:$16 sps:$4 sm:$0xff]   ;;  %v17094_v39 = vld [vmem:[%s20427_s7 + $0x1c8] ss:$16 sps:$4 sm:$0xff]  }
 0x396   : > { %16481 = vmatprep.subr.bf16.mxu0 %v17361_v54 }
 0x397   : > { %16504 = vmatpush3.bf16.msra.mxu1 %v17004_v19  ;;  %v17042_v19 = vld [vmem:[%s20425_s5 + $0x1f0] sm:$0xff]  }
 0x398   : > { %16505 = vmatprep.subr.bf16.mxu1 %v17361_v54 }
 0x399   : > { %16482 = vmatpush3.bf16.msra.mxu0 %v17005_v25  ;;  %v17043_v25 = vld [vmem:[%s20425_s5 + $0x1a8] sm:$0xff]  }
 0x39a   : > { %16483 = vmatprep.subr.bf16.mxu0 %v17361_v54 }
 0x39b   : > { %16506 = vmatpush3.bf16.msra.mxu1 %v17006_v31  ;;  %v12014_v31 = vcombine.low %v19600_v16, %v11996_v45  ;;  %v17099_v45 = vld [vmem:[%s20427_s7 + $0x1e4] ss:$16 sps:$4 sm:$0xff]  }
 0x39c   : > { %16507 = vmatprep.subr.bf16.mxu1 %v17361_v54 }
 0x39d   : > { %16484 = vmatpush3.bf16.msra.mxu0 %v17007_v52  ;;  %v11834_v52 = vld [vmem:[#allocation3 + $0x6] sm:$0x1] }
 0x39e   : > { %16485 = vmatprep.subr.bf16.mxu0 %v17361_v54  ;;  %v11854_v16 = vcombine.low %v11833_v0, %v11834_v52  ;;  %v17105_v52 = vld [vmem:[%s20427_s7 + $0x4] ss:$16 sps:$4 sm:$0xff]  }
 0x39f   : > { %16508 = vmatpush3.bf16.msra.mxu1 %v17008_v37  ;;  %v17045_v37 = vld [vmem:[%s20425_s5 + $0x1b0] sm:$0xff]  }
 0x3a0   : > { %16509 = vmatprep.subr.bf16.mxu1 %v17361_v54 }
 0x3a1   : > { %16486 = vmatpush3.bf16.msra.mxu0 %v17009_v22  ;;  %v12021_v22 = vrot.slane %v12014_v31, %v17532_v28  ;;  %v17100_v31 = vld [vmem:[%s20427_s7 + $0x1e8] ss:$16 sps:$4 sm:$0xff]  }
 0x3a2   : > { %16487 = vmatprep.subr.bf16.mxu0 %v17361_v54 }
 0x3a3   : > { %16510 = vmatpush3.bf16.msra.mxu1 %v17010_v42  ;;  %v12028_v42 = vrot.slane %v12021_v22, %v17532_v28 }
 0x3a4   : > { %16511 = vmatprep.subr.bf16.mxu1 %v17361_v54 }
 0x3a5   : > { %16488 = vmatpush3.bf16.msra.mxu0 %v17011_v20  ;;  %v11861_v20 = vrot.slane %v11854_v16, %v17532_v28 }
 0x3a6   : > { %16489 = vmatprep.subr.bf16.mxu0 %v17361_v54 }
 0x3a7   : > { %16512 = vmatpush3.bf16.msra.mxu1 %v17012_v23  ;;  %v11868_v41 = vrot.slane %v11861_v20, %v17532_v28  ;;  %v17048_v23 = vld [vmem:[%s20425_s5 + $0x208] sm:$0xff]  }
 0x3a8   : > { %16537 = vmatprep.subr.bf16.mxu1 %v17361_v54 }
 0x3a9   : > { %16490 = vmatpush3.bf16.msra.mxu0 %v17013_v44  ;;  %v17049_v44 = vld [vmem:[%s20425_s5 + $0x210] sm:$0xff]  }
 0x3aa   : > { %16491 = vmatprep.subr.bf16.mxu0 %v17361_v54  ;;  %16514 = vmatmul.mubr.bf16.vlgmr.msra.gmra.mrb[44].mxu1 %v11439_v46  ;;  %v17053_v46 = vld [vmem:[%s20425_s5 + $0x230] sm:$0xff]  }
 0x3ab   : > { %16538 = vmatpush3.bf16.msra.mxu1 %v17014_v59  ;;  %16553 = vmatprep.mubr.msk.bf16.mxu1 %vm17362_vm0, %v17361_v54  ;;  %v15082_v59 = vld.sshfl [vmem:[#allocation3 + $0x6] sm:$0x10 pattern:$0x75316420] }
 0x3ac   : > { %16539 = vmatprep.subr.bf16.mxu1 %v17361_v54 }
 0x3ad   : > { %16492 = vmatpush3.bf16.msra.mxu0 %v17015_v1  ;;  %v15099_v1 = vcombine.high %v19721_v11, %v15082_v59  ;;  %v17075_v11 = vld [vmem:[%s20427_s7 + $0x164] ss:$16 sps:$4 sm:$0xff]  }
 0x3ae   : > { %16517 = vmatprep.subr.bf16.mxu0 %v17361_v54 }
 0x3af   : > { %16540 = vmatpush3.bf16.msra.mxu1 %v17016_v8  ;;  %v12163_v8 = vrot.slane %v15099_v1, %v17532_v28 }
 0x3b0   : > { %16494 = vmatmul.mubr.bf16.vlgmr.msra.gmra.mrb[44].mxu0 %v11312_v29  ;;  %16541 = vmatprep.subr.bf16.mxu1 %v17361_v54  ;;  %v17055_v29 = vld [vmem:[%s20427_s7 + $0x100] ss:$16 sps:$4 sm:$0xff]  }
 0x3b1   : > { %16518 = vmatpush3.bf16.msra.mxu0 %v17017_v48  ;;  %16533 = vmatprep.mubr.msk.bf16.mxu0 %vm17362_vm0, %v17361_v54  ;;  %v12170_v48 = vrot.slane %v12163_v8, %v17532_v28  ;;  %v17063_v28 = vld [vmem:[%s20427_s7 + $0x124] ss:$16 sps:$4 sm:$0xff]  }
 0x3b2   : > { %16519 = vmatprep.subr.bf16.mxu0 %v17361_v54 }
 0x3b3   : > { %16542 = vmatpush3.bf16.msra.mxu1 %v17018_v12  ;;  %v17057_v12 = vld [vmem:[%s20427_s7 + $0x104] ss:$16 sps:$4 sm:$0xff]  }
 0x3b4   : > { %16543 = vmatprep.subr.bf16.mxu1 %v17361_v54 }
 0x3b5   : > { %16520 = vmatpush3.bf16.msra.mxu0 %v17019_v24  ;;  %v17058_v24 = vld [vmem:[%s20427_s7 + $0x108] ss:$16 sps:$4 sm:$0xff]  }
 0x3b6   : > { %16521 = vmatprep.subr.bf16.mxu0 %v17361_v54 }
 0x3b7   : > { %16544 = vmatpush3.bf16.msra.mxu1 %v17020_v53  ;;  %v17066_v53 = vld [vmem:[%s20427_s7 + $0x12c] ss:$16 sps:$4 sm:$0xff]  }
 0x3b8   : > { %16545 = vmatprep.subr.bf16.mxu1 %v17361_v54 }
 0x3b9   : > { %16522 = vmatpush3.bf16.msra.mxu0 %v17021_v18  ;;  %v17061_v18 = vld [vmem:[%s20427_s7 + $0x120] ss:$16 sps:$4 sm:$0xff]  }
 0x3ba   : > { %16523 = vmatprep.subr.bf16.mxu0 %v17361_v54 }
 0x3bb   : > { %16546 = vmatpush3.bf16.msra.mxu1 %v17022_v10  ;;  %v17064_v10 = vld [vmem:[%s20427_s7 + $0x128] ss:$16 sps:$4 sm:$0xff]  }
 0x3bc   : > { %16547 = vmatprep.subr.bf16.mxu1 %v17361_v54 }
 0x3bd   : > { %16524 = vmatpush3.bf16.msra.mxu0 %v17023_v40  ;;  %v17069_v40 = vld [vmem:[%s20427_s7 + $0x144] ss:$16 sps:$4 sm:$0xff]  }
 0x3be   : > { %16525 = vmatprep.subr.bf16.mxu0 %v17361_v54 }
 0x3bf   : > { %16548 = vmatpush3.bf16.msra.mxu1 %v17024_v57  ;;  %v17072_v57 = vld [vmem:[%s20427_s7 + $0x14c] ss:$16 sps:$4 sm:$0xff]  }
 0x3c0   : > { %16549 = vmatprep.subr.bf16.mxu1 %v17361_v54 }
 0x3c1   : > { %16526 = vmatpush3.bf16.msra.mxu0 %v17025_v17  ;;  %v17067_v17 = vld [vmem:[%s20427_s7 + $0x140] ss:$16 sps:$4 sm:$0xff]  }
 0x3c2   : > { %16527 = vmatprep.subr.bf16.mxu0 %v17361_v54 }
 0x3c3   : > { %16550 = vmatpush3.bf16.msra.mxu1 %v17026_v9  ;;  %v17070_v9 = vld [vmem:[%s20427_s7 + $0x148] ss:$16 sps:$4 sm:$0xff]  }
 0x3c4   : > { %16551 = vmatprep.subr.bf16.mxu1 %v17361_v54 }
 0x3c5   : > { %16528 = vmatpush3.bf16.msra.mxu0 %v17027_v2  ;;  %v17078_v2 = vld [vmem:[%s20427_s7 + $0x16c] ss:$16 sps:$4 sm:$0xff]  }
 0x3c6   : > { %16529 = vmatprep.subr.bf16.mxu0 %v17361_v54 }
 0x3c7   : > { %16552 = vmatpush3.bf16.msra.mxu1 %v17028_v38  ;;  %v17076_v38 = vld [vmem:[%s20427_s7 + $0x168] ss:$16 sps:$4 sm:$0xff]  }
 0x3c8   : > { %16577 = vmatprep.subr.bf16.mxu1 %v17361_v54 }
 0x3c9   : > { %16530 = vmatpush3.bf16.msra.mxu0 %v17029_v60  ;;  %v17081_v60 = vld [vmem:[%s20427_s7 + $0x184] ss:$16 sps:$4 sm:$0xff]  }
 0x3ca   : > { %16531 = vmatprep.subr.bf16.mxu0 %v17361_v54  ;;  %16554 = vmatmul.mubr.bf16.vlgmr.msra.gmra.mrb[48].mxu1 %v11741_v4  ;;  %v17082_v4 = vld [vmem:[%s20427_s7 + $0x188] ss:$16 sps:$4 sm:$0xff]  }
 0x3cb   : > { %16578 = vmatpush3.bf16.msra.mxu1 %v17030_v62  ;;  %16593 = vmatprep.mubr.msk.bf16.mxu1 %vm17362_vm0, %v17361_v54  ;;  %v17079_v62 = vld [vmem:[%s20427_s7 + $0x180] ss:$16 sps:$4 sm:$0xff]  }
 0x3cc   : > { %16579 = vmatprep.subr.bf16.mxu1 %v17361_v54 }
 0x3cd   : > { %16532 = vmatpush3.bf16.msra.mxu0 %v17031_v34  ;;  %v17087_v34 = vld [vmem:[%s20427_s7 + $0x1a4] ss:$16 sps:$4 sm:$0xff]  }
 0x3ce   : > { %16557 = vmatprep.subr.bf16.mxu0 %v17361_v54 }
 0x3cf   : > { %16580 = vmatpush3.bf16.msra.mxu1 %v17032_v55  ;;  %v17085_v55 = vld [vmem:[%s20427_s7 + $0x1a0] ss:$16 sps:$4 sm:$0xff]  }
 0x3d0   : > { %16534 = vmatmul.mubr.bf16.vlgmr.msra.gmra.mrb[48].mxu0 %v11599_v6  ;;  %16581 = vmatprep.subr.bf16.mxu1 %v17361_v54 }
 0x3d1   : > { %16558 = vmatpush3.bf16.msra.mxu0 %v17033_v49  ;;  %16573 = vmatprep.mubr.msk.bf16.mxu0 %vm17362_vm0, %v17361_v54  ;;  %v17088_v49 = vld [vmem:[%s20427_s7 + $0x1a8] ss:$16 sps:$4 sm:$0xff]  }
 0x3d2   : > { %16559 = vmatprep.subr.bf16.mxu0 %v17361_v54 }
 0x3d3   : > { %16582 = vmatpush3.bf16.msra.mxu1 %v17034_v50 }
 0x3d4   : > { %16583 = vmatprep.subr.bf16.mxu1 %v17361_v54 }
 0x3d5   : > { %16560 = vmatpush3.bf16.msra.mxu0 %v17035_v26 }
 0x3d6   : > { %16561 = vmatprep.subr.bf16.mxu0 %v17361_v54 }
 0x3d7   : > { %16584 = vmatpush3.bf16.msra.mxu1 %v17036_v63 }
 0x3d8   : > { %16585 = vmatprep.subr.bf16.mxu1 %v17361_v54 }
 0x3d9   : > { %16562 = vmatpush3.bf16.msra.mxu0 %v17037_v32 }
 0x3da   : > { %16563 = vmatprep.subr.bf16.mxu0 %v17361_v54 }
 0x3db   : > { %16586 = vmatpush3.bf16.msra.mxu1 %v17038_v7 }
 0x3dc   : > { %16587 = vmatprep.subr.bf16.mxu1 %v17361_v54 }
 0x3dd   : > { %16564 = vmatpush3.bf16.msra.mxu0 %v17039_v14 }
 0x3de   : > { %16565 = vmatprep.subr.bf16.mxu0 %v17361_v54 }
 0x3df   : > { %16588 = vmatpush3.bf16.msra.mxu1 %v17040_v27  ;;  %v17093_v27 = vld [vmem:[%s20427_s7 + $0x1c4] ss:$16 sps:$4 sm:$0xff]  }
 0x3e0   : > { %16589 = vmatprep.subr.bf16.mxu1 %v17361_v54 }
 0x3e1   : > { %16566 = vmatpush3.bf16.msra.mxu0 %v17041_v43  ;;  %v17096_v43 = vld [vmem:[%s20427_s7 + $0x1cc] ss:$16 sps:$4 sm:$0xff]  }
 0x3e2   : > { %16567 = vmatprep.subr.bf16.mxu0 %v17361_v54 }
 0x3e3   : > { %16590 = vmatpush3.bf16.msra.mxu1 %v17042_v19  ;;  %v17102_v19 = vld [vmem:[%s20427_s7 + $0x1ec] ss:$16 sps:$4 sm:$0xff]  }
 0x3e4   : > { %16591 = vmatprep.subr.bf16.mxu1 %v17361_v54 }
 0x3e5   : > { %16568 = vmatpush3.bf16.msra.mxu0 %v17043_v25  ;;  %v17097_v25 = vld [vmem:[%s20427_s7 + $0x1e0] ss:$16 sps:$4 sm:$0xff]  }
 0x3e6   : > { %16569 = vmatprep.subr.bf16.mxu0 %v17361_v54 }
 0x3e7   : > { %16592 = vmatpush3.bf16.msra.mxu1 %v17044_v5  ;;  %v17365_v5 = vmov 0  }
 0x3e8   : > { %12500 = vmatprep.subr.bf16.mxu1 %v17057_v12 }
 0x3e9   : > { %16570 = vmatpush3.bf16.msra.mxu0 %v17045_v37  ;;  %v17108_v37 = vld [vmem:[%s20427_s7 + $0xc] ss:$16 sps:$4 sm:$0xff]  }
 0x3ea   : > { %16571 = vmatprep.subr.bf16.mxu0 %v17361_v54  ;;  %16594 = vmatmul.mubr.bf16.vlgmr.msra.gmra.mrb[52].mxu1 %v12028_v42 }
 0x3eb   : > { %12501 = vmatpush1.bf16.msra.mxu1 %v17055_v29  ;;  %12532 = vmatprep.mubr.bf16.mxu1 %v17365_v5 }
 0x3ec   : > { %12502 = vmatprep.subr.bf16.mxu1 %v17063_v28 }
 0x3ed   : > { %16572 = vmatpush3.bf16.msra.mxu0 %v17046_v58 }
 0x3ee   : > { %16597 = vmatprep.subr.bf16.mxu0 %v17361_v54 }
 0x3ef   : > { %12503 = vmatpush1.bf16.msra.mxu1 %v17061_v18 }
 0x3f0   : > { %16574 = vmatmul.mubr.bf16.vlgmr.msra.gmra.mrb[52].mxu0 %v11868_v41  ;;  %12504 = vmatprep.subr.bf16.mxu1 %v17069_v40 }
 0x3f1   : > { %16598 = vmatpush3.bf16.msra.mxu0 %v17047_v15  ;;  %16613 = vmatprep.mubr.msk.bf16.mxu0 %vm17362_vm0, %v17361_v54 }
 0x3f2   : > { %16599 = vmatprep.subr.bf16.mxu0 %v17361_v54 }
 0x3f3   : > { %12505 = vmatpush1.bf16.msra.mxu1 %v17067_v17 }
 0x3f4   : > { %12506 = vmatprep.subr.bf16.mxu1 %v17075_v11  ;;  %v15108_v11 = vld [vmem:[%s20426_s6] ss:$0 sm:$0xff] }
 0x3f5   : > { %16600 = vmatpush3.bf16.msra.mxu0 %v17048_v23 }
 0x3f6   : > { %16601 = vmatprep.subr.bf16.mxu0 %v17361_v54 }
 0x3f7   : > { %12507 = vmatpush1.bf16.msra.mxu1 %v17073_v36 }
 0x3f8   : > { %12508 = vmatprep.subr.bf16.mxu1 %v17081_v60 }
 0x3f9   : > { %16602 = vmatpush3.bf16.msra.mxu0 %v17049_v44 }
 0x3fa   : > { %16603 = vmatprep.subr.bf16.mxu0 %v17361_v54 }
 0x3fb   : > { %12509 = vmatpush1.bf16.msra.mxu1 %v17079_v62 }
 0x3fc   : > { %12510 = vmatprep.subr.bf16.mxu1 %v17087_v34  ;;  %v17103_v34 = vld [vmem:[%s20427_s7] ss:$16 sps:$4 sm:$0xff]  }
 0x3fd   : > { %16604 = vmatpush3.bf16.msra.mxu0 %v17050_v33 }
 0x3fe   : > { %16605 = vmatprep.subr.bf16.mxu0 %v17361_v54 }
 0x3ff   : > { %12511 = vmatpush1.bf16.msra.mxu1 %v17085_v55 }
 0x400   : > { %12512 = vmatprep.subr.bf16.mxu1 %v17093_v27  ;;  %v17124_v27 = vld [vmem:[%s20427_s7 + $0x68] ss:$16 sps:$4 sm:$0xff]  }
 0x401   : > { %16606 = vmatpush3.bf16.msra.mxu0 %v17051_v3 }
 0x402   : > { %16607 = vmatprep.subr.bf16.mxu0 %v17361_v54 }
 0x403   : > { %12513 = vmatpush1.bf16.msra.mxu1 %v17091_v30  ;;  %v17121_v30 = vld [vmem:[%s20427_s7 + $0x60] ss:$16 sps:$4 sm:$0xff]  }
 0x404   : > { %12514 = vmatprep.subr.bf16.mxu1 %v17099_v45  ;;  %v17127_v45 = vld [vmem:[%s20427_s7 + $0x80] ss:$16 sps:$4 sm:$0xff]  }
 0x405   : > { %16608 = vmatpush3.bf16.msra.mxu0 %v17052_v35 }
 0x406   : > { %16609 = vmatprep.subr.bf16.mxu0 %v17361_v54 }
 0x407   : > { %12515 = vmatpush1.bf16.msra.mxu1 %v17097_v25  ;;  %v17135_v25 = vld [vmem:[%s20427_s7 + $0xa4] ss:$16 sps:$4 sm:$0xff]  }
 0x408   : > { %12742 = vmatprep.subr.bf16.mxu1 %v17105_v52  ;;  %v17133_v52 = vld [vmem:[%s20427_s7 + $0xa0] ss:$16 sps:$4 sm:$0xff]  }
 0x409   : > { %16610 = vmatpush3.bf16.msra.mxu0 %v17053_v46 }
 0x40a   : > { %16611 = vmatprep.subr.bf16.mxu0 %v17361_v54  ;;  %v17060_v54 = vld [vmem:[%s20427_s7 + $0x10c] ss:$16 sps:$4 sm:$0xff]  }
 0x40d   : > { %16612 = vmatpush3.bf16.msra.mxu0 %v17054_v47 }
 0x40e   : > { %12541 = vmatprep.subr.bf16.mxu0 %v17060_v54 }
 0x410   : > { %16614 = vmatmul.mubr.bf16.vlgmr.msra.gmra.mrb[56].mxu0 %v12170_v48 }
 0x411   : > { %12542 = vmatpush1.bf16.msra.mxu0 %v17058_v24  ;;  %12573 = vmatprep.mubr.bf16.mxu0 %v17365_v5 }
 0x412   : > { %12543 = vmatprep.subr.bf16.mxu0 %v17066_v53 }
 0x415   : > { %12544 = vmatpush1.bf16.msra.mxu0 %v17064_v10 }
 0x416   : > { %12545 = vmatprep.subr.bf16.mxu0 %v17072_v57 }
 0x419   : > { %12546 = vmatpush1.bf16.msra.mxu0 %v17070_v9 }
 0x41a   : > { %12547 = vmatprep.subr.bf16.mxu0 %v17078_v2 }
 0x41d   : > { %12548 = vmatpush1.bf16.msra.mxu0 %v17076_v38 }
 0x41e   : > { %12549 = vmatprep.subr.bf16.mxu0 %v17084_v61 }
 0x421   : > { %12550 = vmatpush1.bf16.msra.mxu0 %v17082_v4 }
 0x422   : > { %12551 = vmatprep.subr.bf16.mxu0 %v17090_v56  ;;  %v17106_v56 = vld [vmem:[%s20427_s7 + $0x8] ss:$16 sps:$4 sm:$0xff]  }
 0x425   : > { %12552 = vmatpush1.bf16.msra.mxu0 %v17088_v49  ;;  %v17111_v49 = vld [vmem:[%s20427_s7 + $0x24] ss:$16 sps:$4 sm:$0xff]  }
 0x426   : > { %12553 = vmatprep.subr.bf16.mxu0 %v17096_v43  ;;  %v17132_v43 = vld [vmem:[%s20427_s7 + $0x8c] ss:$16 sps:$4 sm:$0xff]  }
 0x429   : > { %12554 = vmatpush1.bf16.msra.mxu0 %v17094_v39  ;;  %v17129_v39 = vld [vmem:[%s20427_s7 + $0x84] ss:$16 sps:$4 sm:$0xff]  }
 0x42a   : > { %12555 = vmatprep.subr.bf16.mxu0 %v17102_v19  ;;  %v17130_v19 = vld [vmem:[%s20427_s7 + $0x88] ss:$16 sps:$4 sm:$0xff]  }
 0x42d   : > { %12556 = vmatpush1.bf16.msra.mxu0 %v17100_v31  ;;  %v17138_v31 = vld [vmem:[%s20427_s7 + $0xac] ss:$16 sps:$4 sm:$0xff]  }
 0x42e   : > { %12783 = vmatprep.subr.bf16.mxu0 %v17108_v37  ;;  %v17136_v37 = vld [vmem:[%s20427_s7 + $0xa8] ss:$16 sps:$4 sm:$0xff]  }
 0x45d   : > { %v11255_v6 = vpop.f32.mrb[40].mxu1 }
 0x45e   : > { %v16475_v50 = vpop.f32.mrb[41].mxu1 }
 0x45f   : > { %v11258_v26 = vpop.f32.mrb[42].mxu1  ;;  %v17109_v50 = vld [vmem:[%s20427_s7 + $0x20] ss:$16 sps:$4 sm:$0xff]  }
 0x460   : > { %v16476_v51 = vpop.f32.mrb[43].mxu1  ;;  %v17112_v26 = vld [vmem:[%s20427_s7 + $0x28] ss:$16 sps:$4 sm:$0xff]  }
 0x461   : > { %v17117_v51 = vld [vmem:[%s20427_s7 + $0x44] ss:$16 sps:$4 sm:$0xff]  }
 0x463   : > { %v11149_v63 = vpop.f32.mrb[40].mxu0 }
 0x464   : > { %v11256_v32 = vadd.f32 %v11255_v6, %v11149_v63  ;;  %v16455_v21 = vpop.f32.mrb[41].mxu0  ;;  %v17114_v6 = vld [vmem:[%s20427_s7 + $0x2c] ss:$16 sps:$4 sm:$0xff]  }
 0x465   : > { %v11152_v7 = vpop.f32.mrb[42].mxu0  ;;  %v17120_v63 = vld [vmem:[%s20427_s7 + $0x4c] ss:$16 sps:$4 sm:$0xff]   ;;  %v17118_v21 = vld [vmem:[%s20427_s7 + $0x48] ss:$16 sps:$4 sm:$0xff]  }
 0x466   : > { %v16456_v14 = vpop.f32.mrb[43].mxu0  ;;  %v17123_v7 = vld [vmem:[%s20427_s7 + $0x64] ss:$16 sps:$4 sm:$0xff]  }
 0x467   : > { %v17126_v14 = vld [vmem:[%s20427_s7 + $0x6c] ss:$16 sps:$4 sm:$0xff]  }
 0x47d   : > { %v11523_v22 = vpop.f32.mrb[44].mxu1 }
 0x47e   : > { %v16515_v0 = vpop.f32.mrb[45].mxu1 }
 0x47f   : > { %v11526_v16 = vpop.f32.mrb[46].mxu1  ;;  %v17144_v0 = vld [vmem:[%s20427_s7 + $0xcc] ss:$16 sps:$4 sm:$0xff]  }
 0x480   : > { %v16516_v42 = vpop.f32.mrb[47].mxu1  ;;  %v17139_v16 = vld [vmem:[%s20427_s7 + $0xc0] ss:$16 sps:$4 sm:$0xff]  }
 0x481   : > { %v17142_v42 = vld [vmem:[%s20427_s7 + $0xc8] ss:$16 sps:$4 sm:$0xff]  }
 0x483   : > { %v11396_v58 = vpop.f32.mrb[44].mxu0 }
 0x484   : > { %v11402_v20 = vadd.f32 %v11396_v58, %v11256_v32  ;;  %v16495_v15 = vpop.f32.mrb[45].mxu0  ;;  %v17115_v32 = vld [vmem:[%s20427_s7 + $0x40] ss:$16 sps:$4 sm:$0xff]   ;;  %v17147_v58 = vld [vmem:[%s20427_s7 + $0xe4] ss:$16 sps:$4 sm:$0xff]  }
 0x485   : > { %v11399_v41 = vpop.f32.mrb[46].mxu0  ;;  %v17145_v15 = vld [vmem:[%s20427_s7 + $0xe0] ss:$16 sps:$4 sm:$0xff]  }
 0x486   : > { %v16496_v23 = vpop.f32.mrb[47].mxu0  ;;  %v11529_v44 = vadd.f32 %v11523_v22, %v11402_v20  ;;  %v17141_v22 = vld [vmem:[%s20427_s7 + $0xc4] ss:$16 sps:$4 sm:$0xff]   ;;  %v17150_v20 = vld [vmem:[%s20427_s7 + $0xec] ss:$16 sps:$4 sm:$0xff]  }
 0x487   : > { %v17148_v41 = vld [vmem:[%s20427_s7 + $0xe8] ss:$16 sps:$4 sm:$0xff]   ;;  %v17153_v23 = vld [vmem:[%s20427_s7 + $0x204] ss:$16 sps:$4 sm:$0xff]  }
 0x49d   : > { %v11825_v33 = vpop.f32.mrb[48].mxu1 }
 0x49e   : > { %v16555_v3 = vpop.f32.mrb[49].mxu1 }
 0x49f   : > { %v11828_v35 = vpop.f32.mrb[50].mxu1  ;;  %v17154_v3 = vld [vmem:[%s20427_s7 + $0x208] ss:$16 sps:$4 sm:$0xff]  }
 0x4a0   : > { %v16556_v59 = vpop.f32.mrb[51].mxu1  ;;  %v17159_v35 = vld [vmem:[%s20427_s7 + $0x224] ss:$16 sps:$4 sm:$0xff]  }
 0x4a1   : > { %v17162_v59 = vld [vmem:[%s20427_s7 + $0x22c] ss:$16 sps:$4 sm:$0xff]  }
 0x4a3   : > { %v11683_v46 = vpop.f32.mrb[48].mxu0 }
 0x4a4   : > { %v11689_v1 = vadd.f32 %v11683_v46, %v11529_v44  ;;  %v16535_v47 = vpop.f32.mrb[49].mxu0  ;;  %v17156_v44 = vld [vmem:[%s20427_s7 + $0x20c] ss:$16 sps:$4 sm:$0xff]   ;;  %v17157_v46 = vld [vmem:[%s20427_s7 + $0x220] ss:$16 sps:$4 sm:$0xff]  }
 0x4a5   : > { %v11686_v8 = vpop.f32.mrb[50].mxu0  ;;  %v17165_v47 = vld [vmem:[%s20427_s7 + $0x244] ss:$16 sps:$4 sm:$0xff]  }
 0x4a6   : > { %v16536_v48 = vpop.f32.mrb[51].mxu0  ;;  %v11831_v29 = vadd.f32 %v11825_v33, %v11689_v1  ;;  %v17151_v33 = vld [vmem:[%s20427_s7 + $0x200] ss:$16 sps:$4 sm:$0xff]   ;;  %v17160_v1 = vld [vmem:[%s20427_s7 + $0x228] ss:$16 sps:$4 sm:$0xff]  }
 0x4a7   : > { %v17168_v8 = vld [vmem:[%s20427_s7 + $0x24c] ss:$16 sps:$4 sm:$0xff]   ;;  %v17163_v48 = vld [vmem:[%s20427_s7 + $0x240] ss:$16 sps:$4 sm:$0xff]  }
 0x4bd   : > { %v12112_v12 = vpop.f32.mrb[52].mxu1 }
 0x4be   : > { %v16595_v24 = vpop.f32.mrb[53].mxu1 }
 0x4bf   : > { %v12115_v54 = vpop.f32.mrb[54].mxu1  ;;  %v17174_v24 = vld [vmem:[%s20427_s7 + $0x26c] ss:$16 sps:$4 sm:$0xff]  }
 0x4c0   : > { %v16596_v28 = vpop.f32.mrb[55].mxu1  ;;  %v17169_v54 = vld [vmem:[%s20427_s7 + $0x260] ss:$16 sps:$4 sm:$0xff]  }
 0x4c1   : > { %v17172_v28 = vld [vmem:[%s20427_s7 + $0x268] ss:$16 sps:$4 sm:$0xff]  }
 0x4c3   : > { %v11952_v53 = vpop.f32.mrb[52].mxu0 }
 0x4c4   : > { %v11958_v18 = vadd.f32 %v11952_v53, %v11831_v29  ;;  %v16575_v10 = vpop.f32.mrb[53].mxu0  ;;  %v17166_v29 = vld [vmem:[%s20427_s7 + $0x248] ss:$16 sps:$4 sm:$0xff]   ;;  %v17177_v53 = vld [vmem:[%s20427_s7 + $0x284] ss:$16 sps:$4 sm:$0xff]  }
 0x4c5   : > { %v11955_v40 = vpop.f32.mrb[54].mxu0  ;;  %v17175_v10 = vld [vmem:[%s20427_s7 + $0x280] ss:$16 sps:$4 sm:$0xff]  }
 0x4c6   : > { %v16576_v57 = vpop.f32.mrb[55].mxu0  ;;  %v12118_v17 = vadd.f32 %v12112_v12, %v11958_v18  ;;  %v17171_v12 = vld [vmem:[%s20427_s7 + $0x264] ss:$16 sps:$4 sm:$0xff]   ;;  %v17180_v18 = vld [vmem:[%s20427_s7 + $0x28c] ss:$16 sps:$4 sm:$0xff]  }
 0x4c7   : > { %v17178_v40 = vld [vmem:[%s20427_s7 + $0x288] ss:$16 sps:$4 sm:$0xff]   ;;  %v17183_v57 = vld [vmem:[%s20427_s7 + $0x2a4] ss:$16 sps:$4 sm:$0xff]  }
 0x4e3   : > { %v12254_v9 = vpop.f32.mrb[56].mxu0 }
 0x4e4   : > { %v12260_v2 = vadd.f32 %v12254_v9, %v12118_v17  ;;  %v16615_v36 = vpop.f32.mrb[57].mxu0  ;;  %v17186_v17 = vld [vmem:[%s20427_s7 + $0x2ac] ss:$16 sps:$4 sm:$0xff]   ;;  %v17181_v9 = vld [vmem:[%s20427_s7 + $0x2a0] ss:$16 sps:$4 sm:$0xff]  }
 0x4e5   : > { %v12257_v38 = vpop.f32.mrb[58].mxu0  ;;  %v17192_v36 = vld [vmem:[%s20427_s7 + $0x2cc] ss:$16 sps:$4 sm:$0xff]  }
 0x4e6   : > { %v12268_v60 = vadd.f32 %v15108_v11, %v12260_v2  ;;  %v16616_v61 = vpop.f32.mrb[59].mxu0  ;;  %v17184_v11 = vld [vmem:[%s20427_s7 + $0x2a8] ss:$16 sps:$4 sm:$0xff]   ;;  %v17189_v2 = vld [vmem:[%s20427_s7 + $0x2c4] ss:$16 sps:$4 sm:$0xff]  }
 0x4e7   : > { %v17187_v38 = vld [vmem:[%s20427_s7 + $0x2c0] ss:$16 sps:$4 sm:$0xff]   ;;  %v17195_v61 = vld [vmem:[%s20427_s7 + $0x2e4] ss:$16 sps:$4 sm:$0xff]  }
 0x4e8   : > { %v12269_v62 = vmax.f32 %v12268_v60, 0.0  ;;  %v17190_v60 = vld [vmem:[%s20427_s7 + $0x2c8] ss:$16 sps:$4 sm:$0xff]  }
 0x4ea   : > { %v19968_v4 = vpack.c.bf16 %v12269_v62, %v12269_v62  ;;  %v17198_v62 = vld [vmem:[%s20427_s7 + $0x2ec] ss:$16 sps:$4 sm:$0xff]  }
 0x4ec   : > { %v19977_v55 = vshrl.u32 %v19968_v4, 16 }
 0x4ee   : > { %12533 = vmatmul.mubr.bf16.vlgmr.msra.gmra.mrb[56].mxu1 %v19977_v55  ;;  %12574 = vmatmul.mubr.bf16.vlgmr.msra.gmra.mrb[60].mxu0 %v19977_v55 }
 0x4ef   : > { %12743 = vmatpush1.bf16.msra.mxu1 %v17103_v34  ;;  %12784 = vmatpush1.bf16.msra.mxu0 %v17106_v56  ;;  %v17193_v34 = vld [vmem:[%s20427_s7 + $0x2e0] ss:$16 sps:$4 sm:$0xff]   ;;  %v17196_v56 = vld [vmem:[%s20427_s7 + $0x2e8] ss:$16 sps:$4 sm:$0xff]  }
 0x4f0   : > { %12744 = vmatprep.subr.bf16.mxu1 %v17111_v49  ;;  %12785 = vmatprep.subr.bf16.mxu0 %v17114_v6  ;;  %v17201_v49 = vld [vmem:[%s20427_s7 + $0x304] ss:$16 sps:$4 sm:$0xff]   ;;  %v17204_v6 = vld [vmem:[%s20427_s7 + $0x30c] ss:$16 sps:$4 sm:$0xff]  }
 0x4f1   : > { %12774 = vmatprep.mubr.bf16.mxu1 %v17365_v5  ;;  %12815 = vmatprep.mubr.bf16.mxu0 %v17365_v5 }
 0x4f3   : > { %12745 = vmatpush1.bf16.msra.mxu1 %v17109_v50  ;;  %12786 = vmatpush1.bf16.msra.mxu0 %v17112_v26  ;;  %v17199_v50 = vld [vmem:[%s20427_s7 + $0x300] ss:$16 sps:$4 sm:$0xff]   ;;  %v17202_v26 = vld [vmem:[%s20427_s7 + $0x308] ss:$16 sps:$4 sm:$0xff]  }
 0x4f4   : > { %12746 = vmatprep.subr.bf16.mxu1 %v17117_v51  ;;  %12787 = vmatprep.subr.bf16.mxu0 %v17120_v63  ;;  %v12858_v51 = vrot.slane %v19968_v4, 1  ;;  %v17207_v63 = vld [vmem:[%s20427_s7 + $0x324] ss:$16 sps:$4 sm:$0xff]  }
 0x4f7   : > { %12747 = vmatpush1.bf16.msra.mxu1 %v17115_v32  ;;  %12788 = vmatpush1.bf16.msra.mxu0 %v17118_v21  ;;  %v17210_v32 = vld [vmem:[%s20427_s7 + $0x32c] ss:$16 sps:$4 sm:$0xff]   ;;  %v17205_v21 = vld [vmem:[%s20427_s7 + $0x320] ss:$16 sps:$4 sm:$0xff]  }
 0x4f8   : > { %12748 = vmatprep.subr.bf16.mxu1 %v17123_v7  ;;  %12789 = vmatprep.subr.bf16.mxu0 %v17126_v14  ;;  %v17213_v7 = vld [vmem:[%s20427_s7 + $0x344] ss:$16 sps:$4 sm:$0xff]   ;;  %v17216_v14 = vld [vmem:[%s20427_s7 + $0x34c] ss:$16 sps:$4 sm:$0xff]  }
 0x4fb   : > { %12749 = vmatpush1.bf16.msra.mxu1 %v17121_v30  ;;  %12790 = vmatpush1.bf16.msra.mxu0 %v17124_v27  ;;  %v17211_v30 = vld [vmem:[%s20427_s7 + $0x340] ss:$16 sps:$4 sm:$0xff]   ;;  %v17214_v27 = vld [vmem:[%s20427_s7 + $0x348] ss:$16 sps:$4 sm:$0xff]  }
 0x4fc   : > { %12750 = vmatprep.subr.bf16.mxu1 %v17129_v39  ;;  %12791 = vmatprep.subr.bf16.mxu0 %v17132_v43  ;;  %v17219_v39 = vld [vmem:[%s20427_s7 + $0x364] ss:$16 sps:$4 sm:$0xff]   ;;  %v17217_v43 = vld [vmem:[%s20427_s7 + $0x360] ss:$16 sps:$4 sm:$0xff]  }
 0x4ff   : > { %12751 = vmatpush1.bf16.msra.mxu1 %v17127_v45  ;;  %12792 = vmatpush1.bf16.msra.mxu0 %v17130_v19  ;;  %v17220_v45 = vld [vmem:[%s20427_s7 + $0x368] ss:$16 sps:$4 sm:$0xff]   ;;  %v17225_v19 = vld [vmem:[%s20427_s7 + $0x384] ss:$16 sps:$4 sm:$0xff]  }
 0x500   : > { %12752 = vmatprep.subr.bf16.mxu1 %v17135_v25  ;;  %12793 = vmatprep.subr.bf16.mxu0 %v17138_v31  ;;  %v17228_v25 = vld [vmem:[%s20427_s7 + $0x38c] ss:$16 sps:$4 sm:$0xff]   ;;  %v17223_v31 = vld [vmem:[%s20427_s7 + $0x380] ss:$16 sps:$4 sm:$0xff]  }
 0x503   : > { %12753 = vmatpush1.bf16.msra.mxu1 %v17133_v52  ;;  %12794 = vmatpush1.bf16.msra.mxu0 %v17136_v37  ;;  %v17226_v52 = vld [vmem:[%s20427_s7 + $0x388] ss:$16 sps:$4 sm:$0xff]   ;;  %v17231_v37 = vld [vmem:[%s20427_s7 + $0x3a4] ss:$16 sps:$4 sm:$0xff]  }
 0x504   : > { %12754 = vmatprep.subr.bf16.mxu1 %v17141_v22  ;;  %12795 = vmatprep.subr.bf16.mxu0 %v17144_v0  ;;  %v17234_v22 = vld [vmem:[%s20427_s7 + $0x3ac] ss:$16 sps:$4 sm:$0xff]   ;;  %v17229_v0 = vld [vmem:[%s20427_s7 + $0x3a0] ss:$16 sps:$4 sm:$0xff]  }
 0x507   : > { %12755 = vmatpush1.bf16.msra.mxu1 %v17139_v16  ;;  %12796 = vmatpush1.bf16.msra.mxu0 %v17142_v42  ;;  %v17232_v16 = vld [vmem:[%s20427_s7 + $0x3a8] ss:$16 sps:$4 sm:$0xff]   ;;  %v17237_v42 = vld [vmem:[%s20427_s7 + $0x3c4] ss:$16 sps:$4 sm:$0xff]  }
 0x508   : > { %12756 = vmatprep.subr.bf16.mxu1 %v17147_v58  ;;  %12797 = vmatprep.subr.bf16.mxu0 %v17150_v20  ;;  %v17240_v58 = vld [vmem:[%s20427_s7 + $0x3cc] ss:$16 sps:$4 sm:$0xff]   ;;  %v17235_v20 = vld [vmem:[%s20427_s7 + $0x3c0] ss:$16 sps:$4 sm:$0xff]  }
 0x50b   : > { %12757 = vmatpush1.bf16.msra.mxu1 %v17145_v15  ;;  %12798 = vmatpush1.bf16.msra.mxu0 %v17148_v41  ;;  %v17238_v15 = vld [vmem:[%s20427_s7 + $0x3c8] ss:$16 sps:$4 sm:$0xff]   ;;  %v17243_v41 = vld [vmem:[%s20427_s7 + $0x3e4] ss:$16 sps:$4 sm:$0xff]  }
 0x50c   : > { %13020 = vmatprep.subr.bf16.mxu1 %v17153_v23  ;;  %13061 = vmatprep.subr.bf16.mxu0 %v17156_v44  ;;  %v17246_v23 = vld [vmem:[%s20427_s7 + $0x3ec] ss:$16 sps:$4 sm:$0xff]   ;;  %v17241_v44 = vld [vmem:[%s20427_s7 + $0x3e0] ss:$16 sps:$4 sm:$0xff]  }
 0x50e   : > { %12775 = vmatmul.mubr.bf16.vlgmr.msra.gmra.mrb[60].mxu1 %v19968_v4  ;;  %12816 = vmatmul.mubr.bf16.vlgmr.msra.gmra.mrb[64].mxu0 %v19968_v4  ;;  %v17208_v4 = vld [vmem:[%s20427_s7 + $0x328] ss:$16 sps:$4 sm:$0xff]  }
 0x50f   : > { %13021 = vmatpush1.bf16.msra.mxu1 %v17151_v33  ;;  %13062 = vmatpush1.bf16.msra.mxu0 %v17154_v3  ;;  %v17244_v33 = vld [vmem:[%s20427_s7 + $0x3e8] ss:$16 sps:$4 sm:$0xff]   ;;  %v13139_v3 = vrot.slane %v19977_v55, 1 }
 0x510   : > { %13022 = vmatprep.subr.bf16.mxu1 %v17159_v35  ;;  %13063 = vmatprep.subr.bf16.mxu0 %v17162_v59  ;;  %v17247_v35 = vld [vmem:[%s20429_s9 + $0x40] sm:$0xff]   ;;  %v17251_v55 = vld [vmem:[%s20429_s9 + $0x48] sm:$0xff]  }
 0x511   : > { %13052 = vmatprep.mubr.bf16.mxu1 %v17365_v5  ;;  %13093 = vmatprep.mubr.bf16.mxu0 %v17365_v5  ;;  %v17248_v59 = vld [vmem:[%s20429_s9 + $0xc0] sm:$0xff]  }
 0x513   : > { %13023 = vmatpush1.bf16.msra.mxu1 %v17157_v46  ;;  %13064 = vmatpush1.bf16.msra.mxu0 %v17160_v1  ;;  %v17249_v46 = vld [vmem:[%s20429_s9] sm:$0xff]  }
 0x514   : > { %13024 = vmatprep.subr.bf16.mxu1 %v17165_v47  ;;  %13065 = vmatprep.subr.bf16.mxu0 %v17168_v8  ;;  %v17250_v1 = vld [vmem:[%s20429_s9 + $0x80] sm:$0xff]   ;;  %v17252_v47 = vld [vmem:[%s20429_s9 + $0xc8] sm:$0xff]  }
 0x515   : > { %v17253_v8 = vld [vmem:[%s20429_s9 + $0x8] sm:$0xff]  }
 0x517   : > { %13025 = vmatpush1.bf16.msra.mxu1 %v17163_v48  ;;  %13066 = vmatpush1.bf16.msra.mxu0 %v17166_v29  ;;  %v17254_v48 = vld [vmem:[%s20429_s9 + $0x88] sm:$0xff]   ;;  %v17255_v29 = vld [vmem:[%s20429_s9 + $0x50] sm:$0xff]  }
 0x518   : > { %13026 = vmatprep.subr.bf16.mxu1 %v17171_v12  ;;  %13067 = vmatprep.subr.bf16.mxu0 %v17174_v24  ;;  %v17256_v12 = vld [vmem:[%s20429_s9 + $0xd0] sm:$0xff]  }
 0x519   : > { %v17257_v24 = vld [vmem:[%s20429_s9 + $0x10] sm:$0xff]  }
 0x51b   : > { %13027 = vmatpush1.bf16.msra.mxu1 %v17169_v54  ;;  %13068 = vmatpush1.bf16.msra.mxu0 %v17172_v28  ;;  %v17258_v54 = vld [vmem:[%s20429_s9 + $0x90] sm:$0xff]   ;;  %v17259_v28 = vld [vmem:[%s20429_s9 + $0x58] sm:$0xff]  }
 0x51c   : > { %13028 = vmatprep.subr.bf16.mxu1 %v17177_v53  ;;  %13069 = vmatprep.subr.bf16.mxu0 %v17180_v18  ;;  %v17260_v53 = vld [vmem:[%s20429_s9 + $0xd8] sm:$0xff]  }
 0x51d   : > { %v17261_v18 = vld [vmem:[%s20429_s9 + $0x18] sm:$0xff]  }
 0x51f   : > { %13029 = vmatpush1.bf16.msra.mxu1 %v17175_v10  ;;  %13070 = vmatpush1.bf16.msra.mxu0 %v17178_v40  ;;  %v17262_v10 = vld [vmem:[%s20429_s9 + $0x98] sm:$0xff]   ;;  %v17263_v40 = vld [vmem:[%s20429_s9 + $0x60] sm:$0xff]  }
 0x520   : > { %13030 = vmatprep.subr.bf16.mxu1 %v17183_v57  ;;  %13071 = vmatprep.subr.bf16.mxu0 %v17186_v17  ;;  %v17264_v57 = vld [vmem:[%s20429_s9 + $0xe0] sm:$0xff]  }
 0x521   : > { %v17265_v17 = vld [vmem:[%s20429_s9 + $0x20] sm:$0xff]  }
 0x523   : > { %13031 = vmatpush1.bf16.msra.mxu1 %v17181_v9  ;;  %13072 = vmatpush1.bf16.msra.mxu0 %v17184_v11  ;;  %v17266_v9 = vld [vmem:[%s20429_s9 + $0xa0] sm:$0xff]   ;;  %v17267_v11 = vld [vmem:[%s20429_s9 + $0x68] sm:$0xff]  }
 0x524   : > { %13032 = vmatprep.subr.bf16.mxu1 %v17189_v2  ;;  %13073 = vmatprep.subr.bf16.mxu0 %v17192_v36  ;;  %v17268_v2 = vld [vmem:[%s20429_s9 + $0xe8] sm:$0xff]  }
 0x525   : > { %v17269_v36 = vld [vmem:[%s20429_s9 + $0x28] sm:$0xff]  }
 0x527   : > { %13033 = vmatpush1.bf16.msra.mxu1 %v17187_v38  ;;  %13074 = vmatpush1.bf16.msra.mxu0 %v17190_v60  ;;  %v17270_v38 = vld [vmem:[%s20429_s9 + $0xa8] sm:$0xff]   ;;  %v17271_v60 = vld [vmem:[%s20429_s9 + $0x70] sm:$0xff]  }
 0x528   : > { %13034 = vmatprep.subr.bf16.mxu1 %v17195_v61  ;;  %13075 = vmatprep.subr.bf16.mxu0 %v17198_v62  ;;  %v17272_v61 = vld [vmem:[%s20429_s9 + $0xf0] sm:$0xff]  }
 0x529   : > { %v17273_v62 = vld [vmem:[%s20429_s9 + $0x30] sm:$0xff]  }
 0x52b   : > { %13035 = vmatpush1.bf16.msra.mxu1 %v17193_v34  ;;  %13076 = vmatpush1.bf16.msra.mxu0 %v17196_v56  ;;  %v17274_v34 = vld [vmem:[%s20429_s9 + $0xb0] sm:$0xff]   ;;  %v17275_v56 = vld [vmem:[%s20429_s9 + $0x78] sm:$0xff]  }
 0x52c   : > { %13301 = vmatprep.subr.bf16.mxu1 %v17201_v49  ;;  %13342 = vmatprep.subr.bf16.mxu0 %v17204_v6  ;;  %v17276_v49 = vld [vmem:[%s20429_s9 + $0xf8] sm:$0xff]  }
 0x52d   : > { %v17277_v6 = vld [vmem:[%s20429_s9 + $0x38] sm:$0xff]  }
 0x52e   : > { %13053 = vmatmul.mubr.bf16.vlgmr.msra.gmra.mrb[64].mxu1 %v12858_v51  ;;  %13094 = vmatmul.mubr.bf16.vlgmr.msra.gmra.mrb[68].mxu0 %v12858_v51 }
 0x52f   : > { %13302 = vmatpush1.bf16.msra.mxu1 %v17199_v50  ;;  %13343 = vmatpush1.bf16.msra.mxu0 %v17202_v26  ;;  %v17278_v50 = vld [vmem:[%s20429_s9 + $0xb8] sm:$0xff]  }
 0x530   : > { %13303 = vmatprep.subr.bf16.mxu1 %v17207_v63  ;;  %13344 = vmatprep.subr.bf16.mxu0 %v17210_v32 }
 0x531   : > { %13333 = vmatprep.mubr.bf16.mxu1 %v17365_v5  ;;  %13374 = vmatprep.mubr.bf16.mxu0 %v17365_v5  ;;  %v17222_v5 = vld [vmem:[%s20427_s7 + $0x36c] ss:$16 sps:$4 sm:$0xff]  }
 0x533   : > { %13304 = vmatpush1.bf16.msra.mxu1 %v17205_v21  ;;  %13345 = vmatpush1.bf16.msra.mxu0 %v17208_v4 }
 0x534   : > { %13305 = vmatprep.subr.bf16.mxu1 %v17213_v7  ;;  %13346 = vmatprep.subr.bf16.mxu0 %v17216_v14 }
 0x537   : > { %13306 = vmatpush1.bf16.msra.mxu1 %v17211_v30  ;;  %13347 = vmatpush1.bf16.msra.mxu0 %v17214_v27 }
 0x538   : > { %13307 = vmatprep.subr.bf16.mxu1 %v17219_v39  ;;  %13348 = vmatprep.subr.bf16.mxu0 %v17222_v5 }
 0x53b   : > { %13308 = vmatpush1.bf16.msra.mxu1 %v17217_v43  ;;  %13349 = vmatpush1.bf16.msra.mxu0 %v17220_v45 }
 0x53c   : > { %13309 = vmatprep.subr.bf16.mxu1 %v17225_v19  ;;  %13350 = vmatprep.subr.bf16.mxu0 %v17228_v25 }
 0x53f   : > { %13310 = vmatpush1.bf16.msra.mxu1 %v17223_v31  ;;  %13351 = vmatpush1.bf16.msra.mxu0 %v17226_v52 }
 0x540   : > { %13311 = vmatprep.subr.bf16.mxu1 %v17231_v37  ;;  %13352 = vmatprep.subr.bf16.mxu0 %v17234_v22 }
 0x543   : > { %13312 = vmatpush1.bf16.msra.mxu1 %v17229_v0  ;;  %13353 = vmatpush1.bf16.msra.mxu0 %v17232_v16 }
 0x544   : > { %13313 = vmatprep.subr.bf16.mxu1 %v17237_v42  ;;  %13354 = vmatprep.subr.bf16.mxu0 %v17240_v58 }
 0x547   : > { %13314 = vmatpush1.bf16.msra.mxu1 %v17235_v20  ;;  %13355 = vmatpush1.bf16.msra.mxu0 %v17238_v15 }
 0x548   : > { %13315 = vmatprep.subr.bf16.mxu1 %v17243_v41  ;;  %13356 = vmatprep.subr.bf16.mxu0 %v17246_v23 }
 0x54b   : > { %13316 = vmatpush1.bf16.msra.mxu1 %v17241_v44  ;;  %13357 = vmatpush1.bf16.msra.mxu0 %v17244_v33 }
 0x54c   : > { %15753 = vmatprep.subr.bf16.mxu1 %v17247_v35  ;;  %15775 = vmatprep.subr.bf16.mxu0 %v17248_v59  ;;  %v13391_v59 = vsub.s32 0, %v17518_v13 }
 0x54e   : > { %13334 = vmatmul.mubr.bf16.vlgmr.msra.gmra.mrb[68].mxu1 %v13139_v3  ;;  %13375 = vmatmul.mubr.bf16.vlgmr.msra.gmra.mrb[72].mxu0 %v13139_v3 }
 0x54f   : > { %15754 = vmatpush3.bf16.msra.mxu1 %v17249_v46  ;;  %15776 = vmatpush3.bf16.msra.mxu0 %v17250_v1  ;;  %v13399_v46 = vsub.s32 2, %v17518_v13  ;;  %v13387_v1 = vld [vmem:[%s20428_s8] sm:$0xf] }
 0x550   : > { %15755 = vmatprep.subr.bf16.mxu1 %v17251_v55  ;;  %15777 = vmatprep.subr.bf16.mxu0 %v17252_v47  ;;  %v13395_v55 = vsub.s32 1, %v17518_v13  ;;  %v13403_v47 = vsub.s32 3, %v17518_v13 }
 0x553   : > { %15756 = vmatpush3.bf16.msra.mxu1 %v17253_v8  ;;  %15778 = vmatpush3.bf16.msra.mxu0 %v17254_v48  ;;  %v13392_v8 = vrot.slane %v13387_v1, %v13391_v59  ;;  %v13400_v48 = vrot.slane %v13387_v1, %v13399_v46 }
 0x554   : > { %15757 = vmatprep.subr.bf16.mxu1 %v17255_v29  ;;  %15779 = vmatprep.subr.bf16.mxu0 %v17256_v12 }
 0x557   : > { %15758 = vmatpush3.bf16.msra.mxu1 %v17257_v24  ;;  %15780 = vmatpush3.bf16.msra.mxu0 %v17258_v54  ;;  %v13396_v24 = vrot.slane %v13387_v1, %v13395_v55  ;;  %v13404_v54 = vrot.slane %v13387_v1, %v13403_v47 }
 0x558   : > { %15759 = vmatprep.subr.bf16.mxu1 %v17259_v28  ;;  %15781 = vmatprep.subr.bf16.mxu0 %v17260_v53 }
 0x55b   : > { %15760 = vmatpush3.bf16.msra.mxu1 %v17261_v18  ;;  %15782 = vmatpush3.bf16.msra.mxu0 %v17262_v10 }
 0x55c   : > { %15761 = vmatprep.subr.bf16.mxu1 %v17263_v40  ;;  %15783 = vmatprep.subr.bf16.mxu0 %v17264_v57 }
 0x55f   : > { %15762 = vmatpush3.bf16.msra.mxu1 %v17265_v17  ;;  %15784 = vmatpush3.bf16.msra.mxu0 %v17266_v9 }
 0x560   : > { %15763 = vmatprep.subr.bf16.mxu1 %v17267_v11  ;;  %15785 = vmatprep.subr.bf16.mxu0 %v17268_v2 }
 0x563   : > { %15764 = vmatpush3.bf16.msra.mxu1 %v17269_v36  ;;  %15786 = vmatpush3.bf16.msra.mxu0 %v17270_v38 }
 0x564   : > { %15765 = vmatprep.subr.bf16.mxu1 %v17271_v60  ;;  %15787 = vmatprep.subr.bf16.mxu0 %v17272_v61 }
 0x567   : > { %15766 = vmatpush3.bf16.msra.mxu1 %v17273_v62  ;;  %15788 = vmatpush3.bf16.msra.mxu0 %v17274_v34 }
 0x568   : > { %15767 = vmatprep.subr.bf16.mxu1 %v17275_v56  ;;  %15789 = vmatprep.subr.bf16.mxu0 %v17276_v49 }
 0x56b   : > { %15768 = vmatpush3.bf16.msra.mxu1 %v17277_v6  ;;  %15790 = vmatpush3.bf16.msra.mxu0 %v17278_v50 }
 0x5c1   : > { %v12534_v26 = vpop.f32.mrb[56].mxu1  ;;  %v12575_v51 = vpop.f32.mrb[60].mxu0 }
 0x5c2   : > { %v12536_v63 = vpop.f32.mrb[57].mxu1  ;;  %v12577_v32 = vpop.f32.mrb[61].mxu0 }
 0x5c3   : > { %v12538_v21 = vpop.f32.mrb[58].mxu1  ;;  %v12579_v4 = vpop.f32.mrb[62].mxu0 }
 0x5c4   : > { %v12539_v7 = vpop.f32.mrb[59].mxu1  ;;  %v12580_v14 = vpop.f32.mrb[63].mxu0 }
 0x5e1   : > { %v12776_v30 = vpop.f32.mrb[60].mxu1  ;;  %v12817_v27 = vpop.f32.mrb[64].mxu0 }
 0x5e2   : > { %v12777_v39 = vadd.f32 %v12776_v30, %v12534_v26  ;;  %v12818_v5 = vadd.f32 %v12817_v27, %v12575_v51  ;;  %v12778_v43 = vpop.f32.mrb[61].mxu1  ;;  %v12819_v45 = vpop.f32.mrb[65].mxu0 }
 0x5e3   : > { %v12779_v19 = vadd.f32 %v12778_v43, %v12536_v63  ;;  %v12820_v25 = vadd.f32 %v12819_v45, %v12577_v32  ;;  %v12780_v31 = vpop.f32.mrb[62].mxu1  ;;  %v12821_v52 = vpop.f32.mrb[66].mxu0  ;;  %v13485_v32 = vld [vmem:[%s20430_s10] sm:$0x1] }
 0x5e4   : > { %v12781_v37 = vpop.f32.mrb[63].mxu1  ;;  %v12822_v22 = vpop.f32.mrb[67].mxu0 }
 0x601   : > { %v13054_v0 = vpop.f32.mrb[64].mxu1  ;;  %v13095_v16 = vpop.f32.mrb[68].mxu0 }
 0x602   : > { %v13102_v42 = vadd.f32 %v13054_v0, %v12777_v39  ;;  %v13104_v58 = vadd.f32 %v13095_v16, %v12818_v5  ;;  %v13056_v20 = vpop.f32.mrb[65].mxu1  ;;  %v13097_v15 = vpop.f32.mrb[69].mxu0 }
 0x603   : > { %v13103_v41 = vadd.f32 %v13056_v20, %v12779_v19  ;;  %v13105_v23 = vadd.f32 %v13097_v15, %v12820_v25  ;;  %v13058_v44 = vpop.f32.mrb[66].mxu1  ;;  %v13099_v33 = vpop.f32.mrb[70].mxu0 }
 0x604   : > { %v13059_v3 = vpop.f32.mrb[67].mxu1  ;;  %v13100_v35 = vpop.f32.mrb[71].mxu0 }
 0x621   : > { %v13335_v29 = vpop.f32.mrb[68].mxu1  ;;  %v13376_v12 = vpop.f32.mrb[72].mxu0 }
 0x622   : > { %v13383_v28 = vadd.f32 %v13335_v29, %v13102_v42  ;;  %v13385_v53 = vadd.f32 %v13376_v12, %v13104_v58  ;;  %v13337_v18 = vpop.f32.mrb[69].mxu1  ;;  %v13378_v10 = vpop.f32.mrb[73].mxu0 }
 0x623   : > { %v13384_v40 = vadd.f32 %v13337_v18, %v13103_v41  ;;  %v13386_v57 = vadd.f32 %v13378_v10, %v13105_v23  ;;  %v13339_v17 = vpop.f32.mrb[70].mxu1  ;;  %v13380_v9 = vpop.f32.mrb[74].mxu0 }
 0x624   : > { %v13409_v11 = vadd.f32 %v13392_v8, %v13383_v28  ;;  %v13411_v2 = vadd.f32 %v13400_v48, %v13385_v53  ;;  %v13340_v36 = vpop.f32.mrb[71].mxu1  ;;  %v13381_v38 = vpop.f32.mrb[75].mxu0 }
 0x625   : > { %v13410_v13 = vadd.f32 %v13396_v24, %v13384_v40  ;;  %v13412_v60 = vadd.f32 %v13404_v54, %v13386_v57 }
 0x626   : > { %v13413_v61 = vmax.f32 %v13409_v11, 0.0  ;;  %v13415_v62 = vmax.f32 %v13411_v2, 0.0 }
 0x627   : > { %v13414_v34 = vmax.f32 %v13410_v13, 0.0  ;;  %v13416_v56 = vmax.f32 %v13412_v60, 0.0 }
 0x628   : > { %v13417_v50 = vpack.c.bf16 %v13413_v61, %v13413_v61  ;;  %v13419_v26 = vpack.c.bf16 %v13415_v62, %v13415_v62 }
 0x629   : > { %v13418_v49 = vpack.c.bf16 %v13414_v34, %v13414_v34  ;;  %v13420_v6 = vpack.c.bf16 %v13416_v56, %v13416_v56 }
 0x62b   : > { %13710 = vmatprep.mubr.bf16.mxu1 %v13418_v49  ;;  %13750 = vmatprep.mubr.bf16.mxu0 %v13420_v6 }
 0x62c   : > { %13711 = vmatmul.mubr.bf16.vlgmr.msra.gmra.mrb[72].mxu1 %v13417_v50  ;;  %13751 = vmatmul.mubr.bf16.vlgmr.msra.gmra.mrb[76].mxu0 %v13419_v26 }
 0x6ff   : > { %v15769_v51 = vpop.f32.mrb[72].mxu1  ;;  %v15791_v63 = vpop.f32.mrb[76].mxu0 }
 0x700   : > { %v15770_v21 = vpop.f32.mrb[73].mxu1  ;;  %v15792_v4 = vpop.f32.mrb[77].mxu0 }
 0x701   : > { %v15771_v7 = vadd.f32 %v15770_v21, %v15769_v51  ;;  %v15793_v14 = vadd.f32 %v15792_v4, %v15791_v63  ;;  %v15772_v30 = vpop.f32.mrb[74].mxu1  ;;  %v15794_v27 = vpop.f32.mrb[78].mxu0 }
 0x702   : > { %v15773_v39 = vpop.f32.mrb[75].mxu1  ;;  %v15795_v5 = vpop.f32.mrb[79].mxu0 }
 0x703   : > { %v13713_v43 = vadd.f32 %v15771_v7, %v13485_v32 }
 0x705   : > { %v13753_v45 = vadd.f32 %v15793_v14, %v13713_v43 }
 0x707   : > { %13758 = vst [vmem:[%s378_s19] sm:$0x1] %v13753_v45 }
 0x708   : > { %17309 = shalt.err (!%p17306_p3)
}
 0x709   : > { %s17310_s13 = scalar_lea.hbm %s20378_s24, 16  ;;  %s17314_s19 = scalar_lea.hbm %s20431_s11, 32 }
 0x70a   : > { %p17311_p4 = scmp.ne.s32.totalorder %s20378_s24, %s17310_s13  ;;  %p17315_p9 = scmp.lt.u32.totalorder %s20378_s24, %s20431_s11 }
 0x70b   : > { %p17316_p10 = scmp.lt.u32.totalorder %s17314_s19, %s17310_s13  ;;  %p17318_p12 = scmp.lt.u32.totalorder %s17310_s13, %s20378_s24 }
 0x70c   : > { %p17312_p7 = pnand %p17311_p4, %p17465_p5 }
 0x70d   : > { %p17317_p11 = por %p17316_p10, %p17315_p9 }
 0x70e   : > { %p17313_p8 = pneg %p17312_p7 }
 0x70f   : > { %p17319_p13 = por %p17318_p12, %p17317_p11 }
 0x711   : > { %p17320_p0 = pnand %p17319_p13, %p17313_p8 }
 0x713   : > { %17323 = shalt.err (!%p17320_p0)
}
 0x714   : > { %16666 = dma.vmem_to_hbm [thread:$0]  (%p17465_p5), %s20380_s12, 16, %s20378_s24, %s13760_s25  }
 0x715 PF: > { %p16672_p1 = scmp.ge.s32.totalorder %s17358_s20, 2  ;;  %s13784_s29 = sand.u32 1, %s17346_s17  }
 0x716   : > { %s13785_s21 = scalar_lea.sflag [#allocation5], %s13784_s29 }
 0x717   : > { %p16669_p2 = pnand %p16672_p1, %p17469_p6 }
 0x719   : > { %17341 = dma.done.wait (!%p16669_p2), %s13785_s21, 16  }
 0x71a   : > { %17343 = vsyncadd (!%p16669_p2), %s13785_s21, 4294967280  ;;  %s20445_s30 = sld [smem:[#allocation7_spill]]  ;;  %s20446_s19 = sld [smem:[#allocation8_spill]] }
 0x71b   : > { %p21_p3 = scmp.ge.s32.totalorder %s17452_s23, 4   ;;  %s20447_s17 = smov %s17350_s18 }
 0x71c   : > { %s20449_s20 = smov %s17452_s23 }
 0x71d   :  { %23 = sbr.rel (!%p21_p3) target bundleno = 3 (0x3), region = 139 }
 0x720   : > { %s20448_s18 = smov %s20445_s30 }
 0x724   :  { %13789 = vsyncpa [#allocation5], 1 }
 0x725   :  { %13791 = vsyncpa [#allocation5 + $0x1], 1 }

</bundles_post_ra>
